<compile_context>
chip_gen: v6e
topology: v6e:2x2x1
jax: 0.10.0
libtpu: 0.0.40
codegen_flags: <defaults>
</compile_context>

<pallas_src>
import functools

import jax
import jax.numpy as jnp
from jax.experimental import pallas as pl
from jax.experimental.pallas import tpu as pltpu


# ----------------------------- fused kernel --------------------------------

def _fused_kernel(x_ref, m_ref, w1_ref, b1_ref, w2_ref, b2_ref, w3_ref, b3_ref,
                  fcw_ref, fcb_ref, out_ref, y1s, ths, y2s, y3s,
                  *, Wc, Rcan, B):
    """conv1 -> avgpool -> conv2 -> ReLU -> conv3 -> ReLU -> FC, one stack/step.

    Geometry: each image lives on a flattened canvas (rows = h*Wc + w) with a
    2-pixel zero border; B images are stacked along rows.  The compute slab is
    the Rs middle rows; the canvas' own top/bottom border rows act as guard
    rows for the shifted tap reads, so every slice below is in-bounds.
    """
    G = 2 * Wc                      # guard rows (2 canvas rows) above/below
    total = B * Rcan
    Rs = total - 2 * G              # compute-slab rows
    Rc = Rcan - 2 * G               # per-image slab rows

    # Guard rows are never written below; zero them every step so shifted tap
    # reads see proper conv/pool zero padding and never touch stale VMEM.
    for scr in (y1s, ths, y2s, y3s):
        z = jnp.zeros((G, scr.shape[1]), scr.dtype)
        scr[0:G, :] = z
        scr[G + Rs:total, :] = z

    m1 = m_ref[:, 0:1]              # valid (Hu, Wu) interior
    m2 = m_ref[:, 1:2]              # valid (Hu-1, Wu-1) interior

    # Conv2d(3, 64, 3, padding=1): single im2col matmul (im2col built in glue).
    y1 = jnp.dot(x_ref[0], w1_ref[...],
                 preferred_element_type=jnp.float32) + b1_ref[...]
    y1 = y1 * m1                    # restore the zero padding ring
    y1s[G:G + Rs, :] = y1

    # AvgPool2d(5, stride=1, padding=2), count_include_pad=True; separable.
    th = y1
    for d in (-2, -1, 1, 2):
        th = th + y1s[G + d * Wc:G + d * Wc + Rs, :]
    ths[G:G + Rs, :] = th
    tw = th
    for d in (-2, -1, 1, 2):
        tw = tw + ths[G + d:G + d + Rs, :]
    y2 = (tw * (1.0 / 25.0)).astype(y2s.dtype)
    y2s[G:G + Rs, :] = y2

    # Conv2d(64, 8, 2, padding=0) + ReLU: one (R, 256) @ (256, 8) matmul.
    slab2 = jnp.concatenate(
        [y2 if (i == 0 and j == 0)
         else y2s[G + i * Wc + j:G + i * Wc + j + Rs, :]
         for i in (0, 1) for j in (0, 1)], axis=1)
    y3 = jnp.maximum(
        jnp.dot(slab2, w2_ref[...], preferred_element_type=jnp.float32)
        + b2_ref[...], 0.0)
    # TODO(synk): Dropout2d(0.25) treated as identity (eval semantics); a
    # training-mode forward would need pltpu.prng_* per-channel masking.
    y3 = y3 * m2                    # restore padding ring for conv3
    y3s[G:G + Rs, :] = y3

    # Conv2d(8, 16, 3, padding=1) + ReLU: one (R, 72) @ (72, 16) matmul.
    slab3 = jnp.concatenate(
        [y3 if (di == 0 and dj == 0)
         else y3s[G + di * Wc + dj:G + di * Wc + dj + Rs, :]
         for di in (-1, 0, 1) for dj in (-1, 0, 1)],
        axis=1).astype(jnp.bfloat16)
    y4 = jnp.maximum(
        jnp.dot(slab3, w3_ref[...], preferred_element_type=jnp.float32)
        + b3_ref[...], 0.0)

    # Flatten (torch NCHW order pre-baked into the FC weight canvas) + Linear.
    # fcw is zero outside each image's valid (Hu-1, Wu-1) region, so a plain
    # per-image row sum implements the masked flatten.
    fcw = fcw_ref[...]
    pm = jnp.concatenate(
        [jnp.sum(y4 * fcw[:, 16 * k:16 * (k + 1)], axis=1, keepdims=True)
         for k in range(3)], axis=1)                            # (Rs, 3)
    rows = [jnp.sum(pm[b * Rcan:b * Rcan + Rc, :], axis=0, keepdims=True)
            for b in range(B)]
    out_ref[...] = (jnp.concatenate(rows, axis=0) + fcb_ref[...]).reshape(1, B, 3)


# ----------------------------- JAX glue ------------------------------------

def _round_up(v, m):
    return ((v + m - 1) // m) * m


def _bilinear_upsample_2x(x_nhwc):
    # matches F.interpolate(scale_factor=2.0, mode='bilinear', align_corners=False)
    # TODO(synk): could be folded into the fused kernel as a fixed 0.75/0.25
    # two-tap stencil; kept as JAX glue (gather) for clarity.
    N, H, W, C = x_nhwc.shape

    def coords(out_size, in_size):
        d = jnp.arange(out_size, dtype=jnp.float32)
        src = jnp.maximum((d + 0.5) * 0.5 - 0.5, 0.0)
        i0 = jnp.floor(src).astype(jnp.int32)
        frac = src - i0.astype(jnp.float32)
        i0 = jnp.clip(i0, 0, in_size - 1)
        i1 = jnp.clip(i0 + 1, 0, in_size - 1)
        return i0, i1, frac

    h0, h1, fh = coords(2 * H, H)
    w0, w1, fw = coords(2 * W, W)
    xh = (x_nhwc[:, h0] * (1.0 - fh)[None, :, None, None]
          + x_nhwc[:, h1] * fh[None, :, None, None])
    xw = (xh[:, :, w0] * (1.0 - fw)[None, None, :, None]
          + xh[:, :, w1] * fw[None, None, :, None])
    return xw


def init_params(key, fc_in):
    keys = jax.random.split(key, 8)
    p = {}
    p["bn_gamma"] = jnp.ones((3,), jnp.float32)
    p["bn_beta"] = jnp.zeros((3,), jnp.float32)
    p["conv1_w"] = 0.1 * jax.random.normal(keys[0], (3, 3, 3, 64), jnp.float32)   # HWIO
    p["conv1_b"] = 0.1 * jax.random.normal(keys[1], (64,), jnp.float32)
    p["conv2_w"] = 0.1 * jax.random.normal(keys[2], (2, 2, 64, 8), jnp.float32)
    p["conv2_b"] = 0.1 * jax.random.normal(keys[3], (8,), jnp.float32)
    p["conv3_w"] = 0.1 * jax.random.normal(keys[4], (3, 3, 8, 16), jnp.float32)
    p["conv3_b"] = 0.1 * jax.random.normal(keys[5], (16,), jnp.float32)
    # TODO(synk): the original module declares nn.Linear(64, 3), which is
    # shape-inconsistent with torch.flatten(v9, 1); the Linear is sized to the
    # actual flattened feature count instead.
    p["fc_w"] = 0.1 * jax.random.normal(keys[6], (fc_in, 3), jnp.float32)
    p["fc_b"] = 0.1 * jax.random.normal(keys[7], (3,), jnp.float32)
    return p


def model_forward(params, x_nchw, images_per_step=1):
    N, C, H, W = x_nchw.shape
    B = int(images_per_step)
    assert N % B == 0, "batch must be divisible by images_per_step"
    S = N // B
    x = jnp.transpose(x_nchw, (0, 2, 3, 1)).astype(jnp.float32)   # NCHW -> NHWC

    # BatchNorm2d (training-mode batch statistics) as plain jnp: the reduction
    # is tiny, a dedicated pallas_call costs more in launch latency than math.
    mean = jnp.mean(x, axis=(0, 1, 2), keepdims=True)
    var = jnp.mean(jnp.square(x - mean), axis=(0, 1, 2), keepdims=True)
    xn = ((x - mean) * jax.lax.rsqrt(var + 1e-5)
          * params["bn_gamma"] + params["bn_beta"])
    # TODO(synk): BatchNorm2d running_mean/running_var buffers are not updated.

    # Bilinear 2x upsample, then the zero-bordered canvas.
    up = _bilinear_upsample_2x(xn)                    # (N, Hu, Wu, 3)
    Hu, Wu = 2 * H, 2 * W
    Wc = _round_up(Wu + 4, 8)                         # sublane-aligned canvas width
    Hc = Hu + 4
    Rcan = Hc * Wc
    G = 2 * Wc
    Rs = B * Rcan - 2 * G
    canvas = jnp.pad(up, ((0, 0), (2, 2), (2, Wc - Wu - 2), (0, 0)))

    # conv1 im2col (9 taps x 3 ch per canvas position), built in glue so the
    # kernel's first conv is a single lane-dense MXU matmul.
    cpad = jnp.pad(canvas, ((0, 0), (1, 1), (1, 1), (0, 0)))
    taps = [cpad[:, 1 + di:1 + di + Hc, 1 + dj:1 + dj + Wc, :]
            for di in (-1, 0, 1) for dj in (-1, 0, 1)]
    x27 = jnp.concatenate(taps, axis=-1)              # (N, Hc, Wc, 27)
    x27 = x27.reshape(S, B * Rcan, 27)[:, G:G + Rs, :].astype(jnp.bfloat16)

    # Row masks (restore zero-padding rings after conv1 / conv2).
    hh = jnp.arange(Hc)[:, None]
    ww = jnp.arange(Wc)[None, :]
    m1 = (hh >= 2) & (hh < 2 + Hu) & (ww >= 2) & (ww < 2 + Wu)
    m2 = (hh >= 2) & (hh < 1 + Hu) & (ww >= 2) & (ww < 1 + Wu)
    m = jnp.stack([m1, m2], axis=-1).astype(jnp.float32).reshape(Rcan, 2)
    m = jnp.tile(m, (B, 1))[G:G + Rs, :]

    # FC weights scattered onto the canvas: (Rs, 48) = 3 neurons x 16 channels
    # packed on lanes; zero outside each image's valid (Hu-1, Wu-1) region.
    Hv, Wv = Hu - 1, Wu - 1
    wk = params["fc_w"].T.reshape(3, 16, Hv, Wv)                  # torch (c,h,w) order
    wk = jnp.transpose(wk, (0, 2, 3, 1))                          # (3, Hv, Wv, 16)
    fcw = jnp.zeros((3, Hc, Wc, 16), jnp.float32)
    fcw = fcw.at[:, 2:2 + Hv, 2:2 + Wv, :].set(wk)
    fcw = jnp.transpose(fcw, (1, 2, 0, 3)).reshape(Rcan, 48)
    fcw = jnp.tile(fcw, (B, 1))[G:G + Rs, :]

    w1 = params["conv1_w"].reshape(27, 64).astype(jnp.bfloat16)
    b1 = params["conv1_b"].reshape(1, 64)
    w2 = params["conv2_w"].reshape(256, 8).astype(jnp.bfloat16)
    b2 = params["conv2_b"].reshape(1, 8)
    w3 = params["conv3_w"].reshape(72, 16).astype(jnp.bfloat16)
    b3 = params["conv3_b"].reshape(1, 16)
    fcb = params["fc_b"].reshape(1, 3)

    # Explicit VMEM budget (128-lane padded, double-buffered inputs + scratch).
    lane = 128
    est = (2 * Rs * lane * (2 + 4 + 4)              # x27(bf16) + mask + fcw (f32)
           + B * Rcan * lane * (4 + 4 + 2 + 4)      # y1s, ths, y2s(bf16), y3s
           + 6 * Rs * lane * 4)                     # headroom for live values
    vmem_limit = int(min(64 * 2 ** 20, max(32 * 2 ** 20, 2 * est)))

    # One fused pallas_call: all intermediates stay in VMEM; grid over image
    # stacks ("parallel" so v7x's 2nd TensorCore is used when S > 1).
    # TODO(synk): very large spatial sizes (e.g. the 144x256 spec input) would
    # additionally need row tiling with halos; not required at test sizes.
    out = pl.pallas_call(
        functools.partial(_fused_kernel, Wc=Wc, Rcan=Rcan, B=B),
        grid=(S,),
        in_specs=[
            pl.BlockSpec((1, Rs, 27), lambda s: (s, 0, 0)),   # conv1 im2col (bf16)
            pl.BlockSpec((Rs, 2), lambda s: (0, 0)),          # masks m1|m2
            pl.BlockSpec((27, 64), lambda s: (0, 0)),         # conv1 weight
            pl.BlockSpec((1, 64), lambda s: (0, 0)),          # conv1 bias
            pl.BlockSpec((256, 8), lambda s: (0, 0)),         # conv2 weight
            pl.BlockSpec((1, 8), lambda s: (0, 0)),           # conv2 bias
            pl.BlockSpec((72, 16), lambda s: (0, 0)),         # conv3 weight
            pl.BlockSpec((1, 16), lambda s: (0, 0)),          # conv3 bias
            pl.BlockSpec((Rs, 48), lambda s: (0, 0)),         # FC weight canvas
            pl.BlockSpec((1, 3), lambda s: (0, 0)),           # FC bias
        ],
        out_specs=pl.BlockSpec((1, B, 3), lambda s: (s, 0, 0)),
        out_shape=jax.ShapeDtypeStruct((S, B, 3), jnp.float32),
        scratch_shapes=[
            pltpu.VMEM((B * Rcan, 64), jnp.float32),   # y1 canvas (masked conv1)
            pltpu.VMEM((B * Rcan, 64), jnp.float32),   # pool H-pass canvas
            pltpu.VMEM((B * Rcan, 64), jnp.bfloat16),  # y2 canvas (pool output)
            pltpu.VMEM((B * Rcan, 8), jnp.float32),    # y3 canvas (masked conv2)
        ],
        compiler_params=pltpu.CompilerParams(
            dimension_semantics=("parallel",),
            vmem_limit_bytes=vmem_limit),
    )(x27, m, w1, b1, w2, b2, w3, b3, fcw, fcb)
    return out.reshape(N, 3)


# ----------------------------- pure-JAX reference ---------------------------

def reference_forward(params, x_nchw):
    N, C, H, W = x_nchw.shape
    x = jnp.transpose(x_nchw, (0, 2, 3, 1))
    mean = jnp.mean(x, axis=(0, 1, 2), keepdims=True)
    var = jnp.mean((x - mean) ** 2, axis=(0, 1, 2), keepdims=True)
    xn = (x - mean) * jax.lax.rsqrt(var + 1e-5) * params["bn_gamma"] + params["bn_beta"]
    up = _bilinear_upsample_2x(xn)

    def conv(v, w_hwio, b, pad):
        y = jax.lax.conv_general_dilated(
            v, w_hwio, (1, 1), [(pad, pad), (pad, pad)],
            dimension_numbers=("NHWC", "HWIO", "NHWC"),
            precision=jax.lax.Precision.HIGHEST)
        return y + b

    v3 = conv(up, params["conv1_w"], params["conv1_b"], 1)
    v4 = jax.lax.reduce_window(v3, 0.0, jax.lax.add, (1, 5, 5, 1), (1, 1, 1, 1),
                               [(0, 0), (2, 2), (2, 2), (0, 0)]) / 25.0
    v6 = jax.nn.relu(conv(v4, params["conv2_w"], params["conv2_b"], 0))
    v9 = jax.nn.relu(conv(v6, params["conv3_w"], params["conv3_b"], 1))
    v10 = jnp.transpose(v9, (0, 3, 1, 2)).reshape(N, -1)
    return (jnp.dot(v10, params["fc_w"], precision=jax.lax.Precision.HIGHEST)
            + params["fc_b"])


if __name__ == "__main__":
    key = jax.random.PRNGKey(0)
    kx, kp = jax.random.split(key)

    N, C, H, W = 2, 3, 8, 12                        # small NCHW input like x1
    x1 = jax.random.normal(kx, (N, C, H, W), jnp.float32)

    # after 2x upsample + conv(p=1) + avgpool(p=2) + conv(k=2) + conv(p=1):
    # spatial = (2H-1, 2W-1), channels = 16
    fc_in = 16 * (2 * H - 1) * (2 * W - 1)
    params = init_params(kp, fc_in)

    ref = reference_forward(params, x1)

    # one image per grid step (2 parallel steps -> both v7x TensorCores busy)
    fwd = jax.jit(functools.partial(model_forward, images_per_step=1))
    out = jax.block_until_ready(fwd(params, x1))
    assert out.shape == (N, 3) and out.dtype == jnp.float32
    assert bool(jnp.all(jnp.isfinite(out)))
    assert bool(jnp.allclose(out, ref, rtol=5e-2, atol=5e-2)), (
        f"mismatch: max abs err {float(jnp.max(jnp.abs(out - ref)))}")

    # stacked variant: both images in one grid step (amortizes per-step cost)
    fwd2 = jax.jit(functools.partial(model_forward, images_per_step=2))
    out2 = jax.block_until_ready(fwd2(params, x1))
    assert bool(jnp.allclose(out2, ref, rtol=5e-2, atol=5e-2)), (
        f"stacked mismatch: max abs err {float(jnp.max(jnp.abs(out2 - ref)))}")

    print("KERNEL_OK")
</pallas_src>

<mosaic_0001>
module attributes {stable_mosaic.version = 11 : i64} {
  func.func @_fused_kernel(%arg0: i32, %arg1: memref<1x512x27xbf16, #tpu.memory_space<vmem>>, %arg2: memref<512x2xf32, #tpu.memory_space<vmem>>, %arg3: memref<27x64xbf16, #tpu.memory_space<vmem>>, %arg4: memref<1x64xf32, #tpu.memory_space<vmem>>, %arg5: memref<256x8xbf16, #tpu.memory_space<vmem>>, %arg6: memref<1x8xf32, #tpu.memory_space<vmem>>, %arg7: memref<72x16xbf16, #tpu.memory_space<vmem>>, %arg8: memref<1x16xf32, #tpu.memory_space<vmem>>, %arg9: memref<512x48xf32, #tpu.memory_space<vmem>>, %arg10: memref<1x3xf32, #tpu.memory_space<vmem>>, %arg11: memref<1x1x3xf32, #tpu.memory_space<vmem>>, %arg12: memref<640x64xf32, #tpu.memory_space<vmem>>, %arg13: memref<640x64xf32, #tpu.memory_space<vmem>>, %arg14: memref<640x64xbf16, #tpu.memory_space<vmem>>, %arg15: memref<640x8xf32, #tpu.memory_space<vmem>>) attributes {dimension_semantics = [#tpu.dimension_semantics<parallel>], iteration_bounds = array<i64: 2>, scalar_prefetch = 0 : i64, scratch_operands = 4 : i64, tpu.core_type = #tpu.core_type<tc>, window_params = [{transform_indices = @transform_0, window_bounds = array<i64: 1, 512, 27>}, {pipeline_mode = #tpu.pipeline_mode<synchronous>, transform_indices = @transform_1, window_bounds = array<i64: 512, 2>}, {pipeline_mode = #tpu.pipeline_mode<synchronous>, transform_indices = @transform_2, window_bounds = array<i64: 27, 64>}, {pipeline_mode = #tpu.pipeline_mode<synchronous>, transform_indices = @transform_3, window_bounds = array<i64: 1, 64>}, {pipeline_mode = #tpu.pipeline_mode<synchronous>, transform_indices = @transform_4, window_bounds = array<i64: 256, 8>}, {pipeline_mode = #tpu.pipeline_mode<synchronous>, transform_indices = @transform_5, window_bounds = array<i64: 1, 8>}, {pipeline_mode = #tpu.pipeline_mode<synchronous>, transform_indices = @transform_6, window_bounds = array<i64: 72, 16>}, {pipeline_mode = #tpu.pipeline_mode<synchronous>, transform_indices = @transform_7, window_bounds = array<i64: 1, 16>}, {pipeline_mode = #tpu.pipeline_mode<synchronous>, transform_indices = @transform_8, window_bounds = array<i64: 512, 48>}, {pipeline_mode = #tpu.pipeline_mode<synchronous>, transform_indices = @transform_9, window_bounds = array<i64: 1, 3>}, {transform_indices = @transform_10, window_bounds = array<i64: 1, 1, 3>}]} {
    %cst = arith.constant 0.000000e+00 : f32
    %0 = vector.broadcast %cst : f32 to vector<64x64xf32>
    %c0 = arith.constant 0 : index
    %c0_0 = arith.constant 0 : index
    %1 = vector.load %arg12[%c0, %c0_0] : memref<640x64xf32, #tpu.memory_space<vmem>>, vector<64x64xf32>
    tpu.vector_store %arg12[%c0, %c0_0], %0 {strides = array<i32>} : memref<640x64xf32, #tpu.memory_space<vmem>>, vector<64x64xf32>,
    %c576 = arith.constant 576 : index
    %c0_1 = arith.constant 0 : index
    %2 = vector.load %arg12[%c576, %c0_1] : memref<640x64xf32, #tpu.memory_space<vmem>>, vector<64x64xf32>
    tpu.vector_store %arg12[%c576, %c0_1], %0 {strides = array<i32>} : memref<640x64xf32, #tpu.memory_space<vmem>>, vector<64x64xf32>,
    %cst_2 = arith.constant 0.000000e+00 : f32
    %3 = vector.broadcast %cst_2 : f32 to vector<64x64xf32>
    %c0_3 = arith.constant 0 : index
    %c0_4 = arith.constant 0 : index
    %4 = vector.load %arg13[%c0_3, %c0_4] : memref<640x64xf32, #tpu.memory_space<vmem>>, vector<64x64xf32>
    tpu.vector_store %arg13[%c0_3, %c0_4], %3 {strides = array<i32>} : memref<640x64xf32, #tpu.memory_space<vmem>>, vector<64x64xf32>,
    %c576_5 = arith.constant 576 : index
    %c0_6 = arith.constant 0 : index
    %5 = vector.load %arg13[%c576_5, %c0_6] : memref<640x64xf32, #tpu.memory_space<vmem>>, vector<64x64xf32>
    tpu.vector_store %arg13[%c576_5, %c0_6], %3 {strides = array<i32>} : memref<640x64xf32, #tpu.memory_space<vmem>>, vector<64x64xf32>,
    %cst_7 = arith.constant 0.000000e+00 : bf16
    %6 = vector.broadcast %cst_7 : bf16 to vector<64x64xbf16>
    %c0_8 = arith.constant 0 : index
    %c0_9 = arith.constant 0 : index
    %7 = vector.load %arg14[%c0_8, %c0_9] : memref<640x64xbf16, #tpu.memory_space<vmem>>, vector<64x64xbf16>
    tpu.vector_store %arg14[%c0_8, %c0_9], %6 {strides = array<i32>} : memref<640x64xbf16, #tpu.memory_space<vmem>>, vector<64x64xbf16>,
    %c576_10 = arith.constant 576 : index
    %c0_11 = arith.constant 0 : index
    %8 = vector.load %arg14[%c576_10, %c0_11] : memref<640x64xbf16, #tpu.memory_space<vmem>>, vector<64x64xbf16>
    tpu.vector_store %arg14[%c576_10, %c0_11], %6 {strides = array<i32>} : memref<640x64xbf16, #tpu.memory_space<vmem>>, vector<64x64xbf16>,
    %cst_12 = arith.constant 0.000000e+00 : f32
    %9 = vector.broadcast %cst_12 : f32 to vector<64x8xf32>
    %c0_13 = arith.constant 0 : index
    %c0_14 = arith.constant 0 : index
    %10 = vector.load %arg15[%c0_13, %c0_14] : memref<640x8xf32, #tpu.memory_space<vmem>>, vector<64x8xf32>
    tpu.vector_store %arg15[%c0_13, %c0_14], %9 {strides = array<i32>} : memref<640x8xf32, #tpu.memory_space<vmem>>, vector<64x8xf32>,
    %c576_15 = arith.constant 576 : index
    %c0_16 = arith.constant 0 : index
    %11 = vector.load %arg15[%c576_15, %c0_16] : memref<640x8xf32, #tpu.memory_space<vmem>>, vector<64x8xf32>
    tpu.vector_store %arg15[%c576_15, %c0_16], %9 {strides = array<i32>} : memref<640x8xf32, #tpu.memory_space<vmem>>, vector<64x8xf32>,
    %c0_17 = arith.constant 0 : index
    %c0_18 = arith.constant 0 : index
    %12 = vector.load %arg2[%c0_17, %c0_18] : memref<512x2xf32, #tpu.memory_space<vmem>>, vector<512x1xf32>
    %c0_19 = arith.constant 0 : index
    %c1 = arith.constant 1 : index
    %13 = vector.load %arg2[%c0_19, %c1] : memref<512x2xf32, #tpu.memory_space<vmem>>, vector<512x1xf32>
    %c0_20 = arith.constant 0 : index
    %c0_21 = arith.constant 0 : index
    %c0_22 = arith.constant 0 : index
    %14 = vector.load %arg1[%c0_20, %c0_21, %c0_22] : memref<1x512x27xbf16, #tpu.memory_space<vmem>>, vector<1x512x27xbf16>
    %15 = vector.shape_cast %14 : vector<1x512x27xbf16> to vector<512x27xbf16>
    %c0_23 = arith.constant 0 : index
    %c0_24 = arith.constant 0 : index
    %16 = vector.load %arg3[%c0_23, %c0_24] : memref<27x64xbf16, #tpu.memory_space<vmem>>, vector<27x64xbf16>
    %cst_25 = arith.constant dense<0.000000e+00> : vector<512x64xf32>
    %17 = tpu.matmul %15, %16, %cst_25 {dimension_numbers = #tpu.dot_dimension_numbers<[1], [0], [0], [1], [0, 0, 1, 1], [], []>} : vector<512x27xbf16>, vector<27x64xbf16>, vector<512x64xf32> -> vector<512x64xf32>
    %c0_26 = arith.constant 0 : index
    %c0_27 = arith.constant 0 : index
    %18 = vector.load %arg4[%c0_26, %c0_27] : memref<1x64xf32, #tpu.memory_space<vmem>>, vector<1x64xf32>
    %19 = vector.broadcast %18 : vector<1x64xf32> to vector<512x64xf32>
    %20 = arith.addf %17, %19 : vector<512x64xf32>
    %21 = vector.broadcast %12 : vector<512x1xf32> to vector<512x64xf32>
    %22 = arith.mulf %20, %21 : vector<512x64xf32>
    %c64 = arith.constant 64 : index
    %c0_28 = arith.constant 0 : index
    %23 = vector.load %arg12[%c64, %c0_28] : memref<640x64xf32, #tpu.memory_space<vmem>>, vector<512x64xf32>
    tpu.vector_store %arg12[%c64, %c0_28], %22 {strides = array<i32>} : memref<640x64xf32, #tpu.memory_space<vmem>>, vector<512x64xf32>,
    %c0_29 = arith.constant 0 : index
    %c0_30 = arith.constant 0 : index
    %24 = vector.load %arg12[%c0_29, %c0_30] : memref<640x64xf32, #tpu.memory_space<vmem>>, vector<512x64xf32>
    %25 = arith.addf %22, %24 : vector<512x64xf32>
    %c32 = arith.constant 32 : index
    %c0_31 = arith.constant 0 : index
    %26 = vector.load %arg12[%c32, %c0_31] : memref<640x64xf32, #tpu.memory_space<vmem>>, vector<512x64xf32>
    %27 = arith.addf %25, %26 : vector<512x64xf32>
    %c96 = arith.constant 96 : index
    %c0_32 = arith.constant 0 : index
    %28 = vector.load %arg12[%c96, %c0_32] : memref<640x64xf32, #tpu.memory_space<vmem>>, vector<512x64xf32>
    %29 = arith.addf %27, %28 : vector<512x64xf32>
    %c128 = arith.constant 128 : index
    %c0_33 = arith.constant 0 : index
    %30 = vector.load %arg12[%c128, %c0_33] : memref<640x64xf32, #tpu.memory_space<vmem>>, vector<512x64xf32>
    %31 = arith.addf %29, %30 : vector<512x64xf32>
    %c64_34 = arith.constant 64 : index
    %c0_35 = arith.constant 0 : index
    %32 = vector.load %arg13[%c64_34, %c0_35] : memref<640x64xf32, #tpu.memory_space<vmem>>, vector<512x64xf32>
    tpu.vector_store %arg13[%c64_34, %c0_35], %31 {strides = array<i32>} : memref<640x64xf32, #tpu.memory_space<vmem>>, vector<512x64xf32>,
    %c62 = arith.constant 62 : index
    %c0_36 = arith.constant 0 : index
    %33 = vector.load %arg13[%c62, %c0_36] : memref<640x64xf32, #tpu.memory_space<vmem>>, vector<512x64xf32>
    %34 = arith.addf %31, %33 : vector<512x64xf32>
    %c63 = arith.constant 63 : index
    %c0_37 = arith.constant 0 : index
    %35 = vector.load %arg13[%c63, %c0_37] : memref<640x64xf32, #tpu.memory_space<vmem>>, vector<512x64xf32>
    %36 = arith.addf %34, %35 : vector<512x64xf32>
    %c65 = arith.constant 65 : index
    %c0_38 = arith.constant 0 : index
    %37 = vector.load %arg13[%c65, %c0_38] : memref<640x64xf32, #tpu.memory_space<vmem>>, vector<512x64xf32>
    %38 = arith.addf %36, %37 : vector<512x64xf32>
    %c66 = arith.constant 66 : index
    %c0_39 = arith.constant 0 : index
    %39 = vector.load %arg13[%c66, %c0_39] : memref<640x64xf32, #tpu.memory_space<vmem>>, vector<512x64xf32>
    %40 = arith.addf %38, %39 : vector<512x64xf32>
    %cst_40 = arith.constant 4.000000e-02 : f32
    %41 = vector.broadcast %cst_40 : f32 to vector<512x64xf32>
    %42 = arith.mulf %40, %41 : vector<512x64xf32>
    %43 = arith.truncf %42 : vector<512x64xf32> to vector<512x64xbf16>
    %c64_41 = arith.constant 64 : index
    %c0_42 = arith.constant 0 : index
    %44 = vector.load %arg14[%c64_41, %c0_42] : memref<640x64xbf16, #tpu.memory_space<vmem>>, vector<512x64xbf16>
    tpu.vector_store %arg14[%c64_41, %c0_42], %43 {strides = array<i32>} : memref<640x64xbf16, #tpu.memory_space<vmem>>, vector<512x64xbf16>,
    %c65_43 = arith.constant 65 : index
    %c0_44 = arith.constant 0 : index
    %45 = vector.load %arg14[%c65_43, %c0_44] : memref<640x64xbf16, #tpu.memory_space<vmem>>, vector<512x64xbf16>
    %c96_45 = arith.constant 96 : index
    %c0_46 = arith.constant 0 : index
    %46 = vector.load %arg14[%c96_45, %c0_46] : memref<640x64xbf16, #tpu.memory_space<vmem>>, vector<512x64xbf16>
    %c97 = arith.constant 97 : index
    %c0_47 = arith.constant 0 : index
    %47 = vector.load %arg14[%c97, %c0_47] : memref<640x64xbf16, #tpu.memory_space<vmem>>, vector<512x64xbf16>
    %48 = tpu.concatenate %43, %45, %46, %47 in 1 : vector<512x64xbf16>, vector<512x64xbf16>, vector<512x64xbf16>, vector<512x64xbf16> -> vector<512x256xbf16>
    %c0_48 = arith.constant 0 : index
    %c0_49 = arith.constant 0 : index
    %49 = vector.load %arg5[%c0_48, %c0_49] : memref<256x8xbf16, #tpu.memory_space<vmem>>, vector<256x8xbf16>
    %cst_50 = arith.constant dense<0.000000e+00> : vector<512x8xf32>
    %50 = tpu.matmul %48, %49, %cst_50 {dimension_numbers = #tpu.dot_dimension_numbers<[1], [0], [0], [1], [0, 0, 1, 1], [], []>} : vector<512x256xbf16>, vector<256x8xbf16>, vector<512x8xf32> -> vector<512x8xf32>
    %c0_51 = arith.constant 0 : index
    %c0_52 = arith.constant 0 : index
    %51 = vector.load %arg6[%c0_51, %c0_52] : memref<1x8xf32, #tpu.memory_space<vmem>>, vector<1x8xf32>
    %52 = vector.broadcast %51 : vector<1x8xf32> to vector<512x8xf32>
    %53 = arith.addf %50, %52 : vector<512x8xf32>
    %cst_53 = arith.constant 0.000000e+00 : f32
    %54 = vector.broadcast %cst_53 : f32 to vector<512x8xf32>
    %55 = arith.maximumf %53, %54 : vector<512x8xf32>
    %56 = vector.broadcast %13 : vector<512x1xf32> to vector<512x8xf32>
    %57 = arith.mulf %55, %56 : vector<512x8xf32>
    %c64_54 = arith.constant 64 : index
    %c0_55 = arith.constant 0 : index
    %58 = vector.load %arg15[%c64_54, %c0_55] : memref<640x8xf32, #tpu.memory_space<vmem>>, vector<512x8xf32>
    tpu.vector_store %arg15[%c64_54, %c0_55], %57 {strides = array<i32>} : memref<640x8xf32, #tpu.memory_space<vmem>>, vector<512x8xf32>,
    %c31 = arith.constant 31 : index
    %c0_56 = arith.constant 0 : index
    %59 = vector.load %arg15[%c31, %c0_56] : memref<640x8xf32, #tpu.memory_space<vmem>>, vector<512x8xf32>
    %c32_57 = arith.constant 32 : index
    %c0_58 = arith.constant 0 : index
    %60 = vector.load %arg15[%c32_57, %c0_58] : memref<640x8xf32, #tpu.memory_space<vmem>>, vector<512x8xf32>
    %c33 = arith.constant 33 : index
    %c0_59 = arith.constant 0 : index
    %61 = vector.load %arg15[%c33, %c0_59] : memref<640x8xf32, #tpu.memory_space<vmem>>, vector<512x8xf32>
    %c63_60 = arith.constant 63 : index
    %c0_61 = arith.constant 0 : index
    %62 = vector.load %arg15[%c63_60, %c0_61] : memref<640x8xf32, #tpu.memory_space<vmem>>, vector<512x8xf32>
    %c65_62 = arith.constant 65 : index
    %c0_63 = arith.constant 0 : index
    %63 = vector.load %arg15[%c65_62, %c0_63] : memref<640x8xf32, #tpu.memory_space<vmem>>, vector<512x8xf32>
    %c95 = arith.constant 95 : index
    %c0_64 = arith.constant 0 : index
    %64 = vector.load %arg15[%c95, %c0_64] : memref<640x8xf32, #tpu.memory_space<vmem>>, vector<512x8xf32>
    %c96_65 = arith.constant 96 : index
    %c0_66 = arith.constant 0 : index
    %65 = vector.load %arg15[%c96_65, %c0_66] : memref<640x8xf32, #tpu.memory_space<vmem>>, vector<512x8xf32>
    %c97_67 = arith.constant 97 : index
    %c0_68 = arith.constant 0 : index
    %66 = vector.load %arg15[%c97_67, %c0_68] : memref<640x8xf32, #tpu.memory_space<vmem>>, vector<512x8xf32>
    %67 = tpu.concatenate %59, %60, %61, %62, %57, %63, %64, %65, %66 in 1 : vector<512x8xf32>, vector<512x8xf32>, vector<512x8xf32>, vector<512x8xf32>, vector<512x8xf32>, vector<512x8xf32>, vector<512x8xf32>, vector<512x8xf32>, vector<512x8xf32> -> vector<512x72xf32>
    %68 = arith.truncf %67 : vector<512x72xf32> to vector<512x72xbf16>
    %c0_69 = arith.constant 0 : index
    %c0_70 = arith.constant 0 : index
    %69 = vector.load %arg7[%c0_69, %c0_70] : memref<72x16xbf16, #tpu.memory_space<vmem>>, vector<72x16xbf16>
    %cst_71 = arith.constant dense<0.000000e+00> : vector<512x16xf32>
    %70 = tpu.matmul %68, %69, %cst_71 {dimension_numbers = #tpu.dot_dimension_numbers<[1], [0], [0], [1], [0, 0, 1, 1], [], []>} : vector<512x72xbf16>, vector<72x16xbf16>, vector<512x16xf32> -> vector<512x16xf32>
    %c0_72 = arith.constant 0 : index
    %c0_73 = arith.constant 0 : index
    %71 = vector.load %arg8[%c0_72, %c0_73] : memref<1x16xf32, #tpu.memory_space<vmem>>, vector<1x16xf32>
    %72 = vector.broadcast %71 : vector<1x16xf32> to vector<512x16xf32>
    %73 = arith.addf %70, %72 : vector<512x16xf32>
    %cst_74 = arith.constant 0.000000e+00 : f32
    %74 = vector.broadcast %cst_74 : f32 to vector<512x16xf32>
    %75 = arith.maximumf %73, %74 : vector<512x16xf32>
    %c0_75 = arith.constant 0 : index
    %c0_76 = arith.constant 0 : index
    %76 = vector.load %arg9[%c0_75, %c0_76] : memref<512x48xf32, #tpu.memory_space<vmem>>, vector<512x48xf32>
    %77 = vector.extract_strided_slice %76 {offsets = [0, 0], sizes = [512, 16], strides = [1, 1]} : vector<512x48xf32> to vector<512x16xf32>
    %78 = arith.mulf %75, %77 : vector<512x16xf32>
    %cst_77 = arith.constant dense<0.000000e+00> : vector<512xf32>
    %79 = vector.multi_reduction <add>, %78, %cst_77 [1] : vector<512x16xf32> to vector<512xf32>
    %80 = vector.shape_cast %79 : vector<512xf32> to vector<512x1xf32>
    %81 = vector.extract_strided_slice %76 {offsets = [0, 16], sizes = [512, 16], strides = [1, 1]} : vector<512x48xf32> to vector<512x16xf32>
    %82 = arith.mulf %75, %81 : vector<512x16xf32>
    %cst_78 = arith.constant dense<0.000000e+00> : vector<512xf32>
    %83 = vector.multi_reduction <add>, %82, %cst_78 [1] : vector<512x16xf32> to vector<512xf32>
    %84 = vector.shape_cast %83 : vector<512xf32> to vector<512x1xf32>
    %85 = vector.extract_strided_slice %76 {offsets = [0, 32], sizes = [512, 16], strides = [1, 1]} : vector<512x48xf32> to vector<512x16xf32>
    %86 = arith.mulf %75, %85 : vector<512x16xf32>
    %cst_79 = arith.constant dense<0.000000e+00> : vector<512xf32>
    %87 = vector.multi_reduction <add>, %86, %cst_79 [1] : vector<512x16xf32> to vector<512xf32>
    %88 = vector.shape_cast %87 : vector<512xf32> to vector<512x1xf32>
    %89 = tpu.concatenate %80, %84, %88 in 1 : vector<512x1xf32>, vector<512x1xf32>, vector<512x1xf32> -> vector<512x3xf32>
    %cst_80 = arith.constant dense<0.000000e+00> : vector<3xf32>
    %90 = vector.multi_reduction <add>, %89, %cst_80 [0] : vector<512x3xf32> to vector<3xf32>
    %91 = vector.shape_cast %90 : vector<3xf32> to vector<1x3xf32>
    %c0_81 = arith.constant 0 : index
    %c0_82 = arith.constant 0 : index
    %92 = vector.load %arg10[%c0_81, %c0_82] : memref<1x3xf32, #tpu.memory_space<vmem>>, vector<1x3xf32>
    %93 = arith.addf %91, %92 : vector<1x3xf32>
    %94 = vector.shape_cast %93 : vector<1x3xf32> to vector<1x1x3xf32>
    %c0_83 = arith.constant 0 : index
    %c0_84 = arith.constant 0 : index
    %c0_85 = arith.constant 0 : index
    %95 = vector.load %arg11[%c0_83, %c0_84, %c0_85] : memref<1x1x3xf32, #tpu.memory_space<vmem>>, vector<1x1x3xf32>
    tpu.vector_store %arg11[%c0_83, %c0_84, %c0_85], %94 {strides = array<i32>} : memref<1x1x3xf32, #tpu.memory_space<vmem>>, vector<1x1x3xf32>,
    return
  }
  func.func @transform_0(%arg0: i32) -> (i32, i32, i32) {
    %c0_i32 = arith.constant 0 : i32
    %c0_i32_0 = arith.constant 0 : i32
    %c0_i32_1 = arith.constant 0 : i32
    return %arg0, %c0_i32, %c0_i32_0 : i32, i32, i32
  }
  func.func @transform_1(%arg0: i32) -> (i32, i32) {
    %c0_i32 = arith.constant 0 : i32
    %c0_i32_0 = arith.constant 0 : i32
    %c0_i32_1 = arith.constant 0 : i32
    return %c0_i32, %c0_i32_0 : i32, i32
  }
  func.func @transform_2(%arg0: i32) -> (i32, i32) {
    %c0_i32 = arith.constant 0 : i32
    %c0_i32_0 = arith.constant 0 : i32
    %c0_i32_1 = arith.constant 0 : i32
    return %c0_i32, %c0_i32_0 : i32, i32
  }
  func.func @transform_3(%arg0: i32) -> (i32, i32) {
    %c0_i32 = arith.constant 0 : i32
    %c0_i32_0 = arith.constant 0 : i32
    %c0_i32_1 = arith.constant 0 : i32
    return %c0_i32, %c0_i32_0 : i32, i32
  }
  func.func @transform_4(%arg0: i32) -> (i32, i32) {
    %c0_i32 = arith.constant 0 : i32
    %c0_i32_0 = arith.constant 0 : i32
    %c0_i32_1 = arith.constant 0 : i32
    return %c0_i32, %c0_i32_0 : i32, i32
  }
  func.func @transform_5(%arg0: i32) -> (i32, i32) {
    %c0_i32 = arith.constant 0 : i32
    %c0_i32_0 = arith.constant 0 : i32
    %c0_i32_1 = arith.constant 0 : i32
    return %c0_i32, %c0_i32_0 : i32, i32
  }
  func.func @transform_6(%arg0: i32) -> (i32, i32) {
    %c0_i32 = arith.constant 0 : i32
    %c0_i32_0 = arith.constant 0 : i32
    %c0_i32_1 = arith.constant 0 : i32
    return %c0_i32, %c0_i32_0 : i32, i32
  }
  func.func @transform_7(%arg0: i32) -> (i32, i32) {
    %c0_i32 = arith.constant 0 : i32
    %c0_i32_0 = arith.constant 0 : i32
    %c0_i32_1 = arith.constant 0 : i32
    return %c0_i32, %c0_i32_0 : i32, i32
  }
  func.func @transform_8(%arg0: i32) -> (i32, i32) {
    %c0_i32 = arith.constant 0 : i32
    %c0_i32_0 = arith.constant 0 : i32
    %c0_i32_1 = arith.constant 0 : i32
    return %c0_i32, %c0_i32_0 : i32, i32
  }
  func.func @transform_9(%arg0: i32) -> (i32, i32) {
    %c0_i32 = arith.constant 0 : i32
    %c0_i32_0 = arith.constant 0 : i32
    %c0_i32_1 = arith.constant 0 : i32
    return %c0_i32, %c0_i32_0 : i32, i32
  }
  func.func @transform_10(%arg0: i32) -> (i32, i32, i32) {
    %c0_i32 = arith.constant 0 : i32
    %c0_i32_0 = arith.constant 0 : i32
    %c0_i32_1 = arith.constant 0 : i32
    return %arg0, %c0_i32, %c0_i32_0 : i32, i32, i32
  }
}

</mosaic_0001>

<bundles_post_ra>
// kernel: model_forward.1
= control target key start
LH: loop header
LB: loop body
LE: loop exit
PB: predicated region body
PF: predicated region fallthrough
CT: control target
= control target key end

     0   :  { %s19187_s0 = inlined_call_operand.vmem [shape: bf16[2,512,27], index: 0, kind: input, shape index: {}]   ;;  %s19188_s1 = inlined_call_operand.vmem [shape: f32[512,2], index: 1, kind: input, shape index: {}]   ;;  %s19189_s2 = inlined_call_operand.vmem [shape: bf16[27,64], index: 2, kind: input, shape index: {}]   ;;  %s19190_s3 = inlined_call_operand.vmem [shape: f32[1,64], index: 3, kind: input, shape index: {}]   ;;  %s19191_s4 = inlined_call_operand.vmem [shape: bf16[256,8], index: 4, kind: input, shape index: {}]   ;;  %s19192_s5 = inlined_call_operand.vmem [shape: f32[1,8], index: 5, kind: input, shape index: {}]   ;;  %s19193_s6 = inlined_call_operand.vmem [shape: bf16[72,16], index: 6, kind: input, shape index: {}]   ;;  %s19194_s7 = inlined_call_operand.vmem [shape: f32[1,16], index: 7, kind: input, shape index: {}]   ;;  %s19195_s8 = inlined_call_operand.vmem [shape: f32[512,48], index: 8, kind: input, shape index: {}]   ;;  %s19196_s9 = inlined_call_operand.vmem [shape: f32[1,3], index: 9, kind: input, shape index: {}]   ;;  %s19197_s10 = inlined_call_operand.hbm [shape: f32[2,1,3], index: 10, kind: output, shape index: {}]  }
   0x1   :  { %19374 = sst [smem:[#allocation161_spill]] %s19187_s0 }
   0x2   :  { %15 = vsyncpa [#allocation7], 0 }
   0x3   :  { %17 = vsyncpa [#allocation7 + $0x1], 0  ;;  %s11482_s13 = smov 0   ;;  %s11484_s14 = smov 0  }
   0x4   :  { %s11486_s15 = smov 0   ;;  %s11488_s16 = smov 0  }
   0x5 LB: > { %s11503_s17 = sadd.s32 4294967295, %s11410_s16   ;;  %s9228_s18 = sadd.s32 4294967294, %s11410_s16   ;;  %s11410_s16 = sphi %s11488_s16, %s20235_s16   ;;  %s11406_s15 = sphi %s11486_s15, %s20234_s15   ;;  %s11402_s14 = sphi %s11484_s14, %s20233_s14   ;;  %s11398_s13 = sphi %s11482_s13, %s20232_s13  }
   0x6   : > { %s11507_s19 = sadd.s32 1, %s11410_s16   ;;  %s245_s20 = sadd.s32 1, %s11406_s15 }
   0x7   : > { %s242_s21 = ssub.s32 %s11410_s16, %s11507_s19  ;;  %p255_p0 = scmp.ne.s32.totalorder %s11406_s15, %s11402_s14 }
   0x8   : > { %p243_p1 = scmp.eq.s32.totalorder %s242_s21, 0  ;;  %p256_p2 = scmp.eq.s32.totalorder %s11503_s17, 1 }
   0x9   : > { %p261_p3 = scmp.ne.s32.totalorder %s11402_s14, %s11398_s13  ;;  %p262_p4 = scmp.eq.s32.totalorder %s9228_s18, 1 }
   0xa   : > { %s11518_s22 = scalar_select %p243_p1, %s11406_s15, %s245_s20  }
   0xb   : > { %p11520_p5 = por %p256_p2, %p255_p0  ;;  %p11524_p6 = por %p262_p4, %p261_p3 }
   0xc   : > { %p9231_p7 = scmp.ge.s32.totalorder %s11410_s16, 1  ;;  %p315_p8 = scmp.lt.s32.totalorder %s11410_s16, 3 }
   0xe   : > { %p316_p9 = pnand %p9231_p7, %p315_p8 }
  0x10   : > { %319 = sbr.rel (%p316_p9) target bundleno = 2634 (0xa4a), region = 60 }
  0x15   : > { %v11533_v0 = vld [vmem:[%s19188_s1 + $0x10] sm:$0xff]  ;;  %v11538_v1 = vld [vmem:[%s19188_s1] sm:$0xff]  ;;  %vm832_vm0 = vcmask 1044480   ;;  %v19198_v2 = vmov 0   ;;  %v11107_v3 = vld [vmem:[%s19189_s2 + $0x8] sm:$0x3f]  }
  0x16   : > { %9824 = vset.pattern.permute.xlu1 %v19198_v2  ;;  %9823 = vset.pattern.permute.xlu0 %v19198_v2  ;;  %vm833_vm1 = vcmask 1045504   ;;  %v11413_v4 = vmov 65535   ;;  %p352_p10 = scmp.lt.s32.totalorder %s11503_s17, 1  ;;  %v11551_v7 = vld [vmem:[%s19188_s1 + $0x18] sm:$0xff]  ;;  %v11557_v9 = vld [vmem:[%s19188_s1 + $0x8] sm:$0xff]  ;;  %v11108_v10 = vld [vmem:[%s19189_s2] sm:$0xff]  }
  0x17   : > { %1140 = vperm.xlu1 %9824, %v11533_v0   ;;  %1130 = vperm.xlu0 %9823, %v11538_v1   ;;  %v834_v5 = vsel %vm832_vm0, 4294967295, %v11413_v4  ;;  %vm391_vm2 = vcmask 519168   ;;  %v11578_v11 = vld [vmem:[%s19188_s1 + $0x28] sm:$0xff]  ;;  %v11583_v12 = vld [vmem:[%s19188_s1 + $0x20] sm:$0xff]  ;;  %s19377_s0 = sld [smem:[#allocation161_spill]]  ;;  %vm735_vm3 = vcmask 220160  }
  0x18   : > { %v835_v6 = vsel %vm833_vm1, %v834_v5, 0  ;;  %9737 = vmatprep.subr.bf16.mxu1 %v19198_v2  ;;  %s353_s26 = scalar_select %p352_p10, %s11503_s17, 1  ;;  %402 = vst.msk [vmem:[#allocation4 + $0x128] sm:$0xf] %vm391_vm2, %v19198_v2  ;;  %403 = vst.msk [vmem:[#allocation4 + $0x12c] sm:$0xf] %vm391_vm2, %v19198_v2 }
  0x19   : > { %v837_v8 = vand.u32 %v11107_v3, %v835_v6  ;;  %404 = vst.msk [vmem:[#allocation4 + $0x130] sm:$0xf] %vm391_vm2, %v19198_v2  ;;  %400 = vst.msk [vmem:[#allocation4 + $0x120] sm:$0xf] %vm391_vm2, %v19198_v2  ;;  %v11594_v14 = vld [vmem:[%s19188_s1 + $0x38] sm:$0xff]  ;;  %v11604_v17 = vld [vmem:[%s19188_s1 + $0x30] sm:$0xff] }
  0x1a   : > { %401 = vst.msk [vmem:[#allocation4 + $0x124] sm:$0xf] %vm391_vm2, %v19198_v2  ;;  %s9459_s27 = sshll.u32 %s353_s26, 8  ;;  %v11613_v18 = vld [vmem:[%s19188_s1 + $0x48] sm:$0xff]  ;;  %v11619_v19 = vld [vmem:[%s19188_s1 + $0x40] sm:$0xff]  ;;  %v11627_v21 = vld [vmem:[%s19188_s1 + $0x58] sm:$0xff] }
  0x1b   : > { %9595 = vmatprep.subr.bf16.mxu0 %v837_v8  ;;  %1145 = vperm.xlu1 %9824, %v11551_v7   ;;  %v11633_v23 = vld [vmem:[%s19188_s1 + $0x50] sm:$0xff]  ;;  %v11641_v24 = vld [vmem:[%s19188_s1 + $0x68] sm:$0xff]  ;;  %v11647_v25 = vld [vmem:[%s19188_s1 + $0x60] sm:$0xff]  ;;  %vm358_vm4 = vcmask 523264   ;;  %v19200_v4 = vmov 0.0   ;;  %s11415_s30 = smov 64  }
  0x1c   : > { %9596 = vmatpush3.bf16.msra.mxu0 %v837_v8  ;;  %1135 = vperm.xlu0 %9823, %v11557_v9   ;;  %v11655_v27 = vld [vmem:[%s19188_s1 + $0x78] sm:$0xff]  ;;  %v11661_v29 = vld [vmem:[%s19188_s1 + $0x70] sm:$0xff]  ;;  %v11669_v30 = vld [vmem:[%s19188_s1 + $0x88] sm:$0xff]  ;;  %361 = vst.msk [vmem:[#allocation2 + $0x10] sm:$0xff] %vm358_vm4, %v19200_v4  ;;  %vm3105_vm5 = vsmask.f32 7424 }
  0x1d   : > { %s11588_s20 = scalar_lea.vmem %s19377_s0, %s9459_s27  ;;  %9597 = vmatprep.subr.bf16.mxu0 %v11108_v10  ;;  %v11675_v31 = vld [vmem:[%s19188_s1 + $0x80] sm:$0xff]  ;;  %v11682_v33 = vld [vmem:[%s19188_s1 + $0x98] sm:$0xff]  ;;  %v11689_v35 = vld [vmem:[%s19188_s1 + $0x90] sm:$0xff]  ;;  %359 = vst.msk [vmem:[#allocation2] sm:$0xff] %vm358_vm4, %v19200_v4  ;;  %vm408_vm6 = vcmask 64512   ;;  %s11417_s12 = smov 8  }
  0x1e   : > { %v11109_v13 = vld [vmem:[%s11588_s20] sm:$0xff]   ;;  %v11110_v15 = vld [vmem:[%s11588_s20 + $0x8] sm:$0xff]   ;;  %v11111_v16 = vld [vmem:[%s11588_s20 + $0x10] sm:$0xff]   ;;  %360 = vst.msk [vmem:[#allocation2 + $0x8] sm:$0xff] %vm358_vm4, %v19200_v4  ;;  %s11418_s25 = smov 16   ;;  %s11419_s26 = smov 56  }
  0x1f   : > { %1155 = vperm.xlu1 %9824, %v11578_v11   ;;  %9599 = vmatprep.mubr.msk.bf16.mxu0 %vm735_vm3, %v11109_v13  ;;  %v11112_v20 = vld [vmem:[%s11588_s20 + $0x18] sm:$0xff]   ;;  %v11113_v22 = vld [vmem:[%s11588_s20 + $0x20] sm:$0xff]   ;;  %v11114_v26 = vld [vmem:[%s11588_s20 + $0x28] sm:$0xff]   ;;  %362 = vst.msk [vmem:[#allocation2 + $0x18] sm:$0xff] %vm358_vm4, %v19200_v4  ;;  %s11420_s27 = smov 48   ;;  %s11422_s21 = smov 32  }
  0x20   : > { %9598 = vmatpush3.bf16.msra.mxu0 %v11108_v10  ;;  %1150 = vperm.xlu0 %9823, %v11583_v12   ;;  %v11115_v28 = vld [vmem:[%s11588_s20 + $0x30] sm:$0xff]   ;;  %v11116_v32 = vld [vmem:[%s11588_s20 + $0x38] sm:$0xff]   ;;  %v11117_v34 = vld [vmem:[%s11588_s20 + $0x40] sm:$0xff]   ;;  %363 = vst.msk [vmem:[#allocation2 + $0x20] sm:$0xff] %vm358_vm4, %v19200_v4  ;;  %s11423_s28 = smov 24   ;;  %s11424_s29 = smov 40  }
  0x21   : > { %3800 = vmatprep.subr.bf16.mxu0 %v19198_v2  ;;  %v11697_v36 = vld [vmem:[%s19188_s1 + $0xa8] sm:$0xff]  ;;  %v11703_v37 = vld [vmem:[%s19188_s1 + $0xa0] sm:$0xff]  ;;  %v11711_v39 = vld [vmem:[%s19188_s1 + $0xb8] sm:$0xff]  ;;  %364 = vst.msk [vmem:[#allocation2 + $0x28] sm:$0xff] %vm358_vm4, %v19200_v4  ;;  %vm7255_vm7 = vcmask 1043456   ;;  %vm6629_vm8 = vcmask 130048  }
  0x22   : > { %v11118_v38 = vld [vmem:[%s11588_s20 + $0x48] sm:$0xff]   ;;  %v11119_v40 = vld [vmem:[%s11588_s20 + $0x50] sm:$0xff]   ;;  %v11731_v43 = vld [vmem:[%s19188_s1 + $0xc0] sm:$0xff]  ;;  %365 = vst.msk [vmem:[#allocation2 + $0x30] sm:$0xff] %vm358_vm4, %v19200_v4  ;;  %vm6694_vm9 = vcmask 195584   ;;  %vm6759_vm10 = vcmask 261120  }
  0x23   : > { %9600 = vmatmul.mubr.msk.bf16.vlgmr.msra.gmra.mxu0 %vm735_vm3, %v11110_v15  ;;  %1165 = vperm.xlu1 %9824, %v11594_v14   ;;  %v11717_v41 = vld [vmem:[%s19188_s1 + $0xb0] sm:$0xff]  ;;  %v11725_v42 = vld [vmem:[%s19188_s1 + $0xc8] sm:$0xff]  ;;  %v11120_v44 = vld [vmem:[%s11588_s20 + $0x58] sm:$0xff]   ;;  %366 = vst.msk [vmem:[#allocation2 + $0x38] sm:$0xff] %vm358_vm4, %v19200_v4  ;;  %vm6824_vm11 = vcmask 326656   ;;  %vm6889_vm12 = vcmask 392192  }
  0x24   : > { %1160 = vperm.xlu0 %9823, %v11604_v17   ;;  %9603 = vmatprep.mubr.msk.bf16.mxu0 %vm735_vm3, %v11111_v16  ;;  %v11738_v45 = vld [vmem:[%s19188_s1 + $0xd8] sm:$0xff]  ;;  %v11121_v46 = vld [vmem:[%s11588_s20 + $0x60] sm:$0xff]   ;;  %v11745_v47 = vld [vmem:[%s19188_s1 + $0xd0] sm:$0xff]  ;;  %367 = vst.msk [vmem:[#allocation2 + $0x240] sm:$0xff] %vm358_vm4, %v19200_v4  ;;  %vm6954_vm13 = vcmask 457728   ;;  %vm7158_vm14 = vcmask 588800  }
  0x25   : > { %v11753_v48 = vld [vmem:[%s19188_s1 + $0xe8] sm:$0xff]  ;;  %v11759_v49 = vld [vmem:[%s19188_s1 + $0xe0] sm:$0xff]  ;;  %v11765_v51 = vld [vmem:[%s19188_s1 + $0xf8] sm:$0xff]  ;;  %368 = vst.msk [vmem:[#allocation2 + $0x248] sm:$0xff] %vm358_vm4, %v19200_v4  ;;  %s11425_s18 = smov 96   ;;  %vm8892_vm15 = vcmask 7168  }
  0x26   : > { %v11122_v50 = vld [vmem:[%s11588_s20 + $0x68] sm:$0xff]   ;;  %v11771_v52 = vld [vmem:[%s19188_s1 + $0xf0] sm:$0xff]  ;;  %v11785_v55 = vld [vmem:[%s19188_s1 + $0x100] sm:$0xff]  ;;  %369 = vst.msk [vmem:[#allocation2 + $0x250] sm:$0xff] %vm358_vm4, %v19200_v4  ;;  %vm8957_vm0 = vcmask 15360   ;;  %vm9022_vm1 = vcmask 23552  }
  0x27   : > { %1175 = vperm.xlu1 %9824, %v11613_v18   ;;  %v11123_v53 = vld [vmem:[%s11588_s20 + $0x70] sm:$0xff]   ;;  %v11778_v54 = vld [vmem:[%s19188_s1 + $0x108] sm:$0xff]  ;;  %v11124_v56 = vld [vmem:[%s11588_s20 + $0x78] sm:$0xff]   ;;  %370 = vst.msk [vmem:[#allocation2 + $0x258] sm:$0xff] %vm358_vm4, %v19200_v4 }
  0x28   : > { %1170 = vperm.xlu0 %9823, %v11619_v19   ;;  %v11793_v57 = vld [vmem:[%s19188_s1 + $0x118] sm:$0xff]  ;;  %v11125_v58 = vld [vmem:[%s11588_s20 + $0x80] sm:$0xff]   ;;  %v11800_v59 = vld [vmem:[%s19188_s1 + $0x110] sm:$0xff]  ;;  %371 = vst.msk [vmem:[#allocation2 + $0x260] sm:$0xff] %vm358_vm4, %v19200_v4 }
  0x29   : > { %v11806_v60 = vld [vmem:[%s19188_s1 + $0x128] sm:$0xff]  ;;  %v11813_v61 = vld [vmem:[%s19188_s1 + $0x120] sm:$0xff]  ;;  %v11823_v63 = vld [vmem:[%s19188_s1 + $0x138] sm:$0xff]  ;;  %372 = vst.msk [vmem:[#allocation2 + $0x268] sm:$0xff] %vm358_vm4, %v19200_v4 }
  0x2a   : > { %v11126_v62 = vld [vmem:[%s11588_s20 + $0x88] sm:$0xff]   ;;  %v11127_v3 = vld [vmem:[%s11588_s20 + $0x90] sm:$0xff]   ;;  %373 = vst.msk [vmem:[#allocation2 + $0x270] sm:$0xff] %vm358_vm4, %v19200_v4  ;;  %374 = vst.msk [vmem:[#allocation2 + $0x278] sm:$0xff] %vm358_vm4, %v19200_v4 }
  0x2b   : > { %9604 = vmatmul.mubr.msk.bf16.gmra.mxu0 %vm735_vm3, %v11112_v20  ;;  %1185 = vperm.xlu1 %9824, %v11627_v21   ;;  %382 = vst.msk [vmem:[#allocation3 + $0x38] sm:$0xff] %vm358_vm4, %v19200_v4  ;;  %383 = vst.msk [vmem:[#allocation3 + $0x240] sm:$0xff] %vm358_vm4, %v19200_v4  ;;  %v11865_v5 = vld [vmem:[%s19188_s1 + $0x130] sm:$0xff]  ;;  %v11873_v6 = vld [vmem:[%s19188_s1 + $0x148] sm:$0xff] }
  0x2c   : > { %1180 = vperm.xlu0 %9823, %v11633_v23   ;;  %9607 = vmatprep.mubr.msk.bf16.mxu0 %vm735_vm3, %v11113_v22  ;;  %v11879_v8 = vld [vmem:[%s19188_s1 + $0x140] sm:$0xff]  ;;  %v11128_v10 = vld [vmem:[%s11588_s20 + $0x98] sm:$0xff]   ;;  %v11893_v16 = vld [vmem:[%s19188_s1 + $0x150] sm:$0xff] }
  0x2d   : > { %v11887_v13 = vld [vmem:[%s19188_s1 + $0x158] sm:$0xff]  ;;  %v11129_v15 = vld [vmem:[%s11588_s20 + $0xa0] sm:$0xff]   ;;  %v11901_v20 = vld [vmem:[%s19188_s1 + $0x168] sm:$0xff] }
  0x2e   : > { %v11907_v22 = vld [vmem:[%s19188_s1 + $0x160] sm:$0xff]  ;;  %v11999_v2 = vld [vmem:[%s19188_s1 + $0x1d8] sm:$0xff] }
  0x2f   : > { %1195 = vperm.xlu1 %9824, %v11641_v24   ;;  %19387 = vst [vmem:[#allocation18_spill] sm:$0xff] %v11999_v2  ;;  %v11137_v4 = vld [vmem:[%s11588_s20 + $0xe0] sm:$0xff]  }
  0x30   : > { %1190 = vperm.xlu0 %9823, %v11647_v25  }
  0x33   : > { %9608 = vmatmul.mubr.msk.bf16.gmra.mxu0 %vm735_vm3, %v11114_v26  ;;  %1205 = vperm.xlu1 %9824, %v11655_v27   ;;  %v11130_v26 = vld [vmem:[%s11588_s20 + $0xa8] sm:$0xff]  }
  0x34   : > { %1200 = vperm.xlu0 %9823, %v11661_v29   ;;  %9611 = vmatprep.mubr.msk.bf16.mxu0 %vm735_vm3, %v11115_v28  ;;  %v11915_v28 = vld [vmem:[%s19188_s1 + $0x178] sm:$0xff] }
  0x37   : > { %1215 = vperm.xlu1 %9824, %v11669_v30  }
  0x38   : > { %1210 = vperm.xlu0 %9823, %v11675_v31  }
  0x3b   : > { %9612 = vmatmul.mubr.msk.bf16.gmra.mxu0 %vm735_vm3, %v11116_v32  ;;  %1225 = vperm.xlu1 %9824, %v11682_v33   ;;  %v11131_v32 = vld [vmem:[%s11588_s20 + $0xb0] sm:$0xff]  }
  0x3c   : > { %1220 = vperm.xlu0 %9823, %v11689_v35   ;;  %9615 = vmatprep.mubr.msk.bf16.mxu0 %vm735_vm3, %v11117_v34  ;;  %v11921_v34 = vld [vmem:[%s19188_s1 + $0x170] sm:$0xff] }
  0x3f   : > { %1235 = vperm.xlu1 %9824, %v11697_v36  }
  0x40   : > { %1230 = vperm.xlu0 %9823, %v11703_v37  }
  0x43   : > { %9616 = vmatmul.mubr.msk.bf16.gmra.mxu0 %vm735_vm3, %v11118_v38  ;;  %1245 = vperm.xlu1 %9824, %v11711_v39   ;;  %v11929_v38 = vld [vmem:[%s19188_s1 + $0x188] sm:$0xff] }
  0x44   : > { %1240 = vperm.xlu0 %9823, %v11717_v41   ;;  %9619 = vmatprep.mubr.msk.bf16.mxu0 %vm735_vm3, %v11119_v40  ;;  %19378 = vst [vmem:[#allocation9_spill] sm:$0xff] %v11929_v38  ;;  %v11935_v40 = vld [vmem:[%s19188_s1 + $0x180] sm:$0xff] }
  0x47   : > { %1255 = vperm.xlu1 %9824, %v11725_v42  }
  0x48   : > { %1250 = vperm.xlu0 %9823, %v11731_v43  }
  0x4b   : > { %9620 = vmatmul.mubr.msk.bf16.gmra.mxu0 %vm735_vm3, %v11120_v44  ;;  %1265 = vperm.xlu1 %9824, %v11738_v45   ;;  %v11132_v44 = vld [vmem:[%s11588_s20 + $0xb8] sm:$0xff]  }
  0x4c   : > { %1260 = vperm.xlu0 %9823, %v11745_v47   ;;  %9623 = vmatprep.mubr.msk.bf16.mxu0 %vm735_vm3, %v11121_v46  ;;  %v11943_v46 = vld [vmem:[%s19188_s1 + $0x198] sm:$0xff] }
  0x4d   : > { %19379 = vst [vmem:[#allocation10_spill] sm:$0xff] %v11943_v46 }
  0x4f   : > { %1275 = vperm.xlu1 %9824, %v11753_v48  }
  0x50   : > { %1270 = vperm.xlu0 %9823, %v11759_v49  }
  0x53   : > { %9624 = vmatmul.mubr.msk.bf16.gmra.mxu0 %vm735_vm3, %v11122_v50  ;;  %1285 = vperm.xlu1 %9824, %v11765_v51   ;;  %v11133_v50 = vld [vmem:[%s11588_s20 + $0xc0] sm:$0xff]  }
  0x54   : > { %1280 = vperm.xlu0 %9823, %v11771_v52   ;;  %9627 = vmatprep.mubr.msk.bf16.mxu0 %vm735_vm3, %v11123_v53  ;;  %v11949_v53 = vld [vmem:[%s19188_s1 + $0x190] sm:$0xff] }
  0x55   : > { %19380 = vst [vmem:[#allocation11_spill] sm:$0xff] %v11949_v53 }
  0x57   : > { %1295 = vperm.xlu1 %9824, %v11778_v54  }
  0x58   : > { %1290 = vperm.xlu0 %9823, %v11785_v55  }
  0x5b   : > { %9628 = vmatmul.mubr.msk.bf16.gmra.mxu0 %vm735_vm3, %v11124_v56  ;;  %1305 = vperm.xlu1 %9824, %v11793_v57   ;;  %v11957_v56 = vld [vmem:[%s19188_s1 + $0x1a8] sm:$0xff] }
  0x5c   : > { %1300 = vperm.xlu0 %9823, %v11800_v59   ;;  %9631 = vmatprep.mubr.msk.bf16.mxu0 %vm735_vm3, %v11125_v58  ;;  %19381 = vst [vmem:[#allocation12_spill] sm:$0xff] %v11957_v56  ;;  %v11963_v58 = vld [vmem:[%s19188_s1 + $0x1a0] sm:$0xff] }
  0x5d   : > { %19382 = vst [vmem:[#allocation13_spill] sm:$0xff] %v11963_v58 }
  0x5f   : > { %1315 = vperm.xlu1 %9824, %v11806_v60  }
  0x60   : > { %1310 = vperm.xlu0 %9823, %v11813_v61  }
  0x63   : > { %9632 = vmatmul.mubr.msk.bf16.gmra.mxu0 %vm735_vm3, %v11126_v62  ;;  %1325 = vperm.xlu1 %9824, %v11823_v63   ;;  %v11134_v62 = vld [vmem:[%s11588_s20 + $0xc8] sm:$0xff]  }
  0x64   : > { %1320 = vperm.xlu0 %9823, %v11865_v5   ;;  %9635 = vmatprep.mubr.msk.bf16.mxu0 %vm735_vm3, %v11127_v3  ;;  %v11971_v3 = vld [vmem:[%s19188_s1 + $0x1b8] sm:$0xff] }
  0x65   : > { %19383 = vst [vmem:[#allocation14_spill] sm:$0xff] %v11971_v3 }
  0x67   : > { %1335 = vperm.xlu1 %9824, %v11873_v6  }
  0x68   : > { %1330 = vperm.xlu0 %9823, %v11879_v8  }
  0x6b   : > { %9636 = vmatmul.mubr.msk.bf16.gmra.mxu0 %vm735_vm3, %v11128_v10  ;;  %1345 = vperm.xlu1 %9824, %v11887_v13   ;;  %v11135_v10 = vld [vmem:[%s11588_s20 + $0xd0] sm:$0xff]  }
  0x6c   : > { %1340 = vperm.xlu0 %9823, %v11893_v16   ;;  %9639 = vmatprep.mubr.msk.bf16.mxu0 %vm735_vm3, %v11129_v15  ;;  %v11977_v15 = vld [vmem:[%s19188_s1 + $0x1b0] sm:$0xff] }
  0x6d   : > { %19384 = vst [vmem:[#allocation15_spill] sm:$0xff] %v11977_v15 }
  0x6f   : > { %1355 = vperm.xlu1 %9824, %v11901_v20  }
  0x70   : > { %1350 = vperm.xlu0 %9823, %v11907_v22  }
  0x73   : > { %9640 = vmatmul.mubr.msk.bf16.gmra.mxu0 %vm735_vm3, %v11130_v26  ;;  %1365 = vperm.xlu1 %9824, %v11915_v28   ;;  %v11985_v26 = vld [vmem:[%s19188_s1 + $0x1c8] sm:$0xff] }
  0x74   : > { %1360 = vperm.xlu0 %9823, %v11921_v34   ;;  %9643 = vmatprep.mubr.msk.bf16.mxu0 %vm735_vm3, %v11131_v32  ;;  %19385 = vst [vmem:[#allocation16_spill] sm:$0xff] %v11985_v26  ;;  %v11141_v32 = vld [vmem:[#allocation4 + $0x120] sm:$0xff]  }
  0x77   : > { %1375 = vperm.xlu1 %9824, %v11929_v38  }
  0x78   : > { %1370 = vperm.xlu0 %9823, %v11935_v40  }
  0x7b   : > { %9644 = vmatmul.mubr.msk.bf16.gmra.mxu0 %vm735_vm3, %v11132_v44  ;;  %1385 = vperm.xlu1 %9824, %v11943_v46   ;;  %v11991_v44 = vld [vmem:[%s19188_s1 + $0x1c0] sm:$0xff]  ;;  %v3448_v46 = vshrl.u32 %v11141_v32, 16 }
  0x7c   : > { %1380 = vperm.xlu0 %9823, %v11949_v53   ;;  %9647 = vmatprep.mubr.msk.bf16.mxu0 %vm735_vm3, %v11133_v50  ;;  %19386 = vst [vmem:[#allocation17_spill] sm:$0xff] %v11991_v44  ;;  %v11139_v50 = vld [vmem:[#allocation4 + $0x128] sm:$0xff]   ;;  %v12036_v53 = vld [vmem:[%s19188_s1 + $0x1f0] sm:$0xff] }
  0x7d   : > { %v3456_v38 = vshrl.u32 %v11139_v50, 16 }
  0x7f   : > { %1395 = vperm.xlu1 %9824, %v11957_v56   ;;  %v11140_v56 = vld [vmem:[#allocation4 + $0x130] ss:$0 sps:$4 sm:$0x11]  }
  0x80   : > { %1390 = vperm.xlu0 %9823, %v11963_v58   ;;  %v12021_v58 = vld [vmem:[%s19188_s1 + $0x1e0] sm:$0xff] }
  0x81   : > { %19391 = vst [vmem:[#allocation22_spill] sm:$0xff] %v12021_v58 }
  0x83   : > { %9648 = vmatmul.mubr.msk.bf16.gmra.mxu0 %vm735_vm3, %v11134_v62  ;;  %1405 = vperm.xlu1 %9824, %v11971_v3   ;;  %v11136_v62 = vld [vmem:[%s11588_s20 + $0xd8] sm:$0xff]   ;;  %v3444_v3 = vshll.u32 %v11141_v32, 16  ;;  %v11142_v32 = vld [vmem:[%s11588_s20 + $0xf0] sm:$0xff]  }
  0x84   : > { %1400 = vperm.xlu0 %9823, %v11977_v15   ;;  %9651 = vmatprep.mubr.msk.bf16.mxu0 %vm735_vm3, %v11135_v10  ;;  %v12005_v10 = vld [vmem:[%s19188_s1 + $0x1d0] sm:$0xff]  ;;  %v3452_v15 = vshll.u32 %v11139_v50, 16 }
  0x85   : > { %19388 = vst [vmem:[#allocation19_spill] sm:$0xff] %v12005_v10 }
  0x87   : > { %1415 = vperm.xlu1 %9824, %v11985_v26   ;;  %v12013_v26 = vld [vmem:[%s19188_s1 + $0x1e8] sm:$0xff] }
  0x88   : > { %1410 = vperm.xlu0 %9823, %v11991_v44   ;;  %19389 = vst [vmem:[#allocation20_spill] sm:$0xff] %v12013_v26  ;;  %v12016_v44 = vrot.slane %v3444_v3, 1 }
  0x8a   : > { %19390 = vst [vmem:[#allocation21_spill] sm:$0xff] %v12016_v44  ;;  %v3450_v3 = vor.u32 %v3448_v46, %v12016_v44 }
  0x8b   : > { %9652 = vmatmul.mubr.msk.bf16.gmra.mxu0 %vm735_vm3, %v11136_v62  ;;  %1425 = vperm.xlu1 %9824, %v11999_v2   ;;  %v3454_v62 = vrot.slane %v3452_v15, 1  ;;  %v3460_v2 = vshll.u32 %v11140_v56, 16 }
  0x8c   : > { %1420 = vperm.xlu0 %9823, %v12005_v10   ;;  %9655 = vmatprep.mubr.msk.bf16.mxu0 %vm735_vm3, %v11137_v4  ;;  %v11138_v10 = vld [vmem:[%s11588_s20 + $0xe8] sm:$0xff]   ;;  %v12029_v4 = vld [vmem:[%s19188_s1 + $0x1f8] sm:$0xff] }
  0x8d   : > { %19392 = vst [vmem:[#allocation23_spill] sm:$0xff] %v12029_v4  ;;  %v3458_v56 = vor.u32 %v3456_v38, %v3454_v62  ;;  %v3462_v15 = vrot.slane %v3460_v2, 1  ;;  %v3455_v46 = vsel %vm3105_vm5, %v3450_v3, %v3454_v62  ;;  %v11143_v2 = vld [vmem:[%s11588_s20 + $0xf8] sm:$0xff]   ;;  %s11421_s20 = smov 112  }
  0x8f   : > { %1435 = vperm.xlu1 %9824, %v12013_v26   ;;  %v3463_v44 = vsel %vm3105_vm5, %v3458_v56, %v3462_v15 }
  0x90   : > { %1430 = vperm.xlu0 %9823, %v12021_v58  }
  0x92   : > { %v12038_v50 = vpop.permute.xlu1 %1140  ;;  %v12040_v26 = vpop.permute.xlu0 %1130 }
  0x93   : > { %9656 = vmatmul.mubr.msk.bf16.gmra.mxu0 %vm735_vm3, %v11138_v10  ;;  %1445 = vperm.xlu1 %9824, %v12029_v4   ;;  %v11416_v10 = vmov 1   ;;  %v19393_v4 = vmov 0.0  }
  0x94   : > { %1440 = vperm.xlu0 %9823, %v12036_v53   ;;  %9659 = vmatprep.mubr.msk.bf16.mxu0 %vm735_vm3, %v11142_v32  ;;  %413 = vst.msk [vmem:[#allocation5 + $0x20] sm:$0xff] %vm408_vm6, %v19393_v4  ;;  %414 = vst.msk [vmem:[#allocation5 + $0x28] sm:$0xff] %vm408_vm6, %v19393_v4 }
  0x95   : > { %412 = vst.msk [vmem:[#allocation5 + $0x18] sm:$0xff] %vm408_vm6, %v19393_v4  ;;  %415 = vst.msk [vmem:[#allocation5 + $0x30] sm:$0xff] %vm408_vm6, %v19393_v4 }
  0x96   : > { %v12048_v58 = vpop.permute.xlu1 %1145  ;;  %416 = vst.msk [vmem:[#allocation5 + $0x38] sm:$0xff] %vm408_vm6, %v19393_v4  ;;  %417 = vst.msk [vmem:[#allocation5 + $0x240] sm:$0xff] %vm408_vm6, %v19393_v4 }
  0x97   : > { %v12050_v38 = vpop.permute.xlu0 %1135  ;;  %3466 = vrot.lane.b32.xlu1 %v3455_v46, %s11415_s30  ;;  %418 = vst.msk [vmem:[#allocation5 + $0x248] sm:$0xff] %vm408_vm6, %v19393_v4  ;;  %419 = vst.msk [vmem:[#allocation5 + $0x250] sm:$0xff] %vm408_vm6, %v19393_v4 }
  0x98   : > { %3468 = vrot.lane.b32.xlu0 %v3463_v44, %s11415_s30  ;;  %9825 = vset.pattern.permute.xlu1 %v11416_v10  ;;  %420 = vst.msk [vmem:[#allocation5 + $0x258] sm:$0xff] %vm408_vm6, %v19393_v4  ;;  %421 = vst.msk [vmem:[#allocation5 + $0x260] sm:$0xff] %vm408_vm6, %v19393_v4 }
  0x99   : > { %9826 = vset.pattern.permute.xlu0 %v11416_v10 }
  0x9a   : > { %v12075_v44 = vpop.permute.xlu1 %1155 }
  0x9b   : > { %v12077_v62 = vpop.permute.xlu0 %1150  ;;  %9660 = vmatmul.mubr.msk.bf16.gmra.mxu0 %vm735_vm3, %v11143_v2  ;;  %4154 = vperm.xlu1 %9825, %v11538_v1  }
  0x9c   : > { %4158 = vperm.xlu0 %9826, %v11557_v9  }
  0x9e   : > { %v12082_v3 = vpop.permute.xlu1 %1165 }
  0x9f   : > { %v12084_v32 = vpop.permute.xlu0 %1160  ;;  %4162 = vperm.xlu1 %9825, %v11533_v0  }
  0xa0   : > { %4170 = vperm.xlu0 %9826, %v11583_v12  }
  0xa2   : > { %v12088_v4 = vpop.permute.xlu1 %1175 }
  0xa3   : > { %v12090_v56 = vpop.permute.xlu0 %1170  ;;  %4166 = vperm.xlu1 %9825, %v11551_v7  }
  0xa4   : > { %4178 = vperm.xlu0 %9826, %v11604_v17  }
  0xa6   : > { %v12094_v15 = vpop.permute.xlu1 %1185 }
  0xa7   : > { %v12096_v1 = vpop.permute.xlu0 %1180  ;;  %4174 = vperm.xlu1 %9825, %v11578_v11  }
  0xa8   : > { %4186 = vperm.xlu0 %9826, %v11619_v19  }
  0xaa   : > { %v12100_v9 = vpop.permute.xlu1 %1195 }
  0xab   : > { %v12102_v0 = vpop.permute.xlu0 %1190  ;;  %4182 = vperm.xlu1 %9825, %v11594_v14  }
  0xac   : > { %4194 = vperm.xlu0 %9826, %v11633_v23  }
  0xae   : > { %v12106_v12 = vpop.permute.xlu1 %1205 }
  0xaf   : > { %v12108_v7 = vpop.permute.xlu0 %1200  ;;  %4190 = vperm.xlu1 %9825, %v11613_v18  }
  0xb0   : > { %4202 = vperm.xlu0 %9826, %v11647_v25  }
  0xb2   : > { %v12112_v17 = vpop.permute.xlu1 %1215 }
  0xb3   : > { %v12114_v11 = vpop.permute.xlu0 %1210  ;;  %4198 = vperm.xlu1 %9825, %v11627_v21  }
  0xb4   : > { %4210 = vperm.xlu0 %9826, %v11661_v29  }
  0xb6   : > { %v12118_v19 = vpop.permute.xlu1 %1225 }
  0xb7   : > { %v12120_v14 = vpop.permute.xlu0 %1220  ;;  %4206 = vperm.xlu1 %9825, %v11641_v24  }
  0xb8   : > { %4218 = vperm.xlu0 %9826, %v11675_v31  }
  0xba   : > { %v12124_v23 = vpop.permute.xlu1 %1235 }
  0xbb   : > { %v12126_v18 = vpop.permute.xlu0 %1230  ;;  %4214 = vperm.xlu1 %9825, %v11655_v27  }
  0xbc   : > { %4226 = vperm.xlu0 %9826, %v11689_v35  }
  0xbe   : > { %v12130_v25 = vpop.permute.xlu1 %1245 }
  0xbf   : > { %v12132_v21 = vpop.permute.xlu0 %1240  ;;  %4222 = vperm.xlu1 %9825, %v11669_v30  }
  0xc0   : > { %4234 = vperm.xlu0 %9826, %v11703_v37  }
  0xc2   : > { %v12136_v29 = vpop.permute.xlu1 %1255 }
  0xc3   : > { %v12138_v24 = vpop.permute.xlu0 %1250  ;;  %4230 = vperm.xlu1 %9825, %v11682_v33   ;;  %v11144_v33 = vld [vmem:[%s19191_s4 + $0x38] sm:$0xff]  }
  0xc4   : > { %4242 = vperm.xlu0 %9826, %v11717_v41   ;;  %3801 = vmatpush1.bf16.msra.mxu0 %v11144_v33  ;;  %v19397_v41 = vmov 0  }
  0xc5   : > { %9753 = vmatpush1.bf16.msra.mxu1 %v11144_v33  ;;  %3802 = vmatprep.subr.bf16.mxu0 %v19397_v41 }
  0xc6   : > { %v12142_v31 = vpop.permute.xlu1 %1265  ;;  %9738 = vmatprep.subr.bf16.mxu1 %v19397_v41 }
  0xc7   : > { %v12144_v27 = vpop.permute.xlu0 %1260  ;;  %4238 = vperm.xlu1 %9825, %v11697_v36  }
  0xc8   : > { %4250 = vperm.xlu0 %9826, %v11731_v43  }
  0xca   : > { %v12148_v35 = vpop.permute.xlu1 %1275 }
  0xcb   : > { %19394 = vst [vmem:[#allocation24_spill] sm:$0xff] %v12148_v35  ;;  %v12150_v30 = vpop.permute.xlu0 %1270  ;;  %4246 = vperm.xlu1 %9825, %v11711_v39   ;;  %v12377_v35 = vld [vmem:[#allocation5 + $0x259] sm:$0xff] }
  0xcc   : > { %19395 = vst [vmem:[#allocation25_spill] sm:$0xff] %v12150_v30  ;;  %4258 = vperm.xlu0 %9826, %v11745_v47   ;;  %19428 = vst [vmem:[#allocation55_spill] sm:$0xff] %v12377_v35 }
  0xce   : > { %v12157_v37 = vpop.permute.xlu1 %1285 }
  0xcf   : > { %19396 = vst [vmem:[#allocation26_spill] sm:$0xff] %v12157_v37  ;;  %v12161_v36 = vpop.permute.xlu0 %1280  ;;  %4254 = vperm.xlu1 %9825, %v11725_v42   ;;  %v11148_v42 = vld [vmem:[%s19191_s4 + $0x30] sm:$0xff]  }
  0xd0   : > { %19398 = vst [vmem:[#allocation27_spill] sm:$0xff] %v12161_v36  ;;  %4266 = vperm.xlu0 %9826, %v11759_v49   ;;  %3803 = vmatpush1.bf16.msra.mxu0 %v11148_v42 }
  0xd1   : > { %3804 = vmatprep.subr.bf16.mxu0 %v19397_v41  ;;  %9754 = vmatpush1.bf16.msra.mxu1 %v11148_v42 }
  0xd2   : > { %v12165_v39 = vpop.permute.xlu1 %1295  ;;  %9739 = vmatprep.subr.bf16.mxu1 %v19397_v41 }
  0xd3   : > { %19399 = vst [vmem:[#allocation28_spill] sm:$0xff] %v12165_v39  ;;  %v12167_v43 = vpop.permute.xlu0 %1290  ;;  %4262 = vperm.xlu1 %9825, %v11738_v45   ;;  %v12360_v39 = vld [vmem:[#allocation5 + $0x249] sm:$0xff] }
  0xd4   : > { %19400 = vst [vmem:[#allocation29_spill] sm:$0xff] %v12167_v43  ;;  %4274 = vperm.xlu0 %9826, %v11771_v52   ;;  %19423 = vst [vmem:[#allocation50_spill] sm:$0xff] %v12360_v39  ;;  %v19438_v39 = vld [vmem:[#allocation12_spill] sm:$0xff] }
  0xd6   : > { %v12171_v47 = vpop.permute.xlu1 %1305 }
  0xd7   : > { %19401 = vst [vmem:[#allocation30_spill] sm:$0xff] %v12171_v47  ;;  %v12173_v46 = vpop.permute.xlu0 %1300  ;;  %4270 = vperm.xlu1 %9825, %v11753_v48  }
  0xd8   : > { %19402 = vst [vmem:[#allocation31_spill] sm:$0xff] %v12173_v46  ;;  %4282 = vperm.xlu0 %9826, %v11785_v55   ;;  %v12373_v46 = vld [vmem:[#allocation5 + $0x258] sm:$0xff] }
  0xd9   : > { %19426 = vst [vmem:[#allocation53_spill] sm:$0xff] %v12373_v46 }
  0xda   : > { %v12177_v2 = vpop.permute.xlu1 %1315 }
  0xdb   : > { %19403 = vst [vmem:[#allocation32_spill] sm:$0xff] %v12177_v2  ;;  %v12182_v49 = vpop.permute.xlu0 %1310  ;;  %4278 = vperm.xlu1 %9825, %v11765_v51   ;;  %v12197_v51 = vld [vmem:[%s19190_s3] ss:$0 sm:$0xff] }
  0xdc   : > { %19404 = vst [vmem:[#allocation33_spill] sm:$0xff] %v12182_v49  ;;  %4290 = vperm.xlu0 %9826, %v11800_v59   ;;  %v12350_v49 = vld [vmem:[#allocation5 + $0x241] sm:$0xff] }
  0xde   : > { %v12187_v45 = vpop.permute.xlu1 %1325 }
  0xdf   : > { %19405 = vst [vmem:[#allocation34_spill] sm:$0xff] %v12187_v45  ;;  %v12190_v48 = vpop.permute.xlu0 %1320  ;;  %4286 = vperm.xlu1 %9825, %v11778_v54   ;;  %v12334_v45 = vld [vmem:[#allocation5 + $0x240] sm:$0xff] }
  0xe0   : > { %19406 = vst [vmem:[#allocation35_spill] sm:$0xff] %v12190_v48  ;;  %4298 = vperm.xlu0 %9826, %v11813_v61  }
  0xe2   : > { %v12199_v52 = vpop.permute.xlu1 %1335 }
  0xe3   : > { %19407 = vst [vmem:[#allocation36_spill] sm:$0xff] %v12199_v52  ;;  %v12201_v55 = vpop.permute.xlu0 %1330  ;;  %v9601_v59 = vpop.f32.mrf.mxu0  ;;  %4294 = vperm.xlu1 %9825, %v11793_v57  }
  0xe4   : > { %19408 = vst [vmem:[#allocation37_spill] sm:$0xff] %v12201_v55  ;;  %v882_v10 = vadd.f32 %v9601_v59, %v12197_v51  ;;  %4306 = vperm.xlu0 %9826, %v11865_v5  }
  0xe5   : > { %v873_v33 = vpop.f32.mrf.mxu0 }
  0xe6   : > { %v12207_v54 = vmul.f32 %v12038_v50, %v882_v10  ;;  %v874_v61 = vadd.f32 %v12197_v51, %v873_v33  ;;  %v12210_v42 = vpop.permute.xlu1 %1345 }
  0xe7   : > { %19409 = vst [vmem:[#allocation38_spill] sm:$0xff] %v12210_v42  ;;  %v12212_v2 = vpop.permute.xlu0 %1340  ;;  %v9602_v52 = vpop.f32.mrf.mxu0  ;;  %4302 = vperm.xlu1 %9825, %v11806_v60  }
  0xe8   : > { %19410 = vst [vmem:[#allocation39_spill] sm:$0xff] %v12212_v2  ;;  %1514 = vst.msk [vmem:[#allocation2 + $0x50] sm:$0xff] %vm358_vm4, %v12207_v54  ;;  %v12218_v57 = vmul.f32 %v12040_v26, %v874_v61  ;;  %v885_v5 = vadd.f32 %v9602_v52, %v12197_v51  ;;  %4314 = vperm.xlu0 %9826, %v11879_v8   ;;  %v11151_v8 = vld [vmem:[%s19191_s4 + $0x28] sm:$0xff]  }
  0xe9   : > { %v876_v50 = vpop.f32.mrf.mxu0  ;;  %3805 = vmatpush1.bf16.msra.mxu0 %v11151_v8  ;;  %9755 = vmatpush1.bf16.msra.mxu1 %v11151_v8 }
  0xea   : > { %1512 = vst.msk [vmem:[#allocation2 + $0x40] sm:$0xff] %vm358_vm4, %v12218_v57  ;;  %v12225_v59 = vmul.f32 %v12048_v58, %v885_v5  ;;  %v877_v10 = vadd.f32 %v12197_v51, %v876_v50  ;;  %v12228_v60 = vpop.permute.xlu1 %1355  ;;  %3806 = vmatprep.subr.bf16.mxu0 %v19397_v41  ;;  %9740 = vmatprep.subr.bf16.mxu1 %v19397_v41 }
  0xeb   : > { %19411 = vst [vmem:[#allocation40_spill] sm:$0xff] %v12228_v60  ;;  %v12230_v33 = vpop.permute.xlu0 %1350  ;;  %v9605_v42 = vpop.f32.mrf.mxu0  ;;  %4310 = vperm.xlu1 %9825, %v11823_v63   ;;  %v12309_v60 = vld [vmem:[#allocation5 + $0x29] sm:$0xff] }
  0xec   : > { %19412 = vst [vmem:[#allocation41_spill] sm:$0xff] %v12230_v33  ;;  %1515 = vst.msk [vmem:[#allocation2 + $0x58] sm:$0xff] %vm358_vm4, %v12225_v59  ;;  %v12239_v26 = vmul.f32 %v12050_v38, %v877_v10  ;;  %v898_v58 = vadd.f32 %v9605_v42, %v12197_v51  ;;  %4322 = vperm.xlu0 %9826, %v11893_v16  }
  0xed   : > { %v889_v52 = vpop.f32.mrf.mxu0 }
  0xee   : > { %1513 = vst.msk [vmem:[#allocation2 + $0x48] sm:$0xff] %vm358_vm4, %v12239_v26  ;;  %v12246_v63 = vmul.f32 %v12084_v32, %v898_v58  ;;  %v890_v61 = vadd.f32 %v12197_v51, %v889_v52  ;;  %v12249_v5 = vpop.permute.xlu1 %1365 }
  0xef   : > { %19413 = vst [vmem:[#allocation42_spill] sm:$0xff] %v12249_v5  ;;  %v12252_v38 = vpop.permute.xlu0 %1360  ;;  %v9606_v42 = vpop.f32.mrf.mxu0  ;;  %4318 = vperm.xlu1 %9825, %v11873_v6  }
  0xf0   : > { %19414 = vst [vmem:[#allocation43_spill] sm:$0xff] %v12252_v38  ;;  %1518 = vst.msk [vmem:[#allocation2 + $0x70] sm:$0xff] %vm358_vm4, %v12246_v63  ;;  %v12259_v16 = vmul.f32 %v12077_v62, %v890_v61  ;;  %v901_v32 = vadd.f32 %v9606_v42, %v12197_v51  ;;  %4330 = vperm.xlu0 %9826, %v11907_v22   ;;  %v1576_v42 = vld [vmem:[#allocation2] sm:$0xff] }
  0xf1   : > { %v892_v50 = vpop.f32.mrf.mxu0 }
  0xf2   : > { %1516 = vst.msk [vmem:[#allocation2 + $0x60] sm:$0xff] %vm358_vm4, %v12259_v16  ;;  %v12266_v10 = vmul.f32 %v12082_v3, %v901_v32  ;;  %v893_v6 = vadd.f32 %v12197_v51, %v892_v50  ;;  %v12269_v8 = vpop.permute.xlu1 %1375  ;;  %v1578_v3 = vld [vmem:[#allocation2 + $0x10] sm:$0xff] }
  0xf3   : > { %19415 = vst [vmem:[#allocation44_spill] sm:$0xff] %v12269_v8  ;;  %v12271_v58 = vpop.permute.xlu0 %1370  ;;  %v9609_v52 = vpop.f32.mrf.mxu0  ;;  %4326 = vperm.xlu1 %9825, %v11887_v13   ;;  %v1579_v8 = vld [vmem:[#allocation2 + $0x18] sm:$0xff] }
  0xf4   : > { %19416 = vst [vmem:[#allocation45_spill] sm:$0xff] %v12271_v58  ;;  %1519 = vst.msk [vmem:[#allocation2 + $0x78] sm:$0xff] %vm358_vm4, %v12266_v10  ;;  %v12277_v22 = vmul.f32 %v12075_v44, %v893_v6  ;;  %v914_v62 = vadd.f32 %v9609_v52, %v12197_v51  ;;  %4338 = vperm.xlu0 %9826, %v11921_v34   ;;  %v1582_v44 = vld [vmem:[#allocation2 + $0x30] sm:$0xff]  ;;  %v1642_v34 = vadd.f32 %v1578_v3, %v12207_v54  ;;  %v12293_v58 = vld [vmem:[#allocation2 + $0x20] sm:$0xff] }
  0xf5   : > { %v905_v61 = vpop.f32.mrf.mxu0  ;;  %v12307_v3 = vld [vmem:[#allocation5 + $0x21] sm:$0xff]  ;;  %v1643_v5 = vadd.f32 %v1579_v8, %v12225_v59  ;;  %v19421_v8 = vld [vmem:[#allocation11_spill] sm:$0xff] }
  0xf6   : > { %1517 = vst.msk [vmem:[#allocation2 + $0x68] sm:$0xff] %vm358_vm4, %v12277_v22  ;;  %v12284_v32 = vmul.f32 %v12096_v1, %v914_v62  ;;  %v906_v13 = vadd.f32 %v12197_v51, %v905_v61  ;;  %v12287_v50 = vpop.permute.xlu1 %1385  ;;  %v12302_v61 = vld [vmem:[#allocation5 + $0x20] sm:$0xff]  ;;  %19422 = vst [vmem:[#allocation11_spill] sm:$0xff] %v12350_v49 }
  0xf7   : > { %19417 = vst [vmem:[#allocation46_spill] sm:$0xff] %v12287_v50  ;;  %v12289_v6 = vpop.permute.xlu0 %1380  ;;  %v9610_v52 = vpop.f32.mrf.mxu0  ;;  %4334 = vperm.xlu1 %9825, %v11901_v20   ;;  %v12304_v50 = vld [vmem:[#allocation5 + $0x28] sm:$0xff]  ;;  %v1640_v20 = vadd.f32 %v1576_v42, %v12218_v57  ;;  %v12323_v57 = vld [vmem:[#allocation5 + $0x30] sm:$0xff]  ;;  %v12325_v42 = vld [vmem:[#allocation5 + $0x38] sm:$0xff] }
  0xf8   : > { %19418 = vst [vmem:[#allocation47_spill] sm:$0xff] %v12289_v6  ;;  %1522 = vst.msk [vmem:[#allocation2 + $0x90] sm:$0xff] %vm358_vm4, %v12284_v32  ;;  %v12298_v1 = vmul.f32 %v12090_v56, %v906_v13  ;;  %v917_v62 = vadd.f32 %v9610_v52, %v12197_v51  ;;  %4346 = vperm.xlu0 %9826, %v11935_v40   ;;  %v1577_v6 = vld [vmem:[#allocation2 + $0x8] sm:$0xff]  ;;  %v11154_v56 = vld [vmem:[%s19191_s4 + $0x20] sm:$0xff]  }
  0xf9   : > { %v908_v54 = vpop.f32.mrf.mxu0  ;;  %v12314_v13 = vld [vmem:[#allocation2 + $0x38] sm:$0xff]  ;;  %v12328_v33 = vld [vmem:[#allocation2 + $0x70] sm:$0xff]  ;;  %3807 = vmatpush1.bf16.msra.mxu0 %v11154_v56  ;;  %v12353_v48 = vld [vmem:[#allocation2 + $0x60] sm:$0xff]  ;;  %9756 = vmatpush1.bf16.msra.mxu1 %v11154_v56  ;;  %v1641_v47 = vadd.f32 %v1577_v6, %v12239_v26  ;;  %v1646_v56 = vadd.f32 %v1582_v44, %v12246_v63 }
  0xfa   : > { %1520 = vst.msk [vmem:[#allocation2 + $0x80] sm:$0xff] %vm358_vm4, %v12298_v1  ;;  %v12319_v40 = vmul.f32 %v12094_v15, %v917_v62  ;;  %v12321_v52 = vpop.permute.xlu1 %1395  ;;  %v909_v38 = vadd.f32 %v12197_v51, %v908_v54  ;;  %v12336_v15 = vld [vmem:[#allocation5 + $0x248] sm:$0xff]  ;;  %v1710_v62 = vadd.f32 %v1642_v34, %v1582_v44  ;;  %v1708_v34 = vadd.f32 %v1640_v20, %v12293_v58  ;;  %v12375_v54 = vld [vmem:[#allocation5 + $0x251] sm:$0xff] }
  0xfb   : > { %19419 = vst [vmem:[#allocation48_spill] sm:$0xff] %v12321_v52  ;;  %v12331_v55 = vpop.permute.xlu0 %1390  ;;  %v9613_v2 = vpop.f32.mrf.mxu0  ;;  %4342 = vperm.xlu1 %9825, %v11915_v28   ;;  %v12346_v28 = vld [vmem:[#allocation5 + $0x24f] sm:$0xff]  ;;  %3808 = vmatprep.subr.bf16.mxu0 %v19397_v41  ;;  %19427 = vst [vmem:[#allocation54_spill] sm:$0xff] %v12375_v54  ;;  %v1711_v26 = vadd.f32 %v1643_v5, %v12314_v13  ;;  %v1644_v5 = vadd.f32 %v12293_v58, %v12259_v16 }
  0xfc   : > { %19420 = vst [vmem:[#allocation49_spill] sm:$0xff] %v12331_v55  ;;  %1523 = vst.msk [vmem:[#allocation2 + $0x98] sm:$0xff] %vm358_vm4, %v12319_v40  ;;  %v930_v59 = vadd.f32 %v9613_v2, %v12197_v51  ;;  %4354 = vperm.xlu0 %9826, %v19421_v8   ;;  %v12348_v55 = vld [vmem:[#allocation5 + $0x257] sm:$0xff]  ;;  %v12356_v2 = vmul.f32 %v12088_v4, %v909_v38  ;;  %v1782_v20 = vadd.f32 %v1710_v62, %v12328_v33  ;;  %v1581_v6 = vld [vmem:[#allocation2 + $0x28] sm:$0xff] }
  0xfd   : > { %v921_v8 = vpop.f32.mrf.mxu0  ;;  %v12362_v52 = vld [vmem:[#allocation5 + $0x250] sm:$0xff]  ;;  %9741 = vmatprep.subr.bf16.mxu1 %v19397_v41  ;;  %v1780_v30 = vadd.f32 %v1708_v34, %v12353_v48  ;;  %v12424_v16 = vld [vmem:[#allocation2 + $0x68] sm:$0xff]  ;;  %v1645_v34 = vadd.f32 %v1581_v6, %v12277_v22  ;;  %v1587_v22 = vld [vmem:[#allocation2 + $0x58] sm:$0xff] }
  0xfe   : > { %19424 = vst [vmem:[#allocation51_spill] sm:$0xff] %v12362_v52  ;;  %v12368_v43 = vmul.f32 %v12108_v7, %v930_v59  ;;  %v922_v4 = vadd.f32 %v12197_v51, %v921_v8  ;;  %v12371_v38 = vpop.permute.xlu1 %1405  ;;  %v12384_v7 = vld [vmem:[#allocation2 + $0x78] sm:$0xff]  ;;  %1521 = vst.msk [vmem:[#allocation2 + $0x88] sm:$0xff] %vm358_vm4, %v12356_v2  ;;  %v19434_v52 = vld [vmem:[#allocation10_spill] sm:$0xff] }
  0xff   : > { %19425 = vst [vmem:[#allocation52_spill] sm:$0xff] %v12371_v38  ;;  %v12382_v62 = vld [vmem:[#allocation2 + $0x90] sm:$0xff]  ;;  %v12388_v59 = vpop.permute.xlu0 %1400  ;;  %v9614_v8 = vpop.f32.mrf.mxu0  ;;  %v19430_v38 = vld [vmem:[#allocation9_spill] sm:$0xff] }
 0x100   : > { %19429 = vst [vmem:[#allocation56_spill] sm:$0xff] %v12388_v59  ;;  %4350 = vperm.xlu1 %9825, %v19430_v38   ;;  %v12398_v44 = vadd.f32 %v1782_v20, %v12382_v62  ;;  %1526 = vst.msk [vmem:[#allocation2 + $0xb0] sm:$0xff] %vm358_vm4, %v12368_v43  ;;  %v12404_v59 = vmul.f32 %v12102_v0, %v922_v4  ;;  %v19431_v38 = vld [vmem:[#allocation13_spill] sm:$0xff]  ;;  %v933_v63 = vadd.f32 %v9614_v8, %v12197_v51  ;;  %v1586_v4 = vld [vmem:[#allocation2 + $0x50] sm:$0xff] }
 0x101   : > { %4362 = vperm.xlu0 %9826, %v19431_v38   ;;  %v12407_v37 = vld [vmem:[#allocation2 + $0x80] sm:$0xff]  ;;  %v924_v36 = vpop.f32.mrf.mxu0  ;;  %v1647_v0 = vadd.f32 %v12314_v13, %v12266_v10  ;;  %v1709_v20 = vadd.f32 %v1641_v47, %v1581_v6  ;;  %v1783_v38 = vadd.f32 %v1711_v26, %v12384_v7  ;;  %v1650_v47 = vadd.f32 %v1586_v4, %v12284_v32 }
 0x102   : > { %1914 = vst.msk [vmem:[#allocation3 + $0x50] sm:$0xff] %vm358_vm4, %v12398_v44  ;;  %v12421_v8 = vadd.f32 %v1780_v30, %v12407_v37  ;;  %1524 = vst.msk [vmem:[#allocation2 + $0xa0] sm:$0xff] %vm358_vm4, %v12404_v59  ;;  %v12428_v58 = vpop.permute.xlu1 %1415  ;;  %v1584_v10 = vld [vmem:[#allocation2 + $0x40] sm:$0xff]  ;;  %v1463_v54 = vmul.f32 %v12106_v12, %v933_v63  ;;  %v925_v30 = vadd.f32 %v12197_v51, %v924_v36  ;;  %v1585_v63 = vld [vmem:[#allocation2 + $0x48] sm:$0xff] }
 0x103   : > { %19432 = vst [vmem:[#allocation9_spill] sm:$0xff] %v12428_v58  ;;  %v12432_v13 = vld [vmem:[#allocation2 + $0x98] sm:$0xff]  ;;  %v12436_v35 = vpop.permute.xlu0 %1410  ;;  %v9617_v26 = vpop.f32.mrf.mxu0  ;;  %v1714_v46 = vadd.f32 %v1646_v56, %v1586_v4  ;;  %v1712_v49 = vadd.f32 %v1644_v5, %v1584_v10  ;;  %v1648_v12 = vadd.f32 %v1584_v10, %v12298_v1  ;;  %v1651_v36 = vadd.f32 %v1587_v22, %v12319_v40 }
 0x104   : > { %19433 = vst [vmem:[#allocation13_spill] sm:$0xff] %v12436_v35  ;;  %4358 = vperm.xlu1 %9825, %v19434_v52   ;;  %1912 = vst.msk [vmem:[#allocation3 + $0x40] sm:$0xff] %vm358_vm4, %v12421_v8  ;;  %v12442_v32 = vadd.f32 %v1783_v38, %v12432_v13  ;;  %v946_v6 = vadd.f32 %v9617_v26, %v12197_v51  ;;  %v19435_v58 = vld [vmem:[#allocation15_spill] sm:$0xff]  ;;  %v1781_v52 = vadd.f32 %v1709_v20, %v12424_v16 }
 0x105   : > { %4370 = vperm.xlu0 %9826, %v19435_v58   ;;  %1527 = vst.msk [vmem:[#allocation2 + $0xb8] sm:$0xff] %vm358_vm4, %v1463_v54  ;;  %v1461_v56 = vmul.f32 %v12100_v9, %v925_v30  ;;  %v937_v5 = vpop.f32.mrf.mxu0  ;;  %v1786_v4 = vadd.f32 %v1714_v46, %v12382_v62  ;;  %v12454_v38 = vld [vmem:[#allocation2 + $0x88] sm:$0xff]  ;;  %v1649_v58 = vadd.f32 %v1585_v63, %v12356_v2 }
 0x106   : > { %1915 = vst.msk [vmem:[#allocation3 + $0x58] sm:$0xff] %vm358_vm4, %v12442_v32  ;;  %v1466_v1 = vmul.f32 %v12120_v14, %v946_v6  ;;  %v938_v40 = vadd.f32 %v12197_v51, %v937_v5  ;;  %v12459_v10 = vpop.permute.xlu1 %1425  ;;  %v1718_v20 = vadd.f32 %v1650_v47, %v12328_v33  ;;  %v1715_v26 = vadd.f32 %v1647_v0, %v1587_v22  ;;  %v11157_v14 = vld [vmem:[%s19191_s4 + $0x18] sm:$0xff]   ;;  %v19439_v6 = vld [vmem:[#allocation17_spill] sm:$0xff] }
 0x107   : > { %19436 = vst [vmem:[#allocation10_spill] sm:$0xff] %v12459_v10  ;;  %v1713_v9 = vadd.f32 %v1645_v34, %v1585_v63  ;;  %v12463_v30 = vadd.f32 %v1781_v52, %v12454_v38  ;;  %1525 = vst.msk [vmem:[#allocation2 + $0xa8] sm:$0xff] %vm358_vm4, %v1461_v56  ;;  %v12466_v46 = vld [vmem:[#allocation2 + $0xb0] sm:$0xff]  ;;  %v12468_v35 = vpop.permute.xlu0 %1420  ;;  %v9618_v2 = vpop.f32.mrf.mxu0  ;;  %v1784_v47 = vadd.f32 %v1712_v49, %v12407_v37  ;;  %3809 = vmatpush1.bf16.msra.mxu0 %v11157_v14 }
 0x108   : > { %19437 = vst [vmem:[#allocation15_spill] sm:$0xff] %v12468_v35  ;;  %4366 = vperm.xlu1 %9825, %v19438_v39   ;;  %v1654_v34 = vadd.f32 %v12328_v33, %v12368_v43  ;;  %1530 = vst.msk [vmem:[#allocation2 + $0xd0] sm:$0xff] %vm358_vm4, %v1466_v1  ;;  %v12479_v0 = vadd.f32 %v1786_v4, %v12466_v46  ;;  %v1464_v22 = vmul.f32 %v12114_v11, %v938_v40 }
 0x109   : > { %4378 = vperm.xlu0 %9826, %v19439_v6   ;;  %v12484_v39 = vadd.f32 %v1648_v12, %v12353_v48  ;;  %v12487_v63 = vadd.f32 %v1651_v36, %v12384_v7  ;;  %1913 = vst.msk [vmem:[#allocation3 + $0x48] sm:$0xff] %vm358_vm4, %v12463_v30  ;;  %v12491_v49 = vld [vmem:[#allocation2 + $0xa0] sm:$0xff]  ;;  %v949_v43 = vadd.f32 %v9618_v2, %v12197_v51  ;;  %v940_v33 = vpop.f32.mrf.mxu0  ;;  %v19442_v2 = vld [vmem:[#allocation14_spill] sm:$0xff] }
 0x10a   : > { %9757 = vmatpush1.bf16.msra.mxu1 %v11157_v14  ;;  %v1787_v11 = vadd.f32 %v1715_v26, %v12432_v13  ;;  %v12496_v52 = vadd.f32 %v1649_v58, %v12424_v16  ;;  %v1652_v12 = vadd.f32 %v12353_v48, %v12404_v59  ;;  %1918 = vst.msk [vmem:[#allocation3 + $0x70] sm:$0xff] %vm358_vm4, %v12479_v0  ;;  %1528 = vst.msk [vmem:[#allocation2 + $0xc0] sm:$0xff] %vm358_vm4, %v1464_v22  ;;  %v12506_v5 = vpop.permute.xlu1 %1435 }
 0x10b   : > { %v12504_v36 = vadd.f32 %v1784_v47, %v12491_v49  ;;  %19440 = vst [vmem:[#allocation12_spill] sm:$0xff] %v12506_v5  ;;  %3810 = vmatprep.subr.bf16.mxu0 %v19397_v41  ;;  %v1976_v4 = vld [vmem:[#allocation3 + $0x3e] sm:$0xff]  ;;  %v1655_v40 = vadd.f32 %v12384_v7, %v1463_v54  ;;  %v1467_v58 = vmul.f32 %v12118_v19, %v949_v43  ;;  %v12512_v48 = vpop.permute.xlu0 %1430  ;;  %v9621_v59 = vpop.f32.mrf.mxu0  ;;  %v19443_v7 = vld [vmem:[#allocation19_spill] sm:$0xff] }
 0x10c   : > { %v941_v26 = vadd.f32 %v12197_v51, %v940_v33  ;;  %19441 = vst [vmem:[#allocation17_spill] sm:$0xff] %v12512_v48  ;;  %4374 = vperm.xlu1 %9825, %v19442_v2   ;;  %9742 = vmatprep.subr.bf16.mxu1 %v19397_v41  ;;  %v12517_v14 = vadd.f32 %v1654_v34, %v12382_v62  ;;  %v12523_v19 = vld [vmem:[#allocation2 + $0xb8] sm:$0xff] }
 0x10d   : > { %v1653_v47 = vadd.f32 %v12424_v16, %v1461_v56  ;;  %v1658_v6 = vadd.f32 %v12382_v62, %v1466_v1  ;;  %1916 = vst.msk [vmem:[#allocation3 + $0x60] sm:$0xff] %vm358_vm4, %v12504_v36  ;;  %v962_v54 = vadd.f32 %v9621_v59, %v12197_v51  ;;  %4386 = vperm.xlu0 %9826, %v19443_v7   ;;  %v1979_v33 = vld [vmem:[#allocation3 + $0x56] sm:$0xff]  ;;  %1531 = vst.msk [vmem:[#allocation2 + $0xd8] sm:$0xff] %vm358_vm4, %v1467_v58  ;;  %v953_v56 = vpop.f32.mrf.mxu0 }
 0x10e   : > { %v2040_v43 = vadd.f32 %v1976_v4, %v12421_v8  ;;  %v1785_v2 = vadd.f32 %v1713_v9, %v12454_v38  ;;  %v12531_v16 = vadd.f32 %v1787_v11, %v12523_v19  ;;  %v1465_v62 = vmul.f32 %v12112_v17, %v941_v26  ;;  %v12536_v59 = vld [vmem:[#allocation2 + $0xa8] sm:$0xff]  ;;  %v12540_v4 = vpop.permute.xlu1 %1445 }
 0x10f   : > { %v1790_v1 = vadd.f32 %v1718_v20, %v12466_v46  ;;  %v1656_v34 = vadd.f32 %v12407_v37, %v1464_v22  ;;  %v1470_v7 = vmul.f32 %v12132_v21, %v962_v54  ;;  %v954_v8 = vadd.f32 %v12197_v51, %v953_v56  ;;  %19444 = vst [vmem:[#allocation14_spill] sm:$0xff] %v12540_v4  ;;  %v12555_v21 = vld [vmem:[#allocation2 + $0xd0] sm:$0xff]  ;;  %v12557_v22 = vpop.permute.xlu0 %1440  ;;  %v9622_v26 = vpop.f32.mrf.mxu0 }
 0x110   : > { %v12543_v9 = vadd.f32 %v1652_v12, %v12407_v37  ;;  %v12546_v11 = vadd.f32 %v1655_v40, %v12432_v13  ;;  %v1659_v17 = vadd.f32 %v12432_v13, %v1467_v58  ;;  %1919 = vst.msk [vmem:[#allocation3 + $0x78] sm:$0xff] %vm358_vm4, %v12531_v16  ;;  %1529 = vst.msk [vmem:[#allocation2 + $0xc8] sm:$0xff] %vm358_vm4, %v1465_v62  ;;  %v19446_v37 = vld [vmem:[#allocation16_spill] sm:$0xff]  ;;  %v1977_v54 = vld [vmem:[#allocation3 + $0x46] sm:$0xff] }
 0x111   : > { %v12553_v20 = vadd.f32 %v1785_v2, %v12536_v59  ;;  %19445 = vst [vmem:[#allocation19_spill] sm:$0xff] %v12557_v22  ;;  %4382 = vperm.xlu1 %9825, %v19446_v37   ;;  %v2104_v12 = vld [vmem:[#allocation3 + $0x3f] sm:$0xff]  ;;  %v2043_v40 = vadd.f32 %v1979_v33, %v12442_v32  ;;  %v12562_v13 = vadd.f32 %v1653_v47, %v12454_v38  ;;  %1534 = vst.msk [vmem:[#allocation2 + $0xf0] sm:$0xff] %vm358_vm4, %v1470_v7  ;;  %v19448_v56 = vld [vmem:[#allocation22_spill] sm:$0xff] }
 0x112   : > { %v12565_v58 = vadd.f32 %v1658_v6, %v12466_v46  ;;  %v12569_v2 = vadd.f32 %v1790_v1, %v12555_v21  ;;  %4394 = vperm.xlu0 %9826, %v19448_v56   ;;  %v2168_v5 = vadd.f32 %v2104_v12, %v2040_v43  ;;  %v1978_v4 = vld [vmem:[#allocation3 + $0x4e] sm:$0xff]  ;;  %v2041_v37 = vadd.f32 %v1977_v54, %v12463_v30  ;;  %v956_v6 = vpop.f32.mrf.mxu0  ;;  %v2232_v48 = vld [vmem:[#allocation3 + $0x41] sm:$0xff]  ;;  %v12589_v54 = vpop.permute.xlu1 %3466 }
 0x113   : > { %v1788_v32 = vadd.f32 %v12484_v39, %v12491_v49  ;;  %1917 = vst.msk [vmem:[#allocation3 + $0x68] sm:$0xff] %vm358_vm4, %v12553_v20  ;;  %v1468_v47 = vmul.f32 %v12126_v18, %v954_v8  ;;  %v2105_v33 = vld [vmem:[#allocation3 + $0x47] sm:$0xff]  ;;  %v12579_v1 = vadd.f32 %v1656_v34, %v12491_v49  ;;  %v1791_v43 = vadd.f32 %v12487_v63, %v12523_v19  ;;  %v2107_v18 = vld [vmem:[#allocation3 + $0x57] sm:$0xff]  ;;  %v12597_v10 = vpop.permute.xlu0 %3468 }
 0x114   : > { %19447 = vst [vmem:[#allocation16_spill] sm:$0xff] %v12569_v2  ;;  %1922 = vst.msk [vmem:[#allocation3 + $0x90] sm:$0xff] %vm358_vm4, %v12569_v2  ;;  %v12585_v30 = vld [vmem:[#allocation2 + $0xc0] sm:$0xff]  ;;  %v965_v39 = vadd.f32 %v9622_v26, %v12197_v51  ;;  %v957_v12 = vadd.f32 %v12197_v51, %v956_v6  ;;  %v2169_v8 = vadd.f32 %v2105_v33, %v2041_v37  ;;  %v9625_v35 = vpop.f32.mrf.mxu0  ;;  %v19451_v26 = vld [vmem:[#allocation18_spill] sm:$0xff] }
 0x115   : > { %19449 = vst [vmem:[#allocation22_spill] sm:$0xff] %v12589_v54  ;;  %v1980_v56 = vld [vmem:[#allocation3 + $0x5e] sm:$0xff]  ;;  %v12592_v34 = vadd.f32 %v1659_v17, %v12523_v19  ;;  %v1657_v22 = vadd.f32 %v12454_v38, %v1465_v62  ;;  %v1662_v63 = vadd.f32 %v12466_v46, %v1470_v7  ;;  %1532 = vst.msk [vmem:[#allocation2 + $0xe0] sm:$0xff] %vm358_vm4, %v1468_v47  ;;  %4390 = vperm.xlu1 %9825, %v19451_v26   ;;  %v2233_v2 = vld [vmem:[#allocation3 + $0x49] sm:$0xff] }
 0x116   : > { %19450 = vst [vmem:[#allocation57_spill] sm:$0xff] %v12597_v10  ;;  %v2171_v6 = vadd.f32 %v2107_v18, %v2043_v40  ;;  %v2042_v54 = vadd.f32 %v1978_v4, %v12398_v44  ;;  %v1789_v37 = vadd.f32 %v12496_v52, %v12536_v59  ;;  %v12604_v17 = vadd.f32 %v1788_v32, %v12585_v30  ;;  %v12606_v38 = vld [vmem:[#allocation2 + $0xd8] sm:$0xff]  ;;  %v969_v40 = vpop.f32.mrf.mxu0  ;;  %v2106_v18 = vld [vmem:[#allocation3 + $0x4f] sm:$0xff] }
 0x117   : > { %4402 = vperm.xlu0 %9826, %v12036_v53   ;;  %v2296_v46 = vadd.f32 %v2232_v48, %v2168_v5  ;;  %v2297_v62 = vadd.f32 %v2233_v2, %v2169_v8  ;;  %v1660_v7 = vadd.f32 %v12491_v49, %v1468_v47  ;;  %v1471_v33 = vmul.f32 %v12130_v25, %v965_v39  ;;  %v2361_v44 = vld [vmem:[#allocation3 + $0x4a] sm:$0xff]  ;;  %v12619_v5 = vpop.permute.xlu1 %4154  ;;  %v2235_v48 = vld [vmem:[#allocation3 + $0x59] sm:$0xff]  ;;  %v2360_v8 = vld [vmem:[#allocation3 + $0x42] sm:$0xff] }
 0x118   : > { %v2044_v4 = vadd.f32 %v1980_v56, %v12504_v36  ;;  %1920 = vst.msk [vmem:[#allocation3 + $0x80] sm:$0xff] %vm358_vm4, %v12604_v17  ;;  %v12615_v52 = vadd.f32 %v1791_v43, %v12606_v38  ;;  %v1469_v32 = vmul.f32 %v12124_v23, %v957_v12  ;;  %v978_v53 = vadd.f32 %v9625_v35, %v12197_v51  ;;  %v1983_v25 = vld [vmem:[#allocation3 + $0x76] sm:$0xff]  ;;  %v12630_v43 = vld [vmem:[#allocation2 + $0xc8] sm:$0xff]  ;;  %v12632_v23 = vpop.permute.xlu0 %4158  ;;  %v9626_v35 = vpop.f32.mrf.mxu0 }
 0x119   : > { %19452 = vst [vmem:[#allocation18_spill] sm:$0xff] %v12619_v5  ;;  %v2425_v49 = vadd.f32 %v2361_v44, %v2297_v62  ;;  %v12622_v2 = vadd.f32 %v1657_v22, %v12536_v59  ;;  %v12625_v36 = vadd.f32 %v1662_v63, %v12555_v21  ;;  %v1794_v47 = vadd.f32 %v12517_v14, %v12555_v21  ;;  %v19454_v39 = vld [vmem:[#allocation20_spill] sm:$0xff] }
 0x11a   : > { %1535 = vst.msk [vmem:[#allocation2 + $0xf8] sm:$0xff] %vm358_vm4, %v1471_v33  ;;  %19453 = vst [vmem:[#allocation58_spill] sm:$0xff] %v12632_v23  ;;  %4398 = vperm.xlu1 %9825, %v19454_v39   ;;  %v12635_v12 = vadd.f32 %v2106_v18, %v2042_v54  ;;  %v1981_v22 = vld [vmem:[#allocation3 + $0x66] sm:$0xff]  ;;  %v12641_v14 = vadd.f32 %v1789_v37, %v12630_v43  ;;  %v1474_v56 = vmul.f32 %v12144_v27, %v978_v53  ;;  %v1982_v44 = vld [vmem:[#allocation3 + $0x6e] sm:$0xff] }
 0x11b   : > { %1923 = vst.msk [vmem:[#allocation3 + $0x98] sm:$0xff] %vm358_vm4, %v12615_v52  ;;  %1533 = vst.msk [vmem:[#allocation2 + $0xe8] sm:$0xff] %vm358_vm4, %v1469_v32  ;;  %v970_v63 = vadd.f32 %v12197_v51, %v969_v40  ;;  %v19455_v54 = vpack.i.bf16 %v12304_v50, %v12302_v61  ;;  %v12649_v26 = vadd.f32 %v2360_v8, %v2296_v46  ;;  %v12651_v62 = vmul.f32 0.04, %v2425_v49  ;;  %v2108_v18 = vld [vmem:[#allocation3 + $0x5f] sm:$0xff]  ;;  %v12656_v27 = vld [vmem:[#allocation2 + $0xf0] sm:$0xff]  ;;  %v972_v40 = vpop.f32.mrf.mxu0 }
 0x11c   : > { %v2045_v39 = vadd.f32 %v1981_v22, %v12553_v20  ;;  %v1792_v37 = vadd.f32 %v12543_v9, %v12585_v30  ;;  %v2172_v53 = vadd.f32 %v2108_v18, %v2044_v4  ;;  %v12658_v10 = vadd.f32 %v2235_v48, %v2171_v6  ;;  %v2109_v61 = vld [vmem:[#allocation3 + $0x67] sm:$0xff]  ;;  %1921 = vst.msk [vmem:[#allocation3 + $0x88] sm:$0xff] %vm358_vm4, %v12641_v14  ;;  %v12669_v9 = vpop.permute.xlu1 %4162  ;;  %v12676_v48 = vpop.permute.xlu0 %4170  ;;  %v19459_v8 = vld [vmem:[#allocation23_spill] sm:$0xff] }
 0x11d   : > { %9828 = vrot.lane.b32.xlu0 %v19455_v54, %s11417_s12  ;;  %19456 = vst [vmem:[#allocation20_spill] sm:$0xff] %v12651_v62  ;;  %v2047_v50 = vadd.f32 %v1983_v25, %v12531_v16  ;;  %v12662_v46 = vadd.f32 %v1660_v7, %v12585_v30  ;;  %1538 = vst.msk [vmem:[#allocation2 + $0x110] sm:$0xff] %vm358_vm4, %v1474_v56  ;;  %v12667_v20 = vld [vmem:[#allocation2 + $0xe0] sm:$0xff]  ;;  %v9461_v4 = vpack.c.bf16 %v12651_v62, %v12651_v62  ;;  %v9629_v25 = vpop.f32.mrf.mxu0  ;;  %v11160_v22 = vld [vmem:[%s19191_s4 + $0x10] sm:$0xff]  }
 0x11e   : > { %19457 = vst [vmem:[#allocation59_spill] sm:$0xff] %v12669_v9  ;;  %v2173_v6 = vadd.f32 %v2109_v61, %v2045_v39  ;;  %v2236_v49 = vld [vmem:[#allocation3 + $0x61] sm:$0xff]  ;;  %v1663_v16 = vadd.f32 %v12523_v19, %v1471_v33  ;;  %v1795_v7 = vadd.f32 %v12546_v11, %v12606_v38  ;;  %19458 = vst [vmem:[#allocation60_spill] sm:$0xff] %v12676_v48  ;;  %4406 = vperm.xlu1 %9825, %v19459_v8   ;;  %v2237_v18 = vld [vmem:[#allocation3 + $0x69] sm:$0xff] }
 0x11f   : > { %v2046_v54 = vadd.f32 %v1982_v44, %v12479_v0  ;;  %v1661_v39 = vadd.f32 %v12536_v59, %v1469_v32  ;;  %v12685_v61 = vadd.f32 %v1794_v47, %v12656_v27  ;;  %v1472_v19 = vmul.f32 %v12138_v24, %v970_v63  ;;  %2809 = vst.msk [vmem:[#allocation4 + $0x24] sm:$0xf] %vm391_vm2, %v9461_v4  ;;  %v2111_v33 = vld [vmem:[#allocation3 + $0x77] sm:$0xff]  ;;  %v12698_v24 = vpop.f32.mrf.mxu0  ;;  %v19492_v9 = vld [vmem:[#allocation30_spill] sm:$0xff] }
 0x120   : > { %v19460_v11 = vpack.i.bf16 %v12309_v60, %v12307_v3  ;;  %v2301_v8 = vadd.f32 %v2237_v18, %v2173_v6  ;;  %v1984_v48 = vld [vmem:[#allocation3 + $0x7e] sm:$0xff]  ;;  %v12694_v44 = vadd.f32 %v1792_v37, %v12667_v20  ;;  %v981_v59 = vadd.f32 %v9626_v35, %v12197_v51  ;;  %3811 = vmatpush1.bf16.msra.mxu0 %v11160_v22  ;;  %v2365_v60 = vld [vmem:[#allocation3 + $0x6a] sm:$0xff]  ;;  %v12710_v37 = vpop.permute.xlu1 %4166 }
 0x121   : > { %v2239_v0 = vld [vmem:[#allocation3 + $0x79] sm:$0xff]  ;;  %v973_v32 = vadd.f32 %v12197_v51, %v972_v40  ;;  %v2175_v47 = vadd.f32 %v2111_v33, %v2047_v50  ;;  %v12700_v63 = vadd.f32 %v2236_v49, %v2172_v53  ;;  %v1793_v3 = vadd.f32 %v12562_v13, %v12630_v43  ;;  %1926 = vst.msk [vmem:[#allocation3 + $0xb0] sm:$0xff] %vm358_vm4, %v12685_v61  ;;  %v9630_v50 = vpop.f32.mrf.mxu0  ;;  %v2110_v49 = vld [vmem:[#allocation3 + $0x6f] sm:$0xff] }
 0x122   : > { %9838 = vrot.lane.b32.xlu0 %v19460_v11, %s11418_s25  ;;  %v1666_v4 = vadd.f32 %v12555_v21, %v1474_v56  ;;  %1536 = vst.msk [vmem:[#allocation2 + $0x100] sm:$0xff] %vm358_vm4, %v1472_v19  ;;  %v12708_v35 = vld [vmem:[#allocation2 + $0xf8] sm:$0xff]  ;;  %19461 = vst [vmem:[#allocation23_spill] sm:$0xff] %v12710_v37  ;;  %3812 = vmatprep.subr.bf16.mxu0 %v19397_v41  ;;  %v2429_v40 = vadd.f32 %v2365_v60, %v2301_v8  ;;  %v12720_v56 = vpop.permute.xlu0 %4178 }
 0x123   : > { %v2048_v53 = vadd.f32 %v1984_v48, %v12604_v17  ;;  %1924 = vst.msk [vmem:[#allocation3 + $0xa0] sm:$0xff] %vm358_vm4, %v12694_v44  ;;  %v1475_v13 = vmul.f32 %v12142_v31, %v981_v59  ;;  %v12718_v21 = vadd.f32 %v1795_v7, %v12708_v35  ;;  %19462 = vst [vmem:[#allocation61_spill] sm:$0xff] %v12720_v56  ;;  %v12732_v31 = vld [vmem:[#allocation2 + $0xe8] sm:$0xff]  ;;  %v1987_v33 = vld [vmem:[#allocation3 + $0x96] sm:$0xff]  ;;  %v988_v8 = vpop.f32.mrf.mxu0  ;;  %9758 = vmatpush1.bf16.msra.mxu1 %v11160_v22 }
 0x124   : > { %v19463_v6 = vpack.i.bf16 %v12325_v42, %v12323_v57  ;;  %v2303_v18 = vadd.f32 %v2239_v0, %v2175_v47  ;;  %v12727_v17 = vadd.f32 %v1663_v16, %v12606_v38  ;;  %v12730_v48 = vadd.f32 %v1661_v39, %v12630_v43  ;;  %v1985_v16 = vld [vmem:[#allocation3 + $0x86] sm:$0xff]  ;;  %v12757_v47 = vpop.permute.xlu1 %4174  ;;  %9743 = vmatprep.subr.bf16.mxu1 %v19397_v41 }
 0x125   : > { %v994_v7 = vadd.f32 %v9629_v25, %v12197_v51  ;;  %v19464_v11 = vpack.i.bf16 %v12336_v15, %v12334_v45  ;;  %v12739_v57 = vadd.f32 %v2110_v49, %v2046_v54  ;;  %v12741_v42 = vmul.f32 0.04, %v2429_v40  ;;  %1539 = vst.msk [vmem:[#allocation2 + $0x118] sm:$0xff] %vm358_vm4, %v1475_v13  ;;  %1927 = vst.msk [vmem:[#allocation3 + $0xb8] sm:$0xff] %vm358_vm4, %v12718_v21  ;;  %v2112_v45 = vld [vmem:[#allocation3 + $0x7f] sm:$0xff]  ;;  %v2113_v60 = vld [vmem:[#allocation3 + $0x87] sm:$0xff] }
 0x126   : > { %9833 = vrot.lane.b32.xlu1 %v19463_v6, %s11417_s12  ;;  %v1798_v39 = vadd.f32 %v12565_v58, %v12656_v27  ;;  %v1473_v25 = vmul.f32 %v12136_v29, %v973_v32  ;;  %v2367_v15 = vld [vmem:[#allocation3 + $0x7a] sm:$0xff]  ;;  %v2049_v54 = vadd.f32 %v1985_v16, %v12641_v14  ;;  %v12751_v0 = vadd.f32 %v1666_v4, %v12656_v27  ;;  %v1986_v32 = vld [vmem:[#allocation3 + $0x8e] sm:$0xff] }
 0x127   : > { %9848 = vrot.lane.b32.xlu0 %v19464_v11, %s11419_s26  ;;  %19465 = vst [vmem:[#allocation62_spill] sm:$0xff] %v12741_v42  ;;  %v1664_v59 = vadd.f32 %v12585_v30, %v1472_v19  ;;  %v12755_v58 = vadd.f32 %v1793_v3, %v12732_v31  ;;  %19466 = vst [vmem:[#allocation63_spill] sm:$0xff] %v12757_v47  ;;  %v9465_v29 = vpack.c.bf16 %v12741_v42, %v12741_v42  ;;  %v12767_v30 = vld [vmem:[#allocation2 + $0x110] sm:$0xff]  ;;  %v12769_v19 = vpop.permute.xlu0 %4186  ;;  %v9633_v3 = vpop.f32.mrf.mxu0  ;;  %v2240_v49 = vld [vmem:[#allocation3 + $0x81] sm:$0xff] }
 0x128   : > { %v2176_v22 = vadd.f32 %v2112_v45, %v2048_v53  ;;  %v1796_v14 = vadd.f32 %v12579_v1, %v12667_v20  ;;  %v1799_v4 = vadd.f32 %v12592_v34, %v12708_v35  ;;  %1537 = vst.msk [vmem:[#allocation2 + $0x108] sm:$0xff] %vm358_vm4, %v1473_v25  ;;  %19467 = vst [vmem:[#allocation64_spill] sm:$0xff] %v12769_v19  ;;  %v19469_v34 = vld [vmem:[#allocation27_spill] sm:$0xff]  ;;  %v19470_v16 = vld [vmem:[#allocation50_spill] sm:$0xff] }
 0x129   : > { %v19468_v40 = vpack.i.bf16 %v12348_v55, %v12346_v28  ;;  %v12775_v53 = vadd.f32 %v2367_v15, %v2303_v18  ;;  %v2051_v1 = vadd.f32 %v1987_v33, %v12615_v52  ;;  %v2177_v6 = vadd.f32 %v2113_v60, %v2049_v54  ;;  %1925 = vst.msk [vmem:[#allocation3 + $0xa8] sm:$0xff] %vm358_vm4, %v12755_v58  ;;  %v19471_v45 = vld [vmem:[#allocation11_spill] sm:$0xff]  ;;  %v2241_v55 = vld [vmem:[#allocation3 + $0x89] sm:$0xff]  ;;  %v12792_v33 = vld [vmem:[#allocation2 + $0x100] sm:$0xff]  ;;  %v12795_v15 = vpop.f32.mrf.mxu0 }
 0x12a   : > { %v1478_v11 = vmul.f32 %v19469_v34, %v994_v7  ;;  %v19472_v19 = vpack.i.bf16 %v19470_v16, %v19471_v45  ;;  %2813 = vst.msk [vmem:[#allocation4 + $0x34] sm:$0xf] %vm391_vm2, %v9465_v29  ;;  %v1667_v28 = vadd.f32 %v12606_v38, %v1475_v13  ;;  %v12788_v18 = vadd.f32 %v1798_v39, %v12767_v30  ;;  %v11163_v54 = vld [vmem:[%s19191_s4 + $0x8] sm:$0xff]   ;;  %v19473_v29 = vld [vmem:[#allocation16_spill] sm:$0xff]  ;;  %v12808_v39 = vpop.permute.xlu1 %4182 }
 0x12b   : > { %9843 = vrot.lane.b32.xlu1 %v19468_v40, %s11420_s27  ;;  %v986_v52 = vadd.f32 %v12197_v51, %v12698_v24  ;;  %v997_v7 = vadd.f32 %v9630_v50, %v12197_v51  ;;  %v2050_v60 = vadd.f32 %v1986_v32, %v19473_v29  ;;  %v12802_v38 = vadd.f32 %v1664_v59, %v12667_v20  ;;  %v1988_v13 = vld [vmem:[#allocation3 + $0x9e] sm:$0xff]  ;;  %v2369_v40 = vld [vmem:[#allocation3 + $0x8a] sm:$0xff]  ;;  %v12817_v29 = vpop.permute.xlu0 %4194 }
 0x12c   : > { %9858 = vrot.lane.b32.xlu0 %v19472_v19, %s11415_s30  ;;  %v2305_v19 = vadd.f32 %v2241_v55, %v2177_v6  ;;  %1542 = vst.msk [vmem:[#allocation2 + $0x130] sm:$0xff] %vm358_vm4, %v1478_v11  ;;  %v12806_v24 = vadd.f32 %v1796_v14, %v12792_v33  ;;  %19474 = vst [vmem:[#allocation27_spill] sm:$0xff] %v12808_v39  ;;  %v2115_v50 = vld [vmem:[#allocation3 + $0x97] sm:$0xff]  ;;  %v1665_v16 = vadd.f32 %v12630_v43, %v1473_v25  ;;  %v19475_v59 = vld [vmem:[#allocation25_spill] sm:$0xff]  ;;  %v12819_v14 = vpop.f32.mrf.mxu0 }
 0x12d   : > { %v2243_v34 = vld [vmem:[#allocation3 + $0x99] sm:$0xff]  ;;  %v1797_v32 = vadd.f32 %v12622_v2, %v12732_v31  ;;  %1930 = vst.msk [vmem:[#allocation3 + $0xd0] sm:$0xff] %vm358_vm4, %v12788_v18  ;;  %v1476_v6 = vmul.f32 %v19475_v59, %v986_v52  ;;  %v19476_v45 = vld [vmem:[#allocation26_spill] sm:$0xff]  ;;  %19477 = vst [vmem:[#allocation50_spill] sm:$0xff] %v12817_v29  ;;  %v2179_v43 = vadd.f32 %v2115_v50, %v2051_v1  ;;  %3813 = vmatpush1.bf16.msra.mxu0 %v11163_v54 }
 0x12e   : > { %v1479_v55 = vmul.f32 %v19476_v45, %v997_v7  ;;  %v19478_v47 = vld [vmem:[#allocation53_spill] sm:$0xff]  ;;  %v19479_v39 = vld [vmem:[#allocation51_spill] sm:$0xff]  ;;  %v12825_v25 = vadd.f32 %v2240_v49, %v2176_v22  ;;  %v2433_v2 = vadd.f32 %v2369_v40, %v2305_v19  ;;  %1928 = vst.msk [vmem:[#allocation3 + $0xc0] sm:$0xff] %vm358_vm4, %v12806_v24  ;;  %v989_v52 = vadd.f32 %v12197_v51, %v988_v8  ;;  %v1004_v1 = vpop.f32.mrf.mxu0 }
 0x12f   : > { %v19480_v56 = vpack.i.bf16 %v19478_v47, %v19479_v39  ;;  %v1991_v37 = vld [vmem:[#allocation3 + $0xb6] sm:$0xff]  ;;  %v2052_v59 = vadd.f32 %v1988_v13, %v12694_v44  ;;  %v12832_v45 = vadd.f32 %v1667_v28, %v12708_v35  ;;  %v1670_v47 = vadd.f32 %v12656_v27, %v1478_v11  ;;  %1540 = vst.msk [vmem:[#allocation2 + $0x120] sm:$0xff] %vm358_vm4, %v1476_v6  ;;  %v12848_v27 = vld [vmem:[#allocation2 + $0x108] sm:$0xff]  ;;  %v12850_v11 = vpop.permute.xlu1 %4190  ;;  %v12859_v50 = vpop.permute.xlu0 %4202 }
 0x130   : > { %v2114_v7 = vld [vmem:[#allocation3 + $0x8f] sm:$0xff]  ;;  %1543 = vst.msk [vmem:[#allocation2 + $0x138] sm:$0xff] %vm358_vm4, %v1479_v55  ;;  %v1010_v22 = vadd.f32 %v9633_v3, %v12197_v51  ;;  %3814 = vmatprep.subr.bf16.mxu0 %v19397_v41  ;;  %v12843_v49 = vmul.f32 0.04, %v2433_v2  ;;  %v2307_v44 = vadd.f32 %v2243_v34, %v2179_v43  ;;  %19482 = vst [vmem:[#allocation16_spill] sm:$0xff] %v12850_v11  ;;  %9759 = vmatpush1.bf16.msra.mxu1 %v11163_v54  ;;  %v1989_v3 = vld [vmem:[#allocation3 + $0xa6] sm:$0xff] }
 0x131   : > { %9853 = vrot.lane.b32.xlu1 %v19480_v56, %s11419_s26  ;;  %v12837_v56 = vld [vmem:[#allocation2 + $0x118] sm:$0xff]  ;;  %v12841_v8 = vadd.f32 %v2114_v7, %v2050_v60  ;;  %v2055_v19 = vadd.f32 %v1991_v37, %v12718_v21  ;;  %v12854_v51 = vadd.f32 %v1665_v16, %v12732_v31  ;;  %v1802_v60 = vadd.f32 %v12625_v36, %v12767_v30  ;;  %v19486_v34 = vld [vmem:[#allocation54_spill] sm:$0xff]  ;;  %v2244_v29 = vld [vmem:[#allocation3 + $0xa1] sm:$0xff] }
 0x132   : > { %19481 = vst [vmem:[#allocation11_spill] sm:$0xff] %v12843_v49  ;;  %v12846_v28 = vadd.f32 %v1799_v4, %v12837_v56  ;;  %v19483_v13 = vld [vmem:[#allocation24_spill] sm:$0xff]  ;;  %19484 = vst [vmem:[#allocation25_spill] sm:$0xff] %v12859_v50  ;;  %v12861_v4 = vpop.f32.mrf.mxu0  ;;  %v19485_v40 = vld [vmem:[#allocation55_spill] sm:$0xff]  ;;  %v9469_v37 = vpack.c.bf16 %v12843_v49, %v12843_v49  ;;  %v2053_v16 = vadd.f32 %v1989_v3, %v12755_v58  ;;  %9744 = vmatprep.subr.bf16.mxu1 %v19397_v41 }
 0x133   : > { %v1477_v39 = vmul.f32 %v19483_v13, %v989_v52  ;;  %v19487_v43 = vpack.i.bf16 %v19485_v40, %v19486_v34  ;;  %v2116_v21 = vld [vmem:[#allocation3 + $0x9f] sm:$0xff]  ;;  %v1668_v36 = vadd.f32 %v12667_v20, %v1476_v6  ;;  %v1800_v2 = vadd.f32 %v12662_v46, %v12792_v33  ;;  %v1990_v7 = vld [vmem:[#allocation3 + $0xae] sm:$0xff]  ;;  %v12895_v50 = vpop.permute.xlu1 %4198 }
 0x134   : > { %v2371_v54 = vld [vmem:[#allocation3 + $0x9a] sm:$0xff]  ;;  %1931 = vst.msk [vmem:[#allocation3 + $0xd8] sm:$0xff] %vm358_vm4, %v12846_v28  ;;  %v2180_v52 = vadd.f32 %v2116_v21, %v2052_v59  ;;  %v2117_v13 = vld [vmem:[#allocation3 + $0xa7] sm:$0xff]  ;;  %v12877_v40 = vadd.f32 %v1670_v47, %v12767_v30  ;;  %v12881_v58 = vadd.f32 %v1797_v32, %v12848_v27  ;;  %v19488_v20 = vld [vmem:[#allocation31_spill] sm:$0xff]  ;;  %v12886_v46 = vpop.f32.mrf.mxu0  ;;  %v1671_v47 = vadd.f32 %v12708_v35, %v1479_v55 }
 0x135   : > { %9863 = vrot.lane.b32.xlu1 %v19487_v43, %s11415_s30  ;;  %1541 = vst.msk [vmem:[#allocation2 + $0x128] sm:$0xff] %vm358_vm4, %v1477_v39  ;;  %v1482_v6 = vmul.f32 %v19488_v20, %v1010_v22  ;;  %v12884_v3 = vld [vmem:[#allocation2 + $0x130] sm:$0xff]  ;;  %v12889_v34 = vadd.f32 %v2371_v54, %v2307_v44  ;;  %v2181_v43 = vadd.f32 %v2117_v13, %v2053_v16  ;;  %19489 = vst [vmem:[#allocation26_spill] sm:$0xff] %v12895_v50  ;;  %v12905_v35 = vld [vmem:[%s19190_s3] ss:$0 sm:$0xff] }
 0x136   : > { %2817 = vst.msk [vmem:[#allocation4 + $0x44] sm:$0xf] %vm391_vm2, %v9469_v37  ;;  %v2119_v59 = vld [vmem:[#allocation3 + $0xb7] sm:$0xff]  ;;  %v12893_v21 = vadd.f32 %v1802_v60, %v12884_v3  ;;  %v2245_v22 = vld [vmem:[#allocation3 + $0xa9] sm:$0xff]  ;;  %v1803_v20 = vadd.f32 %v12727_v17, %v12837_v56  ;;  %v1002_v55 = vadd.f32 %v12905_v35, %v12795_v15  ;;  %v1013_v44 = vadd.f32 %v12905_v35, %v12819_v14  ;;  %v12919_v16 = vld [vmem:[#allocation2 + $0x120] sm:$0xff] }
 0x137   : > { %v2183_v32 = vadd.f32 %v2119_v59, %v2055_v19  ;;  %1929 = vst.msk [vmem:[#allocation3 + $0xc8] sm:$0xff] %vm358_vm4, %v12881_v58  ;;  %1546 = vst.msk [vmem:[#allocation2 + $0x150] sm:$0xff] %vm358_vm4, %v1482_v6  ;;  %v12911_v19 = vpop.permute.xlu0 %4210  ;;  %v2054_v17 = vadd.f32 %v1990_v7, %v12685_v61  ;;  %v2309_v60 = vadd.f32 %v2245_v22, %v2181_v43  ;;  %v1992_v54 = vld [vmem:[#allocation3 + $0xbe] sm:$0xff]  ;;  %v2373_v59 = vld [vmem:[#allocation3 + $0xaa] sm:$0xff]  ;;  %v12930_v22 = vpop.f32.mrf.mxu0 }
 0x138   : > { %19490 = vst [vmem:[#allocation53_spill] sm:$0xff] %v12911_v19  ;;  %v12915_v37 = vadd.f32 %v1668_v36, %v12792_v33  ;;  %1934 = vst.msk [vmem:[#allocation3 + $0xf0] sm:$0xff] %vm358_vm4, %v12893_v21  ;;  %v12921_v13 = vld [vmem:[#allocation2 + $0x138] sm:$0xff]  ;;  %v1005_v15 = vadd.f32 %v12905_v35, %v1004_v1  ;;  %v1669_v19 = vadd.f32 %v12732_v31, %v1477_v39  ;;  %v19491_v7 = vld [vmem:[#allocation29_spill] sm:$0xff]  ;;  %v12938_v5 = vpop.permute.xlu1 %4206 }
 0x139   : > { %v2247_v14 = vld [vmem:[#allocation3 + $0xb9] sm:$0xff]  ;;  %v1674_v61 = vadd.f32 %v12767_v30, %v1482_v6  ;;  %v1480_v43 = vmul.f32 %v19491_v7, %v1002_v55  ;;  %v12928_v36 = vadd.f32 %v1800_v2, %v12919_v16  ;;  %v2437_v50 = vadd.f32 %v2373_v59, %v2309_v60  ;;  %19493 = vst [vmem:[#allocation51_spill] sm:$0xff] %v12938_v5  ;;  %v2118_v31 = vld [vmem:[#allocation3 + $0xaf] sm:$0xff] }
 0x13a   : > { %v12933_v11 = vadd.f32 %v1671_v47, %v12837_v56  ;;  %v1801_v1 = vadd.f32 %v12730_v48, %v12848_v27  ;;  %v1483_v23 = vmul.f32 %v19492_v9, %v1013_v44  ;;  %v12940_v30 = vadd.f32 %v2244_v29, %v2180_v52  ;;  %v19494_v6 = vld [vmem:[#allocation28_spill] sm:$0xff] }
 0x13b   : > { %v2056_v39 = vadd.f32 %v1992_v54, %v12806_v24  ;;  %1544 = vst.msk [vmem:[#allocation2 + $0x140] sm:$0xff] %vm358_vm4, %v1480_v43  ;;  %1932 = vst.msk [vmem:[#allocation3 + $0xe0] sm:$0xff] %vm358_vm4, %v12928_v36  ;;  %v12947_v2 = vadd.f32 %v1803_v20, %v12921_v13  ;;  %v1481_v47 = vmul.f32 %v19494_v6, %v1005_v15  ;;  %v12950_v48 = vpop.permute.xlu0 %4218  ;;  %v12954_v55 = vmul.f32 0.04, %v2437_v50  ;;  %v1995_v52 = vld [vmem:[#allocation3 + $0xd6] sm:$0xff] }
 0x13c   : > { %19495 = vst [vmem:[#allocation24_spill] sm:$0xff] %v12950_v48  ;;  %v12952_v9 = vadd.f32 %v2118_v31, %v2054_v17  ;;  %v2311_v29 = vadd.f32 %v2247_v14, %v2183_v32  ;;  %1547 = vst.msk [vmem:[#allocation2 + $0x158] sm:$0xff] %vm358_vm4, %v1483_v23  ;;  %v12957_v24 = vld [vmem:[#allocation2 + $0x128] sm:$0xff]  ;;  %v1026_v44 = vadd.f32 %v12905_v35, %v12861_v4  ;;  %v12975_v32 = vpop.f32.mrf.mxu0  ;;  %v19497_v14 = vld [vmem:[#allocation35_spill] sm:$0xff]  ;;  %v12983_v7 = vpop.permute.xlu1 %4214 }
 0x13d   : > { %19496 = vst [vmem:[#allocation55_spill] sm:$0xff] %v12954_v55  ;;  %v12962_v20 = vadd.f32 %v1669_v19, %v12848_v27  ;;  %v12965_v60 = vadd.f32 %v1674_v61, %v12884_v3  ;;  %v1806_v17 = vadd.f32 %v12751_v0, %v12884_v3  ;;  %1935 = vst.msk [vmem:[#allocation3 + $0xf8] sm:$0xff] %vm358_vm4, %v12947_v2  ;;  %v2120_v19 = vld [vmem:[#allocation3 + $0xbf] sm:$0xff]  ;;  %v2234_v31 = vld [vmem:[#allocation3 + $0x51] sm:$0xff] }
 0x13e   : > { %1545 = vst.msk [vmem:[#allocation2 + $0x148] sm:$0xff] %vm358_vm4, %v1481_v47  ;;  %v12973_v50 = vadd.f32 %v1801_v1, %v12957_v24  ;;  %v9473_v4 = vpack.c.bf16 %v12954_v55, %v12954_v55  ;;  %v1993_v54 = vld [vmem:[#allocation3 + $0xc6] sm:$0xff]  ;;  %v1994_v15 = vld [vmem:[#allocation3 + $0xce] sm:$0xff]  ;;  %v1672_v59 = vadd.f32 %v12792_v33, %v1480_v43  ;;  %v1804_v0 = vadd.f32 %v12802_v38, %v12919_v16  ;;  %v2375_v6 = vld [vmem:[#allocation3 + $0xba] sm:$0xff] }
 0x13f   : > { %v1486_v61 = vmul.f32 %v19497_v14, %v1026_v44  ;;  %19498 = vst [vmem:[#allocation54_spill] sm:$0xff] %v12983_v7  ;;  %v2184_v1 = vadd.f32 %v2120_v19, %v2056_v39  ;;  %v2059_v48 = vadd.f32 %v1995_v52, %v12846_v28  ;;  %v2057_v5 = vadd.f32 %v1993_v54, %v12881_v58  ;;  %v12991_v43 = vpop.permute.xlu0 %4226  ;;  %v2121_v44 = vld [vmem:[#allocation3 + $0xc7] sm:$0xff]  ;;  %v13002_v58 = vld [vmem:[#allocation2 + $0x150] sm:$0xff] }
 0x140   : > { %1933 = vst.msk [vmem:[#allocation3 + $0xe8] sm:$0xff] %vm358_vm4, %v12973_v50  ;;  %v1018_v33 = vadd.f32 %v12905_v35, %v12886_v46  ;;  %19499 = vst [vmem:[#allocation31_spill] sm:$0xff] %v12991_v43  ;;  %v12994_v38 = vadd.f32 %v2375_v6, %v2311_v29  ;;  %v2248_v14 = vld [vmem:[#allocation3 + $0xc1] sm:$0xff]  ;;  %v1675_v39 = vadd.f32 %v12837_v56, %v1483_v23  ;;  %v2362_v52 = vld [vmem:[#allocation3 + $0x52] sm:$0xff]  ;;  %v13010_v23 = vpop.f32.mrf.mxu0 }
 0x141   : > { %2821 = vst.msk [vmem:[#allocation4 + $0x54] sm:$0xf] %vm391_vm2, %v9473_v4  ;;  %v12999_v28 = vadd.f32 %v12832_v45, %v12921_v13  ;;  %v2298_v46 = vadd.f32 %v2234_v31, %v12635_v12  ;;  %v2058_v19 = vadd.f32 %v1994_v15, %v12788_v18  ;;  %v2185_v4 = vadd.f32 %v2121_v44, %v2057_v5  ;;  %v2123_v56 = vld [vmem:[#allocation3 + $0xd7] sm:$0xff]  ;;  %v2249_v45 = vld [vmem:[#allocation3 + $0xc9] sm:$0xff]  ;;  %v13020_v15 = vpop.permute.xlu1 %4222 }
 0x142   : > { %1550 = vst.msk [vmem:[#allocation2 + $0x170] sm:$0xff] %vm358_vm4, %v1486_v61  ;;  %v1673_v29 = vadd.f32 %v12848_v27, %v1481_v47  ;;  %v13008_v54 = vadd.f32 %v1806_v17, %v13002_v58  ;;  %v13013_v6 = vadd.f32 %v1672_v59, %v12919_v16  ;;  %v1996_v43 = vld [vmem:[#allocation3 + $0xde] sm:$0xff]  ;;  %v13017_v12 = vadd.f32 %v12854_v51, %v12957_v24  ;;  %v2122_v51 = vld [vmem:[#allocation3 + $0xcf] sm:$0xff] }
 0x143   : > { %v19500_v31 = vld [vmem:[#allocation33_spill] sm:$0xff]  ;;  %v2426_v5 = vadd.f32 %v2362_v52, %v2298_v46  ;;  %19501 = vst [vmem:[#allocation29_spill] sm:$0xff] %v13020_v15  ;;  %v2363_v27 = vld [vmem:[#allocation3 + $0x5a] sm:$0xff]  ;;  %v2187_v47 = vadd.f32 %v2123_v56, %v2059_v48  ;;  %v2312_v17 = vadd.f32 %v2248_v14, %v2184_v1  ;;  %v2313_v44 = vadd.f32 %v2249_v45, %v2185_v4  ;;  %v13027_v55 = vpop.permute.xlu0 %4234  ;;  %v2377_v49 = vld [vmem:[#allocation3 + $0xca] sm:$0xff] }
 0x144   : > { %v1484_v18 = vmul.f32 %v19500_v31, %v1018_v33  ;;  %v2060_v7 = vadd.f32 %v1996_v43, %v12928_v36  ;;  %1938 = vst.msk [vmem:[#allocation3 + $0x110] sm:$0xff] %vm358_vm4, %v13008_v54  ;;  %v13025_v59 = vld [vmem:[#allocation2 + $0x140] sm:$0xff]  ;;  %19502 = vst [vmem:[#allocation30_spill] sm:$0xff] %v13027_v55  ;;  %v13030_v33 = vadd.f32 %v1675_v39, %v12921_v13  ;;  %v13038_v36 = vmul.f32 0.04, %v12649_v26  ;;  %v13044_v39 = vpop.f32.mrf.mxu0  ;;  %v1999_v55 = vld [vmem:[#allocation3 + $0xf6] sm:$0xff] }
 0x145   : > { %v13034_v48 = vadd.f32 %v1804_v0, %v13025_v59  ;;  %v2427_v1 = vadd.f32 %v2363_v27, %v12658_v10  ;;  %v2186_v43 = vadd.f32 %v2122_v51, %v2058_v19  ;;  %v2376_v14 = vld [vmem:[#allocation3 + $0xc2] sm:$0xff]  ;;  %v2441_v46 = vadd.f32 %v2377_v49, %v2313_v44  ;;  %v2251_v27 = vld [vmem:[#allocation3 + $0xd9] sm:$0xff]  ;;  %v2250_v51 = vld [vmem:[#allocation3 + $0xd1] sm:$0xff] }
 0x146   : > { %1548 = vst.msk [vmem:[#allocation2 + $0x160] sm:$0xff] %vm358_vm4, %v1484_v18  ;;  %v13041_v52 = vadd.f32 %v1673_v29, %v12957_v24  ;;  %v1678_v4 = vadd.f32 %v12884_v3, %v1486_v61  ;;  %v2124_v56 = vld [vmem:[#allocation3 + $0xdf] sm:$0xff]  ;;  %v1810_v0 = vadd.f32 %v12877_v40, %v13002_v58  ;;  %v13050_v10 = vmul.f32 0.04, %v2426_v5  ;;  %v13056_v3 = vpop.permute.xlu1 %4230 }
 0x147   : > { %v1997_v45 = vld [vmem:[#allocation3 + $0xe6] sm:$0xff]  ;;  %v1998_v31 = vld [vmem:[#allocation3 + $0xee] sm:$0xff]  ;;  %1936 = vst.msk [vmem:[#allocation3 + $0x100] sm:$0xff] %vm358_vm4, %v13034_v48  ;;  %v9460_v26 = vpack.c.bf16 %v13038_v36, %v13038_v36  ;;  %v1029_v49 = vadd.f32 %v12905_v35, %v12930_v22  ;;  %19504 = vst [vmem:[#allocation35_spill] sm:$0xff] %v13056_v3  ;;  %v13058_v61 = vadd.f32 %v2376_v14, %v2312_v17  ;;  %v13060_v19 = vmul.f32 0.04, %v2441_v46  ;;  %v13065_v5 = vpop.permute.xlu0 %4242 }
 0x148   : > { %19503 = vst [vmem:[#allocation28_spill] sm:$0xff] %v13050_v10  ;;  %v2188_v29 = vadd.f32 %v2124_v56, %v2060_v7  ;;  %v2061_v40 = vadd.f32 %v1997_v45, %v12973_v50  ;;  %v13063_v44 = vld [vmem:[#allocation2 + $0x158] sm:$0xff]  ;;  %19506 = vst [vmem:[#allocation65_spill] sm:$0xff] %v13065_v5  ;;  %v2062_v15 = vadd.f32 %v1998_v31, %v12893_v21  ;;  %v2125_v42 = vld [vmem:[#allocation3 + $0xe7] sm:$0xff]  ;;  %v13068_v22 = vmul.f32 0.04, %v2427_v1  ;;  %v13083_v1 = vpop.f32.mrf.mxu0 }
 0x149   : > { %19505 = vst [vmem:[#allocation33_spill] sm:$0xff] %v13060_v19  ;;  %v9462_v17 = vpack.c.bf16 %v13050_v10, %v13050_v10  ;;  %2808 = vst.msk [vmem:[#allocation4 + $0x20] sm:$0xf] %vm391_vm2, %v9460_v26  ;;  %v19508_v7 = vld [vmem:[#allocation34_spill] sm:$0xff]  ;;  %v13074_v46 = vadd.f32 %v2250_v51, %v2186_v43  ;;  %v9477_v50 = vpack.c.bf16 %v13060_v19, %v13060_v19  ;;  %v2252_v45 = vld [vmem:[#allocation3 + $0xe1] sm:$0xff] }
 0x14a   : > { %19507 = vst [vmem:[#allocation66_spill] sm:$0xff] %v13068_v22  ;;  %v1487_v14 = vmul.f32 %v19508_v7, %v1029_v49  ;;  %v2189_v56 = vadd.f32 %v2125_v42, %v2061_v40  ;;  %v13079_v5 = vadd.f32 %v1678_v4, %v13002_v58  ;;  %v13081_v21 = vld [vmem:[#allocation2 + $0x148] sm:$0xff]  ;;  %v2315_v31 = vadd.f32 %v2251_v27, %v2187_v47  ;;  %v13094_v4 = vld [vmem:[#allocation2 + $0x170] sm:$0xff]  ;;  %v13096_v49 = vpop.permute.xlu1 %4238 }
 0x14b   : > { %v2253_v3 = vld [vmem:[#allocation3 + $0xe9] sm:$0xff]  ;;  %v1676_v26 = vadd.f32 %v12919_v16, %v1484_v18  ;;  %v9463_v43 = vpack.c.bf16 %v13068_v22, %v13068_v22  ;;  %2810 = vst.msk [vmem:[#allocation4 + $0x28] sm:$0xf] %vm391_vm2, %v9462_v17  ;;  %v13092_v42 = vadd.f32 %v12999_v28, %v13063_v44  ;;  %19509 = vst [vmem:[#allocation34_spill] sm:$0xff] %v13096_v49  ;;  %v13104_v51 = vpop.permute.xlu0 %4250 }
 0x14c   : > { %1551 = vst.msk [vmem:[#allocation2 + $0x178] sm:$0xff] %vm358_vm4, %v1487_v14  ;;  %v2063_v47 = vadd.f32 %v1999_v55, %v12947_v2  ;;  %v2126_v16 = vld [vmem:[#allocation3 + $0xef] sm:$0xff]  ;;  %v2317_v18 = vadd.f32 %v2253_v3, %v2189_v56  ;;  %v1808_v27 = vadd.f32 %v12915_v37, %v13025_v59  ;;  %v1021_v40 = vadd.f32 %v12905_v35, %v12975_v32  ;;  %v2364_v28 = vld [vmem:[#allocation3 + $0x62] sm:$0xff]  ;;  %v2379_v32 = vld [vmem:[#allocation3 + $0xda] sm:$0xff] }
 0x14d   : > { %2825 = vst.msk [vmem:[#allocation4 + $0x64] sm:$0xf] %vm391_vm2, %v9477_v50  ;;  %19510 = vst [vmem:[#allocation67_spill] sm:$0xff] %v13104_v51  ;;  %v2190_v17 = vadd.f32 %v2126_v16, %v2062_v15  ;;  %v2316_v7 = vadd.f32 %v2252_v45, %v2188_v29  ;;  %v2381_v19 = vld [vmem:[#allocation3 + $0xea] sm:$0xff]  ;;  %v13111_v2 = vadd.f32 %v13017_v12, %v13081_v21  ;;  %v13115_v55 = vld [vmem:[#allocation2 + $0x160] sm:$0xff]  ;;  %v13122_v45 = vpop.f32.mrf.mxu0 }
 0x14e   : > { %2811 = vst.msk [vmem:[#allocation4 + $0x2c] sm:$0xf] %vm391_vm2, %v9463_v43  ;;  %v1042_v37 = vadd.f32 %v12905_v35, %v13010_v23  ;;  %v2445_v3 = vadd.f32 %v2381_v19, %v2317_v18  ;;  %v19511_v50 = vld [vmem:[#allocation32_spill] sm:$0xff]  ;;  %v13119_v29 = vadd.f32 %v1810_v0, %v13094_v4  ;;  %v2428_v56 = vadd.f32 %v2364_v28, %v12700_v63  ;;  %v2254_v16 = vld [vmem:[#allocation3 + $0xf1] sm:$0xff]  ;;  %v2380_v28 = vld [vmem:[#allocation3 + $0xe2] sm:$0xff] }
 0x14f   : > { %1939 = vst.msk [vmem:[#allocation3 + $0x118] sm:$0xff] %vm358_vm4, %v13092_v42  ;;  %v1485_v15 = vmul.f32 %v19511_v50, %v1021_v40  ;;  %v13124_v43 = vadd.f32 %v2379_v32, %v2315_v31  ;;  %v2127_v12 = vld [vmem:[#allocation3 + $0xf7] sm:$0xff]  ;;  %v1679_v23 = vadd.f32 %v12921_v13, %v1487_v14  ;;  %1937 = vst.msk [vmem:[#allocation3 + $0x108] sm:$0xff] %vm358_vm4, %v13111_v2  ;;  %v13132_v40 = vpop.permute.xlu1 %4246  ;;  %v13145_v14 = vpop.permute.xlu0 %4258 }
 0x150   : > { %v2000_v51 = vld [vmem:[#allocation3 + $0xfe] sm:$0xff]  ;;  %v19512_v19 = vld [vmem:[#allocation39_spill] sm:$0xff]  ;;  %v1034_v0 = vadd.f32 %v12905_v35, %v13044_v39  ;;  %19513 = vst [vmem:[#allocation32_spill] sm:$0xff] %v13132_v40  ;;  %v2191_v63 = vadd.f32 %v2127_v12, %v2063_v47  ;;  %v13134_v50 = vmul.f32 0.04, %v2445_v3  ;;  %v13137_v31 = vadd.f32 %v1676_v26, %v13025_v59  ;;  %1942 = vst.msk [vmem:[#allocation3 + $0x130] sm:$0xff] %vm358_vm4, %v13119_v29 }
 0x151   : > { %v1490_v18 = vmul.f32 %v19512_v19, %v1042_v37  ;;  %v11145_v32 = vld [vmem:[#allocation4 + $0x20] sm:$0xff]   ;;  %1549 = vst.msk [vmem:[#allocation2 + $0x168] sm:$0xff] %vm358_vm4, %v1485_v15  ;;  %v13143_v13 = vadd.f32 %v1808_v27, %v13115_v55  ;;  %19515 = vst [vmem:[#allocation68_spill] sm:$0xff] %v13145_v14  ;;  %v2238_v39 = vld [vmem:[#allocation3 + $0x71] sm:$0xff]  ;;  %v13147_v37 = vadd.f32 %v2254_v16, %v2190_v17  ;;  %v13154_v3 = vmul.f32 0.04, %v2428_v56  ;;  %v13170_v56 = vpop.f32.mrf.mxu0 }
 0x152   : > { %19514 = vst [vmem:[#allocation39_spill] sm:$0xff] %v13134_v50  ;;  %v13149_v47 = vadd.f32 %v2380_v28, %v2316_v7  ;;  %v1811_v26 = vadd.f32 %v12933_v11, %v13063_v44  ;;  %v11166_v12 = vld [vmem:[%s19191_s4] sm:$0xff]   ;;  %v9481_v27 = vpack.c.bf16 %v13134_v50, %v13134_v50  ;;  %v2064_v19 = vadd.f32 %v2000_v51, %v13034_v48 }
 0x153   : > { %1554 = vst.msk [vmem:[#allocation2 + $0x190] sm:$0xff] %vm358_vm4, %v1490_v18  ;;  %19516 = vst [vmem:[#allocation69_spill] sm:$0xff] %v13154_v3  ;;  %v2255_v17 = vld [vmem:[#allocation3 + $0xf9] sm:$0xff]  ;;  %v3109_v16 = vshll.u32 %v11145_v32, 16  ;;  %v13164_v7 = vadd.f32 %v12962_v20, %v13081_v21  ;;  %v13173_v28 = vadd.f32 %v1679_v23, %v13063_v44  ;;  %v9464_v14 = vpack.c.bf16 %v13154_v3, %v13154_v3  ;;  %v19517_v48 = vld [vmem:[#allocation37_spill] sm:$0xff]  ;;  %v13179_v49 = vpop.permute.xlu1 %4254 }
 0x154   : > { %1940 = vst.msk [vmem:[#allocation3 + $0x120] sm:$0xff] %vm358_vm4, %v13143_v13  ;;  %v13168_v11 = vld [vmem:[#allocation2 + $0x178] sm:$0xff]  ;;  %v1488_v51 = vmul.f32 %v19517_v48, %v1034_v0  ;;  %v2302_v40 = vadd.f32 %v2238_v39, %v12739_v57  ;;  %19518 = vst [vmem:[#allocation37_spill] sm:$0xff] %v13179_v49  ;;  %3815 = vmatpush1.bf16.msra.mxu0 %v11166_v12  ;;  %v3107_v22 = vshrl.u32 %v11145_v32, 16  ;;  %9760 = vmatpush1.bf16.msra.mxu1 %v11166_v12 }
 0x155   : > { %v2366_v20 = vld [vmem:[#allocation3 + $0x72] sm:$0xff]  ;;  %2829 = vst.msk [vmem:[#allocation4 + $0x74] sm:$0xf] %vm391_vm2, %v9481_v27  ;;  %v13182_v50 = vld [vmem:[#allocation4 + $0x28] sm:$0xff]   ;;  %v3111_v10 = vrot.slane %v3109_v16, 1  ;;  %v1045_v23 = vadd.f32 %v12905_v35, %v13083_v1  ;;  %v13187_v62 = vadd.f32 %v1811_v26, %v13168_v11  ;;  %3816 = vmatprep.subr.bf16.mxu0 %v19397_v41  ;;  %v2128_v57 = vld [vmem:[#allocation3 + $0xff] sm:$0xff]  ;;  %v2319_v0 = vadd.f32 %v2255_v17, %v2191_v63  ;;  %v13196_v16 = vpop.permute.xlu0 %4266 }
 0x156   : > { %v1677_v39 = vadd.f32 %v12957_v24, %v1485_v15  ;;  %2812 = vst.msk [vmem:[#allocation4 + $0x30] sm:$0xf] %vm391_vm2, %v9464_v14  ;;  %v2430_v27 = vadd.f32 %v2366_v20, %v2302_v40  ;;  %v13194_v32 = vmul.f32 0.04, %v12775_v53  ;;  %19520 = vst [vmem:[#allocation71_spill] sm:$0xff] %v13196_v16  ;;  %9745 = vmatprep.subr.bf16.mxu1 %v19397_v41  ;;  %v3114_v12 = vshll.u32 %v13182_v50, 16  ;;  %v13203_v15 = vpop.f32.mrf.mxu0 }
 0x157   : > { %1552 = vst.msk [vmem:[#allocation2 + $0x180] sm:$0xff] %vm358_vm4, %v1488_v51  ;;  %v2192_v1 = vadd.f32 %v2128_v57, %v2064_v19  ;;  %v3112_v26 = vor.u32 %v3111_v10, %v3107_v22  ;;  %v2001_v48 = vld [vmem:[#allocation3 + $0x106] sm:$0xff]  ;;  %v2002_v63 = vld [vmem:[#allocation3 + $0x10e] sm:$0xff]  ;;  %1943 = vst.msk [vmem:[#allocation3 + $0x138] sm:$0xff] %vm358_vm4, %v13187_v62  ;;  %v1682_v20 = vadd.f32 %v13002_v58, %v1490_v18  ;;  %v13221_v58 = vpop.permute.xlu1 %4262 }
 0x158   : > { %19519 = vst [vmem:[#allocation70_spill] sm:$0xff] %v13194_v32  ;;  %v19521_v17 = vld [vmem:[#allocation38_spill] sm:$0xff]  ;;  %v2003_v40 = vld [vmem:[#allocation3 + $0x116] sm:$0xff]  ;;  %v2065_v53 = vadd.f32 %v2001_v48, %v13111_v2  ;;  %v2256_v14 = vld [vmem:[#allocation3 + $0x101] sm:$0xff]  ;;  %v13209_v10 = vadd.f32 %v12965_v60, %v13094_v4  ;;  %v13213_v22 = vadd.f32 %v13013_v6, %v13115_v55  ;;  %v2066_v57 = vadd.f32 %v2002_v63, %v13008_v54 }
 0x159   : > { %v1491_v24 = vmul.f32 %v19521_v17, %v1045_v23  ;;  %v2383_v19 = vld [vmem:[#allocation3 + $0xfa] sm:$0xff]  ;;  %v3116_v23 = vrot.slane %v3114_v12, 1  ;;  %v2129_v17 = vld [vmem:[#allocation3 + $0x107] sm:$0xff]  ;;  %v13216_v16 = vmul.f32 0.04, %v2430_v27  ;;  %v9467_v2 = vpack.c.bf16 %v13194_v32, %v13194_v32  ;;  %19523 = vst [vmem:[#allocation72_spill] sm:$0xff] %v13221_v58 }
 0x15a   : > { %v13223_v60 = vadd.f32 %v2383_v19, %v2319_v0  ;;  %v13226_v18 = vadd.f32 %v1677_v39, %v13081_v21  ;;  %v2130_v6 = vld [vmem:[#allocation3 + $0x10f] sm:$0xff]  ;;  %v2193_v48 = vadd.f32 %v2129_v17, %v2065_v53  ;;  %v1037_v54 = vadd.f32 %v12905_v35, %v13122_v45  ;;  %v13236_v39 = vpop.f32.mrf.mxu0  ;;  %v11169_v53 = vld [vmem:[%s19191_s4 + $0x78] sm:$0xff]  }
 0x15b   : > { %19522 = vst [vmem:[#allocation38_spill] sm:$0xff] %v13216_v16  ;;  %1555 = vst.msk [vmem:[#allocation2 + $0x198] sm:$0xff] %vm358_vm4, %v1491_v24  ;;  %v2257_v12 = vld [vmem:[#allocation3 + $0x109] sm:$0xff]  ;;  %v3117_v27 = vsel %vm3105_vm5, %v3112_v26, %v3116_v23  ;;  %v2067_v63 = vadd.f32 %v2003_v40, %v13092_v42  ;;  %v2320_v49 = vadd.f32 %v2256_v14, %v2192_v1  ;;  %v2004_v32 = vld [vmem:[#allocation3 + $0x11e] sm:$0xff]  ;;  %v13253_v40 = vpop.permute.xlu0 %4274  ;;  %v3118_v17 = vshrl.u32 %v13182_v50, 16 }
 0x15c   : > { %v1680_v3 = vadd.f32 %v13025_v59, %v1488_v51  ;;  %2815 = vst.msk [vmem:[#allocation4 + $0x3c] sm:$0xf] %vm391_vm2, %v9467_v2  ;;  %v13234_v0 = vld [vmem:[#allocation2 + $0x168] sm:$0xff]  ;;  %3366 = vrot.lane.b32.xlu0 %v3117_v27, %s11415_s30  ;;  %v2321_v45 = vadd.f32 %v2257_v12, %v2193_v48  ;;  %v13243_v42 = vadd.f32 %v1682_v20, %v13094_v4  ;;  %v13251_v1 = vld [vmem:[#allocation2 + $0x190] sm:$0xff]  ;;  %19524 = vst [vmem:[#allocation73_spill] sm:$0xff] %v13253_v40 }
 0x15d   : > { %v2385_v26 = vld [vmem:[#allocation3 + $0x10a] sm:$0xff]  ;;  %v9466_v59 = vpack.c.bf16 %v13216_v16, %v13216_v16  ;;  %v13249_v51 = vadd.f32 %v13030_v33, %v13168_v11  ;;  %v2194_v14 = vadd.f32 %v2130_v6, %v2066_v57  ;;  %v1683_v2 = vadd.f32 %v13063_v44, %v1491_v24  ;;  %v19525_v20 = vld [vmem:[#allocation36_spill] sm:$0xff]  ;;  %3817 = vmatpush2.bf16.msra.mxu0 %v11169_v53  ;;  %v2384_v27 = vld [vmem:[#allocation3 + $0x102] sm:$0xff] }
 0x15e   : > { %v13255_v19 = vld [vmem:[#allocation4 + $0x30] sm:$0xff]   ;;  %v13260_v48 = vmul.f32 %v19525_v20, %v1037_v54  ;;  %v2449_v58 = vadd.f32 %v2385_v26, %v2321_v45  ;;  %v2068_v40 = vadd.f32 %v2004_v32, %v13143_v13  ;;  %v2259_v57 = vld [vmem:[#allocation3 + $0x119] sm:$0xff]  ;;  %v13269_v50 = vadd.f32 %v13164_v7, %v13234_v0  ;;  %3818 = vmatprep.subr.bf16.mxu0 %v19397_v41  ;;  %v1052_v13 = vpop.f32.mrf.mxu0  ;;  %v13282_v32 = vpop.permute.xlu1 %4270  ;;  %v2368_v7 = vld [vmem:[#allocation3 + $0x82] sm:$0xff] }
 0x15f   : > { %v11172_v33 = vld [vmem:[%s19191_s4 + $0x70] sm:$0xff]   ;;  %2814 = vst.msk [vmem:[#allocation4 + $0x38] sm:$0xf] %vm391_vm2, %v9466_v59  ;;  %v1058_v44 = vadd.f32 %v12905_v35, %v13170_v56  ;;  %v13274_v6 = vadd.f32 %v2384_v27, %v2320_v49  ;;  %v3122_v54 = vshll.u32 %v13255_v19, 16  ;;  %v13278_v45 = vadd.f32 %v1680_v3, %v13115_v55  ;;  %19526 = vst [vmem:[#allocation36_spill] sm:$0xff] %v13282_v32  ;;  %v13295_v20 = vld [vmem:[#allocation2 + $0x180] sm:$0xff] }
 0x160   : > { %v2131_v12 = vld [vmem:[#allocation3 + $0x117] sm:$0xff]  ;;  %1553 = vst.msk [vmem:[#allocation2 + $0x188] sm:$0xff] %vm358_vm4, %v13260_v48  ;;  %9761 = vmatpush2.bf16.msra.mxu1 %v11169_v53  ;;  %v13284_v56 = vmul.f32 0.04, %v2449_v58  ;;  %v3120_v59 = vor.u32 %v3118_v17, %v3116_v23  ;;  %1941 = vst.msk [vmem:[#allocation3 + $0x128] sm:$0xff] %vm358_vm4, %v13269_v50  ;;  %v13293_v3 = vadd.f32 %v13209_v10, %v13251_v1  ;;  %v2132_v58 = vld [vmem:[#allocation3 + $0x11f] sm:$0xff] }
 0x161   : > { %v2195_v24 = vadd.f32 %v2131_v12, %v2067_v63  ;;  %v2258_v26 = vld [vmem:[#allocation3 + $0x111] sm:$0xff]  ;;  %9746 = vmatprep.subr.bf16.mxu1 %v19397_v41  ;;  %v3124_v12 = vrot.slane %v3122_v54, 1  ;;  %v2432_v23 = vadd.f32 %v2368_v7, %v12825_v25  ;;  %3819 = vmatpush2.bf16.msra.mxu0 %v11172_v33  ;;  %v11175_v17 = vld [vmem:[%s19191_s4 + $0x68] sm:$0xff]   ;;  %v1050_v25 = vadd.f32 %v12905_v35, %v13203_v15 }
 0x162   : > { %19527 = vst [vmem:[#allocation74_spill] sm:$0xff] %v13284_v56  ;;  %v19528_v49 = vld [vmem:[#allocation43_spill] sm:$0xff]  ;;  %v13298_v53 = vadd.f32 %v2258_v26, %v2194_v14  ;;  %v9485_v10 = vpack.c.bf16 %v13284_v56, %v13284_v56  ;;  %1946 = vst.msk [vmem:[#allocation3 + $0x150] sm:$0xff] %vm358_vm4, %v13293_v3  ;;  %3820 = vmatprep.subr.bf16.mxu0 %v19397_v41  ;;  %v1813_v54 = vadd.f32 %v13041_v52, %v13234_v0 }
 0x163   : > { %v13289_v63 = vmul.f32 %v19528_v49, %v1058_v44  ;;  %v2323_v27 = vadd.f32 %v2259_v57, %v2195_v24  ;;  %v13306_v44 = vadd.f32 %v2132_v58, %v2068_v40  ;;  %v13309_v49 = vadd.f32 %v1683_v2, %v13168_v11  ;;  %v2007_v14 = vld [vmem:[#allocation3 + $0x136] sm:$0xff]  ;;  %v13319_v24 = vpop.permute.xlu0 %4282  ;;  %v13331_v58 = vpop.f32.mrf.mxu0 }
 0x164   : > { %v13317_v57 = vld [vmem:[#allocation2 + $0x198] sm:$0xff]  ;;  %19529 = vst [vmem:[#allocation43_spill] sm:$0xff] %v13319_v24  ;;  %v3125_v2 = vsel %vm3105_vm5, %v3120_v59, %v3124_v12  ;;  %v13325_v7 = vmul.f32 0.04, %v2432_v23  ;;  %v13329_v26 = vadd.f32 %v13213_v22, %v13295_v20  ;;  %9762 = vmatpush2.bf16.msra.mxu1 %v11172_v33  ;;  %2833 = vst.msk [vmem:[#allocation4 + $0x84] sm:$0xf] %vm391_vm2, %v9485_v10 }
 0x165   : > { %1558 = vst.msk [vmem:[#allocation2 + $0x1b0] sm:$0xff] %vm358_vm4, %v13289_v63  ;;  %v2242_v40 = vld [vmem:[#allocation3 + $0x91] sm:$0xff]  ;;  %3368 = vrot.lane.b32.xlu1 %v3125_v2, %s11415_s30  ;;  %v3126_v15 = vshrl.u32 %v13255_v19, 16  ;;  %v19531_v24 = vld [vmem:[#allocation41_spill] sm:$0xff]  ;;  %v13339_v52 = vmul.f32 0.04, %v12889_v34  ;;  %9747 = vmatprep.subr.bf16.mxu1 %v19397_v41  ;;  %v2071_v33 = vadd.f32 %v2007_v14, %v13187_v62  ;;  %v1061_v19 = vadd.f32 %v12905_v35, %v13236_v39  ;;  %v13355_v34 = vpop.permute.xlu1 %4278 }
 0x166   : > { %19530 = vst [vmem:[#allocation75_spill] sm:$0xff] %v13325_v7  ;;  %v1492_v59 = vmul.f32 %v19531_v24, %v1050_v25  ;;  %v2306_v32 = vadd.f32 %v2242_v40, %v12841_v8  ;;  %v2370_v22 = vld [vmem:[#allocation3 + $0x92] sm:$0xff]  ;;  %v9468_v10 = vpack.c.bf16 %v13325_v7, %v13325_v7  ;;  %1944 = vst.msk [vmem:[#allocation3 + $0x140] sm:$0xff] %vm358_vm4, %v13329_v26  ;;  %3821 = vmatpush2.bf16.msra.mxu0 %v11175_v17  ;;  %v2387_v25 = vld [vmem:[#allocation3 + $0x11a] sm:$0xff] }
 0x167   : > { %19532 = vst [vmem:[#allocation41_spill] sm:$0xff] %v13339_v52  ;;  %v13342_v23 = vld [vmem:[#allocation4 + $0x38] sm:$0xff]   ;;  %v13353_v8 = vadd.f32 %v13249_v51, %v13317_v57  ;;  %19533 = vst [vmem:[#allocation76_spill] sm:$0xff] %v13355_v34  ;;  %v1681_v62 = vadd.f32 %v13081_v21, %v13260_v48  ;;  %v9471_v24 = vpack.c.bf16 %v13339_v52, %v13339_v52  ;;  %3822 = vmatprep.subr.bf16.mxu0 %v19397_v41  ;;  %v2005_v34 = vld [vmem:[#allocation3 + $0x126] sm:$0xff] }
 0x168   : > { %1556 = vst.msk [vmem:[#allocation2 + $0x1a0] sm:$0xff] %vm358_vm4, %v1492_v59  ;;  %v2434_v14 = vadd.f32 %v2370_v22, %v2306_v32  ;;  %v1053_v40 = vadd.f32 %v12905_v35, %v1052_v13  ;;  %v13364_v39 = vadd.f32 %v2387_v25, %v2323_v27  ;;  %v3128_v51 = vor.u32 %v3126_v15, %v3124_v12  ;;  %v2006_v56 = vld [vmem:[#allocation3 + $0x12e] sm:$0xff]  ;;  %v1065_v22 = vpop.f32.mrf.mxu0  ;;  %v2135_v13 = vld [vmem:[#allocation3 + $0x137] sm:$0xff]  ;;  %v2260_v15 = vld [vmem:[#allocation3 + $0x121] sm:$0xff] }
 0x169   : > { %v3130_v2 = vshll.u32 %v13342_v23, 16  ;;  %2816 = vst.msk [vmem:[#allocation4 + $0x40] sm:$0xf] %vm391_vm2, %v9468_v10  ;;  %v19534_v21 = vld [vmem:[#allocation42_spill] sm:$0xff]  ;;  %9763 = vmatpush2.bf16.msra.mxu1 %v11175_v17  ;;  %v2069_v27 = vadd.f32 %v2005_v34, %v13269_v50  ;;  %v2070_v12 = vadd.f32 %v2006_v56, %v13119_v29  ;;  %v1818_v25 = vadd.f32 %v13079_v5, %v13251_v1  ;;  %v13380_v10 = vpop.permute.xlu0 %4290  ;;  %v19537_v29 = vld [vmem:[#allocation40_spill] sm:$0xff] }
 0x16a   : > { %v1495_v48 = vmul.f32 %v19534_v21, %v1061_v19  ;;  %1947 = vst.msk [vmem:[#allocation3 + $0x158] sm:$0xff] %vm358_vm4, %v13353_v8  ;;  %v13371_v32 = vld [vmem:[#allocation2 + $0x188] sm:$0xff]  ;;  %v13377_v52 = vmul.f32 0.04, %v2434_v14  ;;  %19536 = vst [vmem:[#allocation77_spill] sm:$0xff] %v13380_v10  ;;  %9748 = vmatprep.subr.bf16.mxu1 %v19397_v41  ;;  %v13383_v21 = vadd.f32 %v2135_v13, %v2071_v33 }
 0x16b   : > { %2819 = vst.msk [vmem:[#allocation4 + $0x4c] sm:$0xf] %vm391_vm2, %v9471_v24  ;;  %v3132_v19 = vrot.slane %v3130_v2, 1  ;;  %v2133_v17 = vld [vmem:[#allocation3 + $0x127] sm:$0xff]  ;;  %v1686_v50 = vadd.f32 %v13094_v4, %v13289_v63  ;;  %v1493_v56 = vmul.f32 %v19537_v29, %v1053_v40  ;;  %v13390_v5 = vadd.f32 %v1681_v62, %v13234_v0  ;;  %v2134_v2 = vld [vmem:[#allocation3 + $0x12f] sm:$0xff] }
 0x16c   : > { %19535 = vst [vmem:[#allocation42_spill] sm:$0xff] %v13377_v52  ;;  %1559 = vst.msk [vmem:[#allocation2 + $0x1b8] sm:$0xff] %vm358_vm4, %v1495_v48  ;;  %v2197_v34 = vadd.f32 %v2133_v17, %v2069_v27  ;;  %v9470_v14 = vpack.c.bf16 %v13377_v52, %v13377_v52  ;;  %v13395_v24 = vadd.f32 %v1813_v54, %v13371_v32  ;;  %v13397_v33 = vld [vmem:[#allocation2 + $0x1b0] sm:$0xff]  ;;  %v11178_v4 = vld [vmem:[%s19191_s4 + $0x60] sm:$0xff]   ;;  %v13408_v54 = vpop.f32.mrf.mxu0  ;;  %v13410_v17 = vpop.permute.xlu1 %4286 }
 0x16d   : > { %v3133_v63 = vsel %vm3105_vm5, %v3128_v51, %v3132_v19  ;;  %v2261_v40 = vld [vmem:[#allocation3 + $0x129] sm:$0xff]  ;;  %v2324_v62 = vadd.f32 %v2260_v15, %v13306_v44  ;;  %v1684_v13 = vadd.f32 %v13115_v55, %v1492_v59  ;;  %v1816_v27 = vadd.f32 %v13137_v31, %v13295_v20  ;;  %1557 = vst.msk [vmem:[#allocation2 + $0x1a8] sm:$0xff] %vm358_vm4, %v1493_v56 }
 0x16e   : > { %19538 = vst [vmem:[#allocation40_spill] sm:$0xff] %v13410_v17  ;;  %v2372_v29 = vld [vmem:[#allocation3 + $0xa2] sm:$0xff]  ;;  %3370 = vrot.lane.b32.xlu0 %v3133_v63, %s11415_s30  ;;  %v2198_v10 = vadd.f32 %v2134_v2, %v2070_v12  ;;  %v2325_v51 = vadd.f32 %v2261_v40, %v2197_v34  ;;  %2818 = vst.msk [vmem:[#allocation4 + $0x48] sm:$0xf] %vm391_vm2, %v9470_v14  ;;  %v1687_v44 = vadd.f32 %v13168_v11, %v1495_v48  ;;  %v2389_v59 = vld [vmem:[#allocation3 + $0x12a] sm:$0xff]  ;;  %v13439_v2 = vpop.permute.xlu0 %4298 }
 0x16f   : > { %1945 = vst.msk [vmem:[#allocation3 + $0x148] sm:$0xff] %vm358_vm4, %v13395_v24  ;;  %v1074_v55 = vadd.f32 %v12905_v35, %v13331_v58  ;;  %v2388_v31 = vld [vmem:[#allocation3 + $0x122] sm:$0xff]  ;;  %v13420_v15 = vadd.f32 %v1686_v50, %v13251_v1  ;;  %v3134_v17 = vshrl.u32 %v13342_v23, 16  ;;  %v13425_v12 = vadd.f32 %v13173_v28, %v13317_v57  ;;  %3823 = vmatpush2.bf16.msra.mxu0 %v11178_v4  ;;  %v11181_v11 = vld [vmem:[%s19191_s4 + $0x58] sm:$0xff]  }
 0x170   : > { %v13428_v34 = vadd.f32 %v1818_v25, %v13397_v33  ;;  %v2453_v58 = vadd.f32 %v2389_v59, %v2325_v51  ;;  %v11150_v48 = vld [vmem:[#allocation4 + $0x40] sm:$0xff]   ;;  %v13435_v50 = vadd.f32 %v13226_v18, %v13371_v32  ;;  %v19539_v23 = vld [vmem:[#allocation47_spill] sm:$0xff]  ;;  %v2436_v28 = vadd.f32 %v2372_v29, %v12940_v30  ;;  %3824 = vmatprep.subr.bf16.mxu0 %v19397_v41 }
 0x171   : > { %v2008_v14 = vld [vmem:[#allocation3 + $0x13e] sm:$0xff]  ;;  %v1498_v63 = vmul.f32 %v19539_v23, %v1074_v55  ;;  %19540 = vst [vmem:[#allocation47_spill] sm:$0xff] %v13439_v2  ;;  %v2262_v25 = vld [vmem:[#allocation3 + $0x131] sm:$0xff]  ;;  %v13442_v40 = vadd.f32 %v2388_v31, %v2324_v62  ;;  %v3136_v52 = vor.u32 %v3134_v17, %v3132_v19  ;;  %v13445_v51 = vadd.f32 %v1684_v13, %v13295_v20  ;;  %v13452_v55 = vpop.f32.mrf.mxu0 }
 0x172   : > { %1950 = vst.msk [vmem:[#allocation3 + $0x170] sm:$0xff] %vm358_vm4, %v13428_v34  ;;  %v1066_v18 = vadd.f32 %v12905_v35, %v1065_v22  ;;  %v13450_v59 = vld [vmem:[#allocation2 + $0x1a0] sm:$0xff]  ;;  %9764 = vmatpush2.bf16.msra.mxu1 %v11178_v4  ;;  %v13454_v30 = vadd.f32 %v2262_v25, %v2198_v10  ;;  %v13456_v29 = vmul.f32 0.04, %v2453_v58  ;;  %v3138_v62 = vshll.u32 %v11150_v48, 16  ;;  %v13470_v58 = vpop.permute.xlu1 %4294  ;;  %v2246_v23 = vld [vmem:[#allocation3 + $0xb1] sm:$0xff] }
 0x173   : > { %v2263_v31 = vld [vmem:[#allocation3 + $0x139] sm:$0xff]  ;;  %v13459_v19 = vadd.f32 %v1687_v44, %v13317_v57  ;;  %1562 = vst.msk [vmem:[#allocation2 + $0x1d0] sm:$0xff] %vm358_vm4, %v1498_v63  ;;  %9749 = vmatprep.subr.bf16.mxu1 %v19397_v41  ;;  %v2072_v22 = vadd.f32 %v2008_v14, %v13329_v26  ;;  %v1685_v13 = vadd.f32 %v13234_v0, %v1493_v56  ;;  %v13465_v17 = vmul.f32 0.04, %v2436_v28  ;;  %v19543_v4 = vld [vmem:[#allocation45_spill] sm:$0xff]  ;;  %v11185_v0 = vld [vmem:[%s19191_s4 + $0x50] sm:$0xff]  }
 0x174   : > { %19541 = vst [vmem:[#allocation78_spill] sm:$0xff] %v13456_v29  ;;  %v13468_v10 = vmul.f32 %v19543_v4, %v1066_v18  ;;  %19544 = vst [vmem:[#allocation45_spill] sm:$0xff] %v13470_v58  ;;  %3825 = vmatpush2.bf16.msra.mxu0 %v11181_v11  ;;  %v9489_v44 = vpack.c.bf16 %v13456_v29, %v13456_v29  ;;  %v3140_v25 = vrot.slane %v3138_v62, 1  ;;  %v3142_v2 = vshrl.u32 %v11150_v48, 16  ;;  %v2011_v7 = vld [vmem:[#allocation3 + $0x156] sm:$0xff]  ;;  %v13492_v18 = vpop.f32.mrf.mxu0 }
 0x175   : > { %19542 = vst [vmem:[#allocation79_spill] sm:$0xff] %v13465_v17  ;;  %v13475_v16 = vadd.f32 %v1816_v27, %v13450_v59  ;;  %3826 = vmatprep.subr.bf16.mxu0 %v19397_v41  ;;  %v2327_v26 = vadd.f32 %v2263_v31, %v13383_v21  ;;  %v13482_v56 = vld [vmem:[#allocation4 + $0x48] sm:$0xff]   ;;  %v9472_v28 = vpack.c.bf16 %v13465_v17, %v13465_v17  ;;  %v13490_v48 = vmul.f32 0.04, %v12994_v38  ;;  %v13505_v38 = vpop.permute.xlu0 %4306 }
 0x176   : > { %v2009_v14 = vld [vmem:[#allocation3 + $0x146] sm:$0xff]  ;;  %1560 = vst.msk [vmem:[#allocation2 + $0x1c0] sm:$0xff] %vm358_vm4, %v13468_v10  ;;  %v2310_v27 = vadd.f32 %v2246_v23, %v12952_v9  ;;  %9765 = vmatpush2.bf16.msra.mxu1 %v11181_v11  ;;  %v3141_v21 = vsel %vm3105_vm5, %v3136_v52, %v3140_v25  ;;  %v2010_v62 = vld [vmem:[#allocation3 + $0x14e] sm:$0xff]  ;;  %v13499_v4 = vadd.f32 %v13243_v42, %v13397_v33  ;;  %19545 = vst [vmem:[#allocation80_spill] sm:$0xff] %v13505_v38  ;;  %v1081_v29 = vpop.f32.mrf.mxu0  ;;  %v13525_v17 = vpop.permute.xlu1 %4302 }
 0x177   : > { %2837 = vst.msk [vmem:[#allocation4 + $0x94] sm:$0xf] %vm391_vm2, %v9489_v44  ;;  %v2073_v31 = vadd.f32 %v2009_v14, %v13395_v24  ;;  %v1077_v9 = vadd.f32 %v12905_v35, %v13408_v54  ;;  %9750 = vmatprep.subr.bf16.mxu1 %v19397_v41  ;;  %v2374_v11 = vld [vmem:[#allocation3 + $0xb2] sm:$0xff]  ;;  %3372 = vrot.lane.b32.xlu1 %v3141_v21, %s11415_s30  ;;  %v3146_v24 = vshll.u32 %v13482_v56, 16  ;;  %v2137_v42 = vld [vmem:[#allocation3 + $0x147] sm:$0xff]  ;;  %v2136_v35 = vld [vmem:[#allocation3 + $0x13f] sm:$0xff] }
 0x178   : > { %1948 = vst.msk [vmem:[#allocation3 + $0x160] sm:$0xff] %vm358_vm4, %v13475_v16  ;;  %v3144_v52 = vor.u32 %v3142_v2, %v3140_v25  ;;  %v2075_v23 = vadd.f32 %v2011_v7, %v13353_v8  ;;  %v1690_v44 = vadd.f32 %v13251_v1, %v1498_v63  ;;  %v13513_v14 = vld [vmem:[#allocation2 + $0x1b8] sm:$0xff]  ;;  %3827 = vmatpush2.bf16.msra.mxu0 %v11185_v0  ;;  %v2265_v63 = vld [vmem:[#allocation3 + $0x149] sm:$0xff] }
 0x179   : > { %2820 = vst.msk [vmem:[#allocation4 + $0x50] sm:$0xf] %vm391_vm2, %v9472_v28  ;;  %v13516_v54 = vadd.f32 %v1685_v13, %v13371_v32  ;;  %v2201_v38 = vadd.f32 %v2137_v42, %v2073_v31  ;;  %v2438_v58 = vadd.f32 %v2374_v11, %v2310_v27  ;;  %v9475_v2 = vpack.c.bf16 %v13490_v48, %v13490_v48  ;;  %v2391_v8 = vld [vmem:[#allocation3 + $0x13a] sm:$0xff]  ;;  %v19546_v28 = vld [vmem:[#allocation46_spill] sm:$0xff] }
 0x17a   : > { %3828 = vmatprep.subr.bf16.mxu0 %v19397_v41  ;;  %v2200_v7 = vadd.f32 %v2136_v35, %v2072_v22  ;;  %v13521_v25 = vrot.slane %v3146_v24, 1  ;;  %v2074_v1 = vadd.f32 %v2010_v62, %v13293_v3  ;;  %v1499_v21 = vmul.f32 %v19546_v28, %v1077_v9  ;;  %19547 = vst [vmem:[#allocation46_spill] sm:$0xff] %v13525_v17  ;;  %v2139_v27 = vld [vmem:[#allocation3 + $0x157] sm:$0xff]  ;;  %v2264_v31 = vld [vmem:[#allocation3 + $0x141] sm:$0xff]  ;;  %v2393_v62 = vld [vmem:[#allocation3 + $0x14a] sm:$0xff]  ;;  %v13565_v35 = vpop.permute.xlu0 %4314 }
 0x17b   : > { %9766 = vmatpush2.bf16.msra.mxu1 %v11185_v0  ;;  %v13527_v13 = vadd.f32 %v2391_v8, %v2327_v26  ;;  %v2329_v11 = vadd.f32 %v2265_v63, %v2201_v38  ;;  %v13529_v42 = vmul.f32 0.04, %v2438_v58  ;;  %2823 = vst.msk [vmem:[#allocation4 + $0x5c] sm:$0xf] %vm391_vm2, %v9475_v2  ;;  %v13534_v22 = vadd.f32 %v13425_v12, %v13513_v14  ;;  %v13536_v3 = vld [vmem:[#allocation2 + $0x1a8] sm:$0xff] }
 0x17c   : > { %9751 = vmatprep.subr.bf16.mxu1 %v19397_v41  ;;  %v3149_v0 = vsel %vm3105_vm5, %v3144_v52, %v13521_v25  ;;  %v13541_v26 = vadd.f32 %v2139_v27, %v2075_v23  ;;  %v13544_v9 = vadd.f32 %v1690_v44, %v13397_v33  ;;  %v1820_v58 = vadd.f32 %v13278_v45, %v13450_v59  ;;  %v2138_v12 = vld [vmem:[#allocation3 + $0x14f] sm:$0xff]  ;;  %v13559_v23 = vld [vmem:[%s19190_s3] ss:$0 sm:$0xff]  ;;  %v9654_v27 = vpop.f32.mrf.mxu0 }
 0x17d   : > { %1563 = vst.msk [vmem:[#allocation2 + $0x1d8] sm:$0xff] %vm358_vm4, %v1499_v21  ;;  %3374 = vrot.lane.b32.xlu0 %v3149_v0, %s11415_s30  ;;  %v2457_v38 = vadd.f32 %v2393_v62, %v2329_v11  ;;  %v1688_v24 = vadd.f32 %v13295_v20, %v13468_v10  ;;  %v9474_v52 = vpack.c.bf16 %v13529_v42, %v13529_v42  ;;  %1951 = vst.msk [vmem:[#allocation3 + $0x178] sm:$0xff] %vm358_vm4, %v13534_v22  ;;  %v13563_v44 = vld [vmem:[#allocation2 + $0x1d0] sm:$0xff]  ;;  %v11190_v20 = vld [vmem:[%s19191_s4 + $0x48] sm:$0xff]  }
 0x17e   : > { %v1069_v45 = vadd.f32 %v13559_v23, %v13452_v55  ;;  %19548 = vst [vmem:[#allocation81_spill] sm:$0xff] %v13565_v35  ;;  %v2202_v10 = vadd.f32 %v2138_v12, %v2074_v1  ;;  %v2328_v2 = vadd.f32 %v2264_v31, %v2200_v7  ;;  %v13572_v63 = vadd.f32 %v13435_v50, %v13536_v3  ;;  %v19550_v7 = vld [vmem:[#allocation44_spill] sm:$0xff] }
 0x17f   : > { %v2012_v8 = vld [vmem:[#allocation3 + $0x15e] sm:$0xff]  ;;  %v1090_v28 = vadd.f32 %v13559_v23, %v13492_v18  ;;  %v13576_v55 = vmul.f32 0.04, %v2457_v38  ;;  %v3150_v0 = vshrl.u32 %v13482_v56, 16  ;;  %2822 = vst.msk [vmem:[#allocation4 + $0x58] sm:$0xf] %vm391_vm2, %v9474_v52  ;;  %v1691_v1 = vadd.f32 %v13317_v57, %v1499_v21  ;;  %3829 = vmatpush2.bf16.msra.mxu0 %v11190_v20  ;;  %9767 = vmatpush2.bf16.msra.mxu1 %v11190_v20  ;;  %v13597_v57 = vpop.permute.xlu1 %4310 }
 0x180   : > { %v13578_v11 = vld [vmem:[#allocation4 + $0x50] sm:$0xff]   ;;  %v1497_v31 = vmul.f32 %v19550_v7, %v1069_v45  ;;  %1949 = vst.msk [vmem:[#allocation3 + $0x168] sm:$0xff] %vm358_vm4, %v13572_v63  ;;  %v19551_v50 = vld [vmem:[#allocation56_spill] sm:$0xff]  ;;  %v13589_v62 = vadd.f32 %v13499_v4, %v13563_v44  ;;  %v13592_v12 = vmul.f32 0.04, %v13058_v61  ;;  %v1082_v56 = vadd.f32 %v13559_v23, %v1081_v29  ;;  %3830 = vmatprep.subr.bf16.mxu0 %v19397_v41  ;;  %v2392_v52 = vld [vmem:[#allocation3 + $0x142] sm:$0xff] }
 0x181   : > { %19549 = vst [vmem:[#allocation82_spill] sm:$0xff] %v13576_v55  ;;  %v1502_v18 = vmul.f32 %v19551_v50, %v1090_v28  ;;  %v13595_v38 = vld [vmem:[#allocation2 + $0x1c0] sm:$0xff]  ;;  %19553 = vst [vmem:[#allocation56_spill] sm:$0xff] %v13597_v57  ;;  %9752 = vmatprep.subr.bf16.mxu1 %v19397_v41  ;;  %v2266_v21 = vld [vmem:[#allocation3 + $0x151] sm:$0xff]  ;;  %v9493_v45 = vpack.c.bf16 %v13576_v55, %v13576_v55  ;;  %v3154_v4 = vshll.u32 %v13578_v11, 16 }
 0x182   : > { %19552 = vst [vmem:[#allocation44_spill] sm:$0xff] %v13592_v12  ;;  %v13605_v61 = vadd.f32 %v1688_v24, %v13450_v59  ;;  %v2076_v29 = vadd.f32 %v2012_v8, %v13475_v16  ;;  %1561 = vst.msk [vmem:[#allocation2 + $0x1c8] sm:$0xff] %vm358_vm4, %v1497_v31  ;;  %v11192_v20 = vld [vmem:[%s19191_s4 + $0x40] sm:$0xff]   ;;  %v13612_v28 = vadd.f32 %v2266_v21, %v2202_v10  ;;  %v1084_v24 = vpop.f32.mrf.mxu0  ;;  %v2378_v8 = vld [vmem:[#allocation3 + $0xd2] sm:$0xff] }
 0x183   : > { %v13614_v41 = vadd.f32 %v2392_v52, %v2328_v2  ;;  %v2267_v7 = vld [vmem:[#allocation3 + $0x159] sm:$0xff]  ;;  %v1823_v50 = vadd.f32 %v13309_v49, %v13513_v14  ;;  %1566 = vst.msk [vmem:[#allocation2 + $0x1f0] sm:$0xff] %vm358_vm4, %v1502_v18  ;;  %1954 = vst.msk [vmem:[#allocation3 + $0x190] sm:$0xff] %vm358_vm4, %v13589_v62  ;;  %v9476_v16 = vpack.c.bf16 %v13592_v12, %v13592_v12  ;;  %v3156_v2 = vrot.slane %v3154_v4, 1  ;;  %v19554_v21 = vld [vmem:[#allocation49_spill] sm:$0xff]  ;;  %v13629_v49 = vpop.permute.xlu0 %4322 }
 0x184   : > { %2841 = vst.msk [vmem:[#allocation4 + $0xa4] sm:$0xf] %vm391_vm2, %v9493_v45  ;;  %v3152_v10 = vor.u32 %v3150_v0, %v13521_v25  ;;  %v1500_v52 = vmul.f32 %v19554_v21, %v1082_v56  ;;  %v13627_v35 = vadd.f32 %v1820_v58, %v13595_v38  ;;  %19555 = vst [vmem:[#allocation49_spill] sm:$0xff] %v13629_v49  ;;  %3831 = vmatpush2.bf16.msra.mxu0 %v11192_v20  ;;  %v2140_v57 = vld [vmem:[#allocation3 + $0x15f] sm:$0xff] }
 0x185   : > { %9768 = vmatpush2.bf16.msra.mxu1 %v11192_v20  ;;  %v13632_v17 = vadd.f32 %v1691_v1, %v13513_v14  ;;  %v1821_v55 = vadd.f32 %v13390_v5, %v13536_v3  ;;  %2824 = vst.msk [vmem:[#allocation4 + $0x60] sm:$0xf] %vm391_vm2, %v9476_v16  ;;  %v2442_v25 = vadd.f32 %v2378_v8, %v13074_v46  ;;  %v13639_v0 = vmul.f32 0.04, %v13124_v43  ;;  %v13641_v58 = vld [vmem:[#allocation2 + $0x1d8] sm:$0xff] }
 0x186   : > { %v3157_v56 = vsel %vm3105_vm5, %v3152_v10, %v3156_v2  ;;  %v2204_v45 = vadd.f32 %v2140_v57, %v2076_v29  ;;  %v2331_v4 = vadd.f32 %v2267_v7, %v13541_v26  ;;  %v2015_v20 = vld [vmem:[#allocation3 + $0x176] sm:$0xff]  ;;  %v13647_v1 = vadd.f32 %v13420_v15, %v13563_v44  ;;  %1564 = vst.msk [vmem:[#allocation2 + $0x1e0] sm:$0xff] %vm358_vm4, %v1500_v52  ;;  %v9657_v15 = vpop.f32.mrf.mxu0  ;;  %v13661_v29 = vpop.permute.xlu1 %4318  ;;  %v7612_v7 = vld [vmem:[%s19195_s8] sm:$0xff] }
 0x187   : > { %19556 = vst [vmem:[#allocation83_spill] sm:$0xff] %v13639_v0  ;;  %1952 = vst.msk [vmem:[#allocation3 + $0x180] sm:$0xff] %vm358_vm4, %v13627_v35  ;;  %3376 = vrot.lane.b32.xlu1 %v3157_v56, %s11415_s30  ;;  %v13653_v46 = vld [vmem:[#allocation4 + $0x58] sm:$0xff]   ;;  %v3158_v43 = vshrl.u32 %v13578_v11, 16  ;;  %v13656_v5 = vmul.f32 0.04, %v2442_v25  ;;  %v9479_v26 = vpack.c.bf16 %v13639_v0, %v13639_v0  ;;  %v1093_v57 = vadd.f32 %v13559_v23, %v9654_v27 }
 0x188   : > { %19557 = vst [vmem:[#allocation84_spill] sm:$0xff] %v13661_v29  ;;  %v1689_v16 = vadd.f32 %v13371_v32, %v1497_v31  ;;  %v2013_v8 = vld [vmem:[#allocation3 + $0x166] sm:$0xff]  ;;  %v2014_v10 = vld [vmem:[#allocation3 + $0x16e] sm:$0xff]  ;;  %v1694_v11 = vadd.f32 %v13397_v33, %v1502_v18  ;;  %v13669_v21 = vadd.f32 %v1823_v50, %v13641_v58  ;;  %v1085_v25 = vadd.f32 %v13559_v23, %v1084_v24  ;;  %v2395_v32 = vld [vmem:[#allocation3 + $0x15a] sm:$0xff] }
 0x189   : > { %v3160_v56 = vor.u32 %v3158_v43, %v3156_v2  ;;  %v3162_v27 = vshll.u32 %v13653_v46, 16  ;;  %v2079_v49 = vadd.f32 %v2015_v20, %v13534_v22  ;;  %v2077_v29 = vadd.f32 %v2013_v8, %v13572_v63  ;;  %v2268_v0 = vld [vmem:[#allocation3 + $0x161] sm:$0xff]  ;;  %2827 = vst.msk [vmem:[#allocation4 + $0x6c] sm:$0xf] %vm391_vm2, %v9479_v26  ;;  %v13685_v63 = vpop.permute.xlu0 %4330  ;;  %v1097_v26 = vpop.f32.mrf.mxu0  ;;  %v2269_v8 = vld [vmem:[#allocation3 + $0x169] sm:$0xff] }
 0x18a   : > { %v2141_v31 = vld [vmem:[#allocation3 + $0x167] sm:$0xff]  ;;  %v1692_v12 = vadd.f32 %v13450_v59, %v1500_v52  ;;  %v9478_v33 = vpack.c.bf16 %v13656_v5, %v13656_v5  ;;  %v19558_v18 = vld [vmem:[#allocation52_spill] sm:$0xff]  ;;  %1955 = vst.msk [vmem:[#allocation3 + $0x198] sm:$0xff] %vm358_vm4, %v13669_v21  ;;  %v13687_v20 = vadd.f32 %v2395_v32, %v2331_v4  ;;  %v2078_v59 = vadd.f32 %v2014_v10, %v13428_v34 }
 0x18b   : > { %v1503_v50 = vmul.f32 %v19558_v18, %v1093_v57  ;;  %v19559_v24 = vld [vmem:[#allocation48_spill] sm:$0xff]  ;;  %v13683_v22 = vld [vmem:[#allocation2 + $0x1c8] sm:$0xff]  ;;  %19560 = vst [vmem:[#allocation52_spill] sm:$0xff] %v13685_v63  ;;  %v3164_v43 = vrot.slane %v3162_v27, 1  ;;  %7996 = vrot.lane.b32.xlu1 %v7612_v7, %s11421_s20  ;;  %v2205_v52 = vadd.f32 %v2141_v31, %v2077_v29  ;;  %v13692_v57 = vadd.f32 %v1689_v16, %v13536_v3  ;;  %v13714_v16 = vpop.permute.xlu1 %4326 }
 0x18c   : > { %v1501_v2 = vmul.f32 %v19559_v24, %v1085_v25  ;;  %v2332_v18 = vadd.f32 %v2268_v0, %v2204_v45  ;;  %v13694_v25 = vld [vmem:[#allocation4 + $0x60] sm:$0xff]   ;;  %v1824_v24 = vadd.f32 %v13445_v51, %v13595_v38  ;;  %2826 = vst.msk [vmem:[#allocation4 + $0x68] sm:$0xf] %vm391_vm2, %v9478_v33  ;;  %v13702_v34 = vadd.f32 %v1821_v55, %v13683_v22  ;;  %v2143_v29 = vld [vmem:[#allocation3 + $0x177] sm:$0xff]  ;;  %v2142_v55 = vld [vmem:[#allocation3 + $0x16f] sm:$0xff] }
 0x18d   : > { %1567 = vst.msk [vmem:[#allocation2 + $0x1f8] sm:$0xff] %vm358_vm4, %v1503_v50  ;;  %v3165_v4 = vsel %vm3105_vm5, %v3160_v56, %v3164_v43  ;;  %v2333_v7 = vadd.f32 %v2269_v8, %v2205_v52  ;;  %v13706_v0 = vadd.f32 %v1694_v11, %v13563_v44  ;;  %v13710_v45 = vadd.f32 %v13459_v19, %v13641_v58  ;;  %v13712_v51 = vld [vmem:[#allocation2 + $0x1f0] sm:$0xff]  ;;  %v13724_v19 = vld [vmem:[#allocation2 + $0x1e0] sm:$0xff] }
 0x18e   : > { %1565 = vst.msk [vmem:[#allocation2 + $0x1e8] sm:$0xff] %vm358_vm4, %v1501_v2  ;;  %19561 = vst [vmem:[#allocation48_spill] sm:$0xff] %v13714_v16  ;;  %3378 = vrot.lane.b32.xlu0 %v3165_v4, %s11415_s30  ;;  %v2207_v10 = vadd.f32 %v2143_v29, %v2079_v49  ;;  %v2397_v27 = vld [vmem:[#allocation3 + $0x16a] sm:$0xff]  ;;  %v3166_v56 = vshrl.u32 %v13653_v46, 16  ;;  %v3170_v32 = vshll.u32 %v13694_v25, 16  ;;  %v13720_v11 = vadd.f32 %v1692_v12, %v13595_v38  ;;  %v2396_v33 = vld [vmem:[#allocation3 + $0x162] sm:$0xff]  ;;  %v9658_v46 = vpop.f32.mrf.mxu0  ;;  %v13737_v16 = vpop.permute.xlu0 %4338 }
 0x18f   : > { %1953 = vst.msk [vmem:[#allocation3 + $0x188] sm:$0xff] %vm358_vm4, %v13702_v34  ;;  %v2206_v31 = vadd.f32 %v2142_v55, %v2078_v59  ;;  %v2461_v52 = vadd.f32 %v2397_v27, %v2333_v7  ;;  %v13728_v49 = vadd.f32 %v13516_v54, %v13683_v22  ;;  %v1106_v8 = vadd.f32 %v13559_v23, %v9657_v15  ;;  %v19564_v7 = vld [vmem:[#allocation15_spill] sm:$0xff] }
 0x190   : > { %v13731_v4 = vadd.f32 %v2396_v33, %v2332_v18  ;;  %v3168_v29 = vor.u32 %v3166_v56, %v3164_v43  ;;  %v3172_v12 = vrot.slane %v3170_v32, 1  ;;  %v13735_v63 = vadd.f32 %v13647_v1, %v13712_v51  ;;  %19562 = vst [vmem:[#allocation85_spill] sm:$0xff] %v13737_v16  ;;  %v2382_v15 = vld [vmem:[#allocation3 + $0xf2] sm:$0xff]  ;;  %v2016_v43 = vld [vmem:[#allocation3 + $0x17e] sm:$0xff] }
 0x191   : > { %v13739_v59 = vmul.f32 0.04, %v2461_v52  ;;  %v1506_v55 = vmul.f32 %v19564_v7, %v1106_v8  ;;  %v1098_v54 = vadd.f32 %v13559_v23, %v1097_v26  ;;  %v13744_v27 = vadd.f32 %v1824_v24, %v13724_v19  ;;  %v2271_v56 = vld [vmem:[#allocation3 + $0x179] sm:$0xff]  ;;  %v2270_v52 = vld [vmem:[#allocation3 + $0x171] sm:$0xff] }
 0x192   : > { %v3173_v18 = vsel %vm3105_vm5, %v3168_v29, %v3172_v12  ;;  %v1695_v32 = vadd.f32 %v13513_v14, %v1503_v50  ;;  %v1693_v1 = vadd.f32 %v13536_v3, %v1501_v2  ;;  %1958 = vst.msk [vmem:[#allocation3 + $0x1b0] sm:$0xff] %vm358_vm4, %v13735_v63  ;;  %v13752_v33 = vmul.f32 0.04, %v13149_v47  ;;  %v19566_v14 = vld [vmem:[#allocation13_spill] sm:$0xff]  ;;  %v1100_v50 = vpop.f32.mrf.mxu0  ;;  %v13765_v2 = vpop.permute.xlu1 %4334  ;;  %v2019_v7 = vld [vmem:[#allocation3 + $0x196] sm:$0xff] }
 0x193   : > { %19563 = vst [vmem:[#allocation86_spill] sm:$0xff] %v13739_v59  ;;  %v9497_v26 = vpack.c.bf16 %v13739_v59, %v13739_v59  ;;  %3380 = vrot.lane.b32.xlu1 %v3173_v18, %s11415_s30  ;;  %v13757_v24 = vld [vmem:[#allocation4 + $0x68] sm:$0xff]   ;;  %v3174_v8 = vshrl.u32 %v13694_v25, 16  ;;  %1570 = vst.msk [vmem:[#allocation2 + $0x210] sm:$0xff] %vm358_vm4, %v1506_v55  ;;  %v1504_v3 = vmul.f32 %v19566_v14, %v1098_v54  ;;  %v13772_v25 = vmul.f32 0.04, %v13223_v60 }
 0x194   : > { %19565 = vst [vmem:[#allocation15_spill] sm:$0xff] %v13752_v33  ;;  %1956 = vst.msk [vmem:[#allocation3 + $0x1a0] sm:$0xff] %vm358_vm4, %v13744_v27  ;;  %v2446_v47 = vadd.f32 %v2382_v15, %v13147_v37  ;;  %v13767_v29 = vadd.f32 %v2270_v52, %v2206_v31  ;;  %v9480_v18 = vpack.c.bf16 %v13752_v33, %v13752_v33  ;;  %v3178_v15 = vshll.u32 %v13757_v24, 16  ;;  %v13779_v52 = vld [vmem:[#allocation2 + $0x1f8] sm:$0xff] }
 0x195   : > { %19567 = vst [vmem:[#allocation13_spill] sm:$0xff] %v13765_v2  ;;  %19568 = vst [vmem:[#allocation87_spill] sm:$0xff] %v13772_v25  ;;  %v1109_v16 = vadd.f32 %v13559_v23, %v9658_v46  ;;  %v2080_v54 = vadd.f32 %v2016_v43, %v13627_v35  ;;  %v2335_v14 = vadd.f32 %v2271_v56, %v2207_v10  ;;  %v13790_v10 = vpop.permute.xlu0 %4346  ;;  %v13795_v33 = vld [vmem:[#allocation2 + $0x1e8] sm:$0xff] }
 0x196   : > { %2845 = vst.msk [vmem:[#allocation4 + $0xb4] sm:$0xf] %vm391_vm2, %v9497_v26  ;;  %v3176_v37 = vor.u32 %v3174_v8, %v3172_v12  ;;  %v2017_v2 = vld [vmem:[#allocation3 + $0x186] sm:$0xff]  ;;  %v2018_v31 = vld [vmem:[#allocation3 + $0x18e] sm:$0xff]  ;;  %v13782_v59 = vadd.f32 %v1695_v32, %v13641_v58  ;;  %2828 = vst.msk [vmem:[#allocation4 + $0x70] sm:$0xf] %vm391_vm2, %v9480_v18  ;;  %v9483_v35 = vpack.c.bf16 %v13772_v25, %v13772_v25 }
 0x197   : > { %1568 = vst.msk [vmem:[#allocation2 + $0x200] sm:$0xff] %vm358_vm4, %v1504_v3  ;;  %v2081_v60 = vadd.f32 %v2017_v2, %v13702_v34  ;;  %v13786_v46 = vmul.f32 0.04, %v2446_v47  ;;  %19569 = vst [vmem:[#allocation88_spill] sm:$0xff] %v13790_v10  ;;  %v3180_v12 = vrot.slane %v3178_v15, 1  ;;  %v2083_v43 = vadd.f32 %v2019_v7, %v13669_v21  ;;  %v2145_v56 = vld [vmem:[#allocation3 + $0x187] sm:$0xff]  ;;  %v9661_v34 = vpop.f32.mrf.mxu0 }
 0x198   : > { %v1698_v26 = vadd.f32 %v13563_v44, %v1506_v55  ;;  %v19570_v8 = vld [vmem:[#allocation10_spill] sm:$0xff]  ;;  %v2144_v2 = vld [vmem:[#allocation3 + $0x17f] sm:$0xff]  ;;  %v2082_v47 = vadd.f32 %v2018_v31, %v13589_v62  ;;  %2831 = vst.msk [vmem:[#allocation4 + $0x7c] sm:$0xf] %vm391_vm2, %v9483_v35  ;;  %v13803_v21 = vadd.f32 %v13710_v45, %v13779_v52  ;;  %v13807_v55 = vadd.f32 %v1693_v1, %v13683_v22  ;;  %v13811_v31 = vpop.permute.xlu1 %4342  ;;  %v2147_v45 = vld [vmem:[#allocation3 + $0x197] sm:$0xff] }
 0x199   : > { %v1507_v32 = vmul.f32 %v19570_v8, %v1109_v16  ;;  %v2209_v18 = vadd.f32 %v2145_v56, %v2081_v60  ;;  %v9482_v25 = vpack.c.bf16 %v13786_v46, %v13786_v46  ;;  %v2208_v7 = vadd.f32 %v2144_v2, %v2080_v54  ;;  %v2399_v44 = vld [vmem:[#allocation3 + $0x17a] sm:$0xff]  ;;  %v2273_v15 = vld [vmem:[#allocation3 + $0x189] sm:$0xff]  ;;  %19571 = vst [vmem:[#allocation10_spill] sm:$0xff] %v13811_v31 }
 0x19a   : > { %v3181_v16 = vsel %vm3105_vm5, %v3176_v37, %v3180_v12  ;;  %v1696_v62 = vadd.f32 %v13595_v38, %v1504_v3  ;;  %v13813_v60 = vadd.f32 %v2399_v44, %v2335_v14  ;;  %v2272_v35 = vld [vmem:[#allocation3 + $0x181] sm:$0xff]  ;;  %1959 = vst.msk [vmem:[#allocation3 + $0x1b8] sm:$0xff] %vm358_vm4, %v13803_v21  ;;  %v1101_v1 = vadd.f32 %v13559_v23, %v1100_v50  ;;  %v2146_v37 = vld [vmem:[#allocation3 + $0x18f] sm:$0xff] }
 0x19b   : > { %1571 = vst.msk [vmem:[#allocation2 + $0x218] sm:$0xff] %vm358_vm4, %v1507_v32  ;;  %3382 = vrot.lane.b32.xlu0 %v3181_v16, %s11415_s30  ;;  %v2337_v54 = vadd.f32 %v2273_v15, %v2209_v18  ;;  %v13822_v38 = vadd.f32 %v13728_v49, %v13795_v33  ;;  %v2211_v3 = vadd.f32 %v2147_v45, %v2083_v43  ;;  %v2401_v14 = vld [vmem:[#allocation3 + $0x18a] sm:$0xff]  ;;  %v3182_v8 = vshrl.u32 %v13757_v24, 16  ;;  %v1113_v18 = vpop.f32.mrf.mxu0  ;;  %v19572_v50 = vld [vmem:[#allocation9_spill] sm:$0xff]  ;;  %v13836_v43 = vpop.permute.xlu0 %4354  ;;  %v19574_v45 = vld [vmem:[#allocation19_spill] sm:$0xff] }
 0x19c   : > { %2830 = vst.msk [vmem:[#allocation4 + $0x78] sm:$0xf] %vm391_vm2, %v9482_v25  ;;  %v13825_v56 = vadd.f32 %v1698_v26, %v13712_v51  ;;  %v1122_v2 = vadd.f32 %v13559_v23, %v9661_v34  ;;  %v13829_v25 = vld [vmem:[#allocation2 + $0x210] sm:$0xff]  ;;  %v2210_v44 = vadd.f32 %v2146_v37, %v2082_v47  ;;  %v1505_v15 = vmul.f32 %v19572_v50, %v1101_v1  ;;  %v2020_v37 = vld [vmem:[#allocation3 + $0x19e] sm:$0xff] }
 0x19d   : > { %v2465_v16 = vadd.f32 %v2401_v14, %v2337_v54  ;;  %1957 = vst.msk [vmem:[#allocation3 + $0x1a8] sm:$0xff] %vm358_vm4, %v13822_v38  ;;  %v1830_v49 = vadd.f32 %v13544_v9, %v13712_v51  ;;  %19573 = vst [vmem:[#allocation9_spill] sm:$0xff] %v13836_v43  ;;  %v13838_v26 = vadd.f32 %v2272_v35, %v2208_v7  ;;  %v11159_v24 = vld [vmem:[#allocation4 + $0x70] sm:$0xff]   ;;  %v13845_v47 = vmul.f32 0.04, %v13274_v6  ;;  %v2275_v43 = vld [vmem:[#allocation3 + $0x199] sm:$0xff] }
 0x19e   : > { %v13841_v34 = vadd.f32 %v1696_v62, %v13724_v19  ;;  %v1510_v10 = vmul.f32 %v19574_v45, %v1122_v2  ;;  %v3184_v1 = vor.u32 %v3182_v8, %v3180_v12  ;;  %1569 = vst.msk [vmem:[#allocation2 + $0x208] sm:$0xff] %vm358_vm4, %v1505_v15  ;;  %v1114_v7 = vadd.f32 %v13559_v23, %v1113_v18  ;;  %v2274_v35 = vld [vmem:[#allocation3 + $0x191] sm:$0xff]  ;;  %v1704_v12 = vld [vmem:[#allocation2 + $0x200] sm:$0xff]  ;;  %v13859_v8 = vpop.permute.xlu1 %4350 }
 0x19f   : > { %v13847_v54 = vmul.f32 0.04, %v2465_v16  ;;  %v13851_v9 = vadd.f32 %v1830_v49, %v13829_v25  ;;  %v3186_v14 = vshll.u32 %v11159_v24, 16  ;;  %v1699_v62 = vadd.f32 %v13641_v58, %v1507_v32  ;;  %19576 = vst [vmem:[#allocation89_spill] sm:$0xff] %v13859_v8  ;;  %v2386_v16 = vld [vmem:[#allocation3 + $0x112] sm:$0xff]  ;;  %v19577_v58 = vld [vmem:[#allocation17_spill] sm:$0xff] }
 0x1a0   : > { %1574 = vst.msk [vmem:[#allocation2 + $0x230] sm:$0xff] %vm358_vm4, %v1510_v10  ;;  %v1702_v6 = vadd.f32 %v13712_v51, %v1510_v10  ;;  %v9484_v2 = vpack.c.bf16 %v13845_v47, %v13845_v47  ;;  %v13861_v50 = vadd.f32 %v2274_v35, %v2210_v44  ;;  %v1778_v49 = vld [vmem:[#allocation2 + $0x250] sm:$0xff]  ;;  %v1508_v32 = vmul.f32 %v19577_v58, %v1114_v7 }
 0x1a1   : > { %19575 = vst [vmem:[#allocation19_spill] sm:$0xff] %v13847_v54  ;;  %v9501_v18 = vpack.c.bf16 %v13847_v54, %v13847_v54  ;;  %1962 = vst.msk [vmem:[#allocation3 + $0x1d0] sm:$0xff] %vm358_vm4, %v13851_v9  ;;  %v1828_v51 = vadd.f32 %v13605_v61, %v13724_v19  ;;  %v3188_v10 = vrot.slane %v3186_v14, 1  ;;  %v2084_v45 = vadd.f32 %v2020_v37, %v13744_v27  ;;  %v1846_v31 = vld [vmem:[#allocation2 + $0x270] sm:$0xff]  ;;  %v13884_v37 = vpop.permute.xlu0 %4362 }
 0x1a2   : > { %v3190_v44 = vshrl.u32 %v11159_v24, 16  ;;  %v1770_v35 = vadd.f32 %v13829_v25, %v1702_v6  ;;  %2832 = vst.msk [vmem:[#allocation4 + $0x80] sm:$0xf] %vm391_vm2, %v9484_v2  ;;  %v1700_v7 = vadd.f32 %v13724_v19, %v1508_v32  ;;  %v2450_v61 = vadd.f32 %v2386_v16, %v13298_v53  ;;  %19578 = vst [vmem:[#allocation17_spill] sm:$0xff] %v13884_v37  ;;  %v2023_v53 = vld [vmem:[#allocation3 + $0x1b6] sm:$0xff] }
 0x1a3   : > { %v13871_v8 = vld [vmem:[#allocation4 + $0x78] sm:$0xff]   ;;  %2849 = vst.msk [vmem:[#allocation4 + $0xc4] sm:$0xf] %vm391_vm2, %v9501_v18  ;;  %v13878_v58 = vadd.f32 %v1828_v51, %v1704_v12  ;;  %v13882_v27 = vmul.f32 0.04, %v13364_v39  ;;  %v3189_v24 = vsel %vm3105_vm5, %v3184_v1, %v3188_v10  ;;  %v13889_v54 = vadd.f32 %v2275_v43, %v2211_v3  ;;  %v1776_v43 = vld [vmem:[#allocation2 + $0x240] sm:$0xff] }
 0x1a4   : > { %1572 = vst.msk [vmem:[#allocation2 + $0x220] sm:$0xff] %vm358_vm4, %v1508_v32  ;;  %v3192_v14 = vor.u32 %v3190_v44, %v3188_v10  ;;  %v3194_v6 = vshll.u32 %v13871_v8, 16  ;;  %v2021_v2 = vld [vmem:[#allocation3 + $0x1a6] sm:$0xff]  ;;  %v1842_v18 = vadd.f32 %v1778_v49, %v1770_v35  ;;  %3384 = vrot.lane.b32.xlu1 %v3189_v24, %s11415_s30  ;;  %v13892_v19 = vadd.f32 %v1699_v62, %v13779_v52  ;;  %v13902_v62 = vpop.permute.xlu1 %4358 }
 0x1a5   : > { %v1697_v39 = vadd.f32 %v13683_v22, %v1505_v15  ;;  %v2085_v16 = vadd.f32 %v2021_v2, %v13822_v38  ;;  %1960 = vst.msk [vmem:[#allocation3 + $0x1c0] sm:$0xff] %vm358_vm4, %v13878_v58  ;;  %v2148_v1 = vld [vmem:[#allocation3 + $0x19f] sm:$0xff]  ;;  %v2149_v51 = vld [vmem:[#allocation3 + $0x1a7] sm:$0xff]  ;;  %v1834_v10 = vadd.f32 %v13706_v0, %v13829_v25  ;;  %v1768_v3 = vadd.f32 %v1704_v12, %v1700_v7 }
 0x1a6   : > { %v3196_v32 = vrot.slane %v3194_v6, 1  ;;  %v13900_v44 = vadd.f32 %v1846_v31, %v1842_v18  ;;  %19579 = vst [vmem:[#allocation90_spill] sm:$0xff] %v13902_v62  ;;  %v13904_v35 = vadd.f32 %v2148_v1, %v2084_v45  ;;  %v13906_v38 = vmul.f32 0.04, %v2450_v61  ;;  %v9662_v6 = vpop.f32.mrf.mxu0  ;;  %v2277_v31 = vld [vmem:[#allocation3 + $0x1a9] sm:$0xff] }
 0x1a7   : > { %v2213_v22 = vadd.f32 %v2149_v51, %v2085_v16  ;;  %v1774_v15 = vld [vmem:[#allocation2 + $0x230] sm:$0xff]  ;;  %v9487_v24 = vpack.c.bf16 %v13882_v27, %v13882_v27  ;;  %v2087_v0 = vadd.f32 %v2023_v53, %v13803_v21  ;;  %v13919_v45 = vadd.f32 %v1697_v39, %v13795_v33  ;;  %v1844_v21 = vld [vmem:[#allocation2 + $0x260] sm:$0xff] }
 0x1a8   : > { %v3197_v2 = vsel %vm3105_vm5, %v3192_v14, %v3196_v32  ;;  %v1838_v25 = vadd.f32 %v1774_v15, %v13825_v56  ;;  %v13913_v7 = vadd.f32 %v1834_v10, %v1774_v15  ;;  %1974 = vst.msk [vmem:[#allocation3 + $0x230] sm:$0xff] %vm358_vm4, %v13900_v44  ;;  %v1832_v14 = vadd.f32 %v13720_v11, %v1704_v12  ;;  %v13925_v56 = vpop.permute.xlu0 %4370  ;;  %v2405_v53 = vld [vmem:[#allocation3 + $0x1aa] sm:$0xff]  ;;  %v2151_v12 = vld [vmem:[#allocation3 + $0x1b7] sm:$0xff] }
 0x1a9   : > { %3386 = vrot.lane.b32.xlu0 %v3197_v2, %s11415_s30  ;;  %v2341_v61 = vadd.f32 %v2277_v31, %v2213_v22  ;;  %v13921_v18 = vld [vmem:[#allocation4 + $0x80] sm:$0xff]   ;;  %v1840_v16 = vadd.f32 %v1776_v43, %v1768_v3  ;;  %2835 = vst.msk [vmem:[#allocation4 + $0x8c] sm:$0xf] %vm391_vm2, %v9487_v24  ;;  %19580 = vst [vmem:[#allocation91_spill] sm:$0xff] %v13925_v56  ;;  %v3198_v39 = vshrl.u32 %v13871_v8, 16  ;;  %v1116_v2 = vpop.f32.mrf.mxu0 }
 0x1aa   : > { %v13927_v1 = vadd.f32 %v1838_v25, %v1778_v49  ;;  %1966 = vst.msk [vmem:[#allocation3 + $0x1f0] sm:$0xff] %vm358_vm4, %v13913_v7  ;;  %v9486_v10 = vpack.c.bf16 %v13906_v38, %v13906_v38  ;;  %v1125_v11 = vadd.f32 %v13559_v23, %v9662_v6  ;;  %v3202_v22 = vshll.u32 %v13921_v18, 16  ;;  %v1707_v49 = vld [vmem:[#allocation2 + $0x218] sm:$0xff]  ;;  %v2022_v25 = vld [vmem:[#allocation3 + $0x1ae] sm:$0xff] }
 0x1ab   : > { %v1772_v51 = vld [vmem:[#allocation2 + $0x220] sm:$0xff]  ;;  %v2469_v3 = vadd.f32 %v2405_v53, %v2341_v61  ;;  %v2215_v31 = vadd.f32 %v2151_v12, %v2087_v0  ;;  %v13941_v8 = vadd.f32 %v1844_v21, %v1840_v16  ;;  %v19581_v6 = vld [vmem:[#allocation14_spill] sm:$0xff]  ;;  %v1831_v53 = vadd.f32 %v13632_v17, %v13779_v52 }
 0x1ac   : > { %v1836_v15 = vadd.f32 %v1772_v51, %v13841_v34  ;;  %v13937_v24 = vadd.f32 %v1832_v14, %v1772_v51  ;;  %1970 = vst.msk [vmem:[#allocation3 + $0x210] sm:$0xff] %vm358_vm4, %v13927_v1  ;;  %v2279_v56 = vld [vmem:[#allocation3 + $0x1b9] sm:$0xff]  ;;  %v1511_v61 = vmul.f32 %v19581_v6, %v1125_v11  ;;  %v13947_v34 = vpop.permute.xlu1 %4366  ;;  %v3200_v51 = vor.u32 %v3198_v39, %v3196_v32 }
 0x1ad   : > { %2834 = vst.msk [vmem:[#allocation4 + $0x88] sm:$0xf] %vm391_vm2, %v9486_v10  ;;  %19582 = vst [vmem:[#allocation14_spill] sm:$0xff] %v13947_v34  ;;  %v13949_v14 = vmul.f32 0.04, %v2469_v3  ;;  %v3204_v0 = vrot.slane %v3202_v22, 1  ;;  %v2343_v16 = vadd.f32 %v2279_v56, %v2215_v31  ;;  %v13959_v17 = vadd.f32 %v1831_v53, %v1707_v49 }
 0x1ae   : > { %v13951_v12 = vadd.f32 %v1836_v15, %v1776_v43  ;;  %1964 = vst.msk [vmem:[#allocation3 + $0x1e0] sm:$0xff] %vm358_vm4, %v13937_v24  ;;  %1972 = vst.msk [vmem:[#allocation3 + $0x220] sm:$0xff] %vm358_vm4, %v13941_v8  ;;  %v1703_v21 = vadd.f32 %v13779_v52, %v1511_v61  ;;  %v1117_v10 = vadd.f32 %v13559_v23, %v1116_v2  ;;  %v3206_v56 = vshrl.u32 %v13921_v18, 16  ;;  %v1779_v11 = vld [vmem:[#allocation2 + $0x258] sm:$0xff]  ;;  %v1705_v3 = vld [vmem:[#allocation2 + $0x208] sm:$0xff]  ;;  %v13971_v52 = vpop.permute.xlu0 %4378 }
 0x1af   : > { %19583 = vst [vmem:[#allocation92_spill] sm:$0xff] %v13949_v14  ;;  %1575 = vst.msk [vmem:[#allocation2 + $0x238] sm:$0xff] %vm358_vm4, %v1511_v61  ;;  %v13963_v32 = vadd.f32 %v2022_v25, %v13735_v63  ;;  %v9505_v43 = vpack.c.bf16 %v13949_v14, %v13949_v14  ;;  %v3205_v39 = vsel %vm3105_vm5, %v3200_v51, %v3204_v0  ;;  %v2390_v22 = vld [vmem:[#allocation3 + $0x132] sm:$0xff]  ;;  %v2407_v23 = vld [vmem:[#allocation3 + $0x1ba] sm:$0xff]  ;;  %v13982_v61 = vmul.f32 0.04, %v13442_v40 }
 0x1b0   : > { %1968 = vst.msk [vmem:[#allocation3 + $0x200] sm:$0xff] %vm358_vm4, %v13951_v12  ;;  %19584 = vst [vmem:[#allocation93_spill] sm:$0xff] %v13971_v52  ;;  %3388 = vrot.lane.b32.xlu1 %v3205_v39, %s11415_s30  ;;  %v1771_v63 = vadd.f32 %v1707_v49, %v1703_v21  ;;  %v1835_v15 = vadd.f32 %v13782_v59, %v1707_v49  ;;  %v19585_v2 = vld [vmem:[#allocation12_spill] sm:$0xff]  ;;  %v1829_v25 = vadd.f32 %v13692_v57, %v13795_v33  ;;  %v2394_v59 = vld [vmem:[#allocation3 + $0x152] sm:$0xff] }
 0x1b1   : > { %1963 = vst.msk [vmem:[#allocation3 + $0x1d8] sm:$0xff] %vm358_vm4, %v13959_v17  ;;  %v1509_v31 = vmul.f32 %v19585_v2, %v1117_v10  ;;  %v2471_v18 = vadd.f32 %v2407_v23, %v2343_v16  ;;  %v1847_v6 = vld [vmem:[#allocation2 + $0x278] sm:$0xff]  ;;  %v2454_v53 = vadd.f32 %v2390_v22, %v13454_v30  ;;  %v13986_v51 = vmul.f32 0.04, %v13527_v13  ;;  %v13996_v40 = vld [vmem:[#allocation2 + $0x248] sm:$0xff] }
 0x1b2   : > { %2853 = vst.msk [vmem:[#allocation4 + $0xd4] sm:$0xf] %vm391_vm2, %v9505_v43  ;;  %v3208_v49 = vor.u32 %v3206_v56, %v3204_v0  ;;  %v1843_v21 = vadd.f32 %v1779_v11, %v1771_v63  ;;  %v13990_v57 = vadd.f32 %v1829_v25, %v1705_v3  ;;  %v13992_v43 = vpop.permute.xlu1 %4374  ;;  %v9488_v30 = vpack.c.bf16 %v13982_v61, %v13982_v61  ;;  %v1845_v22 = vld [vmem:[#allocation2 + $0x268] sm:$0xff] }
 0x1b3   : > { %19586 = vst [vmem:[#allocation12_spill] sm:$0xff] %v13986_v51  ;;  %1573 = vst.msk [vmem:[#allocation2 + $0x228] sm:$0xff] %vm358_vm4, %v1509_v31  ;;  %v1701_v10 = vadd.f32 %v13795_v33, %v1509_v31  ;;  %v14000_v13 = vmul.f32 0.04, %v2454_v53  ;;  %v9491_v0 = vpack.c.bf16 %v13986_v51, %v13986_v51  ;;  %v2458_v39 = vadd.f32 %v2394_v59, %v13612_v28  ;;  %v14024_v53 = vpop.permute.xlu0 %4386 }
 0x1b4   : > { %19587 = vst [vmem:[#allocation94_spill] sm:$0xff] %v13992_v43  ;;  %v13994_v16 = vld [vmem:[#allocation4 + $0x88] sm:$0xff]   ;;  %v14005_v56 = vadd.f32 %v1847_v6, %v1843_v21  ;;  %1961 = vst.msk [vmem:[#allocation3 + $0x1c8] sm:$0xff] %vm358_vm4, %v13990_v57  ;;  %v14010_v23 = vmul.f32 0.04, %v13614_v41 }
 0x1b5   : > { %v1769_v33 = vadd.f32 %v1705_v3, %v1701_v10  ;;  %v14013_v63 = vmul.f32 0.04, %v13687_v20  ;;  %v14015_v2 = vmul.f32 0.04, %v2471_v18  ;;  %v3210_v31 = vshll.u32 %v13994_v16, 16  ;;  %19591 = vst [vmem:[#allocation98_spill] sm:$0xff] %v14024_v53 }
 0x1b6   : > { %19588 = vst [vmem:[#allocation95_spill] sm:$0xff] %v14010_v23  ;;  %v1775_v25 = vld [vmem:[#allocation2 + $0x238] sm:$0xff]  ;;  %2836 = vst.msk [vmem:[#allocation4 + $0x90] sm:$0xf] %vm391_vm2, %v9488_v30  ;;  %v9490_v28 = vpack.c.bf16 %v14000_v13, %v14000_v13  ;;  %v14022_v6 = vmul.f32 0.04, %v2458_v39  ;;  %v9492_v21 = vpack.c.bf16 %v14010_v23, %v14010_v23  ;;  %v1833_v53 = vadd.f32 %v13807_v55, %v1705_v3  ;;  %v14053_v52 = vpop.permute.xlu1 %4382 }
 0x1b7   : > { %19589 = vst [vmem:[#allocation96_spill] sm:$0xff] %v14013_v63  ;;  %2839 = vst.msk [vmem:[#allocation4 + $0x9c] sm:$0xf] %vm391_vm2, %v9491_v0  ;;  %v2276_v41 = vld [vmem:[#allocation3 + $0x1a1] sm:$0xff]  ;;  %v1839_v20 = vadd.f32 %v1775_v25, %v13892_v19  ;;  %v14027_v59 = vadd.f32 %v1835_v15, %v1775_v25  ;;  %v1841_v18 = vadd.f32 %v13996_v40, %v1769_v33  ;;  %v14034_v30 = vrot.slane %v3210_v31, 1  ;;  %v2398_v25 = vld [vmem:[#allocation3 + $0x172] sm:$0xff] }
 0x1b8   : > { %19590 = vst [vmem:[#allocation97_spill] sm:$0xff] %v14022_v6  ;;  %1975 = vst.msk [vmem:[#allocation3 + $0x238] sm:$0xff] %vm358_vm4, %v14005_v56  ;;  %v2024_v10 = vld [vmem:[#allocation3 + $0x1be] sm:$0xff]  ;;  %v2027_v0 = vld [vmem:[#allocation3 + $0x1d6] sm:$0xff]  ;;  %v9494_v39 = vpack.c.bf16 %v14022_v6, %v14022_v6  ;;  %v9495_v19 = vpack.c.bf16 %v14013_v63, %v14013_v63  ;;  %v14042_v15 = vmul.f32 0.04, %v13731_v4  ;;  %v2340_v43 = vadd.f32 %v2276_v41, %v13904_v35 }
 0x1b9   : > { %2838 = vst.msk [vmem:[#allocation4 + $0x98] sm:$0xf] %vm391_vm2, %v9490_v28  ;;  %v14044_v33 = vadd.f32 %v1839_v20, %v1779_v11  ;;  %v2091_v31 = vadd.f32 %v2027_v0, %v13959_v17  ;;  %v14050_v28 = vadd.f32 %v1845_v22, %v1841_v18  ;;  %2840 = vst.msk [vmem:[#allocation4 + $0xa0] sm:$0xf] %vm391_vm2, %v9492_v21  ;;  %v2155_v11 = vld [vmem:[#allocation3 + $0x1d7] sm:$0xff]  ;;  %v2400_v3 = vld [vmem:[#allocation3 + $0x182] sm:$0xff] }
 0x1ba   : > { %19592 = vst [vmem:[#allocation99_spill] sm:$0xff] %v14042_v15  ;;  %1967 = vst.msk [vmem:[#allocation3 + $0x1f8] sm:$0xff] %vm358_vm4, %v14027_v59  ;;  %v3213_v4 = vsel %vm3105_vm5, %v3208_v49, %v14034_v30  ;;  %v2283_v20 = vld [vmem:[#allocation3 + $0x1d9] sm:$0xff]  ;;  %v1773_v34 = vld [vmem:[#allocation2 + $0x228] sm:$0xff]  ;;  %v9496_v55 = vpack.c.bf16 %v14042_v15, %v14042_v15  ;;  %v2462_v17 = vadd.f32 %v2398_v25, %v13767_v29 }
 0x1bb   : > { %19593 = vst [vmem:[#allocation100_spill] sm:$0xff] %v14053_v52  ;;  %2842 = vst.msk [vmem:[#allocation4 + $0xa8] sm:$0xf] %vm391_vm2, %v9494_v39  ;;  %v2088_v22 = vadd.f32 %v2024_v10, %v13878_v58  ;;  %3390 = vrot.lane.b32.xlu0 %v3213_v4, %s11415_s30  ;;  %v2219_v35 = vadd.f32 %v2155_v11, %v2091_v31  ;;  %v1837_v49 = vadd.f32 %v1773_v34, %v13919_v45  ;;  %v2403_v21 = vld [vmem:[#allocation3 + $0x19a] sm:$0xff]  ;;  %v2150_v29 = vld [vmem:[#allocation3 + $0x1af] sm:$0xff]  ;;  %v14078_v39 = vpop.permute.xlu0 %4394 }
 0x1bc   : > { %2843 = vst.msk [vmem:[#allocation4 + $0xac] sm:$0xf] %vm391_vm2, %v9495_v19  ;;  %v14068_v41 = vadd.f32 %v1833_v53, %v1773_v34  ;;  %v2464_v18 = vadd.f32 %v2400_v3, %v13838_v26  ;;  %v2028_v0 = vld [vmem:[#allocation3 + $0x1de] sm:$0xff]  ;;  %2844 = vst.msk [vmem:[#allocation4 + $0xb0] sm:$0xf] %vm391_vm2, %v9496_v55  ;;  %v9507_v10 = vpack.c.bf16 %v14015_v2, %v14015_v2  ;;  %v2402_v45 = vld [vmem:[#allocation3 + $0x192] sm:$0xff] }
 0x1bd   : > { %1971 = vst.msk [vmem:[#allocation3 + $0x218] sm:$0xff] %vm358_vm4, %v14044_v33  ;;  %1973 = vst.msk [vmem:[#allocation3 + $0x228] sm:$0xff] %vm358_vm4, %v14050_v28  ;;  %v14074_v58 = vmul.f32 0.04, %v2462_v17  ;;  %v2467_v34 = vadd.f32 %v2403_v21, %v13889_v54  ;;  %v2214_v53 = vadd.f32 %v2150_v29, %v13963_v32  ;;  %v2404_v19 = vld [vmem:[#allocation3 + $0x1a2] sm:$0xff]  ;;  %v2347_v25 = vadd.f32 %v2283_v20, %v2219_v35  ;;  %v2411_v17 = vld [vmem:[#allocation3 + $0x1da] sm:$0xff]  ;;  %v14100_v21 = vpop.permute.xlu1 %4390 }
 0x1be   : > { %19594 = vst [vmem:[#allocation101_spill] sm:$0xff] %v14078_v39  ;;  %v14083_v26 = vadd.f32 %v1837_v49, %v13996_v40  ;;  %1965 = vst.msk [vmem:[#allocation3 + $0x1e8] sm:$0xff] %vm358_vm4, %v14068_v41  ;;  %v2025_v31 = vld [vmem:[#allocation3 + $0x1c6] sm:$0xff]  ;;  %v14087_v4 = vadd.f32 %v2404_v19, %v2340_v43  ;;  %v14090_v3 = vmul.f32 0.04, %v13813_v60  ;;  %v2466_v32 = vadd.f32 %v2402_v45, %v13861_v50  ;;  %v2026_v49 = vld [vmem:[#allocation3 + $0x1ce] sm:$0xff] }
 0x1bf   : > { %v2152_v11 = vld [vmem:[#allocation3 + $0x1bf] sm:$0xff]  ;;  %v2039_v55 = vld [vmem:[#allocation3 + $0x236] sm:$0xff]  ;;  %v9498_v54 = vpack.c.bf16 %v14074_v58, %v14074_v58  ;;  %2855 = vst.msk [vmem:[#allocation4 + $0xdc] sm:$0xf] %vm391_vm2, %v9507_v10  ;;  %v2092_v20 = vadd.f32 %v2028_v0, %v13937_v24  ;;  %v2475_v43 = vadd.f32 %v2411_v17, %v2347_v25  ;;  %19595 = vst [vmem:[#allocation102_spill] sm:$0xff] %v14100_v21  ;;  %v3214_v50 = vshrl.u32 %v13994_v16, 16 }
 0x1c0   : > { %v2216_v40 = vadd.f32 %v2152_v11, %v2088_v22  ;;  %v2103_v35 = vadd.f32 %v2039_v55, %v14005_v56  ;;  %1969 = vst.msk [vmem:[#allocation3 + $0x208] sm:$0xff] %vm358_vm4, %v14083_v26  ;;  %v2278_v60 = vld [vmem:[#allocation3 + $0x1b1] sm:$0xff]  ;;  %v2089_v39 = vadd.f32 %v2025_v31, %v13990_v57  ;;  %v9499_v22 = vpack.c.bf16 %v14090_v3, %v14090_v3  ;;  %v2156_v10 = vld [vmem:[#allocation3 + $0x1df] sm:$0xff] }
 0x1c1   : > { %v2031_v29 = vld [vmem:[#allocation3 + $0x1f6] sm:$0xff]  ;;  %2846 = vst.msk [vmem:[#allocation4 + $0xb8] sm:$0xf] %vm391_vm2, %v9498_v54  ;;  %v14107_v24 = vmul.f32 0.04, %v2464_v18  ;;  %v14109_v56 = vadd.f32 %v2278_v60, %v2214_v53  ;;  %v2280_v55 = vld [vmem:[#allocation3 + $0x1c1] sm:$0xff]  ;;  %v2090_v17 = vadd.f32 %v2026_v49, %v13851_v9  ;;  %v14116_v21 = vor.u32 %v3214_v50, %v14034_v30  ;;  %v14123_v53 = vpop.permute.xlu0 %4402 }
 0x1c2   : > { %v2167_v19 = vld [vmem:[#allocation3 + $0x237] sm:$0xff]  ;;  %v2095_v0 = vadd.f32 %v2031_v29, %v14027_v59  ;;  %v14112_v11 = vmul.f32 0.04, %v2475_v43  ;;  %2847 = vst.msk [vmem:[#allocation4 + $0xbc] sm:$0xf] %vm391_vm2, %v9499_v22  ;;  %19597 = vst [vmem:[#allocation104_spill] sm:$0xff] %v14123_v53  ;;  %v14130_v52 = vadd.f32 %v2280_v55, %v2216_v40 }
 0x1c3   : > { %19596 = vst [vmem:[#allocation103_spill] sm:$0xff] %v14107_v24  ;;  %v2231_v45 = vadd.f32 %v2167_v19, %v2103_v35  ;;  %v2295_v25 = vld [vmem:[#allocation3 + $0x239] sm:$0xff]  ;;  %v9500_v18 = vpack.c.bf16 %v14107_v24, %v14107_v24  ;;  %v14121_v59 = vmul.f32 0.04, %v2466_v32  ;;  %v14126_v35 = vadd.f32 %v2156_v10, %v2092_v20  ;;  %v2153_v29 = vld [vmem:[#allocation3 + $0x1c7] sm:$0xff]  ;;  %v2154_v9 = vld [vmem:[#allocation3 + $0x1cf] sm:$0xff] }
 0x1c4   : > { %v2035_v57 = vld [vmem:[#allocation3 + $0x216] sm:$0xff]  ;;  %v2036_v31 = vld [vmem:[#allocation3 + $0x21e] sm:$0xff]  ;;  %v9511_v50 = vpack.c.bf16 %v14112_v11, %v14112_v11  ;;  %v2217_v22 = vadd.f32 %v2153_v29, %v2089_v39  ;;  %v14133_v32 = vmul.f32 0.04, %v2467_v34  ;;  %v2037_v40 = vld [vmem:[#allocation3 + $0x226] sm:$0xff] }
 0x1c5   : > { %v2159_v16 = vld [vmem:[#allocation3 + $0x1f7] sm:$0xff]  ;;  %v2099_v54 = vadd.f32 %v2035_v57, %v14044_v33  ;;  %v2359_v60 = vadd.f32 %v2295_v25, %v2231_v45  ;;  %2848 = vst.msk [vmem:[#allocation4 + $0xc0] sm:$0xf] %vm391_vm2, %v9500_v18  ;;  %v2100_v20 = vadd.f32 %v2036_v31, %v13941_v8  ;;  %v2029_v57 = vld [vmem:[#allocation3 + $0x1e6] sm:$0xff]  ;;  %v2218_v18 = vadd.f32 %v2154_v9, %v2090_v17  ;;  %v2038_v29 = vld [vmem:[#allocation3 + $0x22e] sm:$0xff] }
 0x1c6   : > { %v2223_v43 = vadd.f32 %v2159_v16, %v2095_v0  ;;  %v2163_v49 = vld [vmem:[#allocation3 + $0x217] sm:$0xff]  ;;  %v14136_v16 = vpop.permute.xlu1 %4398  ;;  %2859 = vst.msk [vmem:[#allocation4 + $0xec] sm:$0xf] %vm391_vm2, %v9511_v50  ;;  %v2093_v55 = vadd.f32 %v2029_v57, %v14068_v41  ;;  %v9502_v34 = vpack.c.bf16 %v14121_v59, %v14121_v59  ;;  %v9503_v8 = vpack.c.bf16 %v14133_v32, %v14133_v32  ;;  %v2164_v31 = vld [vmem:[#allocation3 + $0x21f] sm:$0xff]  ;;  %v2030_v9 = vld [vmem:[#allocation3 + $0x1ee] sm:$0xff] }
 0x1c7   : > { %v2287_v30 = vld [vmem:[#allocation3 + $0x1f9] sm:$0xff]  ;;  %v2227_v0 = vadd.f32 %v2163_v49, %v2099_v54  ;;  %19598 = vst [vmem:[#allocation105_spill] sm:$0xff] %v14136_v16  ;;  %v2033_v39 = vld [vmem:[#allocation3 + $0x206] sm:$0xff]  ;;  %v2282_v41 = vld [vmem:[#allocation3 + $0x1d1] sm:$0xff]  ;;  %v2101_v16 = vadd.f32 %v2037_v40, %v14050_v28  ;;  %v2102_v37 = vadd.f32 %v2038_v29, %v13900_v44 }
 0x1c8   : > { %v2423_v19 = vld [vmem:[#allocation3 + $0x23a] sm:$0xff]  ;;  %v2351_v45 = vadd.f32 %v2287_v30, %v2223_v43  ;;  %v2097_v49 = vadd.f32 %v2033_v39, %v14083_v26  ;;  %v2157_v30 = vld [vmem:[#allocation3 + $0x1e7] sm:$0xff]  ;;  %2850 = vst.msk [vmem:[#allocation4 + $0xc8] sm:$0xf] %vm391_vm2, %v9502_v34  ;;  %2851 = vst.msk [vmem:[#allocation4 + $0xcc] sm:$0xf] %vm391_vm2, %v9503_v8  ;;  %v2228_v26 = vadd.f32 %v2164_v31, %v2100_v20 }
 0x1c9   : > { %v2032_v33 = vld [vmem:[#allocation3 + $0x1fe] sm:$0xff]  ;;  %v2487_v25 = vadd.f32 %v2423_v19, %v2359_v60  ;;  %v2281_v19 = vld [vmem:[#allocation3 + $0x1c9] sm:$0xff]  ;;  %v2221_v62 = vadd.f32 %v2157_v30, %v2093_v55  ;;  %v2294_v39 = vld [vmem:[#allocation3 + $0x231] sm:$0xff] }
 0x1ca   : > { %v2291_v10 = vld [vmem:[#allocation3 + $0x219] sm:$0xff]  ;;  %v2096_v50 = vadd.f32 %v2032_v33, %v13951_v12  ;;  %v2034_v57 = vld [vmem:[#allocation3 + $0x20e] sm:$0xff]  ;;  %v2345_v29 = vadd.f32 %v2281_v19, %v2217_v22  ;;  %v2284_v31 = vld [vmem:[#allocation3 + $0x1e1] sm:$0xff]  ;;  %v14163_v14 = vpop.permute.xlu1 %4406 }
 0x1cb   : > { %v2415_v53 = vld [vmem:[#allocation3 + $0x1fa] sm:$0xff]  ;;  %v2355_v54 = vadd.f32 %v2291_v10, %v2227_v0  ;;  %v14144_v60 = vmul.f32 0.04, %v2487_v25  ;;  %v2161_v33 = vld [vmem:[#allocation3 + $0x207] sm:$0xff]  ;;  %v2166_v25 = vld [vmem:[#allocation3 + $0x22f] sm:$0xff]  ;;  %19600 = vst [vmem:[#allocation107_spill] sm:$0xff] %v14163_v14  ;;  %v2098_v22 = vadd.f32 %v2034_v57, %v13927_v1 }
 0x1cc   : > { %v2479_v43 = vadd.f32 %v2415_v53, %v2351_v45  ;;  %v2419_v17 = vld [vmem:[#allocation3 + $0x21a] sm:$0xff]  ;;  %v14152_v53 = vpop.permute.xlu0 %9828  ;;  %v2165_v45 = vld [vmem:[#allocation3 + $0x227] sm:$0xff]  ;;  %v2225_v44 = vadd.f32 %v2161_v33, %v2097_v49  ;;  %v2230_v55 = vadd.f32 %v2166_v25, %v2102_v37  ;;  %v2406_v8 = vld [vmem:[#allocation3 + $0x1b2] sm:$0xff]  ;;  %v2094_v37 = vadd.f32 %v2030_v9, %v13913_v7 }
 0x1cd   : > { %19599 = vst [vmem:[#allocation106_spill] sm:$0xff] %v14152_v53  ;;  %v2483_v0 = vadd.f32 %v2419_v17, %v2355_v54  ;;  %v9523_v12 = vpack.c.bf16 %v14144_v60, %v14144_v60  ;;  %v2160_v28 = vld [vmem:[#allocation3 + $0x1ff] sm:$0xff]  ;;  %v2229_v40 = vadd.f32 %v2165_v45, %v2101_v16  ;;  %v2285_v34 = vld [vmem:[#allocation3 + $0x1e9] sm:$0xff]  ;;  %v2346_v17 = vadd.f32 %v2282_v41, %v2218_v18  ;;  %v2410_v49 = vld [vmem:[#allocation3 + $0x1d2] sm:$0xff] }
 0x1ce   : > { %v14154_v10 = vmul.f32 0.04, %v2479_v43  ;;  %v2289_v54 = vld [vmem:[#allocation3 + $0x209] sm:$0xff]  ;;  %v2292_v43 = vld [vmem:[#allocation3 + $0x221] sm:$0xff]  ;;  %v2349_v53 = vadd.f32 %v2285_v34, %v2221_v62  ;;  %v2224_v16 = vadd.f32 %v2160_v28, %v2096_v50  ;;  %v2422_v24 = vld [vmem:[#allocation3 + $0x232] sm:$0xff]  ;;  %v2358_v34 = vadd.f32 %v2294_v39, %v2230_v55 }
 0x1cf   : > { %v14158_v30 = vmul.f32 0.04, %v2483_v0  ;;  %2871 = vst.msk [vmem:[#allocation4 + $0x11c] sm:$0xf] %vm391_vm2, %v9523_v12  ;;  %v2288_v19 = vld [vmem:[#allocation3 + $0x201] sm:$0xff]  ;;  %v2293_v0 = vld [vmem:[#allocation3 + $0x229] sm:$0xff]  ;;  %v2353_v33 = vadd.f32 %v2289_v54, %v2225_v44  ;;  %v2356_v18 = vadd.f32 %v2292_v43, %v2228_v26  ;;  %v14172_v44 = vadd.f32 %v2406_v8, %v14109_v56 }
 0x1d0   : > { %v9515_v20 = vpack.c.bf16 %v14154_v10, %v14154_v10  ;;  %v2408_v45 = vld [vmem:[#allocation3 + $0x1c2] sm:$0xff]  ;;  %v2409_v25 = vld [vmem:[#allocation3 + $0x1ca] sm:$0xff]  ;;  %v2357_v41 = vadd.f32 %v2293_v0, %v2229_v40  ;;  %v14174_v54 = vpop.permute.xlu0 %9838  ;;  %v14178_v26 = vadd.f32 %v2410_v49, %v2346_v17  ;;  %v14184_v56 = vld [vmem:[#allocation4 + $0x98] sm:$0xff]  }
 0x1d1   : > { %v9519_v12 = vpack.c.bf16 %v14158_v30, %v14158_v30  ;;  %v2158_v62 = vld [vmem:[#allocation3 + $0x1ef] sm:$0xff]  ;;  %v2420_v9 = vld [vmem:[#allocation3 + $0x222] sm:$0xff]  ;;  %v2472_v50 = vadd.f32 %v2408_v45, %v14130_v52  ;;  %v2473_v57 = vadd.f32 %v2409_v25, %v2345_v29  ;;  %19601 = vst [vmem:[#allocation108_spill] sm:$0xff] %v14174_v54  ;;  %v14188_v45 = vadd.f32 %v2288_v19, %v2224_v16 }
 0x1d2   : > { %2863 = vst.msk [vmem:[#allocation4 + $0xfc] sm:$0xf] %vm391_vm2, %v9515_v20  ;;  %v2413_v14 = vld [vmem:[#allocation3 + $0x1ea] sm:$0xff]  ;;  %v2348_v20 = vadd.f32 %v2284_v31, %v14126_v35  ;;  %v2484_v40 = vadd.f32 %v2420_v9, %v2356_v18  ;;  %v2222_v0 = vadd.f32 %v2158_v62, %v2094_v37  ;;  %v2412_v52 = vld [vmem:[#allocation3 + $0x1e2] sm:$0xff]  ;;  %v14198_v37 = vpop.permute.xlu1 %9833 }
 0x1d3   : > { %v2417_v7 = vld [vmem:[#allocation3 + $0x20a] sm:$0xff]  ;;  %v2477_v28 = vadd.f32 %v2413_v14, %v2349_v53  ;;  %2867 = vst.msk [vmem:[#allocation4 + $0x10c] sm:$0xf] %vm391_vm2, %v9519_v12  ;;  %v2486_v14 = vadd.f32 %v2422_v24, %v2358_v34  ;;  %v14182_v53 = vmul.f32 0.04, %v2473_v57  ;;  %v14194_v17 = vld [vmem:[#allocation4 + $0xa0] sm:$0xff]  }
 0x1d4   : > { %v2421_v1 = vld [vmem:[#allocation3 + $0x22a] sm:$0xff]  ;;  %v2481_v39 = vadd.f32 %v2417_v7, %v2353_v33  ;;  %v14190_v35 = vmul.f32 0.04, %v2472_v50  ;;  %19602 = vst [vmem:[#allocation109_spill] sm:$0xff] %v14198_v37  ;;  %v14202_v24 = vmul.f32 0.04, %v2484_v40  ;;  %v2476_v16 = vadd.f32 %v2412_v52, %v2348_v20 }
 0x1d5   : > { %v14180_v55 = vld [vmem:[#allocation4 + $0x90] sm:$0xff]   ;;  %v2485_v29 = vadd.f32 %v2421_v1, %v2357_v41  ;;  %v14192_v31 = vmul.f32 0.04, %v2477_v28  ;;  %v14196_v49 = vld [vmem:[#allocation4 + $0xa8] sm:$0xff]   ;;  %v14208_v19 = vmul.f32 0.04, %v2486_v14  ;;  %v14223_v1 = vpop.permute.xlu0 %9848 }
 0x1d6   : > { %v2162_v43 = vld [vmem:[#allocation3 + $0x20f] sm:$0xff]  ;;  %v14200_v33 = vmul.f32 0.04, %v2481_v39  ;;  %v3218_v62 = vshll.u32 %v14180_v55, 16  ;;  %v9520_v41 = vpack.c.bf16 %v14202_v24, %v14202_v24  ;;  %v3226_v7 = vshll.u32 %v14184_v56, 16  ;;  %19604 = vst [vmem:[#allocation111_spill] sm:$0xff] %v14223_v1 }
 0x1d7   : > { %v14186_v8 = vadd.f32 %v2162_v43, %v2098_v22  ;;  %v14204_v25 = vmul.f32 0.04, %v2485_v29  ;;  %v9509_v22 = vpack.c.bf16 %v14182_v53, %v14182_v53  ;;  %v9513_v12 = vpack.c.bf16 %v14192_v31, %v14192_v31  ;;  %v14221_v9 = vld [vmem:[#allocation4 + $0xb0] sm:$0xff]   ;;  %v14250_v15 = vld [vmem:[#allocation4 + $0xc8] sm:$0xff]  }
 0x1d8   : > { %v9517_v18 = vpack.c.bf16 %v14200_v33, %v14200_v33  ;;  %19603 = vst [vmem:[#allocation110_spill] sm:$0xff] %v14221_v9  ;;  %v3220_v50 = vrot.slane %v3218_v62, 1  ;;  %v3222_v57 = vshrl.u32 %v14180_v55, 16  ;;  %v3230_v28 = vshrl.u32 %v14184_v56, 16  ;;  %2868 = vst.msk [vmem:[#allocation4 + $0x110] sm:$0xf] %vm391_vm2, %v9520_v41 }
 0x1d9   : > { %v9521_v34 = vpack.c.bf16 %v14204_v25, %v14204_v25  ;;  %2857 = vst.msk [vmem:[#allocation4 + $0xe4] sm:$0xf] %vm391_vm2, %v9509_v22  ;;  %2861 = vst.msk [vmem:[#allocation4 + $0xf4] sm:$0xf] %vm391_vm2, %v9513_v12  ;;  %v3234_v20 = vshll.u32 %v14194_v17, 16  ;;  %v3228_v39 = vrot.slane %v3226_v7, 1  ;;  %v9508_v37 = vpack.c.bf16 %v14190_v35, %v14190_v35 }
 0x1da   : > { %2865 = vst.msk [vmem:[#allocation4 + $0x104] sm:$0xf] %vm391_vm2, %v9517_v18  ;;  %v3238_v40 = vshrl.u32 %v14194_v17, 16  ;;  %v3242_v43 = vshll.u32 %v14196_v49, 16  ;;  %v3250_v52 = vshll.u32 %v14221_v9, 16  ;;  %v3221_v29 = vsel %vm3105_vm5, %v14116_v21, %v3220_v50  ;;  %v14237_v12 = vld [vmem:[#allocation4 + $0xb8] sm:$0xff]  }
 0x1db   : > { %2869 = vst.msk [vmem:[#allocation4 + $0x114] sm:$0xf] %vm391_vm2, %v9521_v34  ;;  %v3224_v14 = vor.u32 %v3222_v57, %v3220_v50  ;;  %v3236_v22 = vrot.slane %v3234_v20, 1  ;;  %19605 = vst [vmem:[#allocation112_spill] sm:$0xff] %v14237_v12  ;;  %v3254_v62 = vshrl.u32 %v14221_v9, 16  ;;  %v14240_v18 = vld [vmem:[#allocation4 + $0xc0] sm:$0xff]   ;;  %v14242_v34 = vpop.permute.xlu1 %9843  ;;  %3392 = vrot.lane.b32.xlu1 %v3221_v29, %s11415_s30  ;;  %v3232_v41 = vor.u32 %v3230_v28, %v3228_v39  ;;  %v14256_v29 = vpop.permute.xlu0 %9858 }
 0x1dc   : > { %19606 = vst [vmem:[#allocation113_spill] sm:$0xff] %v14240_v18  ;;  %19607 = vst [vmem:[#allocation114_spill] sm:$0xff] %v14242_v34  ;;  %v3244_v7 = vrot.slane %v3242_v43, 1  ;;  %v3252_v1 = vrot.slane %v3250_v52, 1  ;;  %v2286_v54 = vld [vmem:[#allocation3 + $0x1f1] sm:$0xff]  ;;  %v3246_v57 = vshrl.u32 %v14196_v49, 16 }
 0x1dd   : > { %v3229_v21 = vsel %vm3105_vm5, %v3224_v14, %v3228_v39  ;;  %v3240_v50 = vor.u32 %v3238_v40, %v3236_v22  ;;  %v3258_v20 = vshll.u32 %v14237_v12, 16  ;;  %19608 = vst [vmem:[#allocation115_spill] sm:$0xff] %v14250_v15  ;;  %v2350_v63 = vadd.f32 %v2286_v54, %v2222_v0  ;;  %2856 = vst.msk [vmem:[#allocation4 + $0xe0] sm:$0xf] %vm391_vm2, %v9508_v37  ;;  %v2416_v39 = vld [vmem:[#allocation3 + $0x202] sm:$0xff] }
 0x1de   : > { %3394 = vrot.lane.b32.xlu0 %v3229_v21, %s11415_s30  ;;  %v3237_v28 = vsel %vm3105_vm5, %v3232_v41, %v3236_v22  ;;  %v3256_v43 = vor.u32 %v3254_v62, %v3252_v1  ;;  %v3266_v52 = vshll.u32 %v14240_v18, 16  ;;  %19609 = vst [vmem:[#allocation116_spill] sm:$0xff] %v14256_v29  ;;  %v14258_v40 = vmul.f32 0.04, %v2476_v16 }
 0x1df   : > { %v3245_v14 = vsel %vm3105_vm5, %v3240_v50, %v3244_v7  ;;  %v3248_v34 = vor.u32 %v3246_v57, %v3244_v7  ;;  %v3260_v6 = vrot.slane %v3258_v20, 1  ;;  %v2480_v54 = vadd.f32 %v2416_v39, %v14188_v45  ;;  %3396 = vrot.lane.b32.xlu1 %v3237_v28, %s11415_s30  ;;  %v14273_v7 = vpop.permute.xlu1 %9853 }
 0x1e0   : > { %v3262_v0 = vshrl.u32 %v14237_v12, 16  ;;  %v3268_v22 = vrot.slane %v3266_v52, 1  ;;  %v14265_v62 = vmul.f32 0.04, %v14087_v4  ;;  %v3270_v41 = vshrl.u32 %v14240_v18, 16  ;;  %19611 = vst [vmem:[#allocation118_spill] sm:$0xff] %v14273_v7 }
 0x1e1   : > { %v3253_v37 = vsel %vm3105_vm5, %v3248_v34, %v3252_v1  ;;  %v3274_v16 = vshll.u32 %v14250_v15, 16  ;;  %v14271_v21 = vmul.f32 0.04, %v14172_v44  ;;  %v3261_v45 = vsel %vm3105_vm5, %v3256_v43, %v3260_v6  ;;  %v2290_v34 = vld [vmem:[#allocation3 + $0x211] sm:$0xff] }
 0x1e2   : > { %19610 = vst [vmem:[#allocation117_spill] sm:$0xff] %v14265_v62  ;;  %3398 = vrot.lane.b32.xlu0 %v3245_v14, %s11415_s30  ;;  %v9504_v50 = vpack.c.bf16 %v14265_v62, %v14265_v62  ;;  %v14280_v4 = vmul.f32 0.04, %v14178_v26  ;;  %v9522_v1 = vpack.c.bf16 %v14208_v19, %v14208_v19  ;;  %v3264_v57 = vor.u32 %v3262_v0, %v3260_v6  ;;  %v2414_v52 = vld [vmem:[#allocation3 + $0x1f2] sm:$0xff]  ;;  %v3367_v6 = vpop.permute.xlu0 %3366 }
 0x1e3   : > { %v3272_v20 = vor.u32 %v3270_v41, %v3268_v22  ;;  %v9506_v44 = vpack.c.bf16 %v14271_v21, %v14271_v21  ;;  %v9512_v28 = vpack.c.bf16 %v14258_v40, %v14258_v40  ;;  %v2354_v43 = vadd.f32 %v2290_v34, %v14186_v8  ;;  %3400 = vrot.lane.b32.xlu1 %v3253_v37, %s11415_s30  ;;  %v2418_v37 = vld [vmem:[#allocation3 + $0x212] sm:$0xff] }
 0x1e4   : > { %2852 = vst.msk [vmem:[#allocation4 + $0xd0] sm:$0xf] %vm391_vm2, %v9504_v50  ;;  %v9510_v26 = vpack.c.bf16 %v14280_v4, %v14280_v4  ;;  %2870 = vst.msk [vmem:[#allocation4 + $0x118] sm:$0xf] %vm391_vm2, %v9522_v1  ;;  %v14294_v39 = vmul.f32 0.04, %v2480_v54  ;;  %v3269_v14 = vsel %vm3105_vm5, %v3264_v57, %v3268_v22  ;;  %v2478_v8 = vadd.f32 %v2414_v52, %v2350_v63  ;;  %v14307_v22 = vpop.permute.xlu1 %9863 }
 0x1e5   : > { %v3276_v0 = vrot.slane %v3274_v16, 1  ;;  %2854 = vst.msk [vmem:[#allocation4 + $0xd8] sm:$0xf] %vm391_vm2, %v9506_v44  ;;  %v14298_v41 = vld [vmem:[#allocation4 + $0xe0] sm:$0xff]   ;;  %2860 = vst.msk [vmem:[#allocation4 + $0xf0] sm:$0xf] %vm391_vm2, %v9512_v28  ;;  %v2482_v16 = vadd.f32 %v2418_v37, %v2354_v43 }
 0x1e6   : > { %19612 = vst [vmem:[#allocation119_spill] sm:$0xff] %v14298_v41  ;;  %3402 = vrot.lane.b32.xlu0 %v3261_v45, %s11415_s30  ;;  %2858 = vst.msk [vmem:[#allocation4 + $0xe8] sm:$0xf] %vm391_vm2, %v9510_v26  ;;  %v3298_v54 = vshll.u32 %v14298_v41, 16  ;;  %v14305_v1 = vmul.f32 0.04, %v2478_v8  ;;  %v9516_v63 = vpack.c.bf16 %v14294_v39, %v14294_v39 }
 0x1e7   : > { %v3277_v50 = vsel %vm3105_vm5, %v3272_v20, %v3276_v0  ;;  %19613 = vst [vmem:[#allocation120_spill] sm:$0xff] %v14307_v22  ;;  %3404 = vrot.lane.b32.xlu1 %v3269_v14, %s11415_s30  ;;  %v3278_v45 = vshrl.u32 %v14250_v15, 16  ;;  %v14316_v20 = vpop.permute.xlu0 %3370  ;;  %v3302_v28 = vshrl.u32 %v14298_v41, 16  ;;  %v14327_v26 = vmul.f32 0.04, %v2482_v16  ;;  %v14349_v9 = vld [vmem:[#allocation4 + $0x110] sm:$0xff]  }
 0x1e8   : > { %v9514_v34 = vpack.c.bf16 %v14305_v1, %v14305_v1  ;;  %v3300_v57 = vrot.slane %v3298_v54, 1  ;;  %2864 = vst.msk [vmem:[#allocation4 + $0x100] sm:$0xf] %vm391_vm2, %v9516_v63  ;;  %v3369_v22 = vpop.permute.xlu1 %3368 }
 0x1ea   : > { %3406 = vrot.lane.b32.xlu0 %v3277_v50, %s11415_s30  ;;  %2862 = vst.msk [vmem:[#allocation4 + $0xf8] sm:$0xf] %vm391_vm2, %v9514_v34  ;;  %v11200_v50 = vld [vmem:[#allocation4 + $0x30] sm:$0xff]   ;;  %v3280_v34 = vor.u32 %v3278_v45, %v3276_v0  ;;  %v3304_v7 = vor.u32 %v3302_v28, %v3300_v57  ;;  %v19619_v0 = vld [vmem:[#allocation20_spill] sm:$0xff] }
 0x1eb   : > { %v14318_v44 = vld [vmem:[#allocation4 + $0xd0] sm:$0xff]   ;;  %v14325_v43 = vld [vmem:[#allocation4 + $0x118] sm:$0xff]   ;;  %v3598_v54 = vsel %vm358_vm4, %v11200_v50, %v14316_v20  ;;  %v9518_v50 = vpack.c.bf16 %v14327_v26, %v14327_v26  ;;  %v2552_v45 = vpack.c.bf16 %v19619_v0, %v13038_v36  ;;  %19620 = vst [vmem:[#allocation20_spill] sm:$0xff] %v14349_v9 }
 0x1ec   : > { %19614 = vst [vmem:[#allocation121_spill] sm:$0xff] %v14318_v44  ;;  %v14323_v52 = vld [vmem:[#allocation4 + $0xd8] sm:$0xff]   ;;  %19616 = vst [vmem:[#allocation123_spill] sm:$0xff] %v14325_v43  ;;  %v3282_v14 = vshll.u32 %v14318_v44, 16  ;;  %v14332_v37 = vld [vmem:[#allocation4 + $0xf0] sm:$0xff]   ;;  %v3354_v29 = vshll.u32 %v14325_v43, 16  ;;  %3832 = vmatprep.mubr.bf16.mxu0 %v3598_v54 }
 0x1ed   : > { %19615 = vst [vmem:[#allocation122_spill] sm:$0xff] %v14323_v52  ;;  %v14330_v8 = vld [vmem:[#allocation4 + $0xe8] sm:$0xff]   ;;  %19618 = vst [vmem:[#allocation125_spill] sm:$0xff] %v14332_v37  ;;  %v3290_v63 = vshll.u32 %v14323_v52, 16  ;;  %v3286_v62 = vshrl.u32 %v14318_v44, 16  ;;  %v3314_v15 = vshll.u32 %v14332_v37, 16 }
 0x1ee   : > { %19617 = vst [vmem:[#allocation124_spill] sm:$0xff] %v14330_v8  ;;  %v3284_v16 = vrot.slane %v3282_v14, 1  ;;  %v3306_v41 = vshll.u32 %v14330_v8, 16  ;;  %v3294_v12 = vshrl.u32 %v14323_v52, 16  ;;  %v14347_v14 = vrot.slane %v3354_v29, 1 }
 0x1ef   : > { %v3292_v18 = vrot.slane %v3290_v63, 1  ;;  %v11187_v44 = vld [vmem:[#allocation4 + $0x120] ss:$0 sps:$4 sm:$0x11]   ;;  %2866 = vst.msk [vmem:[#allocation4 + $0x108] sm:$0xf] %vm391_vm2, %v9518_v50  ;;  %v3472_v52 = vsel %vm358_vm4, %v2552_v45, %v3367_v6 }
 0x1f0   : > { %v3285_v28 = vsel %vm3105_vm5, %v3280_v34, %v3284_v16  ;;  %v3288_v23 = vor.u32 %v3286_v62, %v3284_v16  ;;  %v3308_v54 = vrot.slane %v3306_v41, 1  ;;  %v3358_v34 = vshrl.u32 %v14325_v43, 16  ;;  %3833 = vmatmul.mubr.bf16.vlgmr.msra.gmra.mxu0 %v3472_v52  ;;  %v3373_v41 = vpop.permute.xlu1 %3372  ;;  %v14362_v0 = vld [vmem:[#allocation4 + $0x100] sm:$0xff]   ;;  %v11201_v52 = vld [vmem:[#allocation4 + $0x38] sm:$0xff]  }
 0x1f1   : > { %3408 = vrot.lane.b32.xlu1 %v3285_v28, %s11415_s30  ;;  %v3296_v63 = vor.u32 %v3294_v12, %v3292_v18  ;;  %v14352_v51 = vld [vmem:[#allocation4 + $0xf8] sm:$0xff]   ;;  %v3310_v62 = vshrl.u32 %v14330_v8, 16  ;;  %v3316_v29 = vrot.slane %v3314_v15, 1  ;;  %v3346_v15 = vshll.u32 %v14349_v9, 16 }
 0x1f2   : > { %19621 = vst [vmem:[#allocation126_spill] sm:$0xff] %v14352_v51  ;;  %v3293_v36 = vsel %vm3105_vm5, %v3288_v23, %v3292_v18  ;;  %v3322_v12 = vshll.u32 %v14352_v51, 16  ;;  %v3309_v50 = vsel %vm3105_vm5, %v3304_v7, %v3308_v54  ;;  %v3360_v6 = vor.u32 %v3358_v34, %v14347_v14  ;;  %v14372_v7 = vpop.permute.xlu0 %3374  ;;  %v19624_v34 = vld [vmem:[#allocation21_spill] sm:$0xff] }
 0x1f3   : > { %3410 = vrot.lane.b32.xlu0 %v3293_v36, %s11415_s30  ;;  %v3301_v16 = vsel %vm3105_vm5, %v3296_v63, %v3300_v57  ;;  %v3312_v23 = vor.u32 %v3310_v62, %v3308_v54  ;;  %v3362_v18 = vshll.u32 %v11187_v44, 16  ;;  %v3600_v45 = vsel %vm358_vm4, %v11201_v52, %v3373_v41  ;;  %v19622_v36 = vld [vmem:[#allocation28_spill] sm:$0xff]  ;;  %v19623_v54 = vld [vmem:[#allocation66_spill] sm:$0xff] }
 0x1f4   : > { %3840 = vmatprep.mubr.bf16.mxu0 %v3600_v45  ;;  %v3324_v57 = vrot.slane %v3322_v12, 1  ;;  %v3330_v63 = vshll.u32 %v14362_v0, 16  ;;  %v2553_v44 = vpack.c.bf16 %v19623_v54, %v19622_v36  ;;  %v3447_v62 = vsel %vm3105_vm5, %v3360_v6, %v19624_v34  ;;  %v11202_v36 = vld [vmem:[#allocation4 + $0x40] sm:$0xff]  }
 0x1f5   : > { %3412 = vrot.lane.b32.xlu1 %v3301_v16, %s11415_s30  ;;  %v3317_v28 = vsel %vm3105_vm5, %v3312_v23, %v3316_v29  ;;  %v3318_v16 = vshrl.u32 %v14332_v37, 16  ;;  %v3364_v43 = vrot.slane %v3362_v18, 1  ;;  %v3348_v23 = vrot.slane %v3346_v15, 1 }
 0x1f6   : > { %v14379_v52 = vld [vmem:[#allocation4 + $0x108] sm:$0xff]   ;;  %v3326_v12 = vshrl.u32 %v14352_v51, 16  ;;  %v3602_v54 = vsel %vm358_vm4, %v11202_v36, %v14372_v7  ;;  %v3350_v18 = vshrl.u32 %v14349_v9, 16  ;;  %v3332_v37 = vrot.slane %v3330_v63, 1 }
 0x1f7   : > { %3414 = vrot.lane.b32.xlu0 %v3309_v50, %s11415_s30  ;;  %v3476_v50 = vsel %vm358_vm4, %v2553_v44, %v3369_v22  ;;  %v3320_v45 = vor.u32 %v3318_v16, %v3316_v29  ;;  %v3338_v8 = vshll.u32 %v14379_v52, 16  ;;  %v3365_v15 = vsel %vm3105_vm5, %v3360_v6, %v3364_v43  ;;  %v19625_v51 = vld [vmem:[#allocation38_spill] sm:$0xff] }
 0x1f8   : > { %3841 = vmatmul.mubr.bf16.gmra.mxu0 %v3476_v50  ;;  %v3328_v34 = vor.u32 %v3326_v12, %v3324_v57  ;;  %v19626_v22 = vld [vmem:[#allocation70_spill] sm:$0xff]  ;;  %v3352_v16 = vor.u32 %v3350_v18, %v3348_v23  ;;  %v3334_v50 = vshrl.u32 %v14362_v0, 16  ;;  %v2571_v63 = vpack.c.bf16 %v14090_v3, %v14074_v58  ;;  %v19659_v3 = vld [vmem:[#allocation119_spill] sm:$0xff] }
 0x1f9   : > { %3416 = vrot.lane.b32.xlu1 %v3317_v28, %s11415_s30  ;;  %3848 = vmatprep.mubr.bf16.mxu0 %v3602_v54  ;;  %v3340_v28 = vrot.slane %v3338_v8, 1  ;;  %v2555_v29 = vpack.c.bf16 %v19626_v22, %v19625_v51  ;;  %v19628_v36 = vld [vmem:[#allocation62_spill] sm:$0xff]  ;;  %v3325_v43 = vsel %vm3105_vm5, %v3320_v45, %v3324_v57  ;;  %v3342_v8 = vshrl.u32 %v14379_v52, 16  ;;  %v3377_v6 = vpop.permute.xlu1 %3376 }
 0x1fa   : > { %v2573_v12 = vpack.c.bf16 %v14133_v32, %v14121_v59  ;;  %v3333_v54 = vsel %vm3105_vm5, %v3328_v34, %v3332_v37  ;;  %v11203_v18 = vld [vmem:[#allocation4 + $0x48] sm:$0xff]   ;;  %v2575_v57 = vpack.c.bf16 %v14015_v2, %v14271_v21  ;;  %v2578_v34 = vpack.c.bf16 %v14192_v31, %v14258_v40  ;;  %v11204_v44 = vld [vmem:[#allocation4 + $0x50] sm:$0xff]  }
 0x1fb   : > { %3464 = vrot.lane.b32.xlu0 %v3447_v62, %s11415_s30  ;;  %v19627_v62 = vld [vmem:[#allocation69_spill] sm:$0xff]  ;;  %v3484_v51 = vsel %vm358_vm4, %v2555_v29, %v3373_v41  ;;  %v3344_v45 = vor.u32 %v3342_v8, %v3340_v28  ;;  %v2576_v41 = vpack.c.bf16 %v14182_v53, %v14190_v35  ;;  %v2577_v29 = vpack.c.bf16 %v14112_v11, %v14280_v4 }
 0x1fc   : > { %v2554_v9 = vpack.c.bf16 %v19628_v36, %v19627_v62  ;;  %v3357_v36 = vsel %vm3105_vm5, %v3352_v16, %v14347_v14  ;;  %v2582_v8 = vpack.c.bf16 %v14204_v25, %v14202_v24  ;;  %v19630_v14 = vld [vmem:[#allocation75_spill] sm:$0xff]  ;;  %vm9158_vm2 = vcmask 16384  }
 0x1fd   : > { %3428 = vrot.lane.b32.xlu1 %v3365_v15, %s11415_s30  ;;  %v3604_v15 = vsel %vm358_vm4, %v11203_v18, %v3377_v6 }
 0x1fe   : > { %v3480_v22 = vsel %vm358_vm4, %v2554_v9, %v14316_v20  ;;  %3856 = vmatprep.mubr.bf16.mxu1 %v3604_v15  ;;  %v2579_v9 = vpack.c.bf16 %v14154_v10, %v14305_v1  ;;  %v2580_v20 = vpack.c.bf16 %v14200_v33, %v14294_v39  ;;  %v19678_v33 = vld [vmem:[#allocation26_spill] sm:$0xff] }
 0x1ff   : > { %3418 = vrot.lane.b32.xlu0 %v3325_v43, %s11415_s30  ;;  %3857 = vmatmul.mubr.bf16.vlgmr.msra.gmra.mxu1 %v3484_v51  ;;  %v3336_v43 = vor.u32 %v3334_v50, %v3332_v37  ;;  %v3349_v51 = vsel %vm3105_vm5, %v3344_v45, %v3348_v23  ;;  %v19631_v37 = vld [vmem:[#allocation11_spill] sm:$0xff] }
 0x200   : > { %3849 = vmatmul.mubr.bf16.gmra.mxu0 %v3480_v22  ;;  %v3379_v18 = vpop.permute.xlu0 %3378  ;;  %v2556_v16 = vpack.c.bf16 %v19631_v37, %v19630_v14  ;;  %v11205_v22 = vld [vmem:[#allocation4 + $0x58] sm:$0xff]   ;;  %v11206_v14 = vld [vmem:[#allocation4 + $0x60] sm:$0xff]  }
 0x201   : > { %3420 = vrot.lane.b32.xlu1 %v3333_v54, %s11415_s30  ;;  %v14431_v54 = vpop.permute.xlu1 %7996  ;;  %v3341_v15 = vsel %vm3105_vm5, %v3336_v43, %v3340_v28  ;;  %v3606_v62 = vsel %vm358_vm4, %v11204_v44, %v3379_v18  ;;  %v19633_v28 = vld [vmem:[#allocation41_spill] sm:$0xff]  ;;  %v19635_v37 = vld [vmem:[#allocation55_spill] sm:$0xff] }
 0x202   : > { %19629 = vst [vmem:[#allocation28_spill] sm:$0xff] %v14431_v54  ;;  %3864 = vmatprep.mubr.bf16.mxu1 %v3606_v62  ;;  %v3488_v50 = vsel %vm358_vm4, %v2556_v16, %v14372_v7  ;;  %v19634_v62 = vld [vmem:[#allocation79_spill] sm:$0xff] }
 0x203   : > { %3426 = vrot.lane.b32.xlu0 %v3357_v36, %s11415_s30  ;;  %v19632_v36 = vld [vmem:[#allocation42_spill] sm:$0xff]  ;;  %v2558_v7 = vpack.c.bf16 %v19635_v37, %v19634_v62 }
 0x204   : > { %v2557_v43 = vpack.c.bf16 %v19633_v28, %v19632_v36 }
 0x205   : > { %3424 = vrot.lane.b32.xlu1 %v3349_v51, %s11415_s30  ;;  %v3381_v23 = vpop.permute.xlu1 %3380  ;;  %v3496_v16 = vsel %vm358_vm4, %v2558_v7, %v3379_v18  ;;  %v19637_v18 = vld [vmem:[#allocation33_spill] sm:$0xff]  ;;  %v11209_v7 = vld [vmem:[#allocation4 + $0x78] sm:$0xff]  }
 0x206   : > { %v3608_v45 = vsel %vm358_vm4, %v11205_v22, %v3381_v23  ;;  %v3492_v44 = vsel %vm358_vm4, %v2557_v43, %v3377_v6  ;;  %v11207_v22 = vld [vmem:[#allocation4 + $0x68] sm:$0xff]   ;;  %v2559_v6 = vpack.c.bf16 %v13490_v48, %v13529_v42  ;;  %v11208_v43 = vld [vmem:[#allocation4 + $0x70] sm:$0xff]  }
 0x207   : > { %3422 = vrot.lane.b32.xlu0 %v3341_v15, %s11415_s30  ;;  %3865 = vmatmul.mubr.bf16.gmra.mxu1 %v3488_v50  ;;  %v19638_v48 = vld [vmem:[#allocation83_spill] sm:$0xff] }
 0x208   : > { %3872 = vmatprep.mubr.bf16.mxu1 %v3608_v45  ;;  %v3500_v28 = vsel %vm358_vm4, %v2559_v6, %v3381_v23  ;;  %v2561_v42 = vpack.c.bf16 %v19638_v48, %v13656_v5 }
 0x20d   : > { %v3383_v51 = vpop.permute.xlu0 %3382 }
 0x20e   : > { %v3610_v15 = vsel %vm358_vm4, %v11206_v14, %v3383_v51 }
 0x20f   : > { %3873 = vmatmul.mubr.bf16.gmra.mxu1 %v3492_v44 }
 0x210   : > { %3880 = vmatprep.mubr.bf16.mxu1 %v3610_v15  ;;  %v19636_v15 = vld [vmem:[#allocation44_spill] sm:$0xff] }
 0x211   : > { %v2560_v62 = vpack.c.bf16 %v19637_v18, %v19636_v15  ;;  %v19641_v18 = vld [vmem:[#allocation87_spill] sm:$0xff] }
 0x213   : > { %v3504_v37 = vsel %vm358_vm4, %v2560_v62, %v3383_v51  ;;  %v2563_v62 = vpack.c.bf16 %v19641_v18, %v13786_v46 }
 0x216   : > { %v3385_v50 = vpop.permute.xlu1 %3384 }
 0x217   : > { %3881 = vmatmul.mubr.bf16.gmra.mxu1 %v3496_v16  ;;  %v3612_v45 = vsel %vm358_vm4, %v11207_v22, %v3385_v50  ;;  %v3508_v22 = vsel %vm358_vm4, %v2561_v42, %v3385_v50 }
 0x218   : > { %3888 = vmatprep.mubr.bf16.mxu1 %v3612_v45  ;;  %v11210_v45 = vld [vmem:[#allocation4 + $0x80] sm:$0xff]  }
 0x21b   : > { %v3387_v36 = vpop.permute.xlu0 %3386 }
 0x21c   : > { %v3614_v44 = vsel %vm358_vm4, %v11208_v43, %v3387_v36  ;;  %v19640_v43 = vld [vmem:[#allocation39_spill] sm:$0xff] }
 0x21f   : > { %3889 = vmatmul.mubr.bf16.gmra.mxu1 %v3500_v28  ;;  %v19639_v28 = vld [vmem:[#allocation15_spill] sm:$0xff] }
 0x220   : > { %3896 = vmatprep.mubr.bf16.mxu1 %v3614_v44  ;;  %v2562_v44 = vpack.c.bf16 %v19640_v43, %v19639_v28 }
 0x222   : > { %v3389_v14 = vpop.permute.xlu1 %3388  ;;  %v3512_v51 = vsel %vm358_vm4, %v2562_v44, %v3387_v36  ;;  %v19642_v36 = vld [vmem:[#allocation74_spill] sm:$0xff] }
 0x223   : > { %v3616_v16 = vsel %vm358_vm4, %v11209_v7, %v3389_v14  ;;  %v3516_v50 = vsel %vm358_vm4, %v2563_v62, %v3389_v14  ;;  %v2564_v42 = vpack.c.bf16 %v19642_v36, %v13845_v47  ;;  %v2565_v14 = vpack.c.bf16 %v13882_v27, %v13906_v38  ;;  %v19643_v47 = vld [vmem:[#allocation78_spill] sm:$0xff]  ;;  %v19644_v27 = vld [vmem:[#allocation12_spill] sm:$0xff] }
 0x224   : > { %v2567_v38 = vpack.c.bf16 %v19644_v27, %v14000_v13  ;;  %v19647_v62 = vld [vmem:[#allocation82_spill] sm:$0xff]  ;;  %v19649_v13 = vld [vmem:[#allocation97_spill] sm:$0xff] }
 0x227   : > { %3897 = vmatmul.mubr.bf16.gmra.mxu1 %v3504_v37  ;;  %v11211_v37 = vld [vmem:[#allocation4 + $0x88] sm:$0xff]  }
 0x228   : > { %3904 = vmatprep.mubr.bf16.mxu1 %v3616_v16 }
 0x22d   : > { %v3391_v23 = vpop.permute.xlu0 %3390 }
 0x22e   : > { %v3618_v6 = vsel %vm358_vm4, %v11210_v45, %v3391_v23 }
 0x22f   : > { %3905 = vmatmul.mubr.bf16.gmra.mxu1 %v3508_v22  ;;  %v3520_v22 = vsel %vm358_vm4, %v2564_v42, %v3391_v23  ;;  %v2566_v23 = vpack.c.bf16 %v19643_v47, %v13982_v61  ;;  %v19646_v61 = vld [vmem:[#allocation95_spill] sm:$0xff]  ;;  %v19651_v42 = vld [vmem:[#allocation113_spill] sm:$0xff] }
 0x230   : > { %3912 = vmatprep.mubr.bf16.mxu1 %v3618_v6  ;;  %v19654_v47 = vld [vmem:[#allocation115_spill] sm:$0xff] }
 0x237   : > { %3913 = vmatmul.mubr.bf16.gmra.mxu1 %v3512_v51 }
 0x24d   : > { %v3393_v15 = vpop.permute.xlu1 %3392 }
 0x24e   : > { %v3620_v5 = vsel %vm358_vm4, %v11211_v37, %v3393_v15  ;;  %v3524_v6 = vsel %vm358_vm4, %v2565_v14, %v3393_v15  ;;  %v2568_v37 = vpack.c.bf16 %v19647_v62, %v19646_v61  ;;  %v19652_v14 = vld [vmem:[#allocation99_spill] sm:$0xff]  ;;  %v19658_v61 = vld [vmem:[#allocation122_spill] sm:$0xff] }
 0x24f   : > { %3920 = vmatprep.mubr.bf16.mxu1 %v3620_v5 }
 0x250   : > { %v3395_v7 = vpop.permute.xlu0 %3394  ;;  %3921 = vmatmul.mubr.bf16.gmra.mxu1 %v3516_v50 }
 0x251   : > { %v3622_v16 = vsel %vm358_vm4, %v14180_v55, %v3395_v7  ;;  %v3397_v48 = vpop.permute.xlu1 %3396  ;;  %v3528_v43 = vsel %vm358_vm4, %v2566_v23, %v3395_v7 }
 0x252   : > { %3928 = vmatprep.mubr.bf16.mxu1 %v3622_v16  ;;  %v3624_v46 = vsel %vm358_vm4, %v14184_v56, %v3397_v48  ;;  %v3532_v51 = vsel %vm358_vm4, %v2567_v38, %v3397_v48  ;;  %v19650_v16 = vld [vmem:[#allocation96_spill] sm:$0xff] }
 0x253   : > { %v2569_v48 = vpack.c.bf16 %v19650_v16, %v19649_v13  ;;  %v19662_v16 = vld [vmem:[#allocation124_spill] sm:$0xff] }
 0x254   : > { %v3399_v45 = vpop.permute.xlu0 %3398 }
 0x255   : > { %v3626_v55 = vsel %vm358_vm4, %v14194_v17, %v3399_v45  ;;  %v3401_v28 = vpop.permute.xlu1 %3400  ;;  %v19645_v17 = vld [vmem:[#allocation110_spill] sm:$0xff]  ;;  %v3536_v5 = vsel %vm358_vm4, %v2568_v37, %v3399_v45 }
 0x256   : > { %v3628_v56 = vsel %vm358_vm4, %v14196_v49, %v3401_v28  ;;  %v19648_v49 = vld [vmem:[#allocation112_spill] sm:$0xff]  ;;  %v3540_v36 = vsel %vm358_vm4, %v2569_v48, %v3401_v28 }
 0x258   : > { %3929 = vmatmul.mubr.bf16.gmra.mxu1 %v3520_v22  ;;  %v3403_v44 = vpop.permute.xlu0 %3402 }
 0x259   : > { %3936 = vmatprep.mubr.bf16.mxu1 %v3624_v46  ;;  %v3630_v15 = vsel %vm358_vm4, %v19645_v17, %v3403_v44  ;;  %v3405_v18 = vpop.permute.xlu1 %3404  ;;  %v19657_v17 = vld [vmem:[#allocation19_spill] sm:$0xff] }
 0x25a   : > { %v3632_v7 = vsel %vm358_vm4, %v19648_v49, %v3405_v18  ;;  %v3548_v28 = vsel %vm358_vm4, %v2571_v63, %v3405_v18  ;;  %v19661_v49 = vld [vmem:[#allocation92_spill] sm:$0xff] }
 0x25c   : > { %v3407_v50 = vpop.permute.xlu0 %3406 }
 0x25d   : > { %v3634_v22 = vsel %vm358_vm4, %v19651_v42, %v3407_v50 }
 0x260   : > { %3937 = vmatmul.mubr.bf16.gmra.mxu1 %v3524_v6  ;;  %v19653_v6 = vld [vmem:[#allocation86_spill] sm:$0xff] }
 0x261   : > { %3944 = vmatprep.mubr.bf16.mxu1 %v3626_v55  ;;  %v2570_v45 = vpack.c.bf16 %v19653_v6, %v19652_v14 }
 0x263   : > { %v3409_v46 = vpop.permute.xlu1 %3408  ;;  %v3544_v55 = vsel %vm358_vm4, %v2570_v45, %v3403_v44 }
 0x264   : > { %v3636_v23 = vsel %vm358_vm4, %v19654_v47, %v3409_v46  ;;  %v3556_v58 = vsel %vm358_vm4, %v2573_v12, %v3409_v46  ;;  %v19664_v47 = vld [vmem:[#allocation18_spill] sm:$0xff] }
 0x267   : > { %v3413_v38 = vpop.permute.xlu1 %3412 }
 0x268   : > { %3945 = vmatmul.mubr.bf16.gmra.mxu1 %v3528_v43  ;;  %v3411_v43 = vpop.permute.xlu0 %3410  ;;  %v3640_v62 = vsel %vm358_vm4, %v19658_v61, %v3413_v38  ;;  %v3564_v12 = vsel %vm358_vm4, %v2575_v57, %v3413_v38 }
 0x269   : > { %3952 = vmatprep.mubr.bf16.mxu1 %v3628_v56  ;;  %v19655_v56 = vld [vmem:[#allocation121_spill] sm:$0xff] }
 0x26a   : > { %v3638_v27 = vsel %vm358_vm4, %v19655_v56, %v3411_v43 }
 0x26b   : > { %v3417_v18 = vpop.permute.xlu1 %3416 }
 0x26c   : > { %v3415_v37 = vpop.permute.xlu0 %3414  ;;  %v3644_v48 = vsel %vm358_vm4, %v19662_v16, %v3417_v18 }
 0x26d   : > { %v3642_v63 = vsel %vm358_vm4, %v19659_v3, %v3415_v37  ;;  %v19667_v3 = vld [vmem:[#allocation59_spill] sm:$0xff] }
 0x26f   : > { %v14532_v32 = vpop.permute.xlu1 %3428 }
 0x270   : > { %3953 = vmatmul.mubr.bf16.gmra.mxu1 %v3532_v51  ;;  %v19656_v51 = vld [vmem:[#allocation103_spill] sm:$0xff] }
 0x271   : > { %3960 = vmatprep.mubr.bf16.mxu1 %v3630_v15  ;;  %v2572_v44 = vpack.c.bf16 %v19657_v17, %v19656_v51  ;;  %v19666_v17 = vld [vmem:[#allocation58_spill] sm:$0xff] }
 0x273   : > { %v3552_v15 = vsel %vm358_vm4, %v2572_v44, %v3407_v50  ;;  %v14525_v50 = vpop.permute.xlu0 %3464  ;;  %v14547_v45 = vpop.permute.xlu1 %3420 }
 0x277   : > { %v14530_v59 = vpop.permute.xlu0 %3418 }
 0x278   : > { %3961 = vmatmul.mubr.bf16.gmra.mxu1 %v3536_v5  ;;  %v19660_v5 = vld [vmem:[#allocation117_spill] sm:$0xff] }
 0x279   : > { %3968 = vmatprep.mubr.bf16.mxu1 %v3632_v7  ;;  %v2574_v7 = vpack.c.bf16 %v19661_v49, %v19660_v5 }
 0x27b   : > { %v3560_v13 = vsel %vm358_vm4, %v2574_v7, %v3411_v43  ;;  %v14549_v57 = vpop.permute.xlu0 %3426 }
 0x280   : > { %3969 = vmatmul.mubr.bf16.gmra.mxu1 %v3540_v36  ;;  %v19663_v36 = vld [vmem:[#allocation125_spill] sm:$0xff] }
 0x281   : > { %3976 = vmatprep.mubr.bf16.mxu1 %v3634_v22  ;;  %v3646_v42 = vsel %vm358_vm4, %v19663_v36, %v14530_v59  ;;  %v14544_v22 = vld [vmem:[%s19192_s5] ss:$0 sm:$0xff] }
 0x288   : > { %3977 = vmatmul.mubr.bf16.gmra.mxu1 %v3544_v55  ;;  %v3568_v55 = vsel %vm358_vm4, %v2576_v41, %v3415_v37  ;;  %v14563_v41 = vpop.permute.xlu0 %3422  ;;  %v4667_v37 = vld [vmem:[#allocation5 + $0x31] sm:$0xff] }
 0x289   : > { %3984 = vmatprep.mubr.bf16.mxu1 %v3636_v23  ;;  %v3650_v49 = vsel %vm358_vm4, %v14362_v0, %v14563_v41 }
 0x290   : > { %3985 = vmatmul.mubr.bf16.gmra.mxu1 %v3548_v28  ;;  %v19665_v28 = vld [vmem:[#allocation126_spill] sm:$0xff] }
 0x291   : > { %3992 = vmatprep.mubr.bf16.mxu1 %v3638_v27  ;;  %v3648_v56 = vsel %vm358_vm4, %v19665_v28, %v14547_v45 }
 0x298   : > { %3993 = vmatmul.mubr.bf16.gmra.mxu1 %v3552_v15 }
 0x299   : > { %4000 = vmatprep.mubr.bf16.mxu1 %v3640_v62 }
 0x2a0   : > { %4001 = vmatmul.mubr.bf16.gmra.mxu1 %v3556_v58  ;;  %v3572_v58 = vsel %vm358_vm4, %v2577_v29, %v3417_v18 }
 0x2a1   : > { %4008 = vmatprep.mubr.bf16.mxu1 %v3642_v63 }
 0x2a8   : > { %4009 = vmatmul.mubr.bf16.gmra.mxu1 %v3560_v13 }
 0x2a9   : > { %4016 = vmatprep.mubr.bf16.mxu1 %v3644_v48  ;;  %v19668_v48 = vld [vmem:[#allocation23_spill] sm:$0xff] }
 0x2b0   : > { %4017 = vmatmul.mubr.bf16.gmra.mxu1 %v3564_v12  ;;  %v3834_v46 = vpop.f32.mrf.mxu0 }
 0x2b1   : > { %4024 = vmatprep.mubr.bf16.mxu1 %v3646_v42  ;;  %v3835_v14 = vadd.f32 %v14544_v22, %v3834_v46 }
 0x2b2   : > { %v3836_v6 = vpop.f32.mrf.mxu0 }
 0x2b3   : > { %v4089_v2 = vmax.f32 %v3835_v14, 0.0 }
 0x2b4   : > { %v3837_v21 = vpop.f32.mrf.mxu0 }
 0x2b5   : > { %v4409_v23 = vmul.f32 %v19664_v47, %v4089_v2  ;;  %v3838_v43 = vadd.f32 %v14544_v22, %v3837_v21  ;;  %v14581_v2 = vpop.permute.xlu1 %3424 }
 0x2b6   : > { %v3839_v27 = vpop.f32.mrf.mxu0 }
 0x2b7   : > { %4473 = vst.msk [vmem:[#allocation5 + $0x40] sm:$0xff] %vm408_vm6, %v4409_v23  ;;  %v4090_v38 = vmax.f32 %v3838_v43, 0.0  ;;  %v19669_v43 = vld [vmem:[#allocation61_spill] sm:$0xff] }
 0x2b8   : > { %4025 = vmatmul.mubr.bf16.gmra.mxu1 %v3568_v55  ;;  %v3842_v51 = vpop.f32.mrf.mxu0 }
 0x2b9   : > { %4032 = vmatprep.mubr.bf16.mxu1 %v3648_v56  ;;  %v4410_v44 = vmul.f32 %v19666_v17, %v4090_v38  ;;  %v3843_v53 = vadd.f32 %v14544_v22, %v3842_v51  ;;  %v3576_v51 = vsel %vm358_vm4, %v2578_v34, %v14530_v59  ;;  %v19670_v17 = vld [vmem:[#allocation60_spill] sm:$0xff] }
 0x2ba   : > { %v3844_v35 = vpop.f32.mrf.mxu0 }
 0x2bb   : > { %4474 = vst.msk [vmem:[#allocation5 + $0x48] sm:$0xff] %vm408_vm6, %v4410_v44  ;;  %v9867_v15 = vpack.i.bf16 %v4410_v44, %v4409_v23  ;;  %v4091_v61 = vmax.f32 %v3843_v53, 0.0 }
 0x2bc   : > { %v3845_v62 = vpop.f32.mrf.mxu0 }
 0x2bd   : > { %v4411_v63 = vmul.f32 %v19667_v3, %v4091_v61  ;;  %v3846_v5 = vadd.f32 %v14544_v22, %v3845_v62  ;;  %9868 = vrot.lane.b32.xlu0 %v9867_v15, %s11422_s21  ;;  %v3652_v15 = vsel %vm358_vm4, %v14379_v52, %v14581_v2 }
 0x2be   : > { %v3847_v7 = vpop.f32.mrf.mxu0  ;;  %v4668_v13 = vld [vmem:[#allocation5 + $0x39] sm:$0xff] }
 0x2bf   : > { %4475 = vst.msk [vmem:[#allocation5 + $0x50] sm:$0xff] %vm408_vm6, %v4411_v63  ;;  %v4092_v11 = vmax.f32 %v3846_v5, 0.0  ;;  %v3858_v4 = vpop.f32.mrf.mxu1  ;;  %v9872_v29 = vpack.i.bf16 %v4668_v13, %v4667_v37  ;;  %v4605_v14 = vld [vmem:[#allocation5 + $0x40] sm:$0xff]  ;;  %v19671_v37 = vld [vmem:[#allocation27_spill] sm:$0xff] }
 0x2c0   : > { %4033 = vmatmul.mubr.bf16.gmra.mxu1 %v3572_v58  ;;  %v3859_v18 = vadd.f32 %v14544_v22, %v3858_v4  ;;  %v3850_v16 = vpop.f32.mrf.mxu0  ;;  %v4541_v34 = vld [vmem:[#allocation5 + $0x3f] sm:$0xff]  ;;  %v19672_v5 = vld [vmem:[#allocation63_spill] sm:$0xff] }
 0x2c1   : > { %4040 = vmatprep.mubr.bf16.mxu1 %v3650_v49  ;;  %v4412_v12 = vmul.f32 %v19668_v48, %v4092_v11  ;;  %v3851_v36 = vadd.f32 %v14544_v22, %v3850_v16  ;;  %v3860_v42 = vpop.f32.mrf.mxu1  ;;  %9873 = vrot.lane.b32.xlu1 %v9872_v29, %s11418_s25  ;;  %v19673_v48 = vld [vmem:[#allocation64_spill] sm:$0xff] }
 0x2c2   : > { %v4095_v46 = vmax.f32 %v3859_v18, 0.0  ;;  %v3852_v0 = vpop.f32.mrf.mxu0  ;;  %v4606_v6 = vld [vmem:[#allocation5 + $0x48] sm:$0xff] }
 0x2c3   : > { %4476 = vst.msk [vmem:[#allocation5 + $0x58] sm:$0xff] %vm408_vm6, %v4412_v12  ;;  %v9887_v21 = vpack.i.bf16 %v4412_v12, %v4411_v63  ;;  %v4093_v55 = vmax.f32 %v3851_v36, 0.0  ;;  %v3861_v47 = vpop.f32.mrf.mxu1  ;;  %v9877_v23 = vpack.i.bf16 %v4606_v6, %v4605_v14  ;;  %v4542_v38 = vld [vmem:[#allocation5 + $0x47] sm:$0xff]  ;;  %v19674_v14 = vld [vmem:[#allocation20_spill] sm:$0xff] }
 0x2c4   : > { %v4415_v28 = vmul.f32 %v19669_v43, %v4095_v46  ;;  %v3862_v56 = vadd.f32 %v14544_v22, %v3861_v47  ;;  %v3853_v27 = vpop.f32.mrf.mxu0  ;;  %v9882_v62 = vpack.i.bf16 %v4542_v38, %v4541_v34  ;;  %v4669_v11 = vld [vmem:[#allocation5 + $0x41] sm:$0xff]  ;;  %v3580_v46 = vsel %vm358_vm4, %v2579_v9, %v14547_v45 }
 0x2c5   : > { %v14592_v44 = vmul.f32 %v19670_v17, %v4093_v55  ;;  %v3854_v53 = vadd.f32 %v14544_v22, %v3853_v27  ;;  %v3863_v35 = vpop.f32.mrf.mxu1  ;;  %9878 = vrot.lane.b32.xlu0 %v9877_v23, %s11417_s12  ;;  %9888 = vrot.lane.b32.xlu1 %v9887_v21, %s11422_s21  ;;  %v3654_v6 = vsel %vm358_vm4, %v19674_v14, %v14549_v57  ;;  %v19675_v23 = vld [vmem:[#allocation16_spill] sm:$0xff] }
 0x2c6   : > { %4479 = vst.msk [vmem:[#allocation5 + $0x70] sm:$0xff] %vm408_vm6, %v4415_v28  ;;  %v4096_v31 = vmax.f32 %v3862_v56, 0.0  ;;  %v3855_v40 = vpop.f32.mrf.mxu0  ;;  %v4670_v63 = vld [vmem:[#allocation5 + $0x49] sm:$0xff]  ;;  %v3584_v35 = vsel %vm358_vm4, %v2580_v20, %v14563_v41 }
 0x2c7   : > { %4477 = vst.msk [vmem:[#allocation5 + $0x60] sm:$0xff] %vm408_vm6, %v14592_v44  ;;  %v4094_v59 = vmax.f32 %v3854_v53, 0.0  ;;  %v3866_v61 = vpop.f32.mrf.mxu1  ;;  %v9892_v18 = vpack.i.bf16 %v4670_v63, %v4669_v11  ;;  %v4607_v16 = vld [vmem:[#allocation5 + $0x50] sm:$0xff] }
 0x2c8   : > { %4041 = vmatmul.mubr.bf16.gmra.mxu1 %v3576_v51  ;;  %v4416_v58 = vmul.f32 %v19671_v37, %v4096_v31  ;;  %v3867_v3 = vadd.f32 %v14544_v22, %v3866_v61  ;;  %v4543_v9 = vld [vmem:[#allocation5 + $0x4f] sm:$0xff] }
 0x2c9   : > { %4048 = vmatprep.mubr.bf16.mxu1 %v3652_v15  ;;  %v4414_v49 = vmul.f32 %v19672_v5, %v4094_v59  ;;  %v3868_v52 = vpop.f32.mrf.mxu1  ;;  %9883 = vrot.lane.b32.xlu0 %v9882_v62, %s11423_s28  ;;  %v19676_v51 = vld [vmem:[#allocation50_spill] sm:$0xff] }
 0x2ca   : > { %4480 = vst.msk [vmem:[#allocation5 + $0x78] sm:$0xff] %vm408_vm6, %v4416_v58  ;;  %v9902_v7 = vpack.i.bf16 %v4416_v58, %v4415_v28  ;;  %v4097_v13 = vmax.f32 %v3867_v3, 0.0  ;;  %v4608_v4 = vld [vmem:[#allocation5 + $0x58] sm:$0xff] }
 0x2cb   : > { %4478 = vst.msk [vmem:[#allocation5 + $0x68] sm:$0xff] %vm408_vm6, %v4414_v49  ;;  %v3869_v29 = vpop.f32.mrf.mxu1  ;;  %v9907_v42 = vpack.i.bf16 %v4608_v4, %v4607_v16  ;;  %v4544_v47 = vld [vmem:[#allocation5 + $0x57] sm:$0xff]  ;;  %v9917_v56 = vpack.i.bf16 %v4414_v49, %v14592_v44  ;;  %v19679_v49 = vld [vmem:[#allocation25_spill] sm:$0xff]  ;;  %v19680_v4 = vpack.c.bf16 %v14158_v30, %v14327_v26 }
 0x2cc   : > { %v4417_v12 = vmul.f32 %v19673_v48, %v4097_v13  ;;  %v3870_v36 = vadd.f32 %v14544_v22, %v3869_v29  ;;  %9903 = vrot.lane.b32.xlu1 %v9902_v7, %s11422_s21  ;;  %v9912_v28 = vpack.i.bf16 %v4544_v47, %v4543_v9  ;;  %v4671_v31 = vld [vmem:[#allocation5 + $0x51] sm:$0xff]  ;;  %v11212_v48 = vld [vmem:[#allocation4 + $0x120] sm:$0xff]  }
 0x2cd   : > { %v3871_v0 = vpop.f32.mrf.mxu1  ;;  %9893 = vrot.lane.b32.xlu0 %v9892_v18, %s11418_s25  ;;  %v19677_v44 = vld [vmem:[#allocation123_spill] sm:$0xff]  ;;  %v3588_v29 = vsel %vm358_vm4, %v19680_v4, %v14581_v2 }
 0x2ce   : > { %4481 = vst.msk [vmem:[#allocation5 + $0x80] sm:$0xff] %vm408_vm6, %v4417_v12  ;;  %v4098_v21 = vmax.f32 %v3870_v36, 0.0  ;;  %v4672_v38 = vld [vmem:[#allocation5 + $0x59] sm:$0xff]  ;;  %v3657_v40 = vsel %vm358_vm4, %v19677_v44, %v14525_v50  ;;  %v4611_v16 = vld [vmem:[#allocation5 + $0x70] sm:$0xff] }
 0x2cf   : > { %v3874_v55 = vpop.f32.mrf.mxu1  ;;  %v9922_v59 = vpack.i.bf16 %v4672_v38, %v4671_v31  ;;  %v4609_v58 = vld [vmem:[#allocation5 + $0x60] sm:$0xff]  ;;  %v19682_v26 = vld [vmem:[#allocation51_spill] sm:$0xff]  ;;  %v11213_v38 = vld [vmem:[#allocation4 + $0x128] sm:$0xff]  }
 0x2d0   : > { %4049 = vmatmul.mubr.bf16.gmra.mxu1 %v3580_v46  ;;  %v4418_v43 = vmul.f32 %v19675_v23, %v4098_v21  ;;  %v3875_v10 = vadd.f32 %v14544_v22, %v3874_v55  ;;  %9908 = vrot.lane.b32.xlu1 %v9907_v42, %s11417_s12  ;;  %v4545_v47 = vld [vmem:[#allocation5 + $0x5f] sm:$0xff]  ;;  %v19685_v44 = vld [vmem:[#allocation54_spill] sm:$0xff]  ;;  %v19689_v4 = vld [vmem:[#allocation31_spill] sm:$0xff] }
 0x2d1   : > { %4056 = vmatprep.mubr.bf16.mxu1 %v3654_v6  ;;  %v3876_v1 = vpop.f32.mrf.mxu1  ;;  %9898 = vrot.lane.b32.xlu0 %v9892_v18, %s11424_s29  ;;  %v4612_v5 = vld [vmem:[#allocation5 + $0x78] sm:$0xff] }
 0x2d2   : > { %4482 = vst.msk [vmem:[#allocation5 + $0x88] sm:$0xff] %vm408_vm6, %v4418_v43  ;;  %v4099_v45 = vmax.f32 %v3875_v10, 0.0  ;;  %v9937_v61 = vpack.i.bf16 %v4418_v43, %v4417_v12  ;;  %v4610_v41 = vld [vmem:[#allocation5 + $0x68] sm:$0xff]  ;;  %v9932_v46 = vpack.i.bf16 %v4612_v5, %v4611_v16 }
 0x2d3   : > { %v3877_v27 = vpop.f32.mrf.mxu1  ;;  %v14652_v63 = vpack.i.bf16 %v4610_v41, %v4609_v58  ;;  %v4673_v13 = vld [vmem:[#allocation5 + $0x61] sm:$0xff]  ;;  %v4674_v11 = vld [vmem:[#allocation5 + $0x69] sm:$0xff] }
 0x2d4   : > { %v14629_v17 = vmul.f32 %v19676_v51, %v4099_v45  ;;  %v3878_v53 = vadd.f32 %v14544_v22, %v3877_v27  ;;  %9913 = vrot.lane.b32.xlu1 %v9912_v28, %s11423_s28  ;;  %v19681_v12 = vld [vmem:[#allocation22_spill] sm:$0xff]  ;;  %v14670_v30 = vpack.i.bf16 %v4674_v11, %v4673_v13  ;;  %v19683_v1 = vld [vmem:[#allocation53_spill] sm:$0xff]  ;;  %v3592_v28 = vsel %vm358_vm4, %v2582_v8, %v14549_v57  ;;  %v4548_v27 = vld [vmem:[#allocation5 + $0x77] sm:$0xff] }
 0x2d5   : > { %v3879_v15 = vpop.f32.mrf.mxu1  ;;  %9918 = vrot.lane.b32.xlu0 %v9917_v56, %s11422_s21  ;;  %v3660_v36 = vsel %vm358_vm4, %v11212_v48, %v19681_v12  ;;  %v4546_v6 = vld [vmem:[#allocation5 + $0x67] sm:$0xff]  ;;  %v4547_v10 = vld [vmem:[#allocation5 + $0x6f] sm:$0xff]  ;;  %v11193_v13 = vld [vmem:[%s19193_s6 + $0x20] ss:$0 sps:$4 sm:$0xff]  }
 0x2d6   : > { %4483 = vst.msk [vmem:[#allocation5 + $0x90] sm:$0xff] %vm408_vm6, %v14629_v17  ;;  %v4100_v34 = vmax.f32 %v3878_v53, 0.0  ;;  %v9957_v43 = vpack.i.bf16 %v4546_v6, %v4545_v47  ;;  %v19684_v51 = vld [vmem:[#allocation57_spill] sm:$0xff]  ;;  %v9962_v15 = vpack.i.bf16 %v4548_v27, %v4547_v10  ;;  %9769 = vmatprep.subr.msk.bf16.mxu0 %vm7255_vm7, %v11193_v13  ;;  %v7257_v16 = vsel %vm7255_vm7, %v11193_v13, 0  ;;  %v11195_v10 = vld [vmem:[%s19193_s6 + $0x10] sm:$0xff]  }
 0x2d7   : > { %v3882_v62 = vpop.f32.mrf.mxu1  ;;  %v3663_v53 = vsel %vm358_vm4, %v11213_v38, %v19684_v51  ;;  %v19688_v5 = vld [vmem:[#allocation29_spill] sm:$0xff]  ;;  %9664 = vmatpush3.bf16.msra.mxu0 %v7257_v16 }
 0x2d8   : > { %4057 = vmatmul.mubr.bf16.gmra.mxu1 %v3584_v35  ;;  %v14645_v39 = vmul.f32 %v19678_v33, %v4100_v34  ;;  %v3883_v20 = vadd.f32 %v14544_v22, %v3882_v62  ;;  %9923 = vrot.lane.b32.xlu1 %v9922_v59, %s11418_s25  ;;  %v4676_v34 = vld [vmem:[#allocation5 + $0x79] sm:$0xff]  ;;  %v19687_v33 = vpack.c.bf16 %v14144_v60, %v14208_v19 }
 0x2d9   : > { %4064 = vmatprep.mubr.bf16.mxu1 %v3657_v40  ;;  %v3884_v37 = vpop.f32.mrf.mxu1  ;;  %9938 = vrot.lane.b32.xlu0 %v9937_v61, %s11422_s21 }
 0x2da   : > { %4484 = vst.msk [vmem:[#allocation5 + $0x98] sm:$0xff] %vm408_vm6, %v14645_v39  ;;  %v4101_v50 = vmax.f32 %v3883_v20, 0.0  ;;  %v3596_v20 = vsel %vm358_vm4, %v19687_v33, %v14532_v32  ;;  %v4675_v37 = vld [vmem:[#allocation5 + $0x71] sm:$0xff] }
 0x2db   : > { %v3885_v3 = vpop.f32.mrf.mxu1  ;;  %v9992_v58 = vpack.i.bf16 %v4676_v34, %v4675_v37 }
 0x2dc   : > { %v14655_v52 = vmul.f32 %v19679_v49, %v4101_v50  ;;  %v3886_v7 = vadd.f32 %v14544_v22, %v3885_v3  ;;  %9928 = vrot.lane.b32.xlu1 %v9922_v59, %s11424_s29  ;;  %v19686_v59 = vld [vmem:[#allocation24_spill] sm:$0xff] }
 0x2dd   : > { %v3887_v18 = vpop.f32.mrf.mxu1  ;;  %9948 = vrot.lane.b32.xlu0 %v14652_v63, %s11417_s12  ;;  %v4615_v38 = vld [vmem:[#allocation5 + $0x90] sm:$0xff] }
 0x2de   : > { %4485 = vst.msk [vmem:[#allocation5 + $0xa0] sm:$0xff] %vm408_vm6, %v14655_v52  ;;  %v4102_v42 = vmax.f32 %v3886_v7, 0.0  ;;  %v4678_v34 = vld [vmem:[#allocation5 + $0x89] sm:$0xff] }
 0x2df   : > { %v3890_v0 = vpop.f32.mrf.mxu1 }
 0x2e0   : > { %4065 = vmatmul.mubr.bf16.gmra.mxu1 %v3588_v29  ;;  %v14673_v2 = vmul.f32 %v19682_v26, %v4102_v42  ;;  %v3891_v14 = vadd.f32 %v14544_v22, %v3890_v0  ;;  %9933 = vrot.lane.b32.xlu1 %v9932_v46, %s11417_s12  ;;  %v11194_v42 = vld [vmem:[%s19193_s6 + $0x18] sm:$0xff]  }
 0x2e1   : > { %4072 = vmatprep.mubr.bf16.mxu1 %v3660_v36  ;;  %v3892_v21 = vpop.f32.mrf.mxu1  ;;  %9953 = vrot.lane.b32.xlu0 %v14670_v30, %s11418_s25  ;;  %v4613_v36 = vld [vmem:[#allocation5 + $0x80] sm:$0xff]  ;;  %v19690_v26 = vld [vmem:[#allocation35_spill] sm:$0xff] }
 0x2e2   : > { %4486 = vst.msk [vmem:[#allocation5 + $0xa8] sm:$0xff] %vm408_vm6, %v14673_v2  ;;  %v4103_v55 = vmax.f32 %v3891_v14, 0.0  ;;  %9665 = vmatprep.subr.bf16.mxu0 %v11194_v42 }
 0x2e3   : > { %v3893_v23 = vpop.f32.mrf.mxu1  ;;  %9666 = vmatpush3.bf16.msra.mxu0 %v11194_v42 }
 0x2e4   : > { %v14682_v9 = vmul.f32 %v19683_v1, %v4103_v55  ;;  %v3894_v45 = vadd.f32 %v14544_v22, %v3893_v23  ;;  %9943 = vrot.lane.b32.xlu1 %v9932_v46, %s11419_s26  ;;  %v10017_v55 = vpack.i.bf16 %v14645_v39, %v14629_v17  ;;  %9667 = vmatprep.subr.bf16.mxu0 %v11195_v10 }
 0x2e5   : > { %v3895_v56 = vpop.f32.mrf.mxu1  ;;  %9958 = vrot.lane.b32.xlu0 %v9957_v43, %s11423_s28  ;;  %v4680_v33 = vld [vmem:[#allocation5 + $0x99] sm:$0xff] }
 0x2e6   : > { %4487 = vst.msk [vmem:[#allocation5 + $0xb0] sm:$0xff] %vm408_vm6, %v14682_v9  ;;  %v4104_v35 = vmax.f32 %v3894_v45, 0.0  ;;  %v19691_v56 = vld [vmem:[#allocation30_spill] sm:$0xff]  ;;  %v4617_v16 = vld [vmem:[#allocation5 + $0xa0] sm:$0xff] }
 0x2e7   : > { %v3898_v31 = vpop.f32.mrf.mxu1  ;;  %9668 = vmatpush3.bf16.msra.mxu0 %v11195_v10 }
 0x2e8   : > { %4073 = vmatmul.mubr.bf16.gmra.mxu1 %v3592_v28  ;;  %v14697_v24 = vmul.f32 %v19685_v44, %v4104_v35  ;;  %v3899_v25 = vadd.f32 %v14544_v22, %v3898_v31  ;;  %9963 = vrot.lane.b32.xlu1 %v9962_v15, %s11423_s28  ;;  %v4616_v28 = vld [vmem:[#allocation5 + $0x98] sm:$0xff]  ;;  %v11196_v35 = vld [vmem:[%s19193_s6 + $0x8] sm:$0xff]  }
 0x2e9   : > { %4080 = vmatprep.mubr.bf16.mxu1 %v3663_v53  ;;  %v3900_v8 = vpop.f32.mrf.mxu1  ;;  %9968 = vrot.lane.b32.xlu0 %v14670_v30, %s11424_s29  ;;  %v10047_v53 = vpack.i.bf16 %v4616_v28, %v4615_v38  ;;  %v19692_v31 = vld [vmem:[#allocation34_spill] sm:$0xff] }
 0x2ea   : > { %4488 = vst.msk [vmem:[#allocation5 + $0xb8] sm:$0xff] %vm408_vm6, %v14697_v24  ;;  %v4105_v57 = vmax.f32 %v3899_v25, 0.0  ;;  %9669 = vmatprep.subr.bf16.mxu0 %v11196_v35  ;;  %v4551_v25 = vld [vmem:[#allocation5 + $0x8f] sm:$0xff]  ;;  %v4554_v42 = vld [vmem:[#allocation5 + $0xa7] sm:$0xff] }
 0x2eb   : > { %v3901_v40 = vpop.f32.mrf.mxu1  ;;  %9670 = vmatpush3.bf16.msra.mxu0 %v11196_v35 }
 0x2ec   : > { %v14706_v61 = vmul.f32 %v19686_v59, %v4105_v57  ;;  %v3902_v62 = vadd.f32 %v14544_v22, %v3901_v40  ;;  %9978 = vrot.lane.b32.xlu1 %v9962_v15, %s11420_s27  ;;  %v4552_v15 = vld [vmem:[#allocation5 + $0x97] sm:$0xff]  ;;  %v11197_v40 = vld [vmem:[%s19193_s6] sm:$0xff]  }
 0x2ed   : > { %v3903_v41 = vpop.f32.mrf.mxu1  ;;  %9973 = vrot.lane.b32.xlu0 %v9957_v43, %s11420_s27  ;;  %v4549_v43 = vld [vmem:[#allocation5 + $0x7f] sm:$0xff]  ;;  %v10052_v57 = vpack.i.bf16 %v4552_v15, %v4551_v25  ;;  %9671 = vmatprep.subr.bf16.mxu0 %v11197_v40  ;;  %v4619_v28 = vld [vmem:[#allocation5 + $0xb0] sm:$0xff] }
 0x2ee   : > { %4489 = vst.msk [vmem:[#allocation5 + $0xc0] sm:$0xff] %vm408_vm6, %v14706_v61  ;;  %v4106_v50 = vmax.f32 %v3902_v62, 0.0  ;;  %v4677_v59 = vld [vmem:[#allocation5 + $0x81] sm:$0xff]  ;;  %v4555_v15 = vld [vmem:[#allocation5 + $0xaf] sm:$0xff] }
 0x2ef   : > { %v3906_v3 = vpop.f32.mrf.mxu1  ;;  %9672 = vmatpush3.bf16.msra.mxu0 %v11197_v40  ;;  %v10032_v62 = vpack.i.bf16 %v4678_v34, %v4677_v59 }
 0x2f0   : > { %4081 = vmatmul.mubr.bf16.gmra.mxu1 %v3596_v20  ;;  %v14719_v49 = vmul.f32 %v19688_v5, %v4106_v50  ;;  %v3907_v7 = vadd.f32 %v14544_v22, %v3906_v3  ;;  %9993 = vrot.lane.b32.xlu1 %v9992_v58, %s11418_s25  ;;  %v4679_v20 = vld [vmem:[#allocation5 + $0x91] sm:$0xff] }
 0x2f1   : > { %v3908_v60 = vpop.f32.mrf.mxu1  ;;  %9983 = vrot.lane.b32.xlu0 %v14652_v63, %s11419_s26  ;;  %v4614_v63 = vld [vmem:[#allocation5 + $0x88] sm:$0xff]  ;;  %v10072_v37 = vpack.i.bf16 %v4680_v33, %v4679_v20  ;;  %v4620_v10 = vld [vmem:[#allocation5 + $0xb8] sm:$0xff] }
 0x2f2   : > { %4490 = vst.msk [vmem:[#allocation5 + $0xc8] sm:$0xff] %vm408_vm6, %v14719_v49  ;;  %v10137_v19 = vpack.i.bf16 %v14719_v49, %v14706_v61  ;;  %v4107_v32 = vmax.f32 %v3907_v7, 0.0  ;;  %v10007_v0 = vpack.i.bf16 %v4614_v63, %v4613_v36  ;;  %v10057_v7 = vpack.i.bf16 %v14673_v2, %v14655_v52  ;;  %v19693_v60 = vld [vmem:[#allocation65_spill] sm:$0xff]  ;;  %v4556_v38 = vld [vmem:[#allocation5 + $0xb7] sm:$0xff] }
 0x2f3   : > { %v3909_v11 = vpop.f32.mrf.mxu1  ;;  %v10132_v25 = vpack.i.bf16 %v4556_v38, %v4555_v15  ;;  %v19714_v61 = vld [vmem:[#allocation56_spill] sm:$0xff] }
 0x2f4   : > { %v14733_v29 = vmul.f32 %v19689_v4, %v4107_v32  ;;  %v3910_v18 = vadd.f32 %v14544_v22, %v3909_v11  ;;  %9998 = vrot.lane.b32.xlu1 %v9992_v58, %s11424_s29  ;;  %v4618_v4 = vld [vmem:[#allocation5 + $0xa8] sm:$0xff] }
 0x2f5   : > { %v3911_v48 = vpop.f32.mrf.mxu1  ;;  %9988 = vrot.lane.b32.xlu0 %v14670_v30, %s11415_s30  ;;  %v4550_v30 = vld [vmem:[#allocation5 + $0x87] sm:$0xff]  ;;  %v10087_v2 = vpack.i.bf16 %v4618_v4, %v4617_v16 }
 0x2f6   : > { %4491 = vst.msk [vmem:[#allocation5 + $0xd0] sm:$0xff] %vm408_vm6, %v14733_v29  ;;  %v4108_v12 = vmax.f32 %v3910_v18, 0.0  ;;  %v10012_v45 = vpack.i.bf16 %v4550_v30, %v4549_v43  ;;  %v19694_v48 = vld [vmem:[#allocation32_spill] sm:$0xff] }
 0x2f7   : > { %v3914_v46 = vpop.f32.mrf.mxu1  ;;  %v4553_v30 = vld [vmem:[#allocation5 + $0x9f] sm:$0xff] }
 0x2f8   : > { %v14745_v14 = vmul.f32 %v19690_v26, %v4108_v12  ;;  %v3915_v6 = vadd.f32 %v14544_v22, %v3914_v46  ;;  %10003 = vrot.lane.b32.xlu1 %v9992_v58, %s11415_s30  ;;  %v10097_v26 = vpack.i.bf16 %v14697_v24, %v14682_v9  ;;  %v10092_v43 = vpack.i.bf16 %v4554_v42, %v4553_v30  ;;  %v19700_v42 = vld [vmem:[#allocation36_spill] sm:$0xff] }
 0x2f9   : > { %v3916_v21 = vpop.f32.mrf.mxu1  ;;  %10008 = vrot.lane.b32.xlu0 %v10007_v0, %s11417_s12  ;;  %v10127_v24 = vpack.i.bf16 %v4620_v10, %v4619_v28  ;;  %v4621_v38 = vld [vmem:[#allocation5 + $0xc0] sm:$0xff] }
 0x2fa   : > { %4492 = vst.msk [vmem:[#allocation5 + $0xd8] sm:$0xff] %vm408_vm6, %v14745_v14  ;;  %v10177_v47 = vpack.i.bf16 %v14745_v14, %v14733_v29  ;;  %v4109_v23 = vmax.f32 %v3915_v6, 0.0  ;;  %v19695_v21 = vld [vmem:[#allocation67_spill] sm:$0xff] }
 0x2fb   : > { %v3917_v1 = vpop.f32.mrf.mxu1 }
 0x2fc   : > { %v14760_v27 = vmul.f32 %v19691_v56, %v4109_v23  ;;  %v3918_v17 = vadd.f32 %v14544_v22, %v3917_v1  ;;  %10018 = vrot.lane.b32.xlu1 %v10017_v55, %s11422_s21  ;;  %v19696_v56 = vld [vmem:[#allocation37_spill] sm:$0xff] }
 0x2fd   : > { %v3919_v39 = vpop.f32.mrf.mxu1  ;;  %10013 = vrot.lane.b32.xlu0 %v10012_v45, %s11423_s28 }
 0x2fe   : > { %4493 = vst.msk [vmem:[#allocation5 + $0xe0] sm:$0xff] %vm408_vm6, %v14760_v27  ;;  %v4110_v51 = vmax.f32 %v3918_v17, 0.0 }
 0x300   : > { %v14771_v44 = vmul.f32 %v19692_v31, %v4110_v51  ;;  %10048 = vrot.lane.b32.xlu1 %v10047_v53, %s11417_s12 }
 0x301   : > { %10023 = vrot.lane.b32.xlu0 %v10012_v45, %s11420_s27  ;;  %v4560_v29 = vld [vmem:[#allocation5 + $0xd7] sm:$0xff] }
 0x302   : > { %4494 = vst.msk [vmem:[#allocation5 + $0xe8] sm:$0xff] %vm408_vm6, %v14771_v44  ;;  %v10217_v8 = vpack.i.bf16 %v14771_v44, %v14760_v27 }
 0x304   : > { %10053 = vrot.lane.b32.xlu1 %v10052_v57, %s11423_s28 }
 0x305   : > { %10028 = vrot.lane.b32.xlu0 %v10007_v0, %s11419_s26 }
 0x308   : > { %10063 = vrot.lane.b32.xlu1 %v10052_v57, %s11420_s27  ;;  %v19697_v57 = vld [vmem:[#allocation68_spill] sm:$0xff] }
 0x309   : > { %10033 = vrot.lane.b32.xlu0 %v10032_v62, %s11418_s25  ;;  %v4562_v27 = vld [vmem:[#allocation5 + $0xe7] sm:$0xff] }
 0x30c   : > { %10068 = vrot.lane.b32.xlu1 %v10047_v53, %s11419_s26 }
 0x30d   : > { %10038 = vrot.lane.b32.xlu0 %v10032_v62, %s11424_s29 }
 0x310   : > { %v3922_v41 = vpop.f32.mrf.mxu1  ;;  %10073 = vrot.lane.b32.xlu1 %v10072_v37, %s11418_s25 }
 0x311   : > { %v3923_v50 = vadd.f32 %v14544_v22, %v3922_v41  ;;  %10043 = vrot.lane.b32.xlu0 %v10032_v62, %s11415_s30  ;;  %v4682_v62 = vld [vmem:[#allocation5 + $0xa9] sm:$0xff]  ;;  %v4681_v41 = vld [vmem:[#allocation5 + $0xa1] sm:$0xff] }
 0x312   : > { %v3924_v58 = vpop.f32.mrf.mxu1 }
 0x313   : > { %v4111_v3 = vmax.f32 %v3923_v50, 0.0 }
 0x314   : > { %v3925_v5 = vpop.f32.mrf.mxu1  ;;  %10078 = vrot.lane.b32.xlu1 %v10072_v37, %s11424_s29 }
 0x315   : > { %v14794_v32 = vmul.f32 %v19693_v60, %v4111_v3  ;;  %v3926_v13 = vadd.f32 %v14544_v22, %v3925_v5  ;;  %10058 = vrot.lane.b32.xlu0 %v10057_v7, %s11422_s21  ;;  %v10112_v3 = vpack.i.bf16 %v4682_v62, %v4681_v41  ;;  %v4557_v62 = vld [vmem:[#allocation5 + $0xbf] sm:$0xff] }
 0x316   : > { %v3927_v11 = vpop.f32.mrf.mxu1 }
 0x317   : > { %4495 = vst.msk [vmem:[#allocation5 + $0xf0] sm:$0xff] %vm408_vm6, %v14794_v32  ;;  %v4112_v18 = vmax.f32 %v3926_v13, 0.0  ;;  %v19699_v11 = vld [vmem:[#allocation71_spill] sm:$0xff] }
 0x318   : > { %v3930_v63 = vpop.f32.mrf.mxu1  ;;  %10083 = vrot.lane.b32.xlu1 %v10072_v37, %s11415_s30  ;;  %v19698_v37 = vld [vmem:[#allocation72_spill] sm:$0xff] }
 0x319   : > { %v14802_v12 = vmul.f32 %v19694_v48, %v4112_v18  ;;  %v3931_v52 = vadd.f32 %v14544_v22, %v3930_v63  ;;  %10088 = vrot.lane.b32.xlu0 %v10087_v2, %s11417_s12  ;;  %v4684_v63 = vld [vmem:[#allocation5 + $0xb9] sm:$0xff] }
 0x31a   : > { %v3932_v36 = vpop.f32.mrf.mxu1 }
 0x31b   : > { %4496 = vst.msk [vmem:[#allocation5 + $0xf8] sm:$0xff] %vm408_vm6, %v14802_v12  ;;  %v4113_v0 = vmax.f32 %v3931_v52, 0.0  ;;  %v4683_v52 = vld [vmem:[#allocation5 + $0xb1] sm:$0xff] }
 0x31c   : > { %v3933_v6 = vpop.f32.mrf.mxu1  ;;  %10098 = vrot.lane.b32.xlu1 %v10097_v26, %s11422_s21  ;;  %v10152_v36 = vpack.i.bf16 %v4684_v63, %v4683_v52 }
 0x31d   : > { %v14814_v55 = vmul.f32 %v19695_v21, %v4113_v0  ;;  %v3934_v23 = vadd.f32 %v14544_v22, %v3933_v6  ;;  %10093 = vrot.lane.b32.xlu0 %v10092_v43, %s11423_s28 }
 0x31e   : > { %v3935_v1 = vpop.f32.mrf.mxu1  ;;  %v4690_v44 = vld [vmem:[#allocation5 + $0xe9] sm:$0xff] }
 0x31f   : > { %4497 = vst.msk [vmem:[#allocation5 + $0x100] sm:$0xff] %vm408_vm6, %v14814_v55  ;;  %v4114_v45 = vmax.f32 %v3934_v23, 0.0  ;;  %v4563_v46 = vld [vmem:[#allocation5 + $0xef] sm:$0xff] }
 0x320   : > { %v3938_v9 = vpop.f32.mrf.mxu1  ;;  %10128 = vrot.lane.b32.xlu1 %v10127_v24, %s11417_s12 }
 0x321   : > { %v14822_v17 = vmul.f32 %v19696_v56, %v4114_v45  ;;  %v3939_v39 = vadd.f32 %v14544_v22, %v3938_v9  ;;  %10103 = vrot.lane.b32.xlu0 %v10092_v43, %s11420_s27  ;;  %v19701_v43 = vld [vmem:[#allocation73_spill] sm:$0xff] }
 0x322   : > { %v3940_v51 = vpop.f32.mrf.mxu1 }
 0x323   : > { %4498 = vst.msk [vmem:[#allocation5 + $0x108] sm:$0xff] %vm408_vm6, %v14822_v17  ;;  %v4115_v35 = vmax.f32 %v3939_v39, 0.0  ;;  %v19702_v51 = vld [vmem:[#allocation76_spill] sm:$0xff] }
 0x324   : > { %v3941_v31 = vpop.f32.mrf.mxu1  ;;  %10133 = vrot.lane.b32.xlu1 %v10132_v25, %s11423_s28 }
 0x325   : > { %v14832_v40 = vmul.f32 %v19697_v57, %v4115_v35  ;;  %v3942_v34 = vadd.f32 %v14544_v22, %v3941_v31  ;;  %10108 = vrot.lane.b32.xlu0 %v10087_v2, %s11419_s26 }
 0x326   : > { %v3943_v59 = vpop.f32.mrf.mxu1 }
 0x327   : > { %4499 = vst.msk [vmem:[#allocation5 + $0x110] sm:$0xff] %vm408_vm6, %v14832_v40  ;;  %v4116_v33 = vmax.f32 %v3942_v34, 0.0  ;;  %v4558_v59 = vld [vmem:[#allocation5 + $0xc7] sm:$0xff] }
 0x328   : > { %v3946_v20 = vpop.f32.mrf.mxu1  ;;  %10143 = vrot.lane.b32.xlu1 %v10132_v25, %s11420_s27 }
 0x329   : > { %v14840_v50 = vmul.f32 %v19698_v37, %v4116_v33  ;;  %v3947_v58 = vadd.f32 %v14544_v22, %v3946_v20  ;;  %10113 = vrot.lane.b32.xlu0 %v10112_v3, %s11418_s25  ;;  %v19703_v33 = vld [vmem:[#allocation43_spill] sm:$0xff] }
 0x32a   : > { %v3948_v5 = vpop.f32.mrf.mxu1 }
 0x32b   : > { %4500 = vst.msk [vmem:[#allocation5 + $0x118] sm:$0xff] %vm408_vm6, %v14840_v50  ;;  %v4117_v60 = vmax.f32 %v3947_v58, 0.0  ;;  %v10172_v58 = vpack.i.bf16 %v4558_v59, %v4557_v62 }
 0x32c   : > { %v3949_v13 = vpop.f32.mrf.mxu1  ;;  %10148 = vrot.lane.b32.xlu1 %v10127_v24, %s11419_s26  ;;  %v4622_v24 = vld [vmem:[#allocation5 + $0xc8] sm:$0xff] }
 0x32d   : > { %v14850_v4 = vmul.f32 %v19699_v11, %v4117_v60  ;;  %v3950_v18 = vadd.f32 %v14544_v22, %v3949_v13  ;;  %10118 = vrot.lane.b32.xlu0 %v10112_v3, %s11424_s29  ;;  %v10167_v25 = vpack.i.bf16 %v4622_v24, %v4621_v38  ;;  %v4623_v13 = vld [vmem:[#allocation5 + $0xd0] sm:$0xff] }
 0x32e   : > { %v3951_v16 = vpop.f32.mrf.mxu1 }
 0x32f   : > { %4501 = vst.msk [vmem:[#allocation5 + $0x120] sm:$0xff] %vm408_vm6, %v14850_v4  ;;  %v4118_v48 = vmax.f32 %v3950_v18, 0.0  ;;  %v14871_v45 = vpop.permute.xlu0 %9868  ;;  %v19704_v16 = vld [vmem:[#allocation40_spill] sm:$0xff] }
 0x330   : > { %v3954_v2 = vpop.f32.mrf.mxu1  ;;  %10153 = vrot.lane.b32.xlu1 %v10152_v36, %s11418_s25 }
 0x331   : > { %v14858_v0 = vmul.f32 %v19700_v42, %v4118_v48  ;;  %v3955_v26 = vadd.f32 %v14544_v22, %v3954_v2  ;;  %10123 = vrot.lane.b32.xlu0 %v10112_v3, %s11415_s30  ;;  %v4624_v3 = vld [vmem:[#allocation5 + $0xd8] sm:$0xff]  ;;  %v4559_v42 = vld [vmem:[#allocation5 + $0xcf] sm:$0xff] }
 0x332   : > { %v3956_v6 = vpop.f32.mrf.mxu1  ;;  %v10207_v63 = vpack.i.bf16 %v4624_v3, %v4623_v13 }
 0x333   : > { %4502 = vst.msk [vmem:[#allocation5 + $0x128] sm:$0xff] %vm408_vm6, %v14858_v0  ;;  %v4119_v21 = vmax.f32 %v3955_v26, 0.0  ;;  %v14873_v28 = vpop.permute.xlu1 %9873 }
 0x334   : > { %v3957_v23 = vpop.f32.mrf.mxu1  ;;  %10158 = vrot.lane.b32.xlu1 %v10152_v36, %s11424_s29 }
 0x335   : > { %v14868_v10 = vmul.f32 %v19701_v43, %v4119_v21  ;;  %v3958_v1 = vadd.f32 %v14544_v22, %v3957_v23  ;;  %10138 = vrot.lane.b32.xlu0 %v10137_v19, %s11422_s21  ;;  %v10212_v21 = vpack.i.bf16 %v4560_v29, %v4559_v42  ;;  %v19705_v23 = vld [vmem:[#allocation77_spill] sm:$0xff] }
 0x336   : > { %v3959_v9 = vpop.f32.mrf.mxu1 }
 0x337   : > { %4503 = vst.msk [vmem:[#allocation5 + $0x130] sm:$0xff] %vm408_vm6, %v14868_v10  ;;  %v4120_v56 = vmax.f32 %v3958_v1, 0.0  ;;  %v14886_v31 = vpop.permute.xlu0 %9878  ;;  %v14888_v34 = vpop.permute.xlu1 %9888 }
 0x338   : > { %v3962_v39 = vpop.f32.mrf.mxu1  ;;  %10163 = vrot.lane.b32.xlu1 %v10152_v36, %s11415_s30 }
 0x339   : > { %v14883_v35 = vmul.f32 %v19702_v51, %v4120_v56  ;;  %v3963_v15 = vadd.f32 %v14544_v22, %v3962_v39  ;;  %10168 = vrot.lane.b32.xlu0 %v10167_v25, %s11417_s12  ;;  %v4686_v56 = vld [vmem:[#allocation5 + $0xc9] sm:$0xff] }
 0x33a   : > { %v3964_v57 = vpop.f32.mrf.mxu1 }
 0x33b   : > { %4504 = vst.msk [vmem:[#allocation5 + $0x138] sm:$0xff] %vm408_vm6, %v14883_v35  ;;  %v4121_v49 = vmax.f32 %v3963_v15, 0.0  ;;  %v14900_v37 = vpop.permute.xlu0 %9883  ;;  %v4685_v15 = vld [vmem:[#allocation5 + $0xc1] sm:$0xff] }
 0x33c   : > { %v3965_v19 = vpop.f32.mrf.mxu1  ;;  %10178 = vrot.lane.b32.xlu1 %v10177_v47, %s11422_s21  ;;  %v19706_v57 = vld [vmem:[#allocation45_spill] sm:$0xff]  ;;  %v10192_v62 = vpack.i.bf16 %v4686_v56, %v4685_v15  ;;  %v9886_v54 = vunpack.i.h.bf16 %v14900_v37 }
 0x33d   : > { %v14897_v20 = vmul.f32 %v19703_v33, %v4121_v49  ;;  %v3966_v41 = vadd.f32 %v14544_v22, %v3965_v19  ;;  %10173 = vrot.lane.b32.xlu0 %v10172_v58, %s11423_s28 }
 0x33e   : > { %v3967_v5 = vpop.f32.mrf.mxu1  ;;  %v14909_v18 = vpop.permute.xlu1 %9903 }
 0x33f   : > { %4505 = vst.msk [vmem:[#allocation5 + $0x140] sm:$0xff] %vm408_vm6, %v14897_v20  ;;  %v4122_v60 = vmax.f32 %v3966_v41, 0.0  ;;  %v14915_v2 = vpop.permute.xlu0 %9893  ;;  %v19707_v5 = vld [vmem:[#allocation47_spill] sm:$0xff] }
 0x340   : > { %v3970_v11 = vpop.f32.mrf.mxu1  ;;  %10208 = vrot.lane.b32.xlu1 %v10207_v63, %s11417_s12 }
 0x341   : > { %v14912_v48 = vmul.f32 %v19704_v16, %v4122_v60  ;;  %v3971_v52 = vadd.f32 %v14544_v22, %v3970_v11  ;;  %10183 = vrot.lane.b32.xlu0 %v10172_v58, %s11420_s27  ;;  %v4688_v16 = vld [vmem:[#allocation5 + $0xd9] sm:$0xff] }
 0x342   : > { %v3972_v14 = vpop.f32.mrf.mxu1  ;;  %v14923_v6 = vpop.permute.xlu1 %9908 }
 0x343   : > { %4506 = vst.msk [vmem:[#allocation5 + $0x148] sm:$0xff] %vm408_vm6, %v14912_v48  ;;  %v4123_v36 = vmax.f32 %v3971_v52, 0.0  ;;  %v14929_v9 = vpop.permute.xlu0 %9898  ;;  %v4687_v14 = vld [vmem:[#allocation5 + $0xd1] sm:$0xff] }
 0x344   : > { %v3973_v26 = vpop.f32.mrf.mxu1  ;;  %10213 = vrot.lane.b32.xlu1 %v10212_v21, %s11423_s28 }
 0x345   : > { %v14926_v43 = vmul.f32 %v19705_v23, %v4123_v36  ;;  %v3974_v1 = vadd.f32 %v14544_v22, %v3973_v26  ;;  %10188 = vrot.lane.b32.xlu0 %v10167_v25, %s11419_s26  ;;  %v10232_v26 = vpack.i.bf16 %v4688_v16, %v4687_v14  ;;  %v4625_v25 = vld [vmem:[#allocation5 + $0xe0] sm:$0xff] }
 0x346   : > { %v3975_v24 = vpop.f32.mrf.mxu1  ;;  %v14935_v51 = vpop.permute.xlu1 %9913 }
 0x347   : > { %4507 = vst.msk [vmem:[#allocation5 + $0x150] sm:$0xff] %vm408_vm6, %v14926_v43  ;;  %v4124_v39 = vmax.f32 %v3974_v1, 0.0  ;;  %v14941_v19 = vpop.permute.xlu0 %9918 }
 0x348   : > { %v3978_v38 = vpop.f32.mrf.mxu1  ;;  %10223 = vrot.lane.b32.xlu1 %v10212_v21, %s11420_s27  ;;  %v19708_v21 = vld [vmem:[#allocation46_spill] sm:$0xff] }
 0x349   : > { %v14938_v59 = vmul.f32 %v19706_v57, %v4124_v39  ;;  %v3979_v49 = vadd.f32 %v14544_v22, %v3978_v38  ;;  %10193 = vrot.lane.b32.xlu0 %v10192_v62, %s11418_s25  ;;  %v19709_v38 = vld [vmem:[#allocation106_spill] sm:$0xff] }
 0x34a   : > { %v3980_v33 = vpop.f32.mrf.mxu1  ;;  %v14949_v3 = vpop.permute.xlu1 %9923  ;;  %v9831_v15 = vunpack.i.h.bf16 %v19709_v38  ;;  %v9830_v57 = vunpack.i.l.bf16 %v19709_v38  ;;  %v4539_v38 = vld [vmem:[#allocation5 + $0x2f] sm:$0xff] }
 0x34b   : > { %4508 = vst.msk [vmem:[#allocation5 + $0x158] sm:$0xff] %vm408_vm6, %v14938_v59  ;;  %v4125_v41 = vmax.f32 %v3979_v49, 0.0  ;;  %v14955_v11 = vpop.permute.xlu0 %9938  ;;  %v4537_v33 = vld [vmem:[#allocation5 + $0x1f] sm:$0xff] }
 0x34c   : > { %v3981_v58 = vpop.f32.mrf.mxu1  ;;  %10228 = vrot.lane.b32.xlu1 %v10207_v63, %s11419_s26 }
 0x34d   : > { %v14952_v60 = vmul.f32 %v19707_v5, %v4125_v41  ;;  %v3982_v13 = vadd.f32 %v14544_v22, %v3981_v58  ;;  %10198 = vrot.lane.b32.xlu0 %v10192_v62, %s11424_s29  ;;  %v4538_v41 = vld [vmem:[#allocation5 + $0x27] sm:$0xff]  ;;  %v19710_v58 = vld [vmem:[#allocation108_spill] sm:$0xff] }
 0x34e   : > { %v3983_v52 = vpop.f32.mrf.mxu1  ;;  %v14961_v42 = vpop.permute.xlu1 %9928  ;;  %v9841_v5 = vunpack.i.h.bf16 %v19710_v58  ;;  %v9840_v14 = vunpack.i.l.bf16 %v19710_v58  ;;  %v6566_v58 = vsel %vm408_vm6, %v4538_v41, %v9831_v15 }
 0x34f   : > { %4509 = vst.msk [vmem:[#allocation5 + $0x160] sm:$0xff] %vm408_vm6, %v14952_v60  ;;  %v4126_v29 = vmax.f32 %v3982_v13, 0.0  ;;  %v14967_v24 = vpop.permute.xlu0 %9948  ;;  %v19711_v13 = vld [vmem:[#allocation80_spill] sm:$0xff] }
 0x350   : > { %v3986_v36 = vpop.f32.mrf.mxu1  ;;  %10233 = vrot.lane.b32.xlu1 %v10232_v26, %s11418_s25  ;;  %v14986_v52 = vld [vmem:[%s19192_s5] ss:$0 sm:$0xff]  ;;  %v6631_v47 = vsel %vm6629_vm8, %v6566_v58, %v9841_v5  ;;  %v4628_v5 = vld [vmem:[#allocation5 + $0xf8] sm:$0xff]  ;;  %v19715_v58 = vld [vmem:[#allocation81_spill] sm:$0xff] }
 0x351   : > { %v14964_v23 = vmul.f32 %v19708_v21, %v4126_v29  ;;  %v3987_v1 = vadd.f32 %v14544_v22, %v3986_v36  ;;  %10203 = vrot.lane.b32.xlu0 %v10192_v62, %s11415_s30  ;;  %v19713_v36 = vld [vmem:[#allocation109_spill] sm:$0xff] }
 0x352   : > { %v3988_v56 = vpop.f32.mrf.mxu1  ;;  %v14977_v22 = vpop.permute.xlu1 %9933  ;;  %v9836_v21 = vunpack.i.h.bf16 %v19713_v36 }
 0x353   : > { %4510 = vst.msk [vmem:[#allocation5 + $0x168] sm:$0xff] %vm408_vm6, %v14964_v23  ;;  %v4127_v39 = vmax.f32 %v3987_v1, 0.0  ;;  %v14989_v29 = vpop.permute.xlu0 %9953  ;;  %v9835_v1 = vunpack.i.l.bf16 %v19713_v36 }
 0x354   : > { %v3989_v49 = vpop.f32.mrf.mxu1  ;;  %10238 = vrot.lane.b32.xlu1 %v10232_v26, %s11424_s29 }
 0x355   : > { %v14981_v16 = vmul.f32 %v19711_v13, %v4127_v39  ;;  %v3990_v62 = vadd.f32 %v14986_v52, %v3989_v49  ;;  %v4626_v39 = vld [vmem:[#allocation5 + $0xe8] sm:$0xff]  ;;  %v4540_v13 = vld [vmem:[#allocation5 + $0x37] sm:$0xff]  ;;  %10218 = vrot.lane.b32.xlu0 %v10217_v8, %s11422_s21  ;;  %v6565_v49 = vsel %vm408_vm6, %v4537_v33, %v9830_v57  ;;  %v6567_v15 = vsel %vm408_vm6, %v4539_v38, %v9835_v1 }
 0x356   : > { %v3991_v56 = vpop.f32.mrf.mxu1  ;;  %v15012_v53 = vpack.i.bf16 %v4626_v39, %v4625_v25  ;;  %v6630_v8 = vsel %vm6629_vm8, %v6565_v49, %v9840_v14  ;;  %v6568_v57 = vsel %vm408_vm6, %v4540_v13, %v9836_v21  ;;  %v4564_v14 = vld [vmem:[#allocation5 + $0xf7] sm:$0xff]  ;;  %v4689_v21 = vld [vmem:[#allocation5 + $0xe1] sm:$0xff]  ;;  %v9876_v13 = vunpack.i.h.bf16 %v14873_v28 }
 0x357   : > { %19712 = vst [vmem:[#allocation66_spill] sm:$0xff] %v14981_v16  ;;  %4511 = vst.msk [vmem:[#allocation5 + $0x170] sm:$0xff] %vm408_vm6, %v14981_v16  ;;  %v4128_v63 = vmax.f32 %v3990_v62, 0.0  ;;  %v15003_v56 = vpop.permute.xlu1 %9943  ;;  %v15010_v7 = vpop.permute.xlu0 %9958  ;;  %v15027_v38 = vpack.i.bf16 %v4690_v44, %v4689_v21  ;;  %v9875_v49 = vunpack.i.l.bf16 %v14873_v28  ;;  %v4627_v25 = vld [vmem:[#allocation5 + $0xf0] sm:$0xff]  ;;  %v15044_v44 = vpack.i.bf16 %v4564_v14, %v4563_v46 }
 0x358   : > { %v3994_v36 = vpop.f32.mrf.mxu1  ;;  %10243 = vrot.lane.b32.xlu1 %v10232_v26, %s11415_s30  ;;  %v15042_v28 = vpack.i.bf16 %v4628_v5, %v4627_v25  ;;  %v6633_v46 = vsel %vm6629_vm8, %v6568_v57, %v9876_v13 }
 0x359   : > { %v15007_v30 = vmul.f32 %v19714_v61, %v4128_v63  ;;  %v3995_v62 = vadd.f32 %v14986_v52, %v3994_v36  ;;  %v4561_v61 = vld [vmem:[#allocation5 + $0xdf] sm:$0xff]  ;;  %v9885_v63 = vunpack.i.l.bf16 %v14900_v37  ;;  %10248 = vrot.lane.b32.xlu0 %v15012_v53, %s11417_s12  ;;  %v9871_v37 = vunpack.i.h.bf16 %v14871_v45 }
 0x35a   : > { %v3996_v33 = vpop.f32.mrf.mxu1  ;;  %v10252_v26 = vpack.i.bf16 %v4562_v27, %v4561_v61  ;;  %v19716_v27 = vpack.i.bf16 %v14802_v12, %v14794_v32  ;;  %v9870_v32 = vunpack.i.l.bf16 %v14871_v45  ;;  %v9916_v12 = vunpack.i.h.bf16 %v14935_v51 }
 0x35b   : > { %4512 = vst.msk [vmem:[#allocation5 + $0x178] sm:$0xff] %vm408_vm6, %v15007_v30  ;;  %v4129_v41 = vmax.f32 %v3995_v62, 0.0  ;;  %v15025_v39 = vpop.permute.xlu1 %9963  ;;  %v15035_v33 = vpop.permute.xlu0 %9968  ;;  %v6695_v61 = vsel %vm6694_vm9, %v6630_v8, %v9885_v63  ;;  %v6632_v8 = vsel %vm6629_vm8, %v6567_v15, %v9875_v49  ;;  %v19717_v63 = vld [vmem:[#allocation84_spill] sm:$0xff]  ;;  %v6696_v45 = vsel %vm6694_vm9, %v6631_v47, %v9886_v54 }
 0x35c   : > { %v3997_v1 = vpop.f32.mrf.mxu1  ;;  %10258 = vrot.lane.b32.xlu1 %v19716_v27, %s11422_s21  ;;  %v9901_v15 = vunpack.i.h.bf16 %v14929_v9  ;;  %v9900_v54 = vunpack.i.l.bf16 %v14929_v9  ;;  %v6698_v47 = vsel %vm6694_vm9, %v6633_v46, %v9916_v12  ;;  %v9931_v49 = vunpack.i.h.bf16 %v14961_v42 }
 0x35d   : > { %v15032_v36 = vmul.f32 %v19715_v58, %v4129_v41  ;;  %v3998_v62 = vadd.f32 %v14986_v52, %v3997_v1  ;;  %v9915_v41 = vunpack.i.l.bf16 %v14935_v51  ;;  %10253 = vrot.lane.b32.xlu0 %v10252_v26, %s11423_s28  ;;  %v9891_v58 = vunpack.i.h.bf16 %v14888_v34 }
 0x35e   : > { %v3999_v16 = vpop.f32.mrf.mxu1  ;;  %v6760_v51 = vsel %vm6759_vm10, %v6695_v61, %v9870_v32  ;;  %v9930_v61 = vunpack.i.l.bf16 %v14961_v42  ;;  %v6761_v9 = vsel %vm6759_vm10, %v6696_v45, %v9871_v37 }
 0x35f   : > { %4513 = vst.msk [vmem:[#allocation5 + $0x180] sm:$0xff] %vm408_vm6, %v15032_v36  ;;  %v4130_v21 = vmax.f32 %v3998_v62, 0.0  ;;  %v9979_v25 = vpop.permute.xlu1 %9978  ;;  %v9974_v1 = vpop.permute.xlu0 %9973  ;;  %v9890_v62 = vunpack.i.l.bf16 %v14888_v34  ;;  %v6697_v57 = vsel %vm6694_vm9, %v6632_v8, %v9915_v41  ;;  %v19718_v41 = vld [vmem:[#allocation49_spill] sm:$0xff]  ;;  %v6763_v42 = vsel %vm6759_vm10, %v6698_v47, %v9891_v58  ;;  %v19719_v58 = vld [vmem:[#allocation48_spill] sm:$0xff] }
 0x360   : > { %v4002_v16 = vpop.f32.mrf.mxu1  ;;  %10288 = vrot.lane.b32.xlu1 %v15042_v28, %s11417_s12  ;;  %v9976_v46 = vunpack.i.h.bf16 %v9974_v1  ;;  %v9975_v13 = vunpack.i.l.bf16 %v9974_v1  ;;  %v6826_v37 = vsel %vm6824_vm11, %v6761_v9, %v9901_v15  ;;  %v6828_v45 = vsel %vm6824_vm11, %v6763_v42, %v9931_v49 }
 0x361   : > { %v15057_v5 = vmul.f32 %v19717_v63, %v4130_v21  ;;  %v4003_v14 = vadd.f32 %v14986_v52, %v4002_v16  ;;  %10263 = vrot.lane.b32.xlu0 %v10252_v26, %s11420_s27  ;;  %v9981_v63 = vunpack.i.h.bf16 %v9979_v25  ;;  %v6762_v26 = vsel %vm6759_vm10, %v6697_v57, %v9890_v62 }
 0x362   : > { %v4004_v27 = vpop.f32.mrf.mxu1  ;;  %v6825_v62 = vsel %vm6824_vm11, %v6760_v51, %v9900_v54  ;;  %v6827_v1 = vsel %vm6824_vm11, %v6762_v26, %v9930_v61  ;;  %v6891_v51 = vsel %vm6889_vm12, %v6826_v37, %v9976_v46  ;;  %v9945_v46 = vunpack.i.l.bf16 %v15003_v56 }
 0x363   : > { %4514 = vst.msk [vmem:[#allocation5 + $0x188] sm:$0xff] %vm408_vm6, %v15057_v5  ;;  %v4131_v34 = vmax.f32 %v4003_v14, 0.0  ;;  %v15077_v32 = vpop.permute.xlu1 %9993  ;;  %v9980_v14 = vunpack.i.l.bf16 %v9979_v25  ;;  %v9984_v27 = vpop.permute.xlu0 %9983  ;;  %v6890_v54 = vsel %vm6889_vm12, %v6825_v62, %v9975_v13  ;;  %v9946_v13 = vunpack.i.h.bf16 %v15003_v56  ;;  %v19720_v62 = vld [vmem:[#allocation52_spill] sm:$0xff] }
 0x364   : > { %v4005_v21 = vpop.f32.mrf.mxu1  ;;  %10293 = vrot.lane.b32.xlu1 %v15044_v44, %s11423_s28  ;;  %v9985_v25 = vunpack.i.l.bf16 %v9984_v27 }
 0x365   : > { %v15080_v16 = vmul.f32 %v19718_v41, %v4131_v34  ;;  %v4006_v8 = vadd.f32 %v14986_v52, %v4005_v21  ;;  %v9986_v21 = vunpack.i.h.bf16 %v9984_v27  ;;  %10268 = vrot.lane.b32.xlu0 %v15012_v53, %s11419_s26  ;;  %v6892_v27 = vsel %vm6889_vm12, %v6827_v1, %v9980_v14 }
 0x366   : > { %v4007_v12 = vpop.f32.mrf.mxu1  ;;  %v6893_v53 = vsel %vm6889_vm12, %v6828_v45, %v9981_v63  ;;  %v6955_v63 = vsel %vm6954_vm13, %v6890_v54, %v9985_v25 }
 0x367   : > { %4515 = vst.msk [vmem:[#allocation5 + $0x190] sm:$0xff] %vm408_vm6, %v15080_v16  ;;  %v4132_v34 = vmax.f32 %v4006_v8, 0.0  ;;  %v15096_v41 = vpop.permute.xlu1 %9998  ;;  %v9989_v12 = vpop.permute.xlu0 %9988  ;;  %v6956_v26 = vsel %vm6954_vm13, %v6891_v51, %v9986_v21  ;;  %v6958_v56 = vsel %vm6954_vm13, %v6893_v53, %v9946_v13 }
 0x368   : > { %v4010_v57 = vpop.f32.mrf.mxu1  ;;  %v9991_v61 = vunpack.i.h.bf16 %v9989_v12  ;;  %v9990_v49 = vunpack.i.l.bf16 %v9989_v12  ;;  %10303 = vrot.lane.b32.xlu1 %v15044_v44, %s11420_s27  ;;  %v6957_v12 = vsel %vm6954_vm13, %v6892_v27, %v9945_v46 }
 0x369   : > { %v15099_v47 = vmul.f32 %v19719_v58, %v4132_v34  ;;  %v4011_v8 = vadd.f32 %v14986_v52, %v4010_v57  ;;  %10273 = vrot.lane.b32.xlu0 %v15027_v38, %s11418_s25  ;;  %v4692_v58 = vld [vmem:[#allocation5 + $0xf9] sm:$0xff] }
 0x36a   : > { %v4012_v15 = vpop.f32.mrf.mxu1  ;;  %v7019_v44 = vsel %vm358_vm4, %v6955_v63, %v9990_v49  ;;  %v7020_v34 = vsel %vm358_vm4, %v6956_v26, %v9991_v61  ;;  %v4691_v49 = vld [vmem:[#allocation5 + $0xf1] sm:$0xff]  ;;  %v19722_v63 = vld [vmem:[#allocation13_spill] sm:$0xff] }
 0x36b   : > { %4516 = vst.msk [vmem:[#allocation5 + $0x198] sm:$0xff] %vm408_vm6, %v15099_v47  ;;  %v4133_v14 = vmax.f32 %v4011_v8, 0.0  ;;  %v10004_v37 = vpop.permute.xlu1 %10003  ;;  %v15124_v57 = vpop.permute.xlu0 %10008  ;;  %v7083_v15 = vpack.c.bf16 %v7020_v34, %v7019_v44  ;;  %v19727_v44 = vld [vmem:[#allocation10_spill] sm:$0xff] }
 0x36c   : > { %v4013_v42 = vpop.f32.mrf.mxu1  ;;  %v10006_v45 = vunpack.i.h.bf16 %v10004_v37  ;;  %v10005_v21 = vunpack.i.l.bf16 %v10004_v37  ;;  %10308 = vrot.lane.b32.xlu1 %v15042_v28, %s11419_s26  ;;  %v10312_v28 = vpack.i.bf16 %v4692_v58, %v4691_v49 }
 0x36d   : > { %v15121_v1 = vmul.f32 %v19720_v62, %v4133_v14  ;;  %v4014_v25 = vadd.f32 %v14986_v52, %v4013_v42  ;;  %10278 = vrot.lane.b32.xlu0 %v15027_v38, %s11424_s29  ;;  %9673 = vmatprep.mubr.msk.bf16.mxu0 %vm7158_vm14, %v7083_v15 }
 0x36e   : > { %v4015_v8 = vpop.f32.mrf.mxu1  ;;  %v7022_v54 = vsel %vm358_vm4, %v6958_v56, %v10006_v45  ;;  %v7021_v61 = vsel %vm358_vm4, %v6957_v12, %v10005_v21  ;;  %v4566_v45 = vld [vmem:[#allocation5 + $0x107] sm:$0xff]  ;;  %v4632_v56 = vld [vmem:[#allocation5 + $0x118] sm:$0xff] }
 0x36f   : > { %19721 = vst [vmem:[#allocation21_spill] sm:$0xff] %v15121_v1  ;;  %4517 = vst.msk [vmem:[#allocation5 + $0x1a0] sm:$0xff] %vm408_vm6, %v15121_v1  ;;  %v4134_v51 = vmax.f32 %v4014_v25, 0.0  ;;  %v7084_v27 = vpack.c.bf16 %v7022_v54, %v7021_v61  ;;  %v15137_v53 = vpop.permute.xlu1 %10018  ;;  %v15143_v46 = vpop.permute.xlu0 %10013  ;;  %v4630_v25 = vld [vmem:[#allocation5 + $0x108] sm:$0xff]  ;;  %v4565_v54 = vld [vmem:[#allocation5 + $0xff] sm:$0xff] }
 0x370   : > { %v4018_v14 = vpop.f32.mrf.mxu1  ;;  %10313 = vrot.lane.b32.xlu1 %v10312_v28, %s11418_s25  ;;  %v19724_v21 = vld [vmem:[#allocation85_spill] sm:$0xff]  ;;  %v4568_v61 = vld [vmem:[#allocation5 + $0x117] sm:$0xff] }
 0x371   : > { %v15140_v26 = vmul.f32 %v19722_v63, %v4134_v51  ;;  %v4019_v13 = vadd.f32 %v14986_v52, %v4018_v14  ;;  %9674 = vmatmul.mubr.msk.bf16.vlgmr.msra.gmra.mxu0 %vm7158_vm14, %v7084_v27  ;;  %10283 = vrot.lane.b32.xlu0 %v15027_v38, %s11415_s30  ;;  %v4629_v51 = vld [vmem:[#allocation5 + $0x100] sm:$0xff]  ;;  %v9881_v38 = vunpack.i.h.bf16 %v14886_v31  ;;  %v19726_v14 = vpack.i.bf16 %v14822_v17, %v14814_v55 }
 0x372   : > { %v4020_v42 = vpop.f32.mrf.mxu1  ;;  %v15169_v27 = vpack.i.bf16 %v4630_v25, %v4629_v51  ;;  %v15171_v63 = vpack.i.bf16 %v4566_v45, %v4565_v54  ;;  %v9895_v45 = vunpack.i.l.bf16 %v14915_v2  ;;  %v9910_v51 = vunpack.i.l.bf16 %v14923_v6  ;;  %v11215_v54 = vld [vmem:[#allocation5 + $0x47] sm:$0xff] }
 0x373   : > { %19723 = vst [vmem:[#allocation38_spill] sm:$0xff] %v15140_v26  ;;  %4518 = vst.msk [vmem:[#allocation5 + $0x1a8] sm:$0xff] %vm408_vm6, %v15140_v26  ;;  %v4135_v34 = vmax.f32 %v4019_v13, 0.0  ;;  %v15153_v62 = vpop.permute.xlu1 %10048  ;;  %v15159_v12 = vpop.permute.xlu0 %10023  ;;  %v4631_v13 = vld [vmem:[#allocation5 + $0x110] sm:$0xff]  ;;  %v9880_v42 = vunpack.i.l.bf16 %v14886_v31  ;;  %v9911_v31 = vunpack.i.h.bf16 %v14923_v6  ;;  %v9926_v26 = vunpack.i.h.bf16 %v14949_v3 }
 0x374   : > { %v4021_v37 = vpop.f32.mrf.mxu1  ;;  %10318 = vrot.lane.b32.xlu1 %v10312_v28, %s11424_s29 }
 0x375   : > { %v15156_v58 = vmul.f32 %v19724_v21, %v4135_v34  ;;  %v4022_v8 = vadd.f32 %v14986_v52, %v4021_v37  ;;  %10298 = vrot.lane.b32.xlu0 %v19726_v14, %s11422_s21  ;;  %v15176_v21 = vpack.i.bf16 %v4632_v56, %v4631_v13  ;;  %v6570_v14 = vsel %vm408_vm6, %v11215_v54, %v9881_v38  ;;  %v11218_v13 = vld [vmem:[#allocation5 + $0x4f] sm:$0xff] }
 0x376   : > { %v4023_v15 = vpop.f32.mrf.mxu1  ;;  %v9925_v38 = vunpack.i.l.bf16 %v14949_v3  ;;  %v9961_v54 = vunpack.i.h.bf16 %v15010_v7  ;;  %v6571_v1 = vsel %vm408_vm6, %v11218_v13, %v9910_v51  ;;  %v9966_v51 = vunpack.i.h.bf16 %v15025_v39 }
 0x377   : > { %19725 = vst [vmem:[#allocation70_spill] sm:$0xff] %v15156_v58  ;;  %4519 = vst.msk [vmem:[#allocation5 + $0x1b0] sm:$0xff] %vm408_vm6, %v15156_v58  ;;  %v4136_v49 = vmax.f32 %v4022_v8, 0.0  ;;  %v15174_v37 = vpop.permute.xlu1 %10053  ;;  %v4567_v15 = vld [vmem:[#allocation5 + $0x10f] sm:$0xff]  ;;  %v9896_v8 = vunpack.i.h.bf16 %v14915_v2  ;;  %v15183_v17 = vpop.permute.xlu0 %10028  ;;  %v11216_v2 = vld [vmem:[#allocation5 + $0x3f] sm:$0xff] }
 0x378   : > { %v4026_v34 = vpop.f32.mrf.mxu1  ;;  %v15185_v25 = vpack.i.bf16 %v4568_v61, %v4567_v15  ;;  %10323 = vrot.lane.b32.xlu1 %v10312_v28, %s11415_s30  ;;  %v6569_v6 = vsel %vm408_vm6, %v11216_v2, %v9880_v42  ;;  %v11217_v2 = vld [vmem:[#allocation5 + $0x57] sm:$0xff]  ;;  %v6636_v3 = vsel %vm6629_vm8, %v6571_v1, %v9925_v38 }
 0x379   : > { %v15180_v9 = vmul.f32 %v19727_v44, %v4136_v49  ;;  %v4027_v55 = vadd.f32 %v14986_v52, %v4026_v34  ;;  %v9960_v44 = vunpack.i.l.bf16 %v15010_v7  ;;  %10328 = vrot.lane.b32.xlu0 %v15169_v27, %s11417_s12  ;;  %v6634_v42 = vsel %vm6629_vm8, %v6569_v6, %v9895_v45 }
 0x37a   : > { %v4028_v56 = vpop.f32.mrf.mxu1  ;;  %v6572_v28 = vsel %vm408_vm6, %v11217_v2, %v9911_v31  ;;  %v19730_v7 = vpack.i.bf16 %v14840_v50, %v14832_v40  ;;  %v9965_v40 = vunpack.i.l.bf16 %v15025_v39  ;;  %v9970_v50 = vunpack.i.l.bf16 %v15035_v33 }
 0x37b   : > { %19728 = vst [vmem:[#allocation69_spill] sm:$0xff] %v15180_v9  ;;  %4520 = vst.msk [vmem:[#allocation5 + $0x1b8] sm:$0xff] %vm408_vm6, %v15180_v9  ;;  %v4137_v49 = vmax.f32 %v4027_v55, 0.0  ;;  %v15203_v15 = vpop.permute.xlu1 %10063  ;;  %v6635_v56 = vsel %vm6629_vm8, %v6570_v14, %v9896_v8  ;;  %v19729_v55 = vld [vmem:[#allocation88_spill] sm:$0xff]  ;;  %v15211_v9 = vpop.permute.xlu0 %10033  ;;  %v9921_v14 = vunpack.i.h.bf16 %v14941_v19  ;;  %v6699_v45 = vsel %vm6694_vm9, %v6634_v42, %v9960_v44 }
 0x37c   : > { %v4029_v34 = vpop.f32.mrf.mxu1  ;;  %10338 = vrot.lane.b32.xlu1 %v19730_v7, %s11422_s21  ;;  %v9971_v44 = vunpack.i.h.bf16 %v15035_v33  ;;  %v6637_v1 = vsel %vm6629_vm8, %v6572_v28, %v9926_v26  ;;  %v10026_v2 = vunpack.i.h.bf16 %v15159_v12  ;;  %v10030_v26 = vunpack.i.l.bf16 %v15183_v17 }
 0x37d   : > { %v15208_v61 = vmul.f32 %v19729_v55, %v4137_v49  ;;  %v4030_v58 = vadd.f32 %v14986_v52, %v4029_v34  ;;  %v9920_v49 = vunpack.i.l.bf16 %v14941_v19  ;;  %10333 = vrot.lane.b32.xlu0 %v15171_v63, %s11423_s28  ;;  %v6700_v19 = vsel %vm6694_vm9, %v6635_v56, %v9961_v54  ;;  %v19731_v34 = vld [vmem:[#allocation89_spill] sm:$0xff] }
 0x37e   : > { %v4031_v8 = vpop.f32.mrf.mxu1  ;;  %v10031_v54 = vunpack.i.h.bf16 %v15183_v17  ;;  %v6701_v28 = vsel %vm6694_vm9, %v6636_v3, %v9965_v40  ;;  %v6765_v7 = vsel %vm6759_vm10, %v6700_v19, %v9921_v14  ;;  %v4694_v19 = vld [vmem:[#allocation5 + $0x109] sm:$0xff] }
 0x37f   : > { %4521 = vst.msk [vmem:[#allocation5 + $0x1c0] sm:$0xff] %vm408_vm6, %v15208_v61  ;;  %v4138_v31 = vmax.f32 %v4030_v58, 0.0  ;;  %v15232_v13 = vpop.permute.xlu1 %10068  ;;  %v15240_v42 = vpop.permute.xlu0 %10038  ;;  %v6764_v39 = vsel %vm6759_vm10, %v6699_v45, %v9920_v49  ;;  %v10025_v8 = vunpack.i.l.bf16 %v15159_v12  ;;  %v6702_v12 = vsel %vm6694_vm9, %v6637_v1, %v9966_v51 }
 0x380   : > { %v4034_v6 = vpop.f32.mrf.mxu1  ;;  %10368 = vrot.lane.b32.xlu1 %v15176_v21, %s11417_s12  ;;  %v6829_v49 = vsel %vm6824_vm11, %v6764_v39, %v9970_v50 }
 0x381   : > { %v15237_v58 = vmul.f32 %v19731_v34, %v4138_v31  ;;  %v4035_v55 = vadd.f32 %v14986_v52, %v4034_v6  ;;  %10343 = vrot.lane.b32.xlu0 %v15171_v63, %s11420_s27  ;;  %v6830_v6 = vsel %vm6824_vm11, %v6765_v7, %v9971_v44  ;;  %v10001_v34 = vunpack.i.h.bf16 %v15096_v41 }
 0x382   : > { %v4036_v38 = vpop.f32.mrf.mxu1  ;;  %v6895_v3 = vsel %vm6889_vm12, %v6830_v6, %v10026_v2  ;;  %v6894_v51 = vsel %vm6889_vm12, %v6829_v49, %v10025_v8  ;;  %v10000_v44 = vunpack.i.l.bf16 %v15096_v41  ;;  %v10066_v8 = vunpack.i.h.bf16 %v15203_v15  ;;  %v4693_v6 = vld [vmem:[#allocation5 + $0x101] sm:$0xff] }
 0x383   : > { %4522 = vst.msk [vmem:[#allocation5 + $0x1c8] sm:$0xff] %vm408_vm6, %v15237_v58  ;;  %v4139_v56 = vmax.f32 %v4035_v55, 0.0  ;;  %v15260_v31 = vpop.permute.xlu1 %10073  ;;  %v19732_v55 = vld [vmem:[#allocation9_spill] sm:$0xff]  ;;  %v10044_v38 = vpop.permute.xlu0 %10043  ;;  %v6959_v39 = vsel %vm6954_vm13, %v6894_v51, %v10030_v26  ;;  %v10065_v7 = vunpack.i.l.bf16 %v15203_v15  ;;  %v19737_v15 = vunpack.i.h.bf16 %v14909_v18 }
 0x384   : > { %v4037_v45 = vpop.f32.mrf.mxu1  ;;  %10373 = vrot.lane.b32.xlu1 %v15185_v25, %s11423_s28  ;;  %v10046_v40 = vunpack.i.h.bf16 %v10044_v38  ;;  %v10045_v50 = vunpack.i.l.bf16 %v10044_v38 }
 0x385   : > { %v15265_v17 = vmul.f32 %v19732_v55, %v4139_v56  ;;  %v4038_v63 = vadd.f32 %v14986_v52, %v4037_v45  ;;  %v6960_v56 = vsel %vm6954_vm13, %v6895_v3, %v10031_v54  ;;  %10348 = vrot.lane.b32.xlu0 %v15169_v27, %s11419_s26  ;;  %v19734_v55 = vunpack.i.l.bf16 %v14909_v18  ;;  %v19735_v54 = vld [vmem:[#allocation90_spill] sm:$0xff]  ;;  %v11220_v18 = vld [vmem:[#allocation5 + $0x5f] sm:$0xff] }
 0x386   : > { %v4039_v14 = vpop.f32.mrf.mxu1  ;;  %v7023_v49 = vsel %vm358_vm4, %v6959_v39, %v10045_v50  ;;  %v7024_v41 = vsel %vm358_vm4, %v6960_v56, %v10046_v40  ;;  %v10352_v3 = vpack.i.bf16 %v4694_v19, %v4693_v6  ;;  %v6767_v51 = vsel %vm6759_vm10, %v6702_v12, %v19737_v15 }
 0x387   : > { %19733 = vst [vmem:[#allocation62_spill] sm:$0xff] %v15265_v17  ;;  %4523 = vst.msk [vmem:[#allocation5 + $0x1d0] sm:$0xff] %vm408_vm6, %v15265_v17  ;;  %v4140_v1 = vmax.f32 %v4038_v63, 0.0  ;;  %v15283_v45 = vpop.permute.xlu1 %10078  ;;  %v6766_v26 = vsel %vm6759_vm10, %v6701_v28, %v19734_v55  ;;  %v15292_v38 = vpop.permute.xlu0 %10058  ;;  %v10071_v40 = vunpack.i.h.bf16 %v15232_v13  ;;  %v10070_v50 = vunpack.i.l.bf16 %v15232_v13  ;;  %v4696_v55 = vld [vmem:[#allocation5 + $0x119] sm:$0xff]  ;;  %v11222_v17 = vld [vmem:[#allocation5 + $0x6f] sm:$0xff] }
 0x388   : > { %v4042_v2 = vpop.f32.mrf.mxu1  ;;  %10383 = vrot.lane.b32.xlu1 %v15185_v25, %s11420_s27  ;;  %v7085_v28 = vpack.c.bf16 %v7024_v41, %v7023_v49  ;;  %v6831_v39 = vsel %vm6824_vm11, %v6766_v26, %v10000_v44 }
 0x389   : > { %v15289_v63 = vmul.f32 %v19735_v54, %v4140_v1  ;;  %v4043_v27 = vadd.f32 %v14986_v52, %v4042_v2  ;;  %v6832_v1 = vsel %vm6824_vm11, %v6767_v51, %v10001_v34  ;;  %10353 = vrot.lane.b32.xlu0 %v10352_v3, %s11418_s25  ;;  %v6896_v19 = vsel %vm6889_vm12, %v6831_v39, %v10065_v7  ;;  %v19738_v34 = vld [vmem:[#allocation17_spill] sm:$0xff]  ;;  %v4695_v51 = vld [vmem:[#allocation5 + $0x111] sm:$0xff] }
 0x38a   : > { %v4044_v14 = vpop.f32.mrf.mxu1  ;;  %v6897_v13 = vsel %vm6889_vm12, %v6832_v1, %v10066_v8  ;;  %9677 = vmatprep.mubr.msk.bf16.mxu0 %vm7158_vm14, %v7085_v28  ;;  %v6961_v54 = vsel %vm6954_vm13, %v6896_v19, %v10070_v50  ;;  %v10392_v50 = vpack.i.bf16 %v4696_v55, %v4695_v51  ;;  %v4569_v51 = vld [vmem:[#allocation5 + $0x11f] sm:$0xff] }
 0x38b   : > { %19736 = vst [vmem:[#allocation75_spill] sm:$0xff] %v15289_v63  ;;  %4524 = vst.msk [vmem:[#allocation5 + $0x1d8] sm:$0xff] %vm408_vm6, %v15289_v63  ;;  %v4141_v12 = vmax.f32 %v4043_v27, 0.0  ;;  %v10084_v25 = vpop.permute.xlu1 %10083  ;;  %v15315_v6 = vpop.permute.xlu0 %10088  ;;  %v6962_v7 = vsel %vm6954_vm13, %v6897_v13, %v10071_v40  ;;  %v19740_v40 = vld [vmem:[#allocation14_spill] sm:$0xff] }
 0x38c   : > { %v4045_v56 = vpop.f32.mrf.mxu1  ;;  %v10086_v49 = vunpack.i.h.bf16 %v10084_v25  ;;  %v10085_v41 = vunpack.i.l.bf16 %v10084_v25  ;;  %10388 = vrot.lane.b32.xlu1 %v15176_v21, %s11419_s26 }
 0x38d   : > { %v15312_v2 = vmul.f32 %v19738_v34, %v4141_v12  ;;  %v4046_v44 = vadd.f32 %v14986_v52, %v4045_v56  ;;  %10358 = vrot.lane.b32.xlu0 %v10352_v3, %s11424_s29 }
 0x38e   : > { %v4047_v26 = vpop.f32.mrf.mxu1  ;;  %v7025_v27 = vsel %vm358_vm4, %v6961_v54, %v10085_v41  ;;  %v7026_v15 = vsel %vm358_vm4, %v6962_v7, %v10086_v49  ;;  %v4570_v49 = vld [vmem:[#allocation5 + $0x127] sm:$0xff]  ;;  %v19742_v41 = vld [vmem:[#allocation91_spill] sm:$0xff] }
 0x38f   : > { %19739 = vst [vmem:[#allocation11_spill] sm:$0xff] %v15312_v2  ;;  %4525 = vst.msk [vmem:[#allocation5 + $0x1e0] sm:$0xff] %vm408_vm6, %v15312_v2  ;;  %v4142_v8 = vmax.f32 %v4046_v44, 0.0  ;;  %v15326_v28 = vpop.permute.xlu1 %10098  ;;  %v7086_v1 = vpack.c.bf16 %v7026_v15, %v7025_v27  ;;  %v15332_v12 = vpop.permute.xlu0 %10093  ;;  %v4634_v44 = vld [vmem:[#allocation5 + $0x128] sm:$0xff]  ;;  %v4636_v7 = vld [vmem:[#allocation5 + $0x138] sm:$0xff]  ;;  %v10016_v2 = vunpack.i.h.bf16 %v15143_v46 }
 0x390   : > { %v4050_v14 = vpop.f32.mrf.mxu1  ;;  %10393 = vrot.lane.b32.xlu1 %v10392_v50, %s11418_s25  ;;  %v4633_v15 = vld [vmem:[#allocation5 + $0x120] sm:$0xff] }
 0x391   : > { %v15329_v39 = vmul.f32 %v19740_v40, %v4142_v8  ;;  %v4051_v21 = vadd.f32 %v14986_v52, %v4050_v14  ;;  %9678 = vmatmul.mubr.msk.bf16.gmra.mxu0 %vm7158_vm14, %v7086_v1  ;;  %10363 = vrot.lane.b32.xlu0 %v10352_v3, %s11415_s30  ;;  %v4572_v8 = vld [vmem:[#allocation5 + $0x137] sm:$0xff]  ;;  %v19744_v14 = vpack.i.bf16 %v14858_v0, %v14850_v4  ;;  %v9936_v4 = vunpack.i.h.bf16 %v14977_v22  ;;  %v19745_v0 = vld [vmem:[#allocation94_spill] sm:$0xff] }
 0x392   : > { %v4052_v19 = vpop.f32.mrf.mxu1  ;;  %v15356_v1 = vpack.i.bf16 %v4634_v44, %v4633_v15  ;;  %v15358_v40 = vpack.i.bf16 %v4570_v49, %v4569_v51  ;;  %v9935_v51 = vunpack.i.l.bf16 %v14977_v22 }
 0x393   : > { %19741 = vst [vmem:[#allocation42_spill] sm:$0xff] %v15329_v39  ;;  %4526 = vst.msk [vmem:[#allocation5 + $0x1e8] sm:$0xff] %vm408_vm6, %v15329_v39  ;;  %v4143_v56 = vmax.f32 %v4051_v21, 0.0  ;;  %v15341_v34 = vpop.permute.xlu1 %10128  ;;  %v15347_v54 = vpop.permute.xlu0 %10103  ;;  %v4635_v21 = vld [vmem:[#allocation5 + $0x130] sm:$0xff] }
 0x394   : > { %v4053_v25 = vpop.f32.mrf.mxu1  ;;  %10398 = vrot.lane.b32.xlu1 %v10392_v50, %s11424_s29  ;;  %v4571_v19 = vld [vmem:[#allocation5 + $0x12f] sm:$0xff]  ;;  %v11221_v39 = vld [vmem:[#allocation5 + $0x77] sm:$0xff] }
 0x395   : > { %v15344_v55 = vmul.f32 %v19742_v41, %v4143_v56  ;;  %v4054_v26 = vadd.f32 %v14986_v52, %v4053_v25  ;;  %10378 = vrot.lane.b32.xlu0 %v19744_v14, %s11422_s21  ;;  %v9951_v56 = vunpack.i.h.bf16 %v14967_v24  ;;  %v15365_v13 = vpack.i.bf16 %v4572_v8, %v4571_v19  ;;  %v19747_v19 = vld [vmem:[#allocation93_spill] sm:$0xff] }
 0x396   : > { %v4055_v27 = vpop.f32.mrf.mxu1  ;;  %v9956_v14 = vunpack.i.h.bf16 %v14989_v29  ;;  %v9996_v8 = vunpack.i.h.bf16 %v15077_v32 }
 0x397   : > { %19743 = vst [vmem:[#allocation41_spill] sm:$0xff] %v15344_v55  ;;  %4527 = vst.msk [vmem:[#allocation5 + $0x1f0] sm:$0xff] %vm408_vm6, %v15344_v55  ;;  %v4144_v3 = vmax.f32 %v4054_v26, 0.0  ;;  %v15361_v41 = vpop.permute.xlu1 %10133  ;;  %v15363_v27 = vpack.i.bf16 %v4636_v7, %v4635_v21  ;;  %v9950_v26 = vunpack.i.l.bf16 %v14967_v24  ;;  %v15373_v15 = vpop.permute.xlu0 %10108  ;;  %v9955_v7 = vunpack.i.l.bf16 %v14989_v29 }
 0x398   : > { %v4058_v25 = vpop.f32.mrf.mxu1  ;;  %10403 = vrot.lane.b32.xlu1 %v10392_v50, %s11415_s30  ;;  %v9995_v24 = vunpack.i.l.bf16 %v15077_v32  ;;  %v9941_v29 = vunpack.i.h.bf16 %v14955_v11 }
 0x399   : > { %v15370_v44 = vmul.f32 %v19745_v0, %v4144_v3  ;;  %v4059_v49 = vadd.f32 %v14986_v52, %v4058_v25  ;;  %v10015_v3 = vunpack.i.l.bf16 %v15143_v46  ;;  %10408 = vrot.lane.b32.xlu0 %v15356_v1, %s11417_s12  ;;  %v9940_v25 = vunpack.i.l.bf16 %v14955_v11  ;;  %v11219_v0 = vld [vmem:[#allocation5 + $0x67] sm:$0xff] }
 0x39a   : > { %v4060_v21 = vpop.f32.mrf.mxu1  ;;  %v6574_v50 = vsel %vm408_vm6, %v11219_v0, %v9951_v56  ;;  %v6573_v33 = vsel %vm408_vm6, %v11220_v18, %v9950_v26  ;;  %v6576_v11 = vsel %vm408_vm6, %v11221_v39, %v9936_v4  ;;  %v6575_v56 = vsel %vm408_vm6, %v11222_v17, %v9935_v51 }
 0x39b   : > { %19746 = vst [vmem:[#allocation79_spill] sm:$0xff] %v15370_v44  ;;  %4528 = vst.msk [vmem:[#allocation5 + $0x1f8] sm:$0xff] %vm408_vm6, %v15370_v44  ;;  %v4145_v22 = vmax.f32 %v4059_v49, 0.0  ;;  %v15391_v21 = vpop.permute.xlu1 %10143  ;;  %v15399_v44 = vpop.permute.xlu0 %10113  ;;  %v6638_v0 = vsel %vm6629_vm8, %v6573_v33, %v9955_v7  ;;  %v6639_v63 = vsel %vm6629_vm8, %v6574_v50, %v9956_v14  ;;  %v19748_v46 = vpack.i.bf16 %v14883_v35, %v14868_v10 }
 0x39c   : > { %v4061_v32 = vpop.f32.mrf.mxu1  ;;  %v6641_v26 = vsel %vm6629_vm8, %v6576_v11, %v9996_v8  ;;  %v10021_v33 = vunpack.i.h.bf16 %v15137_v53  ;;  %v10056_v39 = vunpack.i.h.bf16 %v15174_v37  ;;  %v10055_v10 = vunpack.i.l.bf16 %v15174_v37  ;;  %v19749_v8 = vld [vmem:[#allocation100_spill] sm:$0xff] }
 0x39d   : > { %v15396_v49 = vmul.f32 %v19747_v19, %v4145_v22  ;;  %v4062_v55 = vadd.f32 %v14986_v52, %v4061_v32  ;;  %10418 = vrot.lane.b32.xlu1 %v19748_v46, %s11422_s21  ;;  %v6640_v19 = vsel %vm6629_vm8, %v6575_v56, %v9995_v24  ;;  %v6703_v22 = vsel %vm6694_vm9, %v6638_v0, %v10015_v3 }
 0x39e   : > { %v4063_v18 = vpop.f32.mrf.mxu1  ;;  %10413 = vrot.lane.b32.xlu0 %v15358_v40, %s11423_s28  ;;  %v10040_v35 = vunpack.i.l.bf16 %v15240_v42  ;;  %v6704_v14 = vsel %vm6694_vm9, %v6639_v63, %v10016_v2  ;;  %v10041_v7 = vunpack.i.h.bf16 %v15240_v42  ;;  %v10020_v50 = vunpack.i.l.bf16 %v15137_v53 }
 0x39f   : > { %4529 = vst.msk [vmem:[#allocation5 + $0x200] sm:$0xff] %vm408_vm6, %v15396_v49  ;;  %v4146_v17 = vmax.f32 %v4062_v55, 0.0  ;;  %v15420_v51 = vpop.permute.xlu1 %10148  ;;  %v15428_v3 = vpop.permute.xlu0 %10118  ;;  %v6768_v37 = vsel %vm6759_vm10, %v6703_v22, %v9940_v25  ;;  %v10106_v11 = vunpack.i.h.bf16 %v15347_v54  ;;  %v10105_v56 = vunpack.i.l.bf16 %v15347_v54 }
 0x3a0   : > { %v4066_v4 = vpop.f32.mrf.mxu1  ;;  %v10111_v2 = vunpack.i.h.bf16 %v15373_v15  ;;  %v10110_v53 = vunpack.i.l.bf16 %v15373_v15  ;;  %v6705_v25 = vsel %vm6694_vm9, %v6640_v19, %v10055_v10  ;;  %v6706_v54 = vsel %vm6694_vm9, %v6641_v26, %v10056_v39 }
 0x3a1   : > { %v15425_v55 = vmul.f32 %v19749_v8, %v4146_v17  ;;  %v4067_v24 = vadd.f32 %v14986_v52, %v4066_v4  ;;  %10448 = vrot.lane.b32.xlu1 %v15363_v27, %s11417_s12  ;;  %v6769_v0 = vsel %vm6759_vm10, %v6704_v14, %v9941_v29  ;;  %v6833_v18 = vsel %vm6824_vm11, %v6768_v37, %v10040_v35  ;;  %v19750_v8 = vld [vmem:[#allocation98_spill] sm:$0xff] }
 0x3a2   : > { %v4068_v32 = vpop.f32.mrf.mxu1  ;;  %10423 = vrot.lane.b32.xlu0 %v15358_v40, %s11420_s27  ;;  %v6834_v17 = vsel %vm6824_vm11, %v6769_v0, %v10041_v7  ;;  %v10081_v4 = vunpack.i.h.bf16 %v15283_v45  ;;  %v6898_v19 = vsel %vm6889_vm12, %v6833_v18, %v10105_v56  ;;  %v4698_v35 = vld [vmem:[#allocation5 + $0x129] sm:$0xff]  ;;  %v10080_v14 = vunpack.i.l.bf16 %v15283_v45 }
 0x3a3   : > { %4530 = vst.msk [vmem:[#allocation5 + $0x208] sm:$0xff] %vm408_vm6, %v15425_v55  ;;  %v4147_v63 = vmax.f32 %v4067_v24, 0.0  ;;  %v15448_v22 = vpop.permute.xlu1 %10153  ;;  %v10124_v24 = vpop.permute.xlu0 %10123  ;;  %v6899_v26 = vsel %vm6889_vm12, %v6834_v17, %v10106_v11  ;;  %v6963_v37 = vsel %vm6954_vm13, %v6898_v19, %v10110_v53  ;;  %v10146_v56 = vunpack.i.h.bf16 %v15391_v21  ;;  %v19751_v53 = vld [vmem:[#allocation102_spill] sm:$0xff] }
 0x3a4   : > { %v4069_v46 = vpop.f32.mrf.mxu1  ;;  %v10126_v39 = vunpack.i.h.bf16 %v10124_v24  ;;  %v10125_v10 = vunpack.i.l.bf16 %v10124_v24  ;;  %v6964_v32 = vsel %vm6954_vm13, %v6899_v26, %v10111_v2  ;;  %v6770_v17 = vsel %vm6759_vm10, %v6705_v25, %v10020_v50 }
 0x3a5   : > { %v15453_v15 = vmul.f32 %v19750_v8, %v4147_v63  ;;  %v4070_v40 = vadd.f32 %v14986_v52, %v4069_v46  ;;  %10453 = vrot.lane.b32.xlu1 %v15365_v13, %s11423_s28  ;;  %v10145_v63 = vunpack.i.l.bf16 %v15391_v21  ;;  %v4697_v46 = vld [vmem:[#allocation5 + $0x121] sm:$0xff]  ;;  %v6771_v24 = vsel %vm6759_vm10, %v6706_v54, %v10021_v33 }
 0x3a6   : > { %v4071_v29 = vpop.f32.mrf.mxu1  ;;  %10428 = vrot.lane.b32.xlu0 %v15356_v1, %s11419_s26  ;;  %v7027_v0 = vsel %vm358_vm4, %v6963_v37, %v10125_v10  ;;  %v7028_v45 = vsel %vm358_vm4, %v6964_v32, %v10126_v39  ;;  %v10151_v19 = vunpack.i.h.bf16 %v15420_v51  ;;  %v10150_v26 = vunpack.i.l.bf16 %v15420_v51  ;;  %v11225_v39 = vld [vmem:[#allocation5 + $0x87] sm:$0xff] }
 0x3a7   : > { %4531 = vst.msk [vmem:[#allocation5 + $0x210] sm:$0xff] %vm408_vm6, %v15453_v15  ;;  %v4148_v7 = vmax.f32 %v4070_v40, 0.0  ;;  %v15471_v18 = vpop.permute.xlu1 %10158  ;;  %v15478_v1 = vpop.permute.xlu0 %10138  ;;  %v10432_v40 = vpack.i.bf16 %v4698_v35, %v4697_v46  ;;  %v7087_v29 = vpack.c.bf16 %v7028_v45, %v7027_v0  ;;  %v6835_v50 = vsel %vm6824_vm11, %v6770_v17, %v10080_v14  ;;  %v19752_v35 = vld [vmem:[#allocation101_spill] sm:$0xff]  ;;  %v4699_v17 = vld [vmem:[#allocation5 + $0x131] sm:$0xff] }
 0x3a8   : > { %v4074_v11 = vpop.f32.mrf.mxu1  ;;  %v6836_v25 = vsel %vm6824_vm11, %v6771_v24, %v10081_v4  ;;  %v6900_v54 = vsel %vm6889_vm12, %v6835_v50, %v10145_v63  ;;  %v10051_v42 = vunpack.i.h.bf16 %v15153_v62 }
 0x3a9   : > { %v15475_v8 = vmul.f32 %v19751_v53, %v4148_v7  ;;  %v4075_v2 = vadd.f32 %v14986_v52, %v4074_v11  ;;  %10463 = vrot.lane.b32.xlu1 %v15365_v13, %s11420_s27  ;;  %v6901_v51 = vsel %vm6889_vm12, %v6836_v25, %v10146_v56  ;;  %9681 = vmatprep.mubr.msk.bf16.mxu0 %vm7158_vm14, %v7087_v29  ;;  %v4700_v11 = vld [vmem:[#allocation5 + $0x139] sm:$0xff] }
 0x3aa   : > { %v4076_v21 = vpop.f32.mrf.mxu1  ;;  %10433 = vrot.lane.b32.xlu0 %v10432_v40, %s11418_s25  ;;  %v6965_v45 = vsel %vm6954_vm13, %v6900_v54, %v10150_v26  ;;  %v6966_v63 = vsel %vm6954_vm13, %v6901_v51, %v10151_v19  ;;  %v10472_v24 = vpack.i.bf16 %v4700_v11, %v4699_v17  ;;  %v19753_v19 = vld [vmem:[#allocation105_spill] sm:$0xff] }
 0x3ab   : > { %4532 = vst.msk [vmem:[#allocation5 + $0x218] sm:$0xff] %vm408_vm6, %v15475_v8  ;;  %v4149_v33 = vmax.f32 %v4075_v2, 0.0  ;;  %v10164_v13 = vpop.permute.xlu1 %10163  ;;  %v15499_v32 = vpop.permute.xlu0 %10168  ;;  %v4638_v11 = vld [vmem:[#allocation5 + $0x148] sm:$0xff] }
 0x3ac   : > { %v4077_v10 = vpop.f32.mrf.mxu1  ;;  %v10166_v7 = vunpack.i.h.bf16 %v10164_v13  ;;  %v10165_v37 = vunpack.i.l.bf16 %v10164_v13  ;;  %v19754_v13 = vld [vmem:[#allocation104_spill] sm:$0xff] }
 0x3ad   : > { %v15496_v14 = vmul.f32 %v19752_v35, %v4149_v33  ;;  %v4078_v4 = vadd.f32 %v14986_v52, %v4077_v10  ;;  %10468 = vrot.lane.b32.xlu1 %v15363_v27, %s11419_s26  ;;  %v11223_v27 = vld [vmem:[%s19192_s5] ss:$0 sm:$0xff] }
 0x3ae   : > { %v4079_v0 = vpop.f32.mrf.mxu1  ;;  %v7029_v46 = vsel %vm358_vm4, %v6965_v45, %v10165_v37  ;;  %v7030_v52 = vsel %vm358_vm4, %v6966_v63, %v10166_v7  ;;  %10438 = vrot.lane.b32.xlu0 %v10432_v40, %s11424_s29  ;;  %v4637_v63 = vld [vmem:[#allocation5 + $0x140] sm:$0xff] }
 0x3af   : > { %4533 = vst.msk [vmem:[#allocation5 + $0x220] sm:$0xff] %vm408_vm6, %v15496_v14  ;;  %v4150_v56 = vmax.f32 %v4078_v4, 0.0  ;;  %v15510_v2 = vpop.permute.xlu1 %10178  ;;  %v7088_v21 = vpack.c.bf16 %v7030_v52, %v7029_v46  ;;  %v15518_v50 = vpop.permute.xlu0 %10173  ;;  %v15548_v17 = vpack.i.bf16 %v4638_v11, %v4637_v63  ;;  %v4701_v63 = vld [vmem:[#allocation5 + $0x141] sm:$0xff] }
 0x3b0   : > { %v4082_v53 = vpop.f32.mrf.mxu1 }
 0x3b1   : > { %v15513_v26 = vmul.f32 %v19753_v19, %v4150_v56  ;;  %v4083_v29 = vadd.f32 %v11223_v27, %v4082_v53  ;;  %10473 = vrot.lane.b32.xlu1 %v10472_v24, %s11418_s25  ;;  %9682 = vmatmul.mubr.msk.bf16.gmra.mxu0 %vm7158_vm14, %v7088_v21  ;;  %v19757_v56 = vld [vmem:[#allocation107_spill] sm:$0xff]  ;;  %v4574_v53 = vld [vmem:[#allocation5 + $0x147] sm:$0xff]  ;;  %v4573_v21 = vld [vmem:[#allocation5 + $0x13f] sm:$0xff]  ;;  %v10011_v19 = vunpack.i.h.bf16 %v15124_v57 }
 0x3b2   : > { %v4084_v25 = vpop.f32.mrf.mxu1  ;;  %10443 = vrot.lane.b32.xlu0 %v10432_v40, %s11415_s30  ;;  %v19756_v40 = vpack.i.bf16 %v14912_v48, %v14897_v20  ;;  %v10050_v20 = vunpack.i.l.bf16 %v15153_v62  ;;  %v10121_v62 = vunpack.i.h.bf16 %v15428_v3 }
 0x3b3   : > { %4534 = vst.msk [vmem:[#allocation5 + $0x228] sm:$0xff] %vm408_vm6, %v15513_v26  ;;  %v4151_v54 = vmax.f32 %v4083_v29, 0.0  ;;  %v15527_v10 = vpop.permute.xlu1 %10208  ;;  %v15532_v7 = vpop.permute.xlu0 %10183  ;;  %v4640_v29 = vld [vmem:[#allocation5 + $0x158] sm:$0xff] }
 0x3b4   : > { %v4085_v51 = vpop.f32.mrf.mxu1  ;;  %v4576_v25 = vld [vmem:[#allocation5 + $0x157] sm:$0xff] }
 0x3b5   : > { %v15530_v35 = vmul.f32 %v19754_v13, %v4151_v54  ;;  %v4086_v4 = vadd.f32 %v11223_v27, %v4085_v51  ;;  %10478 = vrot.lane.b32.xlu1 %v10472_v24, %s11424_s29  ;;  %v10010_v27 = vunpack.i.l.bf16 %v15124_v57  ;;  %v4702_v54 = vld [vmem:[#allocation5 + $0x149] sm:$0xff]  ;;  %v10035_v51 = vunpack.i.l.bf16 %v15211_v9 }
 0x3b6   : > { %v4087_v37 = vpop.f32.mrf.mxu1  ;;  %10458 = vrot.lane.b32.xlu0 %v19756_v40, %s11422_s21  ;;  %v10492_v57 = vpack.i.bf16 %v4574_v53, %v4573_v21  ;;  %v4575_v40 = vld [vmem:[#allocation5 + $0x14f] sm:$0xff]  ;;  %v15574_v33 = vpack.i.bf16 %v4702_v54, %v4701_v63  ;;  %v11224_v53 = vld [vmem:[#allocation5 + $0x7f] sm:$0xff] }
 0x3b7   : > { %19755 = vst [vmem:[#allocation55_spill] sm:$0xff] %v15530_v35  ;;  %4535 = vst.msk [vmem:[#allocation5 + $0x230] sm:$0xff] %vm408_vm6, %v15530_v35  ;;  %v4152_v0 = vmax.f32 %v4086_v4, 0.0  ;;  %v15541_v45 = vpop.permute.xlu1 %10213  ;;  %v15546_v52 = vpop.permute.xlu0 %10188  ;;  %v10096_v4 = vunpack.i.h.bf16 %v15332_v12  ;;  %v10095_v37 = vunpack.i.l.bf16 %v15332_v12  ;;  %v6577_v21 = vsel %vm408_vm6, %v11224_v53, %v10010_v27  ;;  %v11226_v35 = vld [vmem:[#allocation5 + $0x8f] sm:$0xff] }
 0x3b8   : > { %v6578_v12 = vsel %vm408_vm6, %v11225_v39, %v10011_v19 }
 0x3b9   : > { %v15544_v46 = vmul.f32 %v19757_v56, %v4152_v0  ;;  %10483 = vrot.lane.b32.xlu1 %v10472_v24, %s11415_s30  ;;  %v10036_v24 = vunpack.i.h.bf16 %v15211_v9  ;;  %v4639_v0 = vld [vmem:[#allocation5 + $0x150] sm:$0xff]  ;;  %v19759_v56 = vpack.i.bf16 %v14938_v59, %v14926_v43  ;;  %v10532_v9 = vpack.i.bf16 %v4576_v25, %v4575_v40 }
 0x3ba   : > { %10488 = vrot.lane.b32.xlu0 %v15548_v17, %s11417_s12  ;;  %v15572_v48 = vpack.i.bf16 %v4640_v29, %v4639_v0  ;;  %v6642_v59 = vsel %vm6629_vm8, %v6577_v21, %v10035_v51  ;;  %v10076_v29 = vunpack.i.h.bf16 %v15260_v31  ;;  %v10075_v25 = vunpack.i.l.bf16 %v15260_v31  ;;  %v11227_v40 = vld [vmem:[#allocation5 + $0x97] sm:$0xff] }
 0x3bb   : > { %19758 = vst [vmem:[#allocation44_spill] sm:$0xff] %v15544_v46  ;;  %4536 = vst.msk [vmem:[#allocation5 + $0x238] sm:$0xff] %vm408_vm6, %v15544_v46  ;;  %v15562_v13 = vpop.permute.xlu1 %10223  ;;  %v15566_v11 = vpop.permute.xlu0 %10193  ;;  %v6579_v46 = vsel %vm408_vm6, %v11226_v35, %v10050_v20  ;;  %v6643_v43 = vsel %vm6629_vm8, %v6578_v12, %v10036_v24  ;;  %v6707_v27 = vsel %vm6694_vm9, %v6642_v59, %v10095_v37  ;;  %v10120_v35 = vunpack.i.l.bf16 %v15428_v3 }
 0x3bc   : > { %v6708_v39 = vsel %vm6694_vm9, %v6643_v43, %v10096_v4  ;;  %v10061_v20 = vunpack.i.h.bf16 %v15292_v38  ;;  %v10060_v24 = vunpack.i.l.bf16 %v15292_v38  ;;  %v10186_v51 = vunpack.i.h.bf16 %v15532_v7 }
 0x3bd   : > { %10498 = vrot.lane.b32.xlu1 %v19759_v56, %s11422_s21  ;;  %v10185_v31 = vunpack.i.l.bf16 %v15532_v7  ;;  %v10136_v37 = vunpack.i.h.bf16 %v15361_v41  ;;  %v10135_v4 = vunpack.i.l.bf16 %v15361_v41  ;;  %v10191_v0 = vunpack.i.h.bf16 %v15546_v52 }
 0x3be   : > { %10493 = vrot.lane.b32.xlu0 %v10492_v57, %s11423_s28  ;;  %v10190_v3 = vunpack.i.l.bf16 %v15546_v52  ;;  %v6580_v38 = vsel %vm408_vm6, %v11227_v40, %v10051_v42  ;;  %v6644_v63 = vsel %vm6629_vm8, %v6579_v46, %v10075_v25  ;;  %v6772_v7 = vsel %vm6759_vm10, %v6707_v27, %v10060_v24 }
 0x3bf   : > { %v15585_v54 = vpop.permute.xlu1 %10228  ;;  %v15591_v19 = vpop.permute.xlu0 %10198  ;;  %v6773_v56 = vsel %vm6759_vm10, %v6708_v39, %v10061_v20  ;;  %v6645_v21 = vsel %vm6629_vm8, %v6580_v38, %v10076_v29  ;;  %v10101_v41 = vunpack.i.h.bf16 %v15326_v28  ;;  %v6837_v12 = vsel %vm6824_vm11, %v6772_v7, %v10120_v35 }
 0x3c0   : > { %v6838_v52 = vsel %vm6824_vm11, %v6773_v56, %v10121_v62  ;;  %v6902_v43 = vsel %vm6889_vm12, %v6837_v12, %v10185_v31  ;;  %v6709_v25 = vsel %vm6694_vm9, %v6644_v63, %v10135_v4  ;;  %v6710_v27 = vsel %vm6694_vm9, %v6645_v21, %v10136_v37  ;;  %v4704_v12 = vld [vmem:[#allocation5 + $0x159] sm:$0xff] }
 0x3c1   : > { %10528 = vrot.lane.b32.xlu1 %v15572_v48, %s11417_s12  ;;  %v6903_v42 = vsel %vm6889_vm12, %v6838_v52, %v10186_v51  ;;  %v6967_v29 = vsel %vm6954_vm13, %v6902_v43, %v10190_v3  ;;  %v10161_v62 = vunpack.i.h.bf16 %v15471_v18  ;;  %v10160_v35 = vunpack.i.l.bf16 %v15471_v18 }
 0x3c2   : > { %10503 = vrot.lane.b32.xlu0 %v10492_v57, %s11420_s27  ;;  %v6968_v39 = vsel %vm6954_vm13, %v6903_v42, %v10191_v0  ;;  %v10100_v31 = vunpack.i.l.bf16 %v15326_v28  ;;  %v10226_v37 = vunpack.i.h.bf16 %v15562_v13  ;;  %v10225_v4 = vunpack.i.l.bf16 %v15562_v13  ;;  %v4703_v42 = vld [vmem:[#allocation5 + $0x151] sm:$0xff] }
 0x3c3   : > { %v15608_v53 = vpop.permute.xlu1 %10233  ;;  %v10204_v57 = vpop.permute.xlu0 %10203  ;;  %v10230_v40 = vunpack.i.l.bf16 %v15585_v54  ;;  %v6775_v38 = vsel %vm6759_vm10, %v6710_v27, %v10101_v41 }
 0x3c4   : > { %v10206_v46 = vunpack.i.h.bf16 %v10204_v57  ;;  %v10205_v59 = vunpack.i.l.bf16 %v10204_v57  ;;  %v6774_v18 = vsel %vm6759_vm10, %v6709_v25, %v10100_v31  ;;  %v6840_v13 = vsel %vm6824_vm11, %v6775_v38, %v10161_v62 }
 0x3c5   : > { %10533 = vrot.lane.b32.xlu1 %v10532_v9, %s11423_s28  ;;  %v6839_v28 = vsel %vm6824_vm11, %v6774_v18, %v10160_v35  ;;  %v19760_v62 = vpack.i.bf16 %v14964_v23, %v14952_v60  ;;  %v4577_v60 = vld [vmem:[#allocation5 + $0x15f] sm:$0xff]  ;;  %v4580_v23 = vld [vmem:[#allocation5 + $0x177] sm:$0xff]  ;;  %v10116_v18 = vunpack.i.h.bf16 %v15399_v44  ;;  %v10115_v38 = vunpack.i.l.bf16 %v15399_v44 }
 0x3c6   : > { %10508 = vrot.lane.b32.xlu0 %v15548_v17, %s11419_s26  ;;  %v7031_v20 = vsel %vm358_vm4, %v6967_v29, %v10205_v59  ;;  %v7032_v24 = vsel %vm358_vm4, %v6968_v39, %v10206_v46  ;;  %v10231_v17 = vunpack.i.h.bf16 %v15585_v54  ;;  %v6904_v7 = vsel %vm6889_vm12, %v6839_v28, %v10225_v4  ;;  %v4642_v39 = vld [vmem:[#allocation5 + $0x168] sm:$0xff] }
 0x3c7   : > { %v15627_v51 = vpop.permute.xlu1 %10238  ;;  %v15632_v0 = vpop.permute.xlu0 %10218  ;;  %v7089_v3 = vpack.c.bf16 %v7032_v24, %v7031_v20  ;;  %v6905_v54 = vsel %vm6889_vm12, %v6840_v13, %v10226_v37  ;;  %v6969_v41 = vsel %vm6954_vm13, %v6904_v7, %v10230_v40  ;;  %v10552_v59 = vpack.i.bf16 %v4704_v12, %v4703_v42  ;;  %v4641_v20 = vld [vmem:[#allocation5 + $0x160] sm:$0xff]  ;;  %v4644_v37 = vld [vmem:[#allocation5 + $0x178] sm:$0xff]  ;;  %v4706_v40 = vld [vmem:[#allocation5 + $0x169] sm:$0xff] }
 0x3c8   : > { %v6970_v52 = vsel %vm6954_vm13, %v6905_v54, %v10231_v17  ;;  %v15677_v31 = vpack.i.bf16 %v4642_v39, %v4641_v20  ;;  %v10091_v4 = vunpack.i.h.bf16 %v15315_v6  ;;  %v10130_v17 = vunpack.i.l.bf16 %v15341_v34  ;;  %v4705_v12 = vld [vmem:[#allocation5 + $0x161] sm:$0xff]  ;;  %v11230_v39 = vld [vmem:[#allocation5 + $0xaf] sm:$0xff] }
 0x3c9   : > { %10543 = vrot.lane.b32.xlu1 %v10532_v9, %s11420_s27  ;;  %9685 = vmatprep.mubr.msk.bf16.mxu0 %vm7158_vm14, %v7089_v3  ;;  %v10090_v3 = vunpack.i.l.bf16 %v15315_v6  ;;  %v10176_v7 = vunpack.i.h.bf16 %v15518_v50  ;;  %v10175_v6 = vunpack.i.l.bf16 %v15518_v50 }
 0x3ca   : > { %10513 = vrot.lane.b32.xlu0 %v15574_v33, %s11418_s25 }
 0x3cb   : > { %v10244_v63 = vpop.permute.xlu1 %10243  ;;  %v15646_v21 = vpop.permute.xlu0 %10248 }
 0x3cc   : > { %v10246_v56 = vunpack.i.h.bf16 %v10244_v63  ;;  %v10245_v9 = vunpack.i.l.bf16 %v10244_v63  ;;  %v4643_v63 = vld [vmem:[#allocation5 + $0x170] sm:$0xff] }
 0x3cd   : > { %10548 = vrot.lane.b32.xlu1 %v15572_v48, %s11419_s26 }
 0x3ce   : > { %v7033_v57 = vsel %vm358_vm4, %v6969_v41, %v10245_v9  ;;  %v7034_v43 = vsel %vm358_vm4, %v6970_v52, %v10246_v56  ;;  %10518 = vrot.lane.b32.xlu0 %v15574_v33, %s11424_s29  ;;  %v15693_v56 = vpack.i.bf16 %v4644_v37, %v4643_v63  ;;  %v4579_v9 = vld [vmem:[#allocation5 + $0x16f] sm:$0xff]  ;;  %v10155_v37 = vunpack.i.l.bf16 %v15448_v22 }
 0x3cf   : > { %v15656_v46 = vpop.permute.xlu1 %10258  ;;  %v7090_v25 = vpack.c.bf16 %v7034_v43, %v7033_v57  ;;  %v15658_v27 = vpop.permute.xlu0 %10253  ;;  %v19761_v41 = vld [vmem:[#allocation66_spill] sm:$0xff]  ;;  %v10612_v44 = vpack.i.bf16 %v4580_v23, %v4579_v9  ;;  %v15699_v57 = vpack.i.bf16 %v4706_v40, %v4705_v12  ;;  %v10141_v40 = vunpack.i.h.bf16 %v15478_v1  ;;  %v11231_v9 = vld [vmem:[#allocation5 + $0xb7] sm:$0xff] }
 0x3d0   : > { %v19762_v52 = vpack.i.bf16 %v15007_v30, %v19761_v41  ;;  %v11228_v43 = vld [vmem:[#allocation5 + $0xa7] sm:$0xff]  ;;  %v10216_v63 = vunpack.i.h.bf16 %v15541_v45 }
 0x3d1   : > { %10553 = vrot.lane.b32.xlu1 %v10552_v59, %s11418_s25  ;;  %9686 = vmatmul.mubr.msk.bf16.gmra.mxu0 %vm7158_vm14, %v7090_v25  ;;  %v6582_v42 = vsel %vm408_vm6, %v11228_v43, %v10091_v4  ;;  %v10131_v25 = vunpack.i.h.bf16 %v15341_v34  ;;  %v10201_v34 = vunpack.i.h.bf16 %v15591_v19 }
 0x3d2   : > { %10523 = vrot.lane.b32.xlu0 %v15574_v33, %s11415_s30  ;;  %v4578_v33 = vld [vmem:[#allocation5 + $0x167] sm:$0xff]  ;;  %v6647_v30 = vsel %vm6629_vm8, %v6582_v42, %v10116_v18  ;;  %v10140_v18 = vunpack.i.l.bf16 %v15478_v1 }
 0x3d3   : > { %v15664_v48 = vpop.permute.xlu1 %10288  ;;  %v15666_v29 = vpop.permute.xlu0 %10263  ;;  %v10572_v13 = vpack.i.bf16 %v4578_v33, %v4577_v60  ;;  %v10156_v33 = vunpack.i.h.bf16 %v15448_v22  ;;  %v6584_v1 = vsel %vm408_vm6, %v11231_v9, %v10131_v25 }
 0x3d4   : > { %v10265_v22 = vunpack.i.l.bf16 %v15666_v29 }
 0x3d5   : > { %10558 = vrot.lane.b32.xlu1 %v10552_v59, %s11424_s29  ;;  %v6649_v43 = vsel %vm6629_vm8, %v6584_v1, %v10156_v33 }
 0x3d6   : > { %10538 = vrot.lane.b32.xlu0 %v19760_v62, %s11422_s21  ;;  %v6583_v62 = vsel %vm408_vm6, %v11230_v39, %v10130_v17  ;;  %v10200_v17 = vunpack.i.l.bf16 %v15591_v19 }
 0x3d7   : > { %v15673_v35 = vpop.permute.xlu1 %10293  ;;  %v15675_v24 = vpop.permute.xlu0 %10268  ;;  %v6648_v12 = vsel %vm6629_vm8, %v6583_v62, %v10155_v37  ;;  %v10241_v37 = vunpack.i.h.bf16 %v15627_v51 }
 0x3d8   : > { %v10270_v19 = vunpack.i.l.bf16 %v15675_v24 }
 0x3d9   : > { %10563 = vrot.lane.b32.xlu1 %v10552_v59, %s11415_s30  ;;  %v11229_v59 = vld [vmem:[#allocation5 + $0x9f] sm:$0xff] }
 0x3da   : > { %10568 = vrot.lane.b32.xlu0 %v15677_v31, %s11417_s12  ;;  %v6581_v50 = vsel %vm408_vm6, %v11229_v59, %v10090_v3  ;;  %v6712_v3 = vsel %vm6694_vm9, %v6647_v30, %v10176_v7  ;;  %v10215_v7 = vunpack.i.l.bf16 %v15541_v45  ;;  %v10181_v45 = vunpack.i.h.bf16 %v15510_v2 }
 0x3db   : > { %v15687_v28 = vpop.permute.xlu1 %10303  ;;  %v15691_v54 = vpop.permute.xlu0 %10273  ;;  %v6646_v20 = vsel %vm6629_vm8, %v6581_v50, %v10115_v38  ;;  %v10266_v38 = vunpack.i.h.bf16 %v15666_v29  ;;  %v6777_v41 = vsel %vm6759_vm10, %v6712_v3, %v10141_v40  ;;  %v10180_v40 = vunpack.i.l.bf16 %v15510_v2 }
 0x3dc   : > { %v6711_v4 = vsel %vm6694_vm9, %v6646_v20, %v10175_v6  ;;  %v10271_v6 = vunpack.i.h.bf16 %v15675_v24  ;;  %v6842_v24 = vsel %vm6824_vm11, %v6777_v41, %v10201_v34  ;;  %v6713_v62 = vsel %vm6694_vm9, %v6648_v12, %v10215_v7 }
 0x3dd   : > { %10578 = vrot.lane.b32.xlu1 %v19762_v52, %s11422_s21  ;;  %v6776_v29 = vsel %vm6759_vm10, %v6711_v4, %v10140_v18  ;;  %v6907_v50 = vsel %vm6889_vm12, %v6842_v24, %v10266_v38  ;;  %v6714_v20 = vsel %vm6694_vm9, %v6649_v43, %v10216_v63  ;;  %v10240_v4 = vunpack.i.l.bf16 %v15627_v51  ;;  %v4707_v24 = vld [vmem:[#allocation5 + $0x171] sm:$0xff] }
 0x3de   : > { %10573 = vrot.lane.b32.xlu0 %v10572_v13, %s11423_s28  ;;  %v6841_v42 = vsel %vm6824_vm11, %v6776_v29, %v10200_v17  ;;  %v6972_v33 = vsel %vm6954_vm13, %v6907_v50, %v10271_v6  ;;  %v10306_v18 = vunpack.i.h.bf16 %v15687_v28  ;;  %v10305_v38 = vunpack.i.l.bf16 %v15687_v28  ;;  %v4708_v29 = vld [vmem:[#allocation5 + $0x179] sm:$0xff] }
 0x3df   : > { %v15710_v60 = vpop.permute.xlu1 %10308  ;;  %v15716_v23 = vpop.permute.xlu0 %10278  ;;  %v6906_v59 = vsel %vm6889_vm12, %v6841_v42, %v10265_v22  ;;  %v6778_v51 = vsel %vm6759_vm10, %v6713_v62, %v10180_v40  ;;  %v6779_v6 = vsel %vm6759_vm10, %v6714_v20, %v10181_v45  ;;  %v4646_v62 = vld [vmem:[#allocation5 + $0x188] sm:$0xff]  ;;  %v19763_v20 = vpack.i.bf16 %v15057_v5, %v15032_v36  ;;  %v4648_v36 = vld [vmem:[#allocation5 + $0x198] sm:$0xff] }
 0x3e0   : > { %v6971_v30 = vsel %vm6954_vm13, %v6906_v59, %v10270_v19  ;;  %v10310_v7 = vunpack.i.l.bf16 %v15710_v60  ;;  %v6843_v2 = vsel %vm6824_vm11, %v6778_v51, %v10240_v4  ;;  %v6844_v28 = vsel %vm6824_vm11, %v6779_v6, %v10241_v37  ;;  %v4584_v5 = vld [vmem:[#allocation5 + $0x197] sm:$0xff] }
 0x3e1   : > { %10608 = vrot.lane.b32.xlu1 %v15693_v56, %s11417_s12  ;;  %v6908_v9 = vsel %vm6889_vm12, %v6843_v2, %v10305_v38  ;;  %v10632_v59 = vpack.i.bf16 %v4708_v29, %v4707_v24  ;;  %v10170_v40 = vunpack.i.l.bf16 %v15499_v32  ;;  %v4710_v38 = vld [vmem:[#allocation5 + $0x189] sm:$0xff]  ;;  %v10256_v6 = vunpack.i.h.bf16 %v15658_v27 }
 0x3e2   : > { %10583 = vrot.lane.b32.xlu0 %v10572_v13, %s11420_s27  ;;  %v6973_v41 = vsel %vm6954_vm13, %v6908_v9, %v10310_v7  ;;  %v10255_v2 = vunpack.i.l.bf16 %v15658_v27  ;;  %v4709_v9 = vld [vmem:[#allocation5 + $0x181] sm:$0xff] }
 0x3e3   : > { %v15733_v52 = vpop.permute.xlu1 %10313  ;;  %v10284_v13 = vpop.permute.xlu0 %10283  ;;  %v11232_v29 = vld [vmem:[#allocation5 + $0xc7] sm:$0xff] }
 0x3e4   : > { %v10286_v25 = vunpack.i.h.bf16 %v10284_v13  ;;  %v10285_v39 = vunpack.i.l.bf16 %v10284_v13 }
 0x3e5   : > { %10613 = vrot.lane.b32.xlu1 %v10612_v44, %s11423_s28 }
 0x3e6   : > { %10588 = vrot.lane.b32.xlu0 %v15677_v31, %s11419_s26  ;;  %v7035_v3 = vsel %vm358_vm4, %v6971_v30, %v10285_v39  ;;  %v7036_v34 = vsel %vm358_vm4, %v6972_v33, %v10286_v25  ;;  %v10311_v31 = vunpack.i.h.bf16 %v15710_v60  ;;  %v6909_v60 = vsel %vm6889_vm12, %v6844_v28, %v10306_v18  ;;  %v4645_v33 = vld [vmem:[#allocation5 + $0x180] sm:$0xff]  ;;  %v4647_v28 = vld [vmem:[#allocation5 + $0x190] sm:$0xff] }
 0x3e7   : > { %v15752_v17 = vpop.permute.xlu1 %10318  ;;  %v15757_v22 = vpop.permute.xlu0 %10298  ;;  %v7091_v63 = vpack.c.bf16 %v7036_v34, %v7035_v3  ;;  %v15802_v4 = vpack.i.bf16 %v4646_v62, %v4645_v33  ;;  %v4581_v3 = vld [vmem:[#allocation5 + $0x17f] sm:$0xff]  ;;  %v10171_v34 = vunpack.i.h.bf16 %v15499_v32  ;;  %v10210_v18 = vunpack.i.l.bf16 %v15527_v10 }
 0x3e8   : > { %v6974_v43 = vsel %vm6954_vm13, %v6909_v60, %v10311_v31  ;;  %v10195_v31 = vunpack.i.l.bf16 %v15566_v11  ;;  %v19764_v60 = vpack.i.bf16 %v15099_v47, %v15080_v16 }
 0x3e9   : > { %10623 = vrot.lane.b32.xlu1 %v10612_v44, %s11420_s27  ;;  %9689 = vmatprep.mubr.msk.bf16.mxu0 %vm7158_vm14, %v7091_v63  ;;  %v10196_v63 = vunpack.i.h.bf16 %v15566_v11 }
 0x3ea   : > { %10593 = vrot.lane.b32.xlu0 %v15699_v57, %s11418_s25 }
 0x3eb   : > { %v10324_v19 = vpop.permute.xlu1 %10323  ;;  %v15771_v12 = vpop.permute.xlu0 %10328 }
 0x3ec   : > { %v10326_v1 = vunpack.i.h.bf16 %v10324_v19  ;;  %v10325_v44 = vunpack.i.l.bf16 %v10324_v19  ;;  %v4583_v19 = vld [vmem:[#allocation5 + $0x18f] sm:$0xff] }
 0x3ed   : > { %10628 = vrot.lane.b32.xlu1 %v15693_v56, %s11419_s26  ;;  %v10692_v11 = vpack.i.bf16 %v4584_v5, %v4583_v19  ;;  %v10295_v5 = vunpack.i.l.bf16 %v15673_v35 }
 0x3ee   : > { %v7037_v45 = vsel %vm358_vm4, %v6973_v41, %v10325_v44  ;;  %v7038_v42 = vsel %vm358_vm4, %v6974_v43, %v10326_v1  ;;  %10598 = vrot.lane.b32.xlu0 %v15699_v57, %s11424_s29  ;;  %v15822_v1 = vpack.i.bf16 %v4648_v36, %v4647_v28  ;;  %v15824_v44 = vpack.i.bf16 %v4710_v38, %v4709_v9  ;;  %v11233_v43 = vld [vmem:[#allocation5 + $0xbf] sm:$0xff] }
 0x3ef   : > { %v15781_v13 = vpop.permute.xlu1 %10338  ;;  %v7092_v50 = vpack.c.bf16 %v7038_v42, %v7037_v45  ;;  %v15783_v25 = vpop.permute.xlu0 %10333  ;;  %v6586_v41 = vsel %vm408_vm6, %v11232_v29, %v10171_v34  ;;  %v6585_v27 = vsel %vm408_vm6, %v11233_v43, %v10170_v40  ;;  %v10211_v45 = vunpack.i.h.bf16 %v15527_v10  ;;  %v11234_v42 = vld [vmem:[#allocation5 + $0xcf] sm:$0xff] }
 0x3f0   : > { %v6587_v24 = vsel %vm408_vm6, %v11234_v42, %v10210_v18  ;;  %v6650_v16 = vsel %vm6629_vm8, %v6585_v27, %v10195_v31  ;;  %v6651_v47 = vsel %vm6629_vm8, %v6586_v41, %v10196_v63  ;;  %v10281_v10 = vunpack.i.h.bf16 %v15716_v23  ;;  %v11235_v63 = vld [vmem:[#allocation5 + $0xd7] sm:$0xff] }
 0x3f1   : > { %10633 = vrot.lane.b32.xlu1 %v10632_v59, %s11418_s25  ;;  %9690 = vmatmul.mubr.msk.bf16.gmra.mxu0 %vm7158_vm14, %v7092_v50  ;;  %v10235_v50 = vunpack.i.l.bf16 %v15608_v53  ;;  %v6716_v33 = vsel %vm6694_vm9, %v6651_v47, %v10256_v6  ;;  %v10221_v34 = vunpack.i.h.bf16 %v15632_v0  ;;  %v10220_v40 = vunpack.i.l.bf16 %v15632_v0 }
 0x3f2   : > { %10603 = vrot.lane.b32.xlu0 %v15699_v57, %s11415_s30  ;;  %v4582_v57 = vld [vmem:[#allocation5 + $0x187] sm:$0xff]  ;;  %v10296_v36 = vunpack.i.h.bf16 %v15673_v35  ;;  %v6588_v0 = vsel %vm408_vm6, %v11235_v63, %v10211_v45  ;;  %v10261_v35 = vunpack.i.h.bf16 %v15656_v46 }
 0x3f3   : > { %v15789_v56 = vpop.permute.xlu1 %10368  ;;  %v15791_v39 = vpop.permute.xlu0 %10343  ;;  %v10652_v51 = vpack.i.bf16 %v4582_v57, %v4581_v3  ;;  %v10280_v57 = vunpack.i.l.bf16 %v15716_v23  ;;  %v6652_v31 = vsel %vm6629_vm8, %v6587_v24, %v10235_v50  ;;  %v6781_v6 = vsel %vm6759_vm10, %v6716_v33, %v10221_v34 }
 0x3f4   : > { %v10346_v18 = vunpack.i.h.bf16 %v15791_v39  ;;  %v6717_v43 = vsel %vm6694_vm9, %v6652_v31, %v10295_v5  ;;  %v10321_v24 = vunpack.i.h.bf16 %v15752_v17 }
 0x3f5   : > { %10638 = vrot.lane.b32.xlu1 %v10632_v59, %s11424_s29 }
 0x3f6   : > { %10618 = vrot.lane.b32.xlu0 %v19763_v20, %s11422_s21  ;;  %v6715_v20 = vsel %vm6694_vm9, %v6650_v16, %v10255_v2  ;;  %v10320_v16 = vunpack.i.l.bf16 %v15752_v17 }
 0x3f7   : > { %v15798_v30 = vpop.permute.xlu1 %10373  ;;  %v15800_v37 = vpop.permute.xlu0 %10348 }
 0x3f8   : > { %v10351_v38 = vunpack.i.h.bf16 %v15800_v37  ;;  %v10350_v23 = vunpack.i.l.bf16 %v15800_v37  ;;  %v6846_v37 = vsel %vm6824_vm11, %v6781_v6, %v10281_v10  ;;  %v4711_v6 = vld [vmem:[#allocation5 + $0x191] sm:$0xff] }
 0x3f9   : > { %10643 = vrot.lane.b32.xlu1 %v10632_v59, %s11415_s30  ;;  %v10236_v59 = vunpack.i.h.bf16 %v15608_v53  ;;  %v10345_v53 = vunpack.i.l.bf16 %v15791_v39  ;;  %v6780_v39 = vsel %vm6759_vm10, %v6715_v20, %v10220_v40  ;;  %v10260_v20 = vunpack.i.l.bf16 %v15656_v46 }
 0x3fa   : > { %10648 = vrot.lane.b32.xlu0 %v15802_v4, %s11417_s12  ;;  %v6845_v19 = vsel %vm6824_vm11, %v6780_v39, %v10280_v57 }
 0x3fb   : > { %v15812_v7 = vpop.permute.xlu1 %10383  ;;  %v15816_v32 = vpop.permute.xlu0 %10353  ;;  %v6653_v28 = vsel %vm6629_vm8, %v6588_v0, %v10236_v59  ;;  %v6910_v9 = vsel %vm6889_vm12, %v6845_v19, %v10345_v53  ;;  %v6782_v17 = vsel %vm6759_vm10, %v6717_v43, %v10260_v20  ;;  %v4652_v20 = vld [vmem:[#allocation5 + $0x1b8] sm:$0xff] }
 0x3fc   : > { %v6718_v27 = vsel %vm6694_vm9, %v6653_v28, %v10296_v36  ;;  %v6975_v45 = vsel %vm6954_vm13, %v6910_v9, %v10350_v23  ;;  %v10386_v33 = vunpack.i.h.bf16 %v15812_v7  ;;  %v10385_v10 = vunpack.i.l.bf16 %v15812_v7  ;;  %v4712_v23 = vld [vmem:[#allocation5 + $0x199] sm:$0xff]  ;;  %v4650_v9 = vld [vmem:[#allocation5 + $0x1a8] sm:$0xff] }
 0x3fd   : > { %10658 = vrot.lane.b32.xlu1 %v19764_v60, %s11422_s21  ;;  %v6911_v60 = vsel %vm6889_vm12, %v6846_v37, %v10346_v18  ;;  %v6783_v18 = vsel %vm6759_vm10, %v6718_v27, %v10261_v35  ;;  %v6847_v46 = vsel %vm6824_vm11, %v6782_v17, %v10320_v16  ;;  %v10712_v35 = vpack.i.bf16 %v4712_v23, %v4711_v6  ;;  %v4649_v27 = vld [vmem:[#allocation5 + $0x1a0] sm:$0xff] }
 0x3fe   : > { %10653 = vrot.lane.b32.xlu0 %v10652_v51, %s11423_s28  ;;  %v6976_v42 = vsel %vm6954_vm13, %v6911_v60, %v10351_v38  ;;  %v6848_v7 = vsel %vm6824_vm11, %v6783_v18, %v10321_v24  ;;  %v6912_v36 = vsel %vm6889_vm12, %v6847_v46, %v10385_v10  ;;  %v19765_v60 = vld [vmem:[#allocation38_spill] sm:$0xff]  ;;  %v4585_v24 = vld [vmem:[#allocation5 + $0x19f] sm:$0xff]  ;;  %v10251_v16 = vunpack.i.h.bf16 %v15646_v21 }
 0x3ff   : > { %v15835_v62 = vpop.permute.xlu1 %10388  ;;  %v15841_v3 = vpop.permute.xlu0 %10358  ;;  %v4714_v10 = vld [vmem:[#allocation5 + $0x1a9] sm:$0xff]  ;;  %v10336_v18 = vunpack.i.h.bf16 %v15783_v25  ;;  %v10335_v46 = vunpack.i.l.bf16 %v15783_v25  ;;  %v10291_v6 = vunpack.i.h.bf16 %v15664_v48 }
 0x400   : > { %v10390_v40 = vunpack.i.l.bf16 %v15835_v62 }
 0x401   : > { %10688 = vrot.lane.b32.xlu1 %v15822_v1, %s11417_s12 }
 0x402   : > { %10663 = vrot.lane.b32.xlu0 %v10652_v51, %s11420_s27  ;;  %v6977_v63 = vsel %vm6954_vm13, %v6912_v36, %v10390_v40  ;;  %v4713_v36 = vld [vmem:[#allocation5 + $0x1a1] sm:$0xff] }
 0x403   : > { %v15858_v2 = vpop.permute.xlu1 %10393  ;;  %v10364_v51 = vpop.permute.xlu0 %10363 }
 0x404   : > { %v10366_v29 = vunpack.i.h.bf16 %v10364_v51  ;;  %v10365_v41 = vunpack.i.l.bf16 %v10364_v51 }
 0x405   : > { %10693 = vrot.lane.b32.xlu1 %v10692_v11, %s11423_s28 }
 0x406   : > { %10668 = vrot.lane.b32.xlu0 %v15802_v4, %s11419_s26  ;;  %v7039_v47 = vsel %vm358_vm4, %v6975_v45, %v10365_v41  ;;  %v7040_v59 = vsel %vm358_vm4, %v6976_v42, %v10366_v29  ;;  %v10391_v4 = vunpack.i.h.bf16 %v15835_v62  ;;  %v6913_v62 = vsel %vm6889_vm12, %v6848_v7, %v10386_v33  ;;  %v19766_v29 = vld [vmem:[#allocation21_spill] sm:$0xff]  ;;  %v4588_v33 = vld [vmem:[#allocation5 + $0x1b7] sm:$0xff] }
 0x407   : > { %v15877_v50 = vpop.permute.xlu1 %10398  ;;  %v15882_v57 = vpop.permute.xlu0 %10378  ;;  %v7093_v34 = vpack.c.bf16 %v7040_v59, %v7039_v47  ;;  %v19767_v41 = vpack.i.bf16 %v19765_v60, %v19766_v29  ;;  %v15927_v42 = vpack.i.bf16 %v4650_v9, %v4649_v27  ;;  %v10250_v47 = vunpack.i.l.bf16 %v15646_v21  ;;  %v4651_v7 = vld [vmem:[#allocation5 + $0x1b0] sm:$0xff] }
 0x408   : > { %v6978_v0 = vsel %vm6954_vm13, %v6913_v62, %v10391_v4  ;;  %v10290_v59 = vunpack.i.l.bf16 %v15664_v48  ;;  %v10275_v4 = vunpack.i.l.bf16 %v15691_v54  ;;  %v19768_v62 = vld [vmem:[#allocation69_spill] sm:$0xff]  ;;  %v15947_v23 = vpack.i.bf16 %v4652_v20, %v4651_v7 }
 0x409   : > { %10703 = vrot.lane.b32.xlu1 %v10692_v11, %s11420_s27  ;;  %9693 = vmatprep.mubr.msk.bf16.mxu0 %vm7158_vm14, %v7093_v34  ;;  %v10276_v34 = vunpack.i.h.bf16 %v15691_v54  ;;  %v10316_v29 = vunpack.i.h.bf16 %v15733_v52  ;;  %v10361_v48 = vunpack.i.h.bf16 %v15841_v3  ;;  %v10300_v20 = vunpack.i.l.bf16 %v15757_v22 }
 0x40a   : > { %10673 = vrot.lane.b32.xlu0 %v15824_v44, %s11418_s25 }
 0x40b   : > { %v10404_v53 = vpop.permute.xlu1 %10403  ;;  %v15896_v38 = vpop.permute.xlu0 %10408 }
 0x40c   : > { %v10406_v5 = vunpack.i.h.bf16 %v10404_v53  ;;  %v10405_v11 = vunpack.i.l.bf16 %v10404_v53  ;;  %v4587_v53 = vld [vmem:[#allocation5 + $0x1af] sm:$0xff] }
 0x40d   : > { %10708 = vrot.lane.b32.xlu1 %v15822_v1, %s11419_s26  ;;  %v10772_v54 = vpack.i.bf16 %v4588_v33, %v4587_v53 }
 0x40e   : > { %v7041_v31 = vsel %vm358_vm4, %v6977_v63, %v10405_v11  ;;  %v7042_v39 = vsel %vm358_vm4, %v6978_v0, %v10406_v5  ;;  %10678 = vrot.lane.b32.xlu0 %v15824_v44, %s11424_s29  ;;  %v19769_v5 = vld [vmem:[#allocation70_spill] sm:$0xff]  ;;  %v15949_v63 = vpack.i.bf16 %v4714_v10, %v4713_v36  ;;  %v10376_v10 = vunpack.i.h.bf16 %v15798_v30 }
 0x40f   : > { %v15906_v28 = vpop.permute.xlu1 %10418  ;;  %v7094_v19 = vpack.c.bf16 %v7042_v39, %v7041_v31  ;;  %v19770_v11 = vpack.i.bf16 %v19768_v62, %v19769_v5  ;;  %v11236_v0 = vld [vmem:[#allocation5 + $0xe7] sm:$0xff]  ;;  %v11237_v39 = vld [vmem:[#allocation5 + $0xdf] sm:$0xff] }
 0x410   : > { %v15908_v37 = vpop.permute.xlu0 %10413  ;;  %v6590_v31 = vsel %vm408_vm6, %v11236_v0, %v10251_v16  ;;  %v6589_v25 = vsel %vm408_vm6, %v11237_v39, %v10250_v47  ;;  %v10360_v16 = vunpack.i.l.bf16 %v15841_v3 }
 0x411   : > { %10713 = vrot.lane.b32.xlu1 %v10712_v35, %s11418_s25  ;;  %9694 = vmatmul.mubr.msk.bf16.gmra.mxu0 %vm7158_vm14, %v7094_v19  ;;  %v6654_v9 = vsel %vm6629_vm8, %v6589_v25, %v10275_v4  ;;  %v6655_v60 = vsel %vm6629_vm8, %v6590_v31, %v10276_v34  ;;  %v10375_v34 = vunpack.i.l.bf16 %v15798_v30  ;;  %v10341_v30 = vunpack.i.h.bf16 %v15781_v13 }
 0x412   : > { %10683 = vrot.lane.b32.xlu0 %v15824_v44, %s11415_s30  ;;  %v4586_v44 = vld [vmem:[#allocation5 + $0x1a7] sm:$0xff] }
 0x413   : > { %v15914_v1 = vpop.permute.xlu1 %10448  ;;  %v10732_v17 = vpack.i.bf16 %v4586_v44, %v4585_v24  ;;  %v6719_v44 = vsel %vm6694_vm9, %v6654_v9, %v10335_v46  ;;  %v6720_v24 = vsel %vm6694_vm9, %v6655_v60, %v10336_v18  ;;  %v11239_v18 = vld [vmem:[#allocation5 + $0xf7] sm:$0xff]  ;;  %v10400_v9 = vunpack.i.l.bf16 %v15877_v50 }
 0x414   : > { %v15916_v51 = vpop.permute.xlu0 %10423 }
 0x415   : > { %10718 = vrot.lane.b32.xlu1 %v10712_v35, %s11424_s29  ;;  %v10426_v33 = vunpack.i.h.bf16 %v15916_v51 }
 0x416   : > { %10698 = vrot.lane.b32.xlu0 %v19767_v41, %s11422_s21  ;;  %v10315_v41 = vunpack.i.l.bf16 %v15733_v52  ;;  %v10425_v52 = vunpack.i.l.bf16 %v15916_v51  ;;  %v6784_v51 = vsel %vm6759_vm10, %v6719_v44, %v10300_v20  ;;  %v10340_v44 = vunpack.i.l.bf16 %v15781_v13 }
 0x417   : > { %v15923_v43 = vpop.permute.xlu1 %10453  ;;  %v6849_v62 = vsel %vm6824_vm11, %v6784_v51, %v10360_v16 }
 0x418   : > { %v15925_v45 = vpop.permute.xlu0 %10428  ;;  %v6914_v5 = vsel %vm6889_vm12, %v6849_v62, %v10425_v52 }
 0x419   : > { %10723 = vrot.lane.b32.xlu1 %v10712_v35, %s11415_s30  ;;  %v11238_v35 = vld [vmem:[#allocation5 + $0xef] sm:$0xff]  ;;  %v10431_v4 = vunpack.i.h.bf16 %v15925_v45  ;;  %v10430_v3 = vunpack.i.l.bf16 %v15925_v45 }
 0x41a   : > { %10728 = vrot.lane.b32.xlu0 %v15927_v42, %s11417_s12  ;;  %v6591_v19 = vsel %vm408_vm6, %v11238_v35, %v10290_v59  ;;  %v10301_v59 = vunpack.i.h.bf16 %v15757_v22  ;;  %v6592_v22 = vsel %vm408_vm6, %v11239_v18, %v10291_v6 }
 0x41b   : > { %v15937_v40 = vpop.permute.xlu1 %10463  ;;  %v6656_v46 = vsel %vm6629_vm8, %v6591_v19, %v10315_v41  ;;  %v6657_v36 = vsel %vm6629_vm8, %v6592_v22, %v10316_v29  ;;  %v6979_v6 = vsel %vm6954_vm13, %v6914_v5, %v10430_v3  ;;  %v10401_v19 = vunpack.i.h.bf16 %v15877_v50  ;;  %v4716_v3 = vld [vmem:[#allocation5 + $0x1b9] sm:$0xff]  ;;  %v4654_v5 = vld [vmem:[#allocation5 + $0x1c8] sm:$0xff] }
 0x41c   : > { %v15941_v21 = vpop.permute.xlu0 %10433  ;;  %v6785_v7 = vsel %vm6759_vm10, %v6720_v24, %v10301_v59  ;;  %v6721_v39 = vsel %vm6694_vm9, %v6656_v46, %v10375_v34  ;;  %v6722_v25 = vsel %vm6694_vm9, %v6657_v36, %v10376_v10  ;;  %v10466_v24 = vunpack.i.h.bf16 %v15937_v40 }
 0x41d   : > { %10738 = vrot.lane.b32.xlu1 %v19770_v11, %s11422_s21  ;;  %v6850_v45 = vsel %vm6824_vm11, %v6785_v7, %v10361_v48  ;;  %v10465_v48 = vunpack.i.l.bf16 %v15937_v40  ;;  %v6786_v50 = vsel %vm6759_vm10, %v6721_v39, %v10340_v44  ;;  %v4715_v7 = vld [vmem:[#allocation5 + $0x1b1] sm:$0xff]  ;;  %v10355_v44 = vunpack.i.l.bf16 %v15816_v32 }
 0x41e   : > { %10733 = vrot.lane.b32.xlu0 %v10732_v17, %s11423_s28  ;;  %v6915_v11 = vsel %vm6889_vm12, %v6850_v45, %v10426_v33  ;;  %v6787_v33 = vsel %vm6759_vm10, %v6722_v25, %v10341_v30  ;;  %v6851_v13 = vsel %vm6824_vm11, %v6786_v50, %v10400_v9  ;;  %v10792_v30 = vpack.i.bf16 %v4716_v3, %v4715_v7  ;;  %v4591_v50 = vld [vmem:[#allocation5 + $0x1cf] sm:$0xff]  ;;  %v11241_v3 = vld [vmem:[#allocation5 + $0xff] sm:$0xff] }
 0x41f   : > { %v15960_v27 = vpop.permute.xlu1 %10468  ;;  %v6980_v35 = vsel %vm6954_vm13, %v6915_v11, %v10431_v4  ;;  %v6852_v40 = vsel %vm6824_vm11, %v6787_v33, %v10401_v19  ;;  %v6916_v10 = vsel %vm6889_vm12, %v6851_v13, %v10465_v48  ;;  %v19771_v11 = vpack.i.bf16 %v15237_v58, %v15208_v61  ;;  %v4656_v61 = vld [vmem:[#allocation5 + $0x1d8] sm:$0xff]  ;;  %v4717_v33 = vld [vmem:[#allocation5 + $0x1c1] sm:$0xff] }
 0x420   : > { %v15966_v47 = vpop.permute.xlu0 %10438  ;;  %v10470_v20 = vunpack.i.l.bf16 %v15960_v27  ;;  %v10330_v19 = vunpack.i.l.bf16 %v15771_v12  ;;  %v10370_v9 = vunpack.i.l.bf16 %v15789_v56  ;;  %v4592_v58 = vld [vmem:[#allocation5 + $0x1d7] sm:$0xff] }
 0x421   : > { %10768 = vrot.lane.b32.xlu1 %v15947_v23, %s11417_s12  ;;  %v19772_v13 = vld [vmem:[#allocation75_spill] sm:$0xff] }
 0x422   : > { %10743 = vrot.lane.b32.xlu0 %v10732_v17, %s11420_s27  ;;  %v6981_v18 = vsel %vm6954_vm13, %v6916_v10, %v10470_v20  ;;  %v4655_v20 = vld [vmem:[#allocation5 + $0x1d0] sm:$0xff] }
 0x423   : > { %v15983_v53 = vpop.permute.xlu1 %10473  ;;  %v16072_v10 = vpack.i.bf16 %v4656_v61, %v4655_v20  ;;  %v10456_v61 = vunpack.i.h.bf16 %v15923_v43 }
 0x424   : > { %v10444_v17 = vpop.permute.xlu0 %10443 }
 0x425   : > { %10773 = vrot.lane.b32.xlu1 %v10772_v54, %s11423_s28  ;;  %v10446_v0 = vunpack.i.h.bf16 %v10444_v17  ;;  %v10445_v31 = vunpack.i.l.bf16 %v10444_v17 }
 0x426   : > { %10748 = vrot.lane.b32.xlu0 %v15927_v42, %s11419_s26  ;;  %v10471_v42 = vunpack.i.h.bf16 %v15960_v27  ;;  %v6917_v27 = vsel %vm6889_vm12, %v6852_v40, %v10466_v24  ;;  %v19773_v40 = vld [vmem:[#allocation62_spill] sm:$0xff] }
 0x427   : > { %v7043_v60 = vsel %vm358_vm4, %v6979_v6, %v10445_v31  ;;  %v7044_v29 = vsel %vm358_vm4, %v6980_v35, %v10446_v0  ;;  %v16002_v41 = vpop.permute.xlu1 %10478  ;;  %v4653_v31 = vld [vmem:[#allocation5 + $0x1c0] sm:$0xff]  ;;  %v10331_v35 = vunpack.i.h.bf16 %v15771_v12 }
 0x428   : > { %v16007_v16 = vpop.permute.xlu0 %10458  ;;  %v7095_v59 = vpack.c.bf16 %v7044_v29, %v7043_v60  ;;  %v6982_v22 = vsel %vm6954_vm13, %v6917_v27, %v10471_v42  ;;  %v16052_v25 = vpack.i.bf16 %v4654_v5, %v4653_v31  ;;  %v4589_v6 = vld [vmem:[#allocation5 + $0x1bf] sm:$0xff]  ;;  %v4718_v60 = vld [vmem:[#allocation5 + $0x1c9] sm:$0xff]  ;;  %v10356_v29 = vunpack.i.h.bf16 %v15816_v32 }
 0x429   : > { %10783 = vrot.lane.b32.xlu1 %v10772_v54, %s11420_s27  ;;  %v10415_v42 = vunpack.i.l.bf16 %v15908_v37  ;;  %v10852_v32 = vpack.i.bf16 %v4592_v58, %v4591_v50  ;;  %v16074_v27 = vpack.i.bf16 %v4718_v60, %v4717_v33  ;;  %v10455_v58 = vunpack.i.l.bf16 %v15923_v43 }
 0x42a   : > { %10753 = vrot.lane.b32.xlu0 %v15949_v63, %s11418_s25  ;;  %9697 = vmatprep.mubr.msk.bf16.mxu0 %vm7158_vm14, %v7095_v59  ;;  %v10416_v59 = vunpack.i.h.bf16 %v15908_v37  ;;  %v6593_v37 = vsel %vm408_vm6, %v11241_v3, %v10330_v19  ;;  %v10380_v19 = vunpack.i.l.bf16 %v15882_v57  ;;  %v10421_v43 = vunpack.i.h.bf16 %v15906_v28 }
 0x42b   : > { %v10484_v52 = vpop.permute.xlu1 %10483 }
 0x42c   : > { %v10486_v34 = vunpack.i.h.bf16 %v10484_v52  ;;  %v10485_v54 = vunpack.i.l.bf16 %v10484_v52  ;;  %v16021_v4 = vpop.permute.xlu0 %10488  ;;  %v19774_v52 = vpack.i.bf16 %v19772_v13, %v19773_v40 }
 0x42d   : > { %10788 = vrot.lane.b32.xlu1 %v15947_v23, %s11419_s26 }
 0x42e   : > { %v7045_v46 = vsel %vm358_vm4, %v6981_v18, %v10485_v54  ;;  %v7046_v51 = vsel %vm358_vm4, %v6982_v22, %v10486_v34  ;;  %10758 = vrot.lane.b32.xlu0 %v15949_v63, %s11424_s29  ;;  %v11240_v34 = vld [vmem:[#allocation5 + $0x107] sm:$0xff]  ;;  %v10371_v18 = vunpack.i.h.bf16 %v15789_v56  ;;  %v11242_v22 = vld [vmem:[#allocation5 + $0x10f] sm:$0xff]  ;;  %v10441_v56 = vunpack.i.h.bf16 %v15966_v47 }
 0x42f   : > { %v16031_v36 = vpop.permute.xlu1 %10498  ;;  %v7096_v62 = vpack.c.bf16 %v7046_v51, %v7045_v46  ;;  %v6594_v54 = vsel %vm408_vm6, %v11240_v34, %v10331_v35  ;;  %v6595_v46 = vsel %vm408_vm6, %v11242_v22, %v10370_v9  ;;  %v6658_v51 = vsel %vm6629_vm8, %v6593_v37, %v10355_v44 }
 0x430   : > { %v16033_v45 = vpop.permute.xlu0 %10493  ;;  %v6659_v7 = vsel %vm6629_vm8, %v6594_v54, %v10356_v29  ;;  %v10381_v35 = vunpack.i.h.bf16 %v15882_v57  ;;  %v11243_v29 = vld [vmem:[#allocation5 + $0x117] sm:$0xff]  ;;  %v10480_v22 = vunpack.i.l.bf16 %v16002_v41 }
 0x431   : > { %10793 = vrot.lane.b32.xlu1 %v10792_v30, %s11418_s25  ;;  %9698 = vmatmul.mubr.msk.bf16.gmra.mxu0 %vm7158_vm14, %v7096_v62  ;;  %v10395_v62 = vunpack.i.l.bf16 %v15858_v2  ;;  %v6724_v31 = vsel %vm6694_vm9, %v6659_v7, %v10416_v59  ;;  %v6596_v57 = vsel %vm408_vm6, %v11243_v29, %v10371_v18  ;;  %v10481_v18 = vunpack.i.h.bf16 %v16002_v41 }
 0x432   : > { %10763 = vrot.lane.b32.xlu0 %v15949_v63, %s11415_s30  ;;  %v4590_v63 = vld [vmem:[#allocation5 + $0x1c7] sm:$0xff]  ;;  %v6789_v59 = vsel %vm6759_vm10, %v6724_v31, %v10381_v35 }
 0x433   : > { %v16039_v23 = vpop.permute.xlu1 %10528  ;;  %v10812_v48 = vpack.i.bf16 %v4590_v63, %v4589_v6  ;;  %v10440_v63 = vunpack.i.l.bf16 %v15966_v47  ;;  %v6660_v44 = vsel %vm6629_vm8, %v6595_v46, %v10395_v62 }
 0x434   : > { %v16041_v17 = vpop.permute.xlu0 %10503  ;;  %v6725_v34 = vsel %vm6694_vm9, %v6660_v44, %v10455_v58  ;;  %v4720_v58 = vld [vmem:[#allocation5 + $0x1d9] sm:$0xff]  ;;  %v4719_v44 = vld [vmem:[#allocation5 + $0x1d1] sm:$0xff] }
 0x435   : > { %10798 = vrot.lane.b32.xlu1 %v10792_v30, %s11424_s29  ;;  %v10506_v9 = vunpack.i.h.bf16 %v16041_v17 }
 0x436   : > { %10778 = vrot.lane.b32.xlu0 %v19771_v11, %s11422_s21  ;;  %v6723_v11 = vsel %vm6694_vm9, %v6658_v51, %v10415_v42 }
 0x437   : > { %v16048_v0 = vpop.permute.xlu1 %10533 }
 0x438   : > { %v16050_v39 = vpop.permute.xlu0 %10508 }
 0x439   : > { %10803 = vrot.lane.b32.xlu1 %v10792_v30, %s11415_s30  ;;  %v10396_v30 = vunpack.i.h.bf16 %v15858_v2  ;;  %v10505_v2 = vunpack.i.l.bf16 %v16041_v17  ;;  %v10511_v60 = vunpack.i.h.bf16 %v16050_v39  ;;  %v10510_v47 = vunpack.i.l.bf16 %v16050_v39 }
 0x43a   : > { %10808 = vrot.lane.b32.xlu0 %v16052_v25, %s11417_s12  ;;  %v6788_v17 = vsel %vm6759_vm10, %v6723_v11, %v10380_v19  ;;  %v6854_v39 = vsel %vm6824_vm11, %v6789_v59, %v10441_v56  ;;  %v10872_v59 = vpack.i.bf16 %v4720_v58, %v4719_v44  ;;  %v11244_v58 = vld [vmem:[#allocation5 + $0x127] sm:$0xff] }
 0x43b   : > { %v16062_v24 = vpop.permute.xlu1 %10543  ;;  %v6661_v20 = vsel %vm6629_vm8, %v6596_v57, %v10396_v30  ;;  %v6853_v50 = vsel %vm6824_vm11, %v6788_v17, %v10440_v63  ;;  %v6919_v13 = vsel %vm6889_vm12, %v6854_v39, %v10506_v9  ;;  %v10420_v30 = vunpack.i.l.bf16 %v15906_v28  ;;  %v4658_v39 = vld [vmem:[#allocation5 + $0x1e8] sm:$0xff] }
 0x43c   : > { %v16066_v12 = vpop.permute.xlu0 %10513  ;;  %v6918_v33 = vsel %vm6889_vm12, %v6853_v50, %v10505_v2  ;;  %v6726_v54 = vsel %vm6694_vm9, %v6661_v20, %v10456_v61  ;;  %v6984_v37 = vsel %vm6954_vm13, %v6919_v13, %v10511_v60  ;;  %v10546_v62 = vunpack.i.h.bf16 %v16062_v24 }
 0x43d   : > { %10818 = vrot.lane.b32.xlu1 %v19774_v52, %s11422_s21  ;;  %v6983_v3 = vsel %vm6954_vm13, %v6918_v33, %v10510_v47  ;;  %v10545_v11 = vunpack.i.l.bf16 %v16062_v24  ;;  %v6790_v41 = vsel %vm6759_vm10, %v6725_v34, %v10420_v30  ;;  %v6791_v35 = vsel %vm6759_vm10, %v6726_v54, %v10421_v43  ;;  %v19776_v33 = vld [vmem:[#allocation11_spill] sm:$0xff]  ;;  %v4722_v30 = vld [vmem:[#allocation5 + $0x1e9] sm:$0xff] }
 0x43e   : > { %10813 = vrot.lane.b32.xlu0 %v10812_v48, %s11423_s28  ;;  %v6855_v28 = vsel %vm6824_vm11, %v6790_v41, %v10480_v22  ;;  %v6856_v24 = vsel %vm6824_vm11, %v6791_v35, %v10481_v18  ;;  %v10410_v18 = vunpack.i.l.bf16 %v15896_v38  ;;  %v10450_v22 = vunpack.i.l.bf16 %v15914_v1  ;;  %v4659_v35 = vld [vmem:[#allocation5 + $0x1f0] sm:$0xff] }
 0x43f   : > { %v16085_v5 = vpop.permute.xlu1 %10548  ;;  %v6920_v9 = vsel %vm6889_vm12, %v6855_v28, %v10545_v11  ;;  %v10435_v11 = vunpack.i.l.bf16 %v15941_v21  ;;  %v10495_v41 = vunpack.i.l.bf16 %v16033_v45  ;;  %v4595_v28 = vld [vmem:[#allocation5 + $0x1ef] sm:$0xff] }
 0x440   : > { %v16091_v6 = vpop.permute.xlu0 %10518  ;;  %v10550_v63 = vunpack.i.l.bf16 %v16085_v5 }
 0x441   : > { %10848 = vrot.lane.b32.xlu1 %v16072_v10, %s11417_s12 }
 0x442   : > { %10823 = vrot.lane.b32.xlu0 %v10812_v48, %s11420_s27  ;;  %v6985_v60 = vsel %vm6954_vm13, %v6920_v9, %v10550_v63  ;;  %v10496_v63 = vunpack.i.h.bf16 %v16033_v45  ;;  %v19779_v9 = vld [vmem:[#allocation41_spill] sm:$0xff] }
 0x443   : > { %v16108_v42 = vpop.permute.xlu1 %10553 }
 0x444   : > { %v10524_v48 = vpop.permute.xlu0 %10523 }
 0x445   : > { %10853 = vrot.lane.b32.xlu1 %v10852_v32, %s11423_s28  ;;  %v10526_v40 = vunpack.i.h.bf16 %v10524_v48  ;;  %v10525_v52 = vunpack.i.l.bf16 %v10524_v48  ;;  %v19775_v48 = vld [vmem:[#allocation42_spill] sm:$0xff] }
 0x446   : > { %10828 = vrot.lane.b32.xlu0 %v16052_v25, %s11419_s26  ;;  %v10551_v25 = vunpack.i.h.bf16 %v16085_v5  ;;  %v6921_v5 = vsel %vm6889_vm12, %v6856_v24, %v10546_v62  ;;  %v19777_v13 = vpack.i.bf16 %v19775_v48, %v19776_v33  ;;  %v10436_v62 = vunpack.i.h.bf16 %v15941_v21  ;;  %v4721_v24 = vld [vmem:[#allocation5 + $0x1e1] sm:$0xff] }
 0x447   : > { %v7047_v46 = vsel %vm358_vm4, %v6983_v3, %v10525_v52  ;;  %v7048_v51 = vsel %vm358_vm4, %v6984_v37, %v10526_v40  ;;  %v16127_v7 = vpop.permute.xlu1 %10558  ;;  %v4657_v52 = vld [vmem:[#allocation5 + $0x1e0] sm:$0xff]  ;;  %v10411_v37 = vunpack.i.h.bf16 %v15896_v38  ;;  %v10475_v48 = vunpack.i.l.bf16 %v15983_v53 }
 0x448   : > { %v16132_v31 = vpop.permute.xlu0 %10538  ;;  %v7097_v56 = vpack.c.bf16 %v7048_v51, %v7047_v46  ;;  %v6986_v47 = vsel %vm6954_vm13, %v6921_v5, %v10551_v25  ;;  %v16177_v54 = vpack.i.bf16 %v4658_v39, %v4657_v52  ;;  %v4593_v3 = vld [vmem:[#allocation5 + $0x1df] sm:$0xff]  ;;  %v4596_v51 = vld [vmem:[#allocation5 + $0x1f7] sm:$0xff]  ;;  %v10476_v39 = vunpack.i.h.bf16 %v15983_v53 }
 0x449   : > { %10863 = vrot.lane.b32.xlu1 %v10852_v32, %s11420_s27  ;;  %v4660_v46 = vld [vmem:[#allocation5 + $0x1f8] sm:$0xff]  ;;  %v10932_v21 = vpack.i.bf16 %v4596_v51, %v4595_v28  ;;  %v10535_v51 = vunpack.i.l.bf16 %v16048_v0 }
 0x44a   : > { %10833 = vrot.lane.b32.xlu0 %v16074_v27, %s11418_s25  ;;  %9701 = vmatprep.mubr.msk.bf16.mxu0 %vm7158_vm14, %v7097_v56 }
 0x44b   : > { %v10564_v19 = vpop.permute.xlu1 %10563 }
 0x44c   : > { %v10566_v2 = vunpack.i.h.bf16 %v10564_v19  ;;  %v10565_v32 = vunpack.i.l.bf16 %v10564_v19  ;;  %v16146_v61 = vpop.permute.xlu0 %10568  ;;  %v19778_v19 = vld [vmem:[#allocation79_spill] sm:$0xff] }
 0x44d   : > { %10868 = vrot.lane.b32.xlu1 %v16072_v10, %s11419_s26  ;;  %v19780_v5 = vpack.i.bf16 %v19778_v19, %v19779_v9 }
 0x44e   : > { %v7049_v29 = vsel %vm358_vm4, %v6985_v60, %v10565_v32  ;;  %v7050_v57 = vsel %vm358_vm4, %v6986_v47, %v10566_v2  ;;  %10838 = vrot.lane.b32.xlu0 %v16074_v27, %s11424_s29  ;;  %v16197_v2 = vpack.i.bf16 %v4660_v46, %v4659_v35  ;;  %v16199_v32 = vpack.i.bf16 %v4722_v30, %v4721_v24  ;;  %v11245_v47 = vld [vmem:[#allocation5 + $0x11f] sm:$0xff] }
 0x44f   : > { %v16156_v17 = vpop.permute.xlu1 %10578  ;;  %v7098_v20 = vpack.c.bf16 %v7050_v57, %v7049_v29  ;;  %v6598_v60 = vsel %vm408_vm6, %v11244_v58, %v10411_v37  ;;  %v6597_v45 = vsel %vm408_vm6, %v11245_v47, %v10410_v18  ;;  %v10451_v29 = vunpack.i.h.bf16 %v15914_v1  ;;  %v11246_v57 = vld [vmem:[#allocation5 + $0x12f] sm:$0xff] }
 0x450   : > { %v16158_v43 = vpop.permute.xlu0 %10573  ;;  %v6599_v44 = vsel %vm408_vm6, %v11246_v57, %v10450_v22  ;;  %v10521_v1 = vunpack.i.h.bf16 %v16091_v6  ;;  %v10461_v37 = vunpack.i.h.bf16 %v16007_v16  ;;  %v10460_v18 = vunpack.i.l.bf16 %v16007_v16 }
 0x451   : > { %10873 = vrot.lane.b32.xlu1 %v10872_v59, %s11418_s25  ;;  %9702 = vmatmul.mubr.msk.bf16.gmra.mxu0 %vm7158_vm14, %v7098_v20  ;;  %v6663_v20 = vsel %vm6629_vm8, %v6598_v60, %v10436_v62  ;;  %v10536_v46 = vunpack.i.h.bf16 %v16048_v0  ;;  %v11247_v62 = vld [vmem:[#allocation5 + $0x137] sm:$0xff]  ;;  %v10501_v0 = vunpack.i.h.bf16 %v16031_v36  ;;  %v10560_v57 = vunpack.i.l.bf16 %v16127_v7 }
 0x452   : > { %10843 = vrot.lane.b32.xlu0 %v16074_v27, %s11415_s30  ;;  %v4594_v27 = vld [vmem:[#allocation5 + $0x1e7] sm:$0xff]  ;;  %v6728_v52 = vsel %vm6694_vm9, %v6663_v20, %v10496_v63  ;;  %v6600_v16 = vsel %vm408_vm6, %v11247_v62, %v10451_v29  ;;  %v10561_v29 = vunpack.i.h.bf16 %v16127_v7 }
 0x453   : > { %v16164_v10 = vpop.permute.xlu1 %10608  ;;  %v10892_v25 = vpack.i.bf16 %v4594_v27, %v4593_v3  ;;  %v10520_v27 = vunpack.i.l.bf16 %v16091_v6  ;;  %v6793_v63 = vsel %vm6759_vm10, %v6728_v52, %v10461_v37  ;;  %v6665_v35 = vsel %vm6629_vm8, %v6600_v16, %v10476_v39 }
 0x454   : > { %v16166_v50 = vpop.permute.xlu0 %10583  ;;  %v6730_v60 = vsel %vm6694_vm9, %v6665_v35, %v10536_v46  ;;  %v10500_v39 = vunpack.i.l.bf16 %v16031_v36 }
 0x455   : > { %10878 = vrot.lane.b32.xlu1 %v10872_v59, %s11424_s29  ;;  %v10586_v22 = vunpack.i.h.bf16 %v16166_v50  ;;  %v10585_v53 = vunpack.i.l.bf16 %v16166_v50  ;;  %v6795_v37 = vsel %vm6759_vm10, %v6730_v60, %v10501_v0  ;;  %v10491_v60 = vunpack.i.h.bf16 %v16021_v4 }
 0x456   : > { %10858 = vrot.lane.b32.xlu0 %v19777_v13, %s11422_s21 }
 0x457   : > { %v16173_v40 = vpop.permute.xlu1 %10613 }
 0x458   : > { %v16175_v34 = vpop.permute.xlu0 %10588 }
 0x459   : > { %10883 = vrot.lane.b32.xlu1 %v10872_v59, %s11415_s30  ;;  %v6662_v59 = vsel %vm6629_vm8, %v6597_v45, %v10435_v11  ;;  %v10591_v30 = vunpack.i.h.bf16 %v16175_v34  ;;  %v10590_v6 = vunpack.i.l.bf16 %v16175_v34  ;;  %v6664_v11 = vsel %vm6629_vm8, %v6599_v44, %v10475_v48 }
 0x45a   : > { %10888 = vrot.lane.b32.xlu0 %v16177_v54, %s11417_s12  ;;  %v6727_v13 = vsel %vm6694_vm9, %v6662_v59, %v10495_v41  ;;  %v6858_v34 = vsel %vm6824_vm11, %v6793_v63, %v10521_v1  ;;  %v6729_v58 = vsel %vm6694_vm9, %v6664_v11, %v10535_v51  ;;  %v4724_v51 = vld [vmem:[#allocation5 + $0x1f9] sm:$0xff]  ;;  %v4723_v11 = vld [vmem:[#allocation5 + $0x1f1] sm:$0xff] }
 0x45b   : > { %v16187_v56 = vpop.permute.xlu1 %10623  ;;  %v6792_v50 = vsel %vm6759_vm10, %v6727_v13, %v10460_v18  ;;  %v6923_v19 = vsel %vm6889_vm12, %v6858_v34, %v10586_v22  ;;  %v6794_v7 = vsel %vm6759_vm10, %v6729_v58, %v10500_v39  ;;  %v10952_v63 = vpack.i.bf16 %v4724_v51, %v4723_v11  ;;  %v4662_v34 = vld [vmem:[#allocation5 + $0x208] sm:$0xff]  ;;  %v4597_v58 = vld [vmem:[#allocation5 + $0x1ff] sm:$0xff] }
 0x45c   : > { %v16191_v38 = vpop.permute.xlu0 %10593  ;;  %v6857_v28 = vsel %vm6824_vm11, %v6792_v50, %v10520_v27  ;;  %v6988_v45 = vsel %vm6954_vm13, %v6923_v19, %v10591_v30  ;;  %v10626_v48 = vunpack.i.h.bf16 %v16187_v56  ;;  %v10625_v13 = vunpack.i.l.bf16 %v16187_v56  ;;  %v4661_v19 = vld [vmem:[#allocation5 + $0x200] sm:$0xff] }
 0x45d   : > { %10898 = vrot.lane.b32.xlu1 %v19780_v5, %s11422_s21  ;;  %v6922_v24 = vsel %vm6889_vm12, %v6857_v28, %v10585_v53  ;;  %v6859_v36 = vsel %vm6824_vm11, %v6794_v7, %v10560_v57  ;;  %v6860_v56 = vsel %vm6824_vm11, %v6795_v37, %v10561_v29  ;;  %v4726_v29 = vld [vmem:[#allocation5 + $0x209] sm:$0xff]  ;;  %v10516_v57 = vunpack.i.h.bf16 %v16066_v12 }
 0x45e   : > { %10893 = vrot.lane.b32.xlu0 %v10892_v25, %s11423_s28  ;;  %v6987_v47 = vsel %vm6954_vm13, %v6922_v24, %v10590_v6  ;;  %v6924_v22 = vsel %vm6889_vm12, %v6859_v36, %v10625_v13  ;;  %v10575_v13 = vunpack.i.l.bf16 %v16158_v43  ;;  %v19782_v7 = vpack.i.bf16 %v15475_v8, %v15453_v15 }
 0x45f   : > { %v16210_v33 = vpop.permute.xlu1 %10628  ;;  %v10556_v51 = vunpack.i.h.bf16 %v16108_v42 }
 0x460   : > { %v16216_v3 = vpop.permute.xlu0 %10598  ;;  %v10630_v27 = vunpack.i.l.bf16 %v16210_v33 }
 0x461   : > { %10928 = vrot.lane.b32.xlu1 %v16197_v2, %s11417_s12  ;;  %v10600_v11 = vunpack.i.l.bf16 %v16216_v3 }
 0x462   : > { %10903 = vrot.lane.b32.xlu0 %v10892_v25, %s11420_s27  ;;  %v6989_v30 = vsel %vm6954_vm13, %v6924_v22, %v10630_v27  ;;  %v4725_v27 = vld [vmem:[#allocation5 + $0x201] sm:$0xff] }
 0x463   : > { %v16233_v41 = vpop.permute.xlu1 %10633  ;;  %v16324_v36 = vpack.i.bf16 %v4726_v29, %v4725_v27  ;;  %v11249_v22 = vld [vmem:[#allocation5 + $0x13f] sm:$0xff] }
 0x464   : > { %v10604_v25 = vpop.permute.xlu0 %10603 }
 0x465   : > { %10933 = vrot.lane.b32.xlu1 %v10932_v21, %s11423_s28  ;;  %v10606_v9 = vunpack.i.h.bf16 %v10604_v25  ;;  %v10605_v5 = vunpack.i.l.bf16 %v10604_v25  ;;  %v19781_v25 = vpack.i.bf16 %v15425_v55, %v15396_v49  ;;  %v4664_v49 = vld [vmem:[#allocation5 + $0x218] sm:$0xff] }
 0x466   : > { %10908 = vrot.lane.b32.xlu0 %v16177_v54, %s11419_s26  ;;  %v10631_v54 = vunpack.i.h.bf16 %v16210_v33  ;;  %v6925_v33 = vsel %vm6889_vm12, %v6860_v56, %v10626_v48  ;;  %v4600_v55 = vld [vmem:[#allocation5 + $0x217] sm:$0xff]  ;;  %v10576_v48 = vunpack.i.h.bf16 %v16158_v43  ;;  %v11248_v56 = vld [vmem:[#allocation5 + $0x147] sm:$0xff] }
 0x467   : > { %v7051_v44 = vsel %vm358_vm4, %v6987_v47, %v10605_v5  ;;  %v7052_v59 = vsel %vm358_vm4, %v6988_v45, %v10606_v9  ;;  %v16252_v20 = vpop.permute.xlu1 %10638  ;;  %v16302_v5 = vpack.i.bf16 %v4662_v34, %v4661_v19  ;;  %v10490_v47 = vunpack.i.l.bf16 %v16021_v4 }
 0x468   : > { %v16257_v52 = vpop.permute.xlu0 %10618  ;;  %v7099_v1 = vpack.c.bf16 %v7052_v59, %v7051_v44  ;;  %v6990_v6 = vsel %vm6954_vm13, %v6925_v33, %v10631_v54  ;;  %v10530_v45 = vunpack.i.l.bf16 %v16039_v23  ;;  %v10515_v44 = vunpack.i.l.bf16 %v16066_v12  ;;  %v4599_v54 = vld [vmem:[#allocation5 + $0x20f] sm:$0xff] }
 0x469   : > { %10943 = vrot.lane.b32.xlu1 %v10932_v21, %s11420_s27  ;;  %v11012_v12 = vpack.i.bf16 %v4600_v55, %v4599_v54  ;;  %v6601_v43 = vsel %vm408_vm6, %v11249_v22, %v10490_v47  ;;  %v10531_v33 = vunpack.i.h.bf16 %v16039_v23  ;;  %v10601_v23 = vunpack.i.h.bf16 %v16216_v3 }
 0x46a   : > { %10913 = vrot.lane.b32.xlu0 %v16199_v32, %s11418_s25  ;;  %9705 = vmatprep.mubr.msk.bf16.mxu0 %vm7158_vm14, %v7099_v1  ;;  %v4663_v1 = vld [vmem:[#allocation5 + $0x210] sm:$0xff]  ;;  %v6666_v15 = vsel %vm6629_vm8, %v6601_v43, %v10515_v44  ;;  %v10540_v34 = vunpack.i.l.bf16 %v16132_v31  ;;  %v10616_v19 = vunpack.i.h.bf16 %v16173_v40 }
 0x46b   : > { %v10644_v18 = vpop.permute.xlu1 %10643  ;;  %v16322_v37 = vpack.i.bf16 %v4664_v49, %v4663_v1 }
 0x46c   : > { %v10646_v53 = vunpack.i.h.bf16 %v10644_v18  ;;  %v10645_v21 = vunpack.i.l.bf16 %v10644_v18  ;;  %v16271_v46 = vpop.permute.xlu0 %10648  ;;  %v6602_v18 = vsel %vm408_vm6, %v11248_v56, %v10491_v60  ;;  %v11251_v60 = vld [vmem:[#allocation5 + $0x157] sm:$0xff]  ;;  %v10641_v56 = vunpack.i.h.bf16 %v16252_v20 }
 0x46d   : > { %10948 = vrot.lane.b32.xlu1 %v16197_v2, %s11419_s26  ;;  %v6667_v8 = vsel %vm6629_vm8, %v6602_v18, %v10516_v57  ;;  %v10640_v18 = vunpack.i.l.bf16 %v16252_v20 }
 0x46e   : > { %v7053_v62 = vsel %vm358_vm4, %v6989_v30, %v10645_v21  ;;  %v7054_v16 = vsel %vm358_vm4, %v6990_v6, %v10646_v53  ;;  %10918 = vrot.lane.b32.xlu0 %v16199_v32, %s11424_s29  ;;  %v11250_v53 = vld [vmem:[#allocation5 + $0x14f] sm:$0xff]  ;;  %v10555_v30 = vunpack.i.l.bf16 %v16108_v42 }
 0x46f   : > { %v16281_v50 = vpop.permute.xlu1 %10658  ;;  %v7100_v35 = vpack.c.bf16 %v7054_v16, %v7053_v62  ;;  %v6603_v21 = vsel %vm408_vm6, %v11250_v53, %v10530_v45  ;;  %v6731_v62 = vsel %vm6694_vm9, %v6666_v15, %v10575_v13  ;;  %v6732_v16 = vsel %vm6694_vm9, %v6667_v8, %v10576_v48 }
 0x470   : > { %v16283_v0 = vpop.permute.xlu0 %10653  ;;  %v6668_v47 = vsel %vm6629_vm8, %v6603_v21, %v10555_v30  ;;  %v10580_v53 = vunpack.i.l.bf16 %v16156_v17 }
 0x471   : > { %10953 = vrot.lane.b32.xlu1 %v10952_v63, %s11418_s25  ;;  %9706 = vmatmul.mubr.msk.bf16.gmra.mxu0 %vm7158_vm14, %v7100_v35  ;;  %v10541_v35 = vunpack.i.h.bf16 %v16132_v31  ;;  %v6604_v31 = vsel %vm408_vm6, %v11251_v60, %v10531_v33 }
 0x472   : > { %10923 = vrot.lane.b32.xlu0 %v16199_v32, %s11415_s30  ;;  %v4598_v32 = vld [vmem:[#allocation5 + $0x207] sm:$0xff]  ;;  %v6669_v55 = vsel %vm6629_vm8, %v6604_v31, %v10556_v51 }
 0x473   : > { %v16289_v2 = vpop.permute.xlu1 %10688  ;;  %v10972_v39 = vpack.i.bf16 %v4598_v32, %v4597_v58  ;;  %v10615_v32 = vunpack.i.l.bf16 %v16173_v40  ;;  %v6797_v45 = vsel %vm6759_vm10, %v6732_v16, %v10541_v35  ;;  %v10581_v40 = vunpack.i.h.bf16 %v16156_v17 }
 0x474   : > { %v16291_v28 = vpop.permute.xlu0 %10663  ;;  %v6734_v54 = vsel %vm6694_vm9, %v6669_v55, %v10616_v19  ;;  %v19783_v55 = vpack.i.bf16 %v15513_v26, %v15496_v14  ;;  %v4732_v14 = vld [vmem:[#allocation5 + $0x237] sm:$0xff] }
 0x475   : > { %10958 = vrot.lane.b32.xlu1 %v10952_v63, %s11424_s29  ;;  %v10665_v42 = vunpack.i.l.bf16 %v16291_v28  ;;  %v6733_v1 = vsel %vm6694_vm9, %v6668_v47, %v10615_v32  ;;  %v4735_v26 = vld [vmem:[#allocation5 + $0x231] sm:$0xff] }
 0x476   : > { %10938 = vrot.lane.b32.xlu0 %v19781_v25, %s11422_s21  ;;  %v10666_v25 = vunpack.i.h.bf16 %v16291_v28  ;;  %v6796_v28 = vsel %vm6759_vm10, %v6731_v62, %v10540_v34  ;;  %v6798_v20 = vsel %vm6759_vm10, %v6733_v1, %v10580_v53  ;;  %v6799_v62 = vsel %vm6759_vm10, %v6734_v54, %v10581_v40  ;;  %v4728_v34 = vld [vmem:[#allocation5 + $0x219] sm:$0xff]  ;;  %v4731_v53 = vld [vmem:[#allocation5 + $0x22f] sm:$0xff] }
 0x477   : > { %v16298_v24 = vpop.permute.xlu1 %10693  ;;  %v6861_v29 = vsel %vm6824_vm11, %v6796_v28, %v10600_v11  ;;  %v6863_v17 = vsel %vm6824_vm11, %v6798_v20, %v10640_v18  ;;  %v4736_v1 = vld [vmem:[#allocation5 + $0x239] sm:$0xff]  ;;  %v10596_v54 = vunpack.i.h.bf16 %v16191_v38  ;;  %v4733_v18 = vld [vmem:[#allocation5 + $0x221] sm:$0xff] }
 0x478   : > { %v16300_v9 = vpop.permute.xlu0 %10668  ;;  %v6926_v44 = vsel %vm6889_vm12, %v6861_v29, %v10665_v42  ;;  %v4729_v29 = vld [vmem:[#allocation5 + $0x21f] sm:$0xff]  ;;  %v16448_v20 = vpack.i.bf16 %v4736_v1, %v4735_v26 }
 0x479   : > { %10963 = vrot.lane.b32.xlu1 %v10952_v63, %s11415_s30  ;;  %v10671_v58 = vunpack.i.h.bf16 %v16300_v9  ;;  %v10670_v3 = vunpack.i.l.bf16 %v16300_v9  ;;  %v6862_v9 = vsel %vm6824_vm11, %v6797_v45, %v10601_v23  ;;  %v4730_v45 = vld [vmem:[#allocation5 + $0x227] sm:$0xff] }
 0x47a   : > { %10968 = vrot.lane.b32.xlu0 %v16302_v5, %s11417_s12 }
 0x47b   : > { %v16312_v59 = vpop.permute.xlu1 %10703  ;;  %v6991_v27 = vsel %vm6954_vm13, %v6926_v44, %v10670_v3  ;;  %v4734_v44 = vld [vmem:[#allocation5 + $0x229] sm:$0xff] }
 0x47c   : > { %v16316_v4 = vpop.permute.xlu0 %10673  ;;  %v10706_v21 = vunpack.i.h.bf16 %v16312_v59  ;;  %v10705_v15 = vunpack.i.l.bf16 %v16312_v59  ;;  %v6864_v59 = vsel %vm6824_vm11, %v6799_v62, %v10641_v56  ;;  %v4741_v56 = vld [vmem:[#allocation5 + $0x220] sm:$0xff] }
 0x47d   : > { %10978 = vrot.lane.b32.xlu1 %v19782_v7, %s11422_s21  ;;  %v11252_v62 = vld [vmem:[#allocation5 + $0x167] sm:$0xff] }
 0x47e   : > { %10973 = vrot.lane.b32.xlu0 %v10972_v39, %s11423_s28  ;;  %v6928_v23 = vsel %vm6889_vm12, %v6863_v17, %v10705_v15  ;;  %v16440_v15 = vpack.i.bf16 %v4734_v44, %v4733_v18  ;;  %v11255_v44 = vld [vmem:[#allocation5 + $0x177] sm:$0xff] }
 0x47f   : > { %v16335_v6 = vpop.permute.xlu1 %10708 }
 0x480   : > { %v16341_v63 = vpop.permute.xlu0 %10678  ;;  %v10710_v30 = vunpack.i.l.bf16 %v16335_v6 }
 0x481   : > { %11008 = vrot.lane.b32.xlu1 %v16322_v37, %s11417_s12 }
 0x482   : > { %10983 = vrot.lane.b32.xlu0 %v10972_v39, %s11420_s27  ;;  %v6927_v39 = vsel %vm6889_vm12, %v6862_v9, %v10666_v25  ;;  %v6993_v25 = vsel %vm6954_vm13, %v6928_v23, %v10710_v30  ;;  %v11254_v23 = vld [vmem:[#allocation5 + $0x16f] sm:$0xff] }
 0x483   : > { %v16358_v49 = vpop.permute.xlu1 %10713  ;;  %v6992_v7 = vsel %vm6954_vm13, %v6927_v39, %v10671_v58  ;;  %v4727_v58 = vld [vmem:[#allocation5 + $0x211] sm:$0xff]  ;;  %v10571_v39 = vunpack.i.h.bf16 %v16146_v61 }
 0x484   : > { %v10684_v57 = vpop.permute.xlu0 %10683  ;;  %v11032_v31 = vpack.i.bf16 %v4728_v34, %v4727_v58  ;;  %v10636_v34 = vunpack.i.h.bf16 %v16233_v41  ;;  %v10680_v58 = vunpack.i.l.bf16 %v16341_v63 }
 0x485   : > { %11013 = vrot.lane.b32.xlu1 %v11012_v12, %s11423_s28  ;;  %v10686_v48 = vunpack.i.h.bf16 %v10684_v57  ;;  %v10685_v13 = vunpack.i.l.bf16 %v10684_v57  ;;  %v11047_v57 = vpack.i.bf16 %v4730_v45, %v4729_v29  ;;  %v6606_v17 = vsel %vm408_vm6, %v11252_v62, %v10571_v39 }
 0x486   : > { %10988 = vrot.lane.b32.xlu0 %v16302_v5, %s11419_s26  ;;  %v10711_v5 = vunpack.i.h.bf16 %v16335_v6  ;;  %v6929_v6 = vsel %vm6889_vm12, %v6864_v59, %v10706_v21  ;;  %v11253_v59 = vld [vmem:[#allocation5 + $0x15f] sm:$0xff]  ;;  %v10620_v45 = vunpack.i.l.bf16 %v16257_v52  ;;  %v10696_v29 = vunpack.i.h.bf16 %v16298_v24 }
 0x487   : > { %v7055_v22 = vsel %vm358_vm4, %v6991_v27, %v10685_v13  ;;  %v7056_v43 = vsel %vm358_vm4, %v6992_v7, %v10686_v48  ;;  %v16377_v33 = vpop.permute.xlu1 %10718  ;;  %v10570_v48 = vunpack.i.l.bf16 %v16146_v61  ;;  %v10610_v13 = vunpack.i.l.bf16 %v16164_v10 }
 0x488   : > { %v16382_v8 = vpop.permute.xlu0 %10698  ;;  %v7101_v51 = vpack.c.bf16 %v7056_v43, %v7055_v22  ;;  %v6994_v42 = vsel %vm6954_vm13, %v6929_v6, %v10711_v5  ;;  %v10595_v27 = vunpack.i.l.bf16 %v16191_v38  ;;  %v10656_v22 = vunpack.i.h.bf16 %v16283_v0  ;;  %v19785_v5 = vld [vmem:[#allocation55_spill] sm:$0xff] }
 0x489   : > { %11023 = vrot.lane.b32.xlu1 %v11012_v12, %s11420_s27  ;;  %v10655_v43 = vunpack.i.l.bf16 %v16283_v0  ;;  %v16446_v38 = vpack.i.bf16 %v4732_v14, %v4731_v53  ;;  %v6605_v0 = vsel %vm408_vm6, %v11253_v59, %v10570_v48  ;;  %v6607_v6 = vsel %vm408_vm6, %v11254_v23, %v10610_v13 }
 0x48a   : > { %10993 = vrot.lane.b32.xlu0 %v16324_v36, %s11418_s25  ;;  %9709 = vmatprep.mubr.msk.bf16.mxu0 %vm7158_vm14, %v7101_v51  ;;  %v19784_v51 = vld [vmem:[#allocation44_spill] sm:$0xff]  ;;  %v10660_v59 = vunpack.i.l.bf16 %v16281_v50 }
 0x48b   : > { %v10724_v16 = vpop.permute.xlu1 %10723  ;;  %v19786_v30 = vpack.i.bf16 %v19784_v51, %v19785_v5  ;;  %v10721_v51 = vunpack.i.h.bf16 %v16377_v33  ;;  %v10720_v5 = vunpack.i.l.bf16 %v16377_v33 }
 0x48c   : > { %v10726_v11 = vunpack.i.h.bf16 %v10724_v16  ;;  %v10725_v12 = vunpack.i.l.bf16 %v10724_v16  ;;  %v16396_v35 = vpop.permute.xlu0 %10728  ;;  %v10611_v16 = vunpack.i.h.bf16 %v16164_v10  ;;  %v10681_v10 = vunpack.i.h.bf16 %v16341_v63 }
 0x48d   : > { %11028 = vrot.lane.b32.xlu1 %v16322_v37, %s11419_s26 }
 0x48e   : > { %v7057_v19 = vsel %vm358_vm4, %v6993_v25, %v10725_v12  ;;  %v7058_v32 = vsel %vm358_vm4, %v6994_v42, %v10726_v11  ;;  %10998 = vrot.lane.b32.xlu0 %v16324_v36, %s11424_s29  ;;  %v6670_v11 = vsel %vm6629_vm8, %v6605_v0, %v10595_v27  ;;  %v6671_v12 = vsel %vm6629_vm8, %v6606_v17, %v10596_v54 }
 0x48f   : > { %v7102_v3 = vpack.c.bf16 %v7058_v32, %v7057_v19  ;;  %v16406_v60 = vpop.permute.xlu1 %10738  ;;  %v10635_v25 = vunpack.i.l.bf16 %v16233_v41  ;;  %v6735_v19 = vsel %vm6694_vm9, %v6670_v11, %v10655_v43  ;;  %v6736_v32 = vsel %vm6694_vm9, %v6671_v12, %v10656_v22  ;;  %v4744_v11 = vld [vmem:[#allocation5 + $0x238] sm:$0xff] }
 0x490   : > { %v16408_v47 = vpop.permute.xlu0 %10733  ;;  %v4737_v12 = vld [vmem:[#allocation5 + $0x23f] sm:$0xff] }
 0x491   : > { %11033 = vrot.lane.b32.xlu1 %v11032_v31, %s11418_s25  ;;  %9710 = vmatmul.mubr.msk.bf16.gmra.mxu0 %vm7158_vm14, %v7102_v3  ;;  %v6672_v39 = vsel %vm6629_vm8, %v6607_v6, %v10635_v25 }
 0x492   : > { %11003 = vrot.lane.b32.xlu0 %v16324_v36, %s11415_s30  ;;  %v4742_v36 = vld [vmem:[#allocation5 + $0x228] sm:$0xff] }
 0x493   : > { %v16414_v37 = vpop.permute.xlu1 %10768  ;;  %v11062_v21 = vpack.i.bf16 %v4742_v36, %v4741_v56 }
 0x494   : > { %v16416_v28 = vpop.permute.xlu0 %10743 }
 0x495   : > { %11038 = vrot.lane.b32.xlu1 %v11032_v31, %s11424_s29  ;;  %v10745_v41 = vunpack.i.l.bf16 %v16416_v28 }
 0x496   : > { %11018 = vrot.lane.b32.xlu0 %v19783_v55, %s11422_s21  ;;  %v10746_v55 = vunpack.i.h.bf16 %v16416_v28  ;;  %v6800_v28 = vsel %vm6759_vm10, %v6735_v19, %v10620_v45 }
 0x497   : > { %v16423_v40 = vpop.permute.xlu1 %10773  ;;  %v6865_v26 = vsel %vm6824_vm11, %v6800_v28, %v10680_v58  ;;  %v16540_v28 = vld [vmem:[%s19195_s8 + $0x8] sm:$0xff] }
 0x498   : > { %v16425_v9 = vpop.permute.xlu0 %10748  ;;  %v6930_v54 = vsel %vm6889_vm12, %v6865_v26, %v10745_v41 }
 0x499   : > { %11043 = vrot.lane.b32.xlu1 %v11032_v31, %s11415_s30  ;;  %v10621_v31 = vunpack.i.h.bf16 %v16257_v52  ;;  %v10751_v36 = vunpack.i.h.bf16 %v16425_v9  ;;  %v10750_v63 = vunpack.i.l.bf16 %v16425_v9  ;;  %v6608_v52 = vsel %vm408_vm6, %v11255_v44, %v10611_v16 }
 0x49a   : > { %11048 = vrot.lane.b32.xlu0 %v11047_v57, %s11423_s28  ;;  %v6673_v14 = vsel %vm6629_vm8, %v6608_v52, %v10636_v34  ;;  %v4738_v34 = vld [vmem:[#allocation5 + $0x247] sm:$0xff] }
 0x49b   : > { %v16434_v7 = vpop.permute.xlu1 %10783  ;;  %v6801_v48 = vsel %vm6759_vm10, %v6736_v32, %v10621_v31  ;;  %v6738_v43 = vsel %vm6694_vm9, %v6673_v14, %v10696_v29  ;;  %v6995_v53 = vsel %vm6954_vm13, %v6930_v54, %v10750_v63  ;;  %v16549_v14 = vld [vmem:[%s19195_s8 + $0x10] sm:$0xff] }
 0x49c   : > { %v16438_v61 = vpop.permute.xlu0 %10753  ;;  %v6866_v9 = vsel %vm6824_vm11, %v6801_v48, %v10681_v10  ;;  %v10786_v0 = vunpack.i.h.bf16 %v16434_v7  ;;  %v10785_v16 = vunpack.i.l.bf16 %v16434_v7  ;;  %v4743_v7 = vld [vmem:[#allocation5 + $0x230] sm:$0xff] }
 0x49d   : > { %11053 = vrot.lane.b32.xlu1 %v19786_v30, %s11422_s21  ;;  %v6931_v27 = vsel %vm6889_vm12, %v6866_v9, %v10746_v55  ;;  %v11097_v31 = vpack.i.bf16 %v4744_v11, %v4743_v7  ;;  %v16567_v9 = vld [vmem:[%s19195_s8 + $0x18] sm:$0xff]  ;;  %v16576_v54 = vld [vmem:[%s19195_s8 + $0x30] sm:$0xff] }
 0x49e   : > { %11058 = vrot.lane.b32.xlu0 %v11047_v57, %s11420_s27  ;;  %v10695_v57 = vunpack.i.l.bf16 %v16298_v24  ;;  %v10661_v24 = vunpack.i.h.bf16 %v16281_v50 }
 0x49f   : > { %v16459_v42 = vpop.permute.xlu1 %10788 }
 0x4a0   : > { %v16465_v3 = vpop.permute.xlu0 %10758  ;;  %v6737_v22 = vsel %vm6694_vm9, %v6672_v39, %v10695_v57  ;;  %v10791_v33 = vunpack.i.h.bf16 %v16459_v42  ;;  %v10790_v25 = vunpack.i.l.bf16 %v16459_v42  ;;  %v6803_v50 = vsel %vm6759_vm10, %v6738_v43, %v10661_v24 }
 0x4a1   : > { %11078 = vrot.lane.b32.xlu1 %v16446_v38, %s11423_s28  ;;  %v6802_v19 = vsel %vm6759_vm10, %v6737_v22, %v10660_v59  ;;  %v6868_v10 = vsel %vm6824_vm11, %v6803_v50, %v10721_v51  ;;  %v11092_v42 = vpack.i.bf16 %v4738_v34, %v4737_v12  ;;  %v10676_v22 = vunpack.i.h.bf16 %v16316_v4  ;;  %v11257_v59 = vld [vmem:[#allocation5 + $0x17f] sm:$0xff] }
 0x4a2   : > { %11063 = vrot.lane.b32.xlu0 %v11062_v21, %s11419_s26  ;;  %v6996_v21 = vsel %vm6954_vm13, %v6931_v27, %v10751_v36  ;;  %v6867_v32 = vsel %vm6824_vm11, %v6802_v19, %v10720_v5  ;;  %v10651_v27 = vunpack.i.h.bf16 %v16271_v46  ;;  %v10675_v43 = vunpack.i.l.bf16 %v16316_v4  ;;  %v16592_v5 = vld [vmem:[%s19195_s8 + $0x28] sm:$0xff]  ;;  %v7620_v4 = vld [vmem:[%s19195_s8 + $0x40] sm:$0xff] }
 0x4a3   : > { %v16482_v13 = vpop.permute.xlu1 %10793  ;;  %v6932_v45 = vsel %vm6889_vm12, %v6867_v32, %v10785_v16  ;;  %v10735_v51 = vunpack.i.l.bf16 %v16408_v47  ;;  %v11258_v16 = vld [vmem:[#allocation5 + $0x18f] sm:$0xff]  ;;  %v10716_v34 = vunpack.i.h.bf16 %v16358_v49  ;;  %v10760_v7 = vunpack.i.l.bf16 %v16465_v3  ;;  %v16619_v32 = vld [vmem:[%s19195_s8 + $0x38] sm:$0xff] }
 0x4a4   : > { %v10764_v1 = vpop.permute.xlu0 %10763 }
 0x4a5   : > { %11083 = vrot.lane.b32.xlu1 %v16448_v20, %s11424_s29  ;;  %v10766_v56 = vunpack.i.h.bf16 %v10764_v1  ;;  %v10765_v18 = vunpack.i.l.bf16 %v10764_v1 }
 0x4a6   : > { %11068 = vrot.lane.b32.xlu0 %v16440_v15, %s11424_s29  ;;  %s9456_s29 = sshll.u32 %s11503_s17, 4 }
 0x4a7   : > { %v7059_v30 = vsel %vm358_vm4, %v6995_v53, %v10765_v18  ;;  %v7060_v62 = vsel %vm358_vm4, %v6996_v21, %v10766_v56  ;;  %v16502_v17 = vpop.permute.xlu1 %10798  ;;  %v10650_v56 = vunpack.i.l.bf16 %v16271_v46  ;;  %v10690_v18 = vunpack.i.l.bf16 %v16289_v2 }
 0x4a8   : > { %v16507_v23 = vpop.permute.xlu0 %10778  ;;  %v7103_v6 = vpack.c.bf16 %v7060_v62, %v7059_v30  ;;  %v10736_v21 = vunpack.i.h.bf16 %v16408_v47  ;;  %v11256_v30 = vld [vmem:[#allocation5 + $0x187] sm:$0xff] }
 0x4a9   : > { %11088 = vrot.lane.b32.xlu1 %v16446_v38, %s11420_s27  ;;  %v6933_v38 = vsel %vm6889_vm12, %v6868_v10, %v10786_v0  ;;  %v6610_v62 = vsel %vm408_vm6, %v11256_v30, %v10651_v27  ;;  %v6609_v47 = vsel %vm408_vm6, %v11257_v59, %v10650_v56  ;;  %v10691_v0 = vunpack.i.h.bf16 %v16289_v2  ;;  %v16653_v56 = vld [vmem:[%s19195_s8 + $0x48] sm:$0xff] }
 0x4aa   : > { %11073 = vrot.lane.b32.xlu0 %v16440_v15, %s11415_s30  ;;  %9713 = vmatprep.mubr.msk.bf16.mxu0 %vm7158_vm14, %v7103_v6  ;;  %v6997_v15 = vsel %vm6954_vm13, %v6932_v45, %v10790_v25  ;;  %v6998_v57 = vsel %vm6954_vm13, %v6933_v38, %v10791_v33  ;;  %v6611_v6 = vsel %vm408_vm6, %v11258_v16, %v10690_v18  ;;  %v10715_v33 = vunpack.i.l.bf16 %v16358_v49 }
 0x4ab   : > { %v10804_v58 = vpop.permute.xlu1 %10803  ;;  %v6674_v11 = vsel %vm6629_vm8, %v6609_v47, %v10675_v43  ;;  %v6675_v12 = vsel %vm6629_vm8, %v6610_v62, %v10676_v22  ;;  %v10761_v2 = vunpack.i.h.bf16 %v16465_v3  ;;  %v10700_v49 = vunpack.i.l.bf16 %v16382_v8  ;;  %v16632_v3 = vld [vmem:[%s19195_s8 + $0x50] sm:$0xff] }
 0x4ac   : > { %v10806_v55 = vunpack.i.h.bf16 %v10804_v58  ;;  %v10805_v41 = vunpack.i.l.bf16 %v10804_v58  ;;  %v16522_v29 = vpop.permute.xlu0 %10808  ;;  %v6739_v19 = vsel %vm6694_vm9, %v6674_v11, %v10735_v51  ;;  %v6740_v50 = vsel %vm6694_vm9, %v6675_v12, %v10736_v21 }
 0x4ad   : > { %11098 = vrot.lane.b32.xlu1 %v11097_v31, %s11419_s26  ;;  %v10701_v58 = vunpack.i.h.bf16 %v16382_v8  ;;  %v10776_v45 = vunpack.i.h.bf16 %v16423_v40  ;;  %v10775_v38 = vunpack.i.l.bf16 %v16423_v40  ;;  %v10800_v16 = vunpack.i.l.bf16 %v16502_v17 }
 0x4ae   : > { %v7061_v36 = vsel %vm358_vm4, %v6997_v15, %v10805_v41  ;;  %v7062_v63 = vsel %vm358_vm4, %v6998_v57, %v10806_v55  ;;  %11093 = vrot.lane.b32.xlu0 %v11092_v42, %s11420_s27  ;;  %v11259_v41 = vld [vmem:[#allocation5 + $0x197] sm:$0xff]  ;;  %v6676_v57 = vsel %vm6629_vm8, %v6611_v6, %v10715_v33  ;;  %s9171_s27 = scalar_lea.hbm %s19197_s10, %s9456_s29 }
 0x4af   : > { %v7104_v44 = vpack.c.bf16 %v7062_v63, %v7061_v36  ;;  %v16530_v52 = vpop.permute.xlu1 %10818  ;;  %v6612_v15 = vsel %vm408_vm6, %v11259_v41, %v10691_v0  ;;  %v6804_v36 = vsel %vm6759_vm10, %v6739_v19, %v10700_v49  ;;  %v6805_v63 = vsel %vm6759_vm10, %v6740_v50, %v10701_v58  ;;  %v16682_v50 = vld [vmem:[%s19195_s8 + $0x58] sm:$0xff]  ;;  %v16707_v41 = vld [vmem:[%s19195_s8 + $0x68] sm:$0xff] }
 0x4b0   : > { %v16532_v39 = vpop.permute.xlu0 %10813  ;;  %v6677_v40 = vsel %vm6629_vm8, %v6612_v15, %v10716_v34  ;;  %v6870_v27 = vsel %vm6824_vm11, %v6805_v63, %v10761_v2  ;;  %v6741_v30 = vsel %vm6694_vm9, %v6676_v57, %v10775_v38  ;;  %v10801_v0 = vunpack.i.h.bf16 %v16502_v17  ;;  %v16718_v63 = vld [vmem:[%s19195_s8 + $0x80] sm:$0xff] }
 0x4b1   : > { %11103 = vrot.lane.b32.xlu1 %v16448_v20, %s11415_s30  ;;  %9714 = vmatmul.mubr.msk.bf16.gmra.mxu0 %vm7158_vm14, %v7104_v44  ;;  %v16558_v20 = vld [vmem:[%s19195_s8 + $0x20] sm:$0xff]  ;;  %v6742_v62 = vsel %vm6694_vm9, %v6677_v40, %v10776_v45  ;;  %v10740_v34 = vunpack.i.l.bf16 %v16406_v60  ;;  %19787 = vst [vmem:[#allocation33_spill] sm:$0xff] %v16718_v63 }
 0x4b2   : > { %7998 = vrot.lane.b32.xlu0 %v16540_v28, %s11421_s20 }
 0x4b3   : > { %v16544_v48 = vpop.permute.xlu1 %10848 }
 0x4b4   : > { %v16551_v24 = vpop.permute.xlu0 %10823 }
 0x4b5   : > { %8000 = vrot.lane.b32.xlu1 %v16549_v14, %s11421_s20  ;;  %v10826_v31 = vunpack.i.h.bf16 %v16551_v24  ;;  %v10825_v42 = vunpack.i.l.bf16 %v16551_v24  ;;  %v10741_v24 = vunpack.i.h.bf16 %v16406_v60  ;;  %v16693_v60 = vld [vmem:[%s19195_s8 + $0x70] sm:$0xff] }
 0x4b6   : > { %8004 = vrot.lane.b32.xlu0 %v16558_v20, %s11421_s20 }
 0x4b7   : > { %v16562_v26 = vpop.permute.xlu1 %10853  ;;  %v6935_v43 = vsel %vm6889_vm12, %v6870_v27, %v10826_v31  ;;  %v6807_v49 = vsel %vm6759_vm10, %v6742_v62, %v10741_v24 }
 0x4b8   : > { %v16569_v1 = vpop.permute.xlu0 %10828 }
 0x4b9   : > { %8002 = vrot.lane.b32.xlu1 %v16567_v9, %s11421_s20  ;;  %v10831_v55 = vunpack.i.h.bf16 %v16569_v1  ;;  %v10830_v8 = vunpack.i.l.bf16 %v16569_v1  ;;  %v6869_v1 = vsel %vm6824_vm11, %v6804_v36, %v10760_v7 }
 0x4ba   : > { %8008 = vrot.lane.b32.xlu0 %v16576_v54, %s11421_s20  ;;  %v6934_v22 = vsel %vm6889_vm12, %v6869_v1, %v10825_v42 }
 0x4bb   : > { %v16585_v53 = vpop.permute.xlu1 %10863  ;;  %v6999_v59 = vsel %vm6954_vm13, %v6934_v22, %v10830_v8  ;;  %v7000_v47 = vsel %vm6954_vm13, %v6935_v43, %v10831_v55  ;;  %v16739_v43 = vld [vmem:[%s19195_s8 + $0x90] sm:$0xff] }
 0x4bc   : > { %v16594_v46 = vpop.permute.xlu0 %10833  ;;  %v10866_v33 = vunpack.i.h.bf16 %v16585_v53  ;;  %v10865_v19 = vunpack.i.l.bf16 %v16585_v53  ;;  %v6806_v53 = vsel %vm6759_vm10, %v6741_v30, %v10740_v34  ;;  %19788 = vst [vmem:[#allocation83_spill] sm:$0xff] %v16739_v43  ;;  %v16751_v30 = vld [vmem:[%s19195_s8 + $0x88] sm:$0xff]  ;;  %v10770_v34 = vunpack.i.l.bf16 %v16414_v37 }
 0x4bd   : > { %8006 = vrot.lane.b32.xlu1 %v16592_v5, %s11421_s20  ;;  %v6871_v31 = vsel %vm6824_vm11, %v6806_v53, %v10800_v16  ;;  %19789 = vst [vmem:[#allocation15_spill] sm:$0xff] %v16751_v30  ;;  %v16772_v16 = vld [vmem:[%s19195_s8 + $0xb0] sm:$0xff]  ;;  %v10815_v53 = vunpack.i.l.bf16 %v16532_v39 }
 0x4be   : > { %8012 = vrot.lane.b32.xlu0 %v7620_v4, %s11421_s20  ;;  %v16662_v4 = vld [vmem:[%s19195_s8 + $0x60] sm:$0xff]  ;;  %v6936_v45 = vsel %vm6889_vm12, %v6871_v31, %v10865_v19  ;;  %19791 = vst [vmem:[#allocation87_spill] sm:$0xff] %v16772_v16  ;;  %v10756_v19 = vunpack.i.h.bf16 %v16438_v61 }
 0x4bf   : > { %v16610_v25 = vpop.permute.xlu1 %10868  ;;  %v11260_v31 = vld [vmem:[#allocation5 + $0x1a7] sm:$0xff] }
 0x4c0   : > { %v16621_v10 = vpop.permute.xlu0 %10838  ;;  %v10871_v7 = vunpack.i.h.bf16 %v16610_v25  ;;  %v10870_v58 = vunpack.i.l.bf16 %v16610_v25  ;;  %v6872_v25 = vsel %vm6824_vm11, %v6807_v49, %v10801_v0 }
 0x4c1   : > { %8010 = vrot.lane.b32.xlu1 %v16619_v32, %s11421_s20  ;;  %v6937_v38 = vsel %vm6889_vm12, %v6872_v25, %v10866_v33  ;;  %v16782_v33 = vld [vmem:[%s19195_s8 + $0xa8] sm:$0xff] }
 0x4c2   : > { %8016 = vrot.lane.b32.xlu0 %v16632_v3, %s11421_s20  ;;  %v7001_v57 = vsel %vm6954_vm13, %v6936_v45, %v10870_v58  ;;  %v7002_v36 = vsel %vm6954_vm13, %v6937_v38, %v10871_v7  ;;  %19792 = vst [vmem:[#allocation74_spill] sm:$0xff] %v16782_v33  ;;  %v10816_v58 = vunpack.i.h.bf16 %v16532_v39  ;;  %v10771_v45 = vunpack.i.h.bf16 %v16414_v37  ;;  %v11262_v38 = vld [vmem:[#allocation5 + $0x1af] sm:$0xff]  ;;  %v16811_v37 = vpop.f32.mrf.mxu0 }
 0x4c3   : > { %v16644_v44 = vpop.permute.xlu1 %10873 }
 0x4c4   : > { %v10844_v18 = vpop.permute.xlu0 %10843 }
 0x4c5   : > { %8014 = vrot.lane.b32.xlu1 %v16653_v56, %s11421_s20  ;;  %v10846_v21 = vunpack.i.h.bf16 %v10844_v18  ;;  %v10845_v51 = vunpack.i.l.bf16 %v10844_v18  ;;  %v16729_v18 = vld [vmem:[%s19195_s8 + $0x78] sm:$0xff] }
 0x4c6   : > { %8020 = vrot.lane.b32.xlu0 %v16662_v4, %s11421_s20 }
 0x4c7   : > { %v7063_v6 = vsel %vm358_vm4, %v6999_v59, %v10845_v51  ;;  %v7064_v11 = vsel %vm358_vm4, %v7000_v47, %v10846_v21  ;;  %v16674_v12 = vpop.permute.xlu1 %10878  ;;  %v7632_v51 = vld [vmem:[%s19195_s8 + $0xa0] sm:$0xff]  ;;  %v16763_v47 = vld [vmem:[%s19195_s8 + $0x98] sm:$0xff] }
 0x4c8   : > { %v16684_v2 = vpop.permute.xlu0 %10858  ;;  %v7105_v17 = vpack.c.bf16 %v7064_v11, %v7063_v6  ;;  %19790 = vst [vmem:[#allocation39_spill] sm:$0xff] %v16763_v47  ;;  %v10731_v6 = vunpack.i.h.bf16 %v16396_v35  ;;  %v10730_v11 = vunpack.i.l.bf16 %v16396_v35  ;;  %v7636_v35 = vld [vmem:[%s19195_s8 + $0xc0] sm:$0xff] }
 0x4c9   : > { %8018 = vrot.lane.b32.xlu1 %v16682_v50, %s11421_s20 }
 0x4ca   : > { %8024 = vrot.lane.b32.xlu0 %v16693_v60, %s11421_s20  ;;  %9717 = vmatprep.mubr.msk.bf16.mxu0 %vm7158_vm14, %v7105_v17  ;;  %v10755_v17 = vunpack.i.l.bf16 %v16438_v61  ;;  %v6614_v25 = vsel %vm408_vm6, %v11260_v31, %v10731_v6  ;;  %v10841_v6 = vunpack.i.h.bf16 %v16621_v10 }
 0x4cb   : > { %v10884_v42 = vpop.permute.xlu1 %10883 }
 0x4cc   : > { %v10886_v55 = vunpack.i.h.bf16 %v10884_v42  ;;  %v10885_v8 = vunpack.i.l.bf16 %v10884_v42  ;;  %v16709_v15 = vpop.permute.xlu0 %10888  ;;  %v11261_v42 = vld [vmem:[#allocation5 + $0x19f] sm:$0xff] }
 0x4cd   : > { %8022 = vrot.lane.b32.xlu1 %v16707_v41, %s11421_s20  ;;  %v6613_v61 = vsel %vm408_vm6, %v11261_v42, %v10730_v11  ;;  %v10840_v11 = vunpack.i.l.bf16 %v16621_v10  ;;  %v10856_v10 = vunpack.i.h.bf16 %v16562_v26  ;;  %v11263_v42 = vld [vmem:[#allocation5 + $0x1b7] sm:$0xff] }
 0x4ce   : > { %v7065_v40 = vsel %vm358_vm4, %v7001_v57, %v10885_v8  ;;  %v7066_v24 = vsel %vm358_vm4, %v7002_v36, %v10886_v55  ;;  %8028 = vrot.lane.b32.xlu0 %v16718_v63, %s11421_s20  ;;  %v6615_v55 = vsel %vm408_vm6, %v11262_v38, %v10770_v34  ;;  %v6678_v39 = vsel %vm6629_vm8, %v6613_v61, %v10755_v17 }
 0x4cf   : > { %v7106_v1 = vpack.c.bf16 %v7066_v24, %v7065_v40  ;;  %v16724_v27 = vpop.permute.xlu1 %10898  ;;  %v6679_v8 = vsel %vm6629_vm8, %v6614_v25, %v10756_v19  ;;  %v10796_v57 = vunpack.i.h.bf16 %v16482_v13  ;;  %v10795_v36 = vunpack.i.l.bf16 %v16482_v13  ;;  %v7638_v24 = vld [vmem:[%s19195_s8 + $0xd0] sm:$0xff]  ;;  %v16820_v13 = vld [vmem:[%s19195_s8 + $0xb8] sm:$0xff] }
 0x4d0   : > { %v16731_v22 = vpop.permute.xlu0 %10893  ;;  %19793 = vst [vmem:[#allocation78_spill] sm:$0xff] %v16820_v13  ;;  %v10781_v19 = vunpack.i.h.bf16 %v16507_v23  ;;  %v10780_v17 = vunpack.i.l.bf16 %v16507_v23  ;;  %v16838_v23 = vld [vmem:[%s19195_s8 + $0xc8] sm:$0xff] }
 0x4d1   : > { %8026 = vrot.lane.b32.xlu1 %v16729_v18, %s11421_s20  ;;  %9718 = vmatmul.mubr.msk.bf16.gmra.mxu0 %vm7158_vm14, %v7106_v1  ;;  %v6743_v1 = vsel %vm6694_vm9, %v6678_v39, %v10815_v53  ;;  %19794 = vst [vmem:[#allocation12_spill] sm:$0xff] %v16838_v23  ;;  %v6680_v61 = vsel %vm6629_vm8, %v6615_v55, %v10795_v36 }
 0x4d2   : > { %8032 = vrot.lane.b32.xlu0 %v16739_v43, %s11421_s20  ;;  %v6808_v38 = vsel %vm6759_vm10, %v6743_v1, %v10780_v17 }
 0x4d3   : > { %v16743_v21 = vpop.permute.xlu1 %10928 }
 0x4d4   : > { %v16753_v62 = vpop.permute.xlu0 %10903 }
 0x4d5   : > { %8030 = vrot.lane.b32.xlu1 %v16751_v30, %s11421_s20  ;;  %v10905_v53 = vunpack.i.l.bf16 %v16753_v62  ;;  %v10890_v30 = vunpack.i.l.bf16 %v16709_v15 }
 0x4d6   : > { %8036 = vrot.lane.b32.xlu0 %v7632_v51, %s11421_s20  ;;  %v6744_v51 = vsel %vm6694_vm9, %v6679_v8, %v10816_v58  ;;  %v10855_v58 = vunpack.i.l.bf16 %v16562_v26  ;;  %v7293_v8 = vpop.f32.mrf.mxu0 }
 0x4d7   : > { %v16758_v59 = vpop.permute.xlu1 %10933  ;;  %v6809_v26 = vsel %vm6759_vm10, %v6744_v51, %v10781_v19 }
 0x4d8   : > { %v16765_v0 = vpop.permute.xlu0 %10908  ;;  %v6745_v17 = vsel %vm6694_vm9, %v6680_v61, %v10855_v58 }
 0x4d9   : > { %8034 = vrot.lane.b32.xlu1 %v16763_v47, %s11421_s20  ;;  %v10911_v31 = vunpack.i.h.bf16 %v16765_v0  ;;  %v10910_v25 = vunpack.i.l.bf16 %v16765_v0  ;;  %v7640_v0 = vld [vmem:[%s19195_s8 + $0xe0] sm:$0xff] }
 0x4da   : > { %8040 = vrot.lane.b32.xlu0 %v16772_v16, %s11421_s20 }
 0x4db   : > { %v16786_v7 = vpop.permute.xlu1 %10943 }
 0x4dc   : > { %v16793_v49 = vpop.permute.xlu0 %10913  ;;  %v10946_v61 = vunpack.i.h.bf16 %v16786_v7 }
 0x4dd   : > { %8038 = vrot.lane.b32.xlu1 %v16782_v33, %s11421_s20  ;;  %v10821_v33 = vunpack.i.h.bf16 %v16530_v52 }
 0x4de   : > { %8044 = vrot.lane.b32.xlu0 %v7636_v35, %s11421_s20  ;;  %v10906_v35 = vunpack.i.h.bf16 %v16753_v62  ;;  %v6616_v62 = vsel %vm408_vm6, %v11263_v42, %v10771_v45  ;;  %v6874_v45 = vsel %vm6824_vm11, %v6809_v26, %v10841_v6  ;;  %v16865_v6 = vld [vmem:[%s19195_s8 + $0xd8] sm:$0xff] }
 0x4df   : > { %v16806_v40 = vpop.permute.xlu1 %10948  ;;  %19795 = vst [vmem:[#allocation110_spill] sm:$0xff] %v16865_v6 }
 0x4e0   : > { %v16822_v34 = vpop.permute.xlu0 %10918  ;;  %v6939_v1 = vsel %vm6889_vm12, %v6874_v45, %v10906_v35  ;;  %v10880_v35 = vunpack.i.l.bf16 %v16674_v12 }
 0x4e1   : > { %8042 = vrot.lane.b32.xlu1 %v16820_v13, %s11421_s20  ;;  %v6873_v13 = vsel %vm6824_vm11, %v6808_v38, %v10840_v11  ;;  %v7004_v11 = vsel %vm6954_vm13, %v6939_v1, %v10911_v31  ;;  %v7642_v31 = vld [vmem:[%s19195_s8 + $0xf0] sm:$0xff]  ;;  %v10945_v38 = vunpack.i.l.bf16 %v16786_v7  ;;  %v16895_v7 = vld [vmem:[%s19194_s7] ss:$0 sm:$0xff] }
 0x4e2   : > { %8048 = vrot.lane.b32.xlu0 %v7638_v24, %s11421_s20  ;;  %v6681_v24 = vsel %vm6629_vm8, %v6616_v62, %v10796_v57  ;;  %v6938_v36 = vsel %vm6889_vm12, %v6873_v13, %v10905_v53  ;;  %v10881_v13 = vunpack.i.h.bf16 %v16674_v12  ;;  %v10820_v62 = vunpack.i.l.bf16 %v16530_v52  ;;  %v7641_v52 = vld [vmem:[%s19195_s8 + $0xe8] sm:$0xff] }
 0x4e3   : > { %v16844_v39 = vpop.permute.xlu1 %10953  ;;  %v6746_v57 = vsel %vm6694_vm9, %v6681_v24, %v10856_v10  ;;  %v7003_v42 = vsel %vm6954_vm13, %v6938_v36, %v10910_v25  ;;  %v9676_v25 = vpop.f32.mrf.mxu0  ;;  %v10950_v24 = vunpack.i.l.bf16 %v16806_v40 }
 0x4e4   : > { %v10924_v55 = vpop.permute.xlu0 %10923  ;;  %v6810_v45 = vsel %vm6759_vm10, %v6745_v17, %v10820_v62  ;;  %v16914_v62 = vld [vmem:[%s19195_s8 + $0xf8] sm:$0xff] }
 0x4e5   : > { %8046 = vrot.lane.b32.xlu1 %v16838_v23, %s11421_s20  ;;  %v10926_v51 = vunpack.i.h.bf16 %v10924_v55  ;;  %v10925_v19 = vunpack.i.l.bf16 %v10924_v55  ;;  %v6811_v55 = vsel %vm6759_vm10, %v6746_v57, %v10821_v33  ;;  %19796 = vst [vmem:[#allocation95_spill] sm:$0xff] %v16914_v62 }
 0x4e6   : > { %8052 = vrot.lane.b32.xlu0 %v7640_v0, %s11421_s20  ;;  %v10951_v0 = vunpack.i.h.bf16 %v16806_v40  ;;  %v6875_v40 = vsel %vm6824_vm11, %v6810_v45, %v10880_v35  ;;  %v6876_v36 = vsel %vm6824_vm11, %v6811_v55, %v10881_v13  ;;  %v7302_v35 = vadd.f32 %v16811_v37, %v16895_v7 }
 0x4e7   : > { %v7067_v53 = vsel %vm358_vm4, %v7003_v42, %v10925_v19  ;;  %v7068_v58 = vsel %vm358_vm4, %v7004_v11, %v10926_v51  ;;  %v16871_v10 = vpop.permute.xlu1 %10958  ;;  %v7296_v51 = vpop.f32.mrf.mxu0  ;;  %v6940_v33 = vsel %vm6889_vm12, %v6875_v40, %v10945_v38  ;;  %v6941_v19 = vsel %vm6889_vm12, %v6876_v36, %v10946_v61  ;;  %v19801_v36 = vld [vmem:[#allocation111_spill] sm:$0xff] }
 0x4e8   : > { %v16879_v26 = vpop.permute.xlu0 %10938  ;;  %v7107_v12 = vpack.c.bf16 %v7068_v58, %v7067_v53  ;;  %v7005_v11 = vsel %vm6954_vm13, %v6940_v33, %v10950_v24  ;;  %v7006_v53 = vsel %vm6954_vm13, %v6941_v19, %v10951_v0  ;;  %v7294_v13 = vadd.f32 %v16895_v7, %v7293_v8  ;;  %v11264_v19 = vld [vmem:[%s19195_s8] sm:$0xff] }
 0x4e9   : > { %8050 = vrot.lane.b32.xlu1 %v16865_v6, %s11421_s20  ;;  %v7305_v61 = vadd.f32 %v9676_v25, %v16895_v7  ;;  %v7297_v38 = vadd.f32 %v16895_v7, %v7296_v51  ;;  %v16925_v37 = vmax.f32 %v7302_v35, 0.0  ;;  %v7645_v25 = vld [vmem:[%s19195_s8 + $0x108] sm:$0xff] }
 0x4ea   : > { %8056 = vrot.lane.b32.xlu0 %v7642_v31, %s11421_s20  ;;  %9721 = vmatprep.mubr.msk.bf16.mxu0 %vm7158_vm14, %v7107_v12  ;;  %v16927_v8 = vmax.f32 %v7294_v13, 0.0  ;;  %v11268_v6 = vld [vmem:[#allocation5 + $0x1cf] sm:$0xff] }
 0x4eb   : > { %v10964_v1 = vpop.permute.xlu1 %10963  ;;  %19797 = vst [vmem:[#allocation82_spill] sm:$0xff] %v16925_v37  ;;  %v16932_v45 = vmax.f32 %v7305_v61, 0.0  ;;  %v16934_v55 = vmax.f32 %v7297_v38, 0.0  ;;  %v7678_v33 = vmul.f32 %v16549_v14, %v16925_v37  ;;  %v10811_v61 = vunpack.i.h.bf16 %v16522_v29 }
 0x4ec   : > { %v10966_v17 = vunpack.i.h.bf16 %v10964_v1  ;;  %v10965_v57 = vunpack.i.l.bf16 %v10964_v1  ;;  %v16901_v42 = vpop.permute.xlu0 %10968  ;;  %19798 = vst [vmem:[#allocation112_spill] sm:$0xff] %v16927_v8  ;;  %v10810_v38 = vunpack.i.l.bf16 %v16522_v29  ;;  %v10836_v1 = vunpack.i.h.bf16 %v16594_v46 }
 0x4ed   : > { %8054 = vrot.lane.b32.xlu1 %v7641_v52, %s11421_s20  ;;  %19799 = vst [vmem:[#allocation97_spill] sm:$0xff] %v16932_v45  ;;  %19800 = vst [vmem:[#allocation96_spill] sm:$0xff] %v16934_v55  ;;  %v7679_v13 = vmul.f32 %v16567_v9, %v16932_v45  ;;  %v10835_v9 = vunpack.i.l.bf16 %v16594_v46  ;;  %v10875_v14 = vunpack.i.l.bf16 %v16644_v44  ;;  %v16970_v51 = vsel %vm6629_vm8, %v7678_v33, 0.0  ;;  %v11266_v33 = vld [vmem:[#allocation5 + $0x1bf] sm:$0xff] }
 0x4ee   : > { %v7069_v58 = vsel %vm358_vm4, %v7005_v11, %v10965_v57  ;;  %v7070_v31 = vsel %vm358_vm4, %v7006_v53, %v10966_v17  ;;  %v7676_v17 = vmul.f32 %v11264_v19, %v16927_v8  ;;  %v19802_v57 = vld [vmem:[#allocation114_spill] sm:$0xff]  ;;  %v10850_v11 = vunpack.i.l.bf16 %v16544_v48 }
 0x4ef   : > { %v7108_v12 = vpack.c.bf16 %v7070_v31, %v7069_v58  ;;  %v16918_v0 = vpop.permute.xlu1 %10978  ;;  %v7677_v58 = vmul.f32 %v16540_v28, %v16934_v55  ;;  %v19803_v31 = vld [vmem:[#allocation116_spill] sm:$0xff]  ;;  %v10876_v28 = vunpack.i.h.bf16 %v16644_v44  ;;  %v10891_v53 = vunpack.i.h.bf16 %v16709_v15  ;;  %v11265_v55 = vld [vmem:[#allocation5 + $0x1c7] sm:$0xff] }
 0x4f0   : > { %v16920_v24 = vpop.permute.xlu0 %10973  ;;  %v16973_v29 = vsel %vm6629_vm8, %v7676_v17, 0.0  ;;  %v10895_v19 = vunpack.i.l.bf16 %v16731_v22  ;;  %v6618_v44 = vsel %vm408_vm6, %v11265_v55, %v10811_v61  ;;  %v6617_v37 = vsel %vm408_vm6, %v11266_v33, %v10810_v38  ;;  %v11267_v17 = vld [vmem:[#allocation5 + $0x1d7] sm:$0xff] }
 0x4f1   : > { %8058 = vrot.lane.b32.xlu1 %v16914_v62, %s11421_s20  ;;  %9722 = vmatmul.mubr.msk.bf16.gmra.mxu0 %vm7158_vm14, %v7108_v12  ;;  %v10851_v12 = vunpack.i.h.bf16 %v16544_v48  ;;  %v16980_v48 = vsel %vm6629_vm8, %v7679_v13, 0.0  ;;  %v16983_v46 = vsel %vm6629_vm8, %v7677_v58, 0.0  ;;  %v10896_v62 = vunpack.i.h.bf16 %v16731_v22  ;;  %v11269_v22 = vld [vmem:[#allocation5 + $0x1e7] sm:$0xff] }
 0x4f2   : > { %v6619_v13 = vsel %vm408_vm6, %v11268_v6, %v10850_v11  ;;  %v6682_v16 = vsel %vm6629_vm8, %v6617_v37, %v10835_v9  ;;  %v6683_v58 = vsel %vm6629_vm8, %v6618_v44, %v10836_v1  ;;  %v10861_v38 = vunpack.i.h.bf16 %v16684_v2  ;;  %v11270_v9 = vld [vmem:[#allocation5 + $0x1df] sm:$0xff] }
 0x4f3   : > { %v16936_v52 = vpop.permute.xlu1 %11008  ;;  %v6620_v8 = vsel %vm408_vm6, %v11267_v17, %v10851_v12  ;;  %v6684_v55 = vsel %vm6629_vm8, %v6619_v13, %v10875_v14  ;;  %v10860_v12 = vunpack.i.l.bf16 %v16684_v2  ;;  %v6622_v33 = vsel %vm408_vm6, %v11269_v22, %v10891_v53 }
 0x4f4   : > { %v16938_v40 = vpop.permute.xlu0 %10983  ;;  %v6685_v61 = vsel %vm6629_vm8, %v6620_v8, %v10876_v28  ;;  %v6747_v17 = vsel %vm6694_vm9, %v6682_v16, %v10895_v19  ;;  %v10931_v6 = vunpack.i.h.bf16 %v16743_v21  ;;  %v10935_v37 = vunpack.i.l.bf16 %v16758_v59 }
 0x4f5   : > { %8062 = vrot.lane.b32.xlu1 %v7645_v25, %s11421_s20  ;;  %v6748_v15 = vsel %vm6694_vm9, %v6683_v58, %v10896_v62  ;;  %v10936_v11 = vunpack.i.h.bf16 %v16758_v59  ;;  %v10921_v8 = vunpack.i.h.bf16 %v16822_v34  ;;  %v10920_v14 = vunpack.i.l.bf16 %v16822_v34  ;;  %v11271_v34 = vld [vmem:[#allocation5 + $0x1f7] sm:$0xff] }
 0x4f6   : > { %v6621_v53 = vsel %vm408_vm6, %v11270_v9, %v10890_v30  ;;  %v10901_v16 = vunpack.i.h.bf16 %v16724_v27  ;;  %v10986_v19 = vunpack.i.h.bf16 %v16938_v40  ;;  %v10985_v28 = vunpack.i.l.bf16 %v16938_v40 }
 0x4f7   : > { %v16951_v35 = vpop.permute.xlu1 %11013  ;;  %v10900_v44 = vunpack.i.l.bf16 %v16724_v27  ;;  %v10930_v62 = vunpack.i.l.bf16 %v16743_v21  ;;  %v6624_v58 = vsel %vm408_vm6, %v11271_v34, %v10931_v6  ;;  %v6749_v22 = vsel %vm6694_vm9, %v6684_v55, %v10935_v37 }
 0x4f8   : > { %v16961_v25 = vpop.permute.xlu0 %10988  ;;  %v6812_v30 = vsel %vm6759_vm10, %v6747_v17, %v10860_v12  ;;  %v6813_v9 = vsel %vm6759_vm10, %v6748_v15, %v10861_v38  ;;  %v6750_v40 = vsel %vm6694_vm9, %v6685_v61, %v10936_v11  ;;  %v10916_v27 = vunpack.i.h.bf16 %v16793_v49 }
 0x4f9   : > { %v10991_v59 = vunpack.i.h.bf16 %v16961_v25  ;;  %v10990_v13 = vunpack.i.l.bf16 %v16961_v25  ;;  %v6877_v21 = vsel %vm6824_vm11, %v6812_v30, %v10920_v14  ;;  %v6878_v47 = vsel %vm6824_vm11, %v6813_v9, %v10921_v8 }
 0x4fa   : > { %v6942_v43 = vsel %vm6889_vm12, %v6877_v21, %v10985_v28  ;;  %v6943_v6 = vsel %vm6889_vm12, %v6878_v47, %v10986_v19  ;;  %v10915_v12 = vunpack.i.l.bf16 %v16793_v49  ;;  %v10955_v38 = vunpack.i.l.bf16 %v16844_v39  ;;  %v11272_v47 = vld [vmem:[#allocation5 + $0x1ef] sm:$0xff] }
 0x4fb   : > { %v16977_v45 = vpop.permute.xlu1 %11023  ;;  %v7007_v17 = vsel %vm6954_vm13, %v6942_v43, %v10990_v13  ;;  %v7008_v61 = vsel %vm6954_vm13, %v6943_v6, %v10991_v59  ;;  %v10961_v15 = vunpack.i.h.bf16 %v16871_v10  ;;  %v10960_v11 = vunpack.i.l.bf16 %v16871_v10 }
 0x4fc   : > { %v16989_v23 = vpop.permute.xlu0 %10993  ;;  %v6623_v19 = vsel %vm408_vm6, %v11272_v47, %v10930_v62  ;;  %v11026_v49 = vunpack.i.h.bf16 %v16977_v45  ;;  %v11025_v34 = vunpack.i.l.bf16 %v16977_v45  ;;  %v6814_v13 = vsel %vm6759_vm10, %v6749_v22, %v10900_v44 }
 0x4fd   : > { %v6815_v10 = vsel %vm6759_vm10, %v6750_v40, %v10901_v16  ;;  %v6686_v21 = vsel %vm6629_vm8, %v6621_v53, %v10915_v12  ;;  %v6687_v62 = vsel %vm6629_vm8, %v6622_v33, %v10916_v27  ;;  %v6688_v45 = vsel %vm6629_vm8, %v6623_v19, %v10955_v38 }
 0x4fe   : > { %v6879_v44 = vsel %vm6824_vm11, %v6814_v13, %v10960_v11  ;;  %v6880_v16 = vsel %vm6824_vm11, %v6815_v10, %v10961_v15  ;;  %v10976_v22 = vunpack.i.h.bf16 %v16920_v24  ;;  %v10971_v6 = vunpack.i.h.bf16 %v16901_v42  ;;  %v11274_v10 = vld [vmem:[#allocation5 + $0x1ff] sm:$0xff] }
 0x4ff   : > { %v17003_v1 = vpop.permute.xlu1 %11028  ;;  %v6945_v53 = vsel %vm6889_vm12, %v6880_v16, %v11026_v49  ;;  %v11016_v38 = vunpack.i.h.bf16 %v16951_v35  ;;  %v10941_v11 = vunpack.i.h.bf16 %v16879_v26  ;;  %v10996_v13 = vunpack.i.h.bf16 %v16989_v23  ;;  %v11275_v16 = vld [vmem:[#allocation5 + $0x217] sm:$0xff] }
 0x500   : > { %v17009_v2 = vpop.permute.xlu0 %10998  ;;  %v11031_v30 = vunpack.i.h.bf16 %v17003_v1  ;;  %v11030_v9 = vunpack.i.l.bf16 %v17003_v1  ;;  %v10975_v1 = vunpack.i.l.bf16 %v16920_v24  ;;  %v10970_v24 = vunpack.i.l.bf16 %v16901_v42 }
 0x501   : > { %v11011_v42 = vunpack.i.h.bf16 %v16936_v52 }
 0x502   : > { %v7010_v12 = vsel %vm6954_vm13, %v6945_v53, %v11031_v30  ;;  %v6751_v19 = vsel %vm6694_vm9, %v6686_v21, %v10975_v1  ;;  %v6625_v30 = vsel %vm408_vm6, %v11274_v10, %v10970_v24  ;;  %v11000_v21 = vunpack.i.l.bf16 %v17009_v2 }
 0x503   : > { %v17023_v63 = vpop.permute.xlu1 %11033 }
 0x504   : > { %v11004_v25 = vpop.permute.xlu0 %11003 }
 0x505   : > { %v11006_v55 = vunpack.i.h.bf16 %v11004_v25  ;;  %v11005_v37 = vunpack.i.l.bf16 %v11004_v25  ;;  %v10956_v25 = vunpack.i.h.bf16 %v16844_v39 }
 0x507   : > { %v7071_v8 = vsel %vm358_vm4, %v7007_v17, %v11005_v37  ;;  %v7072_v14 = vsel %vm358_vm4, %v7008_v61, %v11006_v55  ;;  %v17039_v28 = vpop.permute.xlu1 %11038  ;;  %v11015_v55 = vunpack.i.l.bf16 %v16951_v35  ;;  %v6689_v15 = vsel %vm6629_vm8, %v6624_v58, %v10956_v25 }
 0x508   : > { %v17044_v43 = vpop.permute.xlu0 %11018  ;;  %v7109_v59 = vpack.c.bf16 %v7072_v14, %v7071_v8  ;;  %v10940_v8 = vunpack.i.l.bf16 %v16879_v26  ;;  %v11010_v35 = vunpack.i.l.bf16 %v16936_v52  ;;  %v10995_v26 = vunpack.i.l.bf16 %v16989_v23 }
 0x509   : > { %7747 = vadd.xlane.f32.xlu0 %v16970_v51  ;;  %v6944_v51 = vsel %vm6889_vm12, %v6879_v44, %v11025_v34  ;;  %v11273_v34 = vld [vmem:[#allocation5 + $0x207] sm:$0xff]  ;;  %v6753_v58 = vsel %vm6694_vm9, %v6688_v45, %v11015_v55  ;;  %v6754_v52 = vsel %vm6694_vm9, %v6689_v15, %v11016_v38  ;;  %v11001_v25 = vunpack.i.h.bf16 %v17009_v2 }
 0x50a   : > { %9725 = vmatprep.mubr.msk.bf16.mxu0 %vm7158_vm14, %v7109_v59  ;;  %v7009_v37 = vsel %vm6954_vm13, %v6944_v51, %v11030_v9  ;;  %v6626_v59 = vsel %vm408_vm6, %v11273_v34, %v10971_v6  ;;  %v10980_v9 = vunpack.i.l.bf16 %v16918_v0  ;;  %v6816_v45 = vsel %vm6759_vm10, %v6751_v19, %v10940_v8 }
 0x50b   : > { %v11044_v40 = vpop.permute.xlu1 %11043  ;;  %v6691_v2 = vsel %vm6629_vm8, %v6626_v59, %v10996_v13  ;;  %v6881_v6 = vsel %vm6824_vm11, %v6816_v45, %v11000_v21  ;;  %v11041_v55 = vunpack.i.h.bf16 %v17039_v28 }
 0x50c   : > { %v11046_v33 = vunpack.i.h.bf16 %v11044_v40  ;;  %v11045_v27 = vunpack.i.l.bf16 %v11044_v40  ;;  %v17062_v39 = vpop.permute.xlu0 %11048  ;;  %v11035_v40 = vunpack.i.l.bf16 %v17023_v63  ;;  %v6818_v51 = vsel %vm6759_vm10, %v6753_v58, %v10980_v9 }
 0x50d   : > { %7741 = vadd.xlane.f32.xlu0 %v16973_v29  ;;  %v6752_v29 = vsel %vm6694_vm9, %v6687_v62, %v10976_v22  ;;  %v10981_v62 = vunpack.i.h.bf16 %v16918_v0  ;;  %v11276_v22 = vld [vmem:[#allocation5 + $0x20f] sm:$0xff]  ;;  %v6690_v0 = vsel %vm6629_vm8, %v6625_v30, %v10995_v26  ;;  %v11051_v38 = vunpack.i.h.bf16 %v17062_v39 }
 0x50e   : > { %v7073_v17 = vsel %vm358_vm4, %v7009_v37, %v11045_v27  ;;  %v7074_v61 = vsel %vm358_vm4, %v7010_v12, %v11046_v33  ;;  %v6817_v23 = vsel %vm6759_vm10, %v6752_v29, %v10941_v11  ;;  %v6627_v1 = vsel %vm408_vm6, %v11276_v22, %v11010_v35 }
 0x50f   : > { %v7110_v14 = vpack.c.bf16 %v7074_v61, %v7073_v17  ;;  %v17076_v47 = vpop.permute.xlu1 %11053  ;;  %v11036_v33 = vunpack.i.h.bf16 %v17023_v63  ;;  %v6819_v27 = vsel %vm6759_vm10, %v6754_v52, %v10981_v62  ;;  %v11040_v37 = vunpack.i.l.bf16 %v17039_v28 }
 0x510   : > { %v11059_v49 = vpop.permute.xlu0 %11058  ;;  %v6882_v24 = vsel %vm6824_vm11, %v6817_v23, %v11001_v25  ;;  %v11050_v17 = vunpack.i.l.bf16 %v17062_v39  ;;  %v6692_v11 = vsel %vm6629_vm8, %v6627_v1, %v11035_v40  ;;  %v11020_v28 = vunpack.i.l.bf16 %v17044_v43 }
 0x511   : > { %9726 = vmatmul.mubr.msk.bf16.gmra.mxu0 %vm7158_vm14, %v7110_v14  ;;  %7750 = vadd.xlane.f32.xlu0 %v16980_v48  ;;  %v6628_v48 = vsel %vm408_vm6, %v11275_v16, %v11011_v42  ;;  %v11060_v61 = vunpack.i.l.bf16 %v11059_v49  ;;  %v11061_v63 = vunpack.i.h.bf16 %v11059_v49  ;;  %v11021_v42 = vunpack.i.h.bf16 %v17044_v43 }
 0x512   : > { %v6693_v29 = vsel %vm6629_vm8, %v6628_v48, %v11036_v33  ;;  %v6883_v34 = vsel %vm6824_vm11, %v6818_v51, %v11040_v37  ;;  %v6884_v39 = vsel %vm6824_vm11, %v6819_v27, %v11041_v55  ;;  %v6755_v49 = vsel %vm6694_vm9, %v6690_v0, %v11050_v17 }
 0x513   : > { %v11079_v44 = vpop.permute.xlu1 %11078  ;;  %v6756_v13 = vsel %vm6694_vm9, %v6691_v2, %v11051_v38  ;;  %v11055_v26 = vunpack.i.l.bf16 %v17076_v47  ;;  %v6946_v10 = vsel %vm6889_vm12, %v6881_v6, %v11060_v61  ;;  %v11056_v43 = vunpack.i.h.bf16 %v17076_v47 }
 0x514   : > { %v11064_v53 = vpop.permute.xlu0 %11063  ;;  %v11080_v12 = vunpack.i.l.bf16 %v11079_v44  ;;  %v11081_v8 = vunpack.i.h.bf16 %v11079_v44  ;;  %v6820_v2 = vsel %vm6759_vm10, %v6755_v49, %v11020_v28  ;;  %v6821_v33 = vsel %vm6759_vm10, %v6756_v13, %v11021_v42 }
 0x515   : > { %v11065_v14 = vunpack.i.l.bf16 %v11064_v53  ;;  %v11066_v35 = vunpack.i.h.bf16 %v11064_v53  ;;  %v19804_v17 = vunpack.i.l.bf16 %v19802_v57  ;;  %v19805_v42 = vunpack.i.l.bf16 %v19801_v36 }
 0x516   : > { %v6757_v59 = vsel %vm6694_vm9, %v6692_v11, %v11080_v12  ;;  %v6758_v9 = vsel %vm6694_vm9, %v6693_v29, %v11081_v8 }
 0x517   : > { %v11084_v15 = vpop.permute.xlu1 %11083  ;;  %v7011_v52 = vsel %vm6954_vm13, %v6946_v10, %v11065_v14  ;;  %v6822_v25 = vsel %vm6759_vm10, %v6757_v59, %v11055_v26  ;;  %v6823_v0 = vsel %vm6759_vm10, %v6758_v9, %v11056_v43  ;;  %v19807_v26 = vunpack.i.l.bf16 %v19803_v31 }
 0x518   : > { %v11069_v19 = vpop.permute.xlu0 %11068  ;;  %v11085_v58 = vunpack.i.l.bf16 %v11084_v15  ;;  %v11086_v44 = vunpack.i.h.bf16 %v11084_v15  ;;  %v19809_v43 = vunpack.i.h.bf16 %v19802_v57  ;;  %v17181_v57 = vld [vmem:[%s19195_s8 + $0x110] sm:$0xff] }
 0x519   : > { %7744 = vadd.xlane.f32.xlu1 %v16983_v46  ;;  %v6947_v46 = vsel %vm6889_vm12, %v6882_v24, %v11061_v63  ;;  %v11071_v48 = vunpack.i.h.bf16 %v11069_v19  ;;  %v11070_v22 = vunpack.i.l.bf16 %v11069_v19 }
 0x51a   : > { %v7012_v62 = vsel %vm6954_vm13, %v6947_v46, %v11066_v35  ;;  %v6887_v16 = vsel %vm6824_vm11, %v6822_v25, %v11085_v58  ;;  %v6888_v38 = vsel %vm6824_vm11, %v6823_v0, %v11086_v44  ;;  %v19806_v35 = vunpack.i.h.bf16 %v19801_v36  ;;  %v9679_v0 = vpop.f32.mrf.mxu0 }
 0x51b   : > { %v11089_v30 = vpop.permute.xlu1 %11088  ;;  %v6952_v61 = vsel %vm6889_vm12, %v6887_v16, %v19804_v17  ;;  %v6885_v15 = vsel %vm6824_vm11, %v6820_v2, %v11070_v22  ;;  %v6886_v11 = vsel %vm6824_vm11, %v6821_v33, %v11071_v48  ;;  %v6953_v46 = vsel %vm6889_vm12, %v6888_v38, %v19809_v43  ;;  %v19811_v48 = vld [vmem:[#allocation120_spill] sm:$0xff] }
 0x51c   : > { %v11074_v21 = vpop.permute.xlu0 %11073  ;;  %v11091_v1 = vunpack.i.h.bf16 %v11089_v30  ;;  %v11090_v47 = vunpack.i.l.bf16 %v11089_v30  ;;  %v19808_v30 = vunpack.i.h.bf16 %v19803_v31  ;;  %v17176_v31 = vld [vmem:[%s19195_s8 + $0x118] sm:$0xff]  ;;  %v9866_v22 = vunpack.i.h.bf16 %v19811_v48  ;;  %v7309_v2 = vpop.f32.mrf.mxu0 }
 0x51d   : > { %v11076_v45 = vunpack.i.h.bf16 %v11074_v21  ;;  %v11075_v23 = vunpack.i.l.bf16 %v11074_v21 }
 0x51e   : > { %v6948_v63 = vsel %vm6889_vm12, %v6883_v34, %v11090_v47  ;;  %v6949_v8 = vsel %vm6889_vm12, %v6884_v39, %v11091_v1  ;;  %v17154_v34 = vld [vmem:[%s19195_s8 + $0x100] sm:$0xff]  ;;  %v9865_v1 = vunpack.i.l.bf16 %v19811_v48  ;;  %v9680_v33 = vpop.f32.mrf.mxu0 }
 0x51f   : > { %v7075_v40 = vsel %vm358_vm4, %v7011_v52, %v11075_v23  ;;  %v7076_v51 = vsel %vm358_vm4, %v7012_v62, %v11076_v45  ;;  %v11099_v53 = vpop.permute.xlu1 %11098  ;;  %v19810_v62 = vld [vmem:[#allocation118_spill] sm:$0xff]  ;;  %v17196_v47 = vld [vmem:[%s19195_s8 + $0x120] sm:$0xff] }
 0x520   : > { %v11094_v27 = vpop.permute.xlu0 %11093  ;;  %v7111_v6 = vpack.c.bf16 %v7076_v51, %v7075_v40  ;;  %v11101_v55 = vunpack.i.h.bf16 %v11099_v53  ;;  %v11100_v37 = vunpack.i.l.bf16 %v11099_v53  ;;  %v9856_v25 = vunpack.i.h.bf16 %v19810_v62 }
 0x521   : > { %v11096_v12 = vunpack.i.h.bf16 %v11094_v27  ;;  %v11095_v24 = vunpack.i.l.bf16 %v11094_v27  ;;  %v9855_v45 = vunpack.i.l.bf16 %v19810_v62  ;;  %v7318_v27 = vadd.f32 %v9679_v0, %v16895_v7  ;;  %v11277_v62 = vld [vmem:[%s19195_s8 + $0x40] sm:$0xff] }
 0x522   : > { %9729 = vmatprep.mubr.msk.bf16.mxu0 %vm7158_vm14, %v7111_v6  ;;  %v7013_v39 = vsel %vm6954_vm13, %v6948_v63, %v11100_v37  ;;  %v7014_v13 = vsel %vm6954_vm13, %v6949_v8, %v11101_v55  ;;  %v7018_v16 = vsel %vm6954_vm13, %v6953_v46, %v9856_v25  ;;  %v7321_v6 = vadd.f32 %v9680_v33, %v16895_v7  ;;  %v7312_v55 = vpop.f32.mrf.mxu0 }
 0x523   : > { %v6950_v14 = vsel %vm6889_vm12, %v6885_v15, %v11095_v24  ;;  %v6951_v19 = vsel %vm6889_vm12, %v6886_v11, %v11096_v12  ;;  %v11104_v29 = vpop.permute.xlu1 %11103  ;;  %v7017_v44 = vsel %vm6954_vm13, %v6952_v61, %v9855_v45  ;;  %v7082_v51 = vsel %vm358_vm4, %v7018_v16, %v9866_v22  ;;  %v17305_v16 = vld [vmem:[%s19195_s8 + $0x160] sm:$0xff] }
 0x524   : > { %v7015_v28 = vsel %vm6954_vm13, %v6950_v14, %v19805_v42  ;;  %v7016_v59 = vsel %vm6954_vm13, %v6951_v19, %v19806_v35  ;;  %v11106_v58 = vunpack.i.h.bf16 %v11104_v29  ;;  %v11105_v49 = vunpack.i.l.bf16 %v11104_v29 }
 0x525   : > { %v7079_v10 = vsel %vm358_vm4, %v7015_v28, %v19807_v26  ;;  %v7080_v36 = vsel %vm358_vm4, %v7016_v59, %v19808_v30  ;;  %v7081_v40 = vsel %vm358_vm4, %v7017_v44, %v9865_v1  ;;  %v17205_v37 = vmax.f32 %v7318_v27, 0.0  ;;  %v9683_v28 = vpop.f32.mrf.mxu0  ;;  %v17298_v44 = vld [vmem:[%s19195_s8 + $0x150] sm:$0xff] }
 0x526   : > { %v7077_v9 = vsel %vm358_vm4, %v7013_v39, %v11105_v49  ;;  %v7078_v52 = vsel %vm358_vm4, %v7014_v13, %v11106_v58  ;;  %v7113_v21 = vpack.c.bf16 %v7080_v36, %v7079_v10  ;;  %v7114_v53 = vpack.c.bf16 %v7082_v51, %v7081_v40 }
 0x527   : > { %v7112_v23 = vpack.c.bf16 %v7078_v52, %v7077_v9  ;;  %8060 = vrot.lane.b32.xlu0 %v17154_v34, %s11421_s20  ;;  %19812 = vst [vmem:[#allocation113_spill] sm:$0xff] %v17205_v37  ;;  %v7310_v12 = vadd.f32 %v16895_v7, %v7309_v2  ;;  %v17208_v24 = vmax.f32 %v7321_v6, 0.0  ;;  %v7313_v38 = vadd.f32 %v16895_v7, %v7312_v55  ;;  %v7325_v35 = vpop.f32.mrf.mxu0 }
 0x528   : > { %v7682_v15 = vmul.f32 %v16576_v54, %v17205_v37  ;;  %v17230_v54 = vld [vmem:[%s19195_s8 + $0x128] sm:$0xff]  ;;  %v7334_v58 = vadd.f32 %v9683_v28, %v16895_v7  ;;  %v7326_v26 = vadd.f32 %v16895_v7, %v7325_v35 }
 0x529   : > { %9730 = vmatmul.mubr.msk.bf16.gmra.mxu0 %vm7158_vm14, %v7112_v23  ;;  %19813 = vst [vmem:[#allocation99_spill] sm:$0xff] %v17208_v24  ;;  %v17211_v17 = vmax.f32 %v7310_v12, 0.0  ;;  %v17213_v61 = vmax.f32 %v7313_v38, 0.0  ;;  %v7683_v11 = vmul.f32 %v16619_v32, %v17208_v24  ;;  %v17251_v32 = vld [vmem:[%s19195_s8 + $0x140] sm:$0xff]  ;;  %v9684_v59 = vpop.f32.mrf.mxu0 }
 0x52a   : > { %8066 = vrot.lane.b32.xlu1 %v17176_v31, %s11421_s20  ;;  %9733 = vmatprep.mubr.msk.bf16.mxu0 %vm7158_vm14, %v7113_v21  ;;  %v7758_v63 = vsel %vm6629_vm8, %v7682_v15, 0.0  ;;  %v7337_v49 = vadd.f32 %v9684_v59, %v16895_v7  ;;  %v17257_v13 = vmax.f32 %v7334_v58, 0.0  ;;  %v17263_v36 = vmax.f32 %v7326_v26, 0.0 }
 0x52b   : > { %8064 = vrot.lane.b32.xlu0 %v17181_v57, %s11421_s20  ;;  %19814 = vst [vmem:[#allocation86_spill] sm:$0xff] %v17211_v17  ;;  %19815 = vst [vmem:[#allocation115_spill] sm:$0xff] %v17213_v61  ;;  %v7761_v8 = vsel %vm6629_vm8, %v7683_v11, 0.0  ;;  %v7680_v14 = vmul.f32 %v16558_v20, %v17211_v17  ;;  %v7681_v19 = vmul.f32 %v16592_v5, %v17213_v61  ;;  %v17237_v20 = vld [vmem:[%s19195_s8 + $0x138] sm:$0xff]  ;;  %v17244_v5 = vld [vmem:[%s19195_s8 + $0x130] sm:$0xff]  ;;  %v7328_v39 = vpop.f32.mrf.mxu0 }
 0x52c   : > { %19816 = vst [vmem:[#allocation121_spill] sm:$0xff] %v17257_v13  ;;  %v17260_v10 = vmax.f32 %v7337_v49, 0.0  ;;  %v7329_v30 = vadd.f32 %v16895_v7, %v7328_v39  ;;  %19818 = vst [vmem:[#allocation19_spill] sm:$0xff] %v17263_v36  ;;  %v7686_v46 = vmul.f32 %v16632_v3, %v17257_v13  ;;  %v7684_v25 = vmul.f32 %v11277_v62, %v17263_v36  ;;  %v19829_v62 = vld [vmem:[#allocation39_spill] sm:$0xff] }
 0x52d   : > { %v7752_v29 = vsel %vm6629_vm8, %v7680_v14, 0.0  ;;  %v7755_v42 = vsel %vm6629_vm8, %v7681_v19, 0.0  ;;  %v9687_v48 = vpop.f32.mrf.mxu0 }
 0x52e   : > { %19817 = vst [vmem:[#allocation103_spill] sm:$0xff] %v17260_v10  ;;  %v17265_v43 = vmax.f32 %v7329_v30, 0.0  ;;  %v7687_v9 = vmul.f32 %v16682_v50, %v17260_v10  ;;  %v7770_v52 = vsel %vm6629_vm8, %v7686_v46, 0.0  ;;  %v7764_v3 = vsel %vm6629_vm8, %v7684_v25, 0.0  ;;  %v17284_v50 = vld [vmem:[%s19195_s8 + $0x148] sm:$0xff] }
 0x52f   : > { %8068 = vrot.lane.b32.xlu0 %v17196_v47, %s11421_s20  ;;  %v7341_v22 = vpop.f32.mrf.mxu0  ;;  %v7350_v40 = vadd.f32 %v9687_v48, %v16895_v7 }
 0x530   : > { %19819 = vst [vmem:[#allocation122_spill] sm:$0xff] %v17265_v43  ;;  %v7773_v21 = vsel %vm6629_vm8, %v7687_v9, 0.0  ;;  %v7685_v45 = vmul.f32 %v16653_v56, %v17265_v43  ;;  %v17291_v56 = vld [vmem:[%s19195_s8 + $0x158] sm:$0xff]  ;;  %v7342_v2 = vadd.f32 %v16895_v7, %v7341_v22 }
 0x531   : > { %9734 = vmatmul.mubr.msk.bf16.gmra.mxu0 %vm7158_vm14, %v7114_v53  ;;  %v9688_v1 = vpop.f32.mrf.mxu0  ;;  %v17311_v0 = vmax.f32 %v7350_v40, 0.0  ;;  %v19831_v22 = vld [vmem:[#allocation15_spill] sm:$0xff] }
 0x532   : > { %v7767_v23 = vsel %vm6629_vm8, %v7685_v45, 0.0  ;;  %v7353_v51 = vadd.f32 %v9688_v1, %v16895_v7  ;;  %v17317_v6 = vmax.f32 %v7342_v2, 0.0  ;;  %v17395_v2 = vld [vmem:[%s19195_s8 + $0x198] sm:$0xff] }
 0x533   : > { %v7344_v53 = vpop.f32.mrf.mxu0  ;;  %19820 = vst [vmem:[#allocation119_spill] sm:$0xff] %v17311_v0  ;;  %v7690_v12 = vmul.f32 %v16693_v60, %v17311_v0  ;;  %v17336_v60 = vld [vmem:[%s19195_s8 + $0x168] sm:$0xff] }
 0x534   : > { %v17314_v33 = vmax.f32 %v7353_v51, 0.0  ;;  %v7345_v27 = vadd.f32 %v16895_v7, %v7344_v53  ;;  %19822 = vst [vmem:[#allocation92_spill] sm:$0xff] %v17317_v6  ;;  %v17388_v53 = vld [vmem:[%s19195_s8 + $0x188] sm:$0xff] }
 0x535   : > { %v7782_v15 = vsel %vm6629_vm8, %v7690_v12, 0.0  ;;  %v17409_v12 = vld [vmem:[%s19195_s8 + $0x1a0] sm:$0xff] }
 0x536   : > { %19821 = vst [vmem:[#allocation117_spill] sm:$0xff] %v17314_v33  ;;  %v17319_v55 = vmax.f32 %v7345_v27, 0.0  ;;  %v7691_v38 = vmul.f32 %v16729_v18, %v17314_v33  ;;  %v17357_v18 = vld [vmem:[%s19195_s8 + $0x180] sm:$0xff]  ;;  %v17402_v27 = vld [vmem:[%s19195_s8 + $0x190] sm:$0xff] }
 0x538   : > { %19823 = vst [vmem:[#allocation124_spill] sm:$0xff] %v17319_v55  ;;  %v7785_v11 = vsel %vm6629_vm8, %v7691_v38, 0.0 }
 0x54e   : > { %7759 = vadd.xlane.f32.xlu1 %v7758_v63  ;;  %7762 = vadd.xlane.f32.xlu0 %v7761_v8  ;;  %v7688_v63 = vmul.f32 %v16662_v4, %v17317_v6  ;;  %v7689_v8 = vmul.f32 %v16707_v41, %v17319_v55  ;;  %v17343_v4 = vld [vmem:[%s19195_s8 + $0x178] sm:$0xff]  ;;  %v17350_v41 = vld [vmem:[%s19195_s8 + $0x170] sm:$0xff] }
 0x550   : > { %v7776_v14 = vsel %vm6629_vm8, %v7688_v63, 0.0  ;;  %v7779_v19 = vsel %vm6629_vm8, %v7689_v8, 0.0 }
 0x552   : > { %7753 = vadd.xlane.f32.xlu1 %v7752_v29  ;;  %7756 = vadd.xlane.f32.xlu0 %v7755_v42  ;;  %v9691_v29 = vpop.f32.mrf.mxu0 }
 0x553   : > { %v7366_v35 = vadd.f32 %v9691_v29, %v16895_v7 }
 0x554   : > { %v7357_v42 = vpop.f32.mrf.mxu0 }
 0x555   : > { %v17363_v49 = vmax.f32 %v7366_v35, 0.0  ;;  %v7358_v39 = vadd.f32 %v16895_v7, %v7357_v42 }
 0x556   : > { %v9692_v28 = vpop.f32.mrf.mxu0 }
 0x557   : > { %v7369_v59 = vadd.f32 %v9692_v28, %v16895_v7  ;;  %19824 = vst [vmem:[#allocation125_spill] sm:$0xff] %v17363_v49  ;;  %v17369_v46 = vmax.f32 %v7358_v39, 0.0 }
 0x558   : > { %v7360_v58 = vpop.f32.mrf.mxu0 }
 0x559   : > { %v17366_v26 = vmax.f32 %v7369_v59, 0.0  ;;  %v7361_v30 = vadd.f32 %v16895_v7, %v7360_v58  ;;  %19826 = vst [vmem:[#allocation126_spill] sm:$0xff] %v17369_v46  ;;  %v19836_v58 = vld [vmem:[#allocation87_spill] sm:$0xff] }
 0x55a   : > { %v9695_v38 = vpop.f32.mrf.mxu0 }
 0x55b   : > { %19825 = vst [vmem:[#allocation18_spill] sm:$0xff] %v17366_v26  ;;  %v17371_v9 = vmax.f32 %v7361_v30, 0.0  ;;  %v7695_v25 = vmul.f32 %v19829_v62, %v17366_v26  ;;  %v7382_v63 = vadd.f32 %v9695_v38, %v16895_v7  ;;  %v19837_v30 = vld [vmem:[#allocation78_spill] sm:$0xff]  ;;  %v17463_v38 = vld [vmem:[%s19195_s8 + $0x1c0] sm:$0xff] }
 0x55d   : > { %19827 = vst [vmem:[#allocation58_spill] sm:$0xff] %v17371_v9  ;;  %v7693_v1 = vmul.f32 %v19831_v22, %v17371_v9 }
 0x55f   : > { %v7791_v51 = vsel %vm6629_vm8, %v7693_v1, 0.0  ;;  %v17442_v1 = vld [vmem:[%s19195_s8 + $0x1a8] sm:$0xff] }
 0x563   : > { %8070 = vrot.lane.b32.xlu1 %v17230_v54, %s11421_s20 }
 0x567   : > { %8074 = vrot.lane.b32.xlu1 %v17237_v20, %s11421_s20 }
 0x568   : > { %8072 = vrot.lane.b32.xlu0 %v17244_v5, %s11421_s20 }
 0x56c   : > { %8076 = vrot.lane.b32.xlu0 %v17251_v32, %s11421_s20 }
 0x58b   : > { %7771 = vadd.xlane.f32.xlu1 %v7770_v52  ;;  %7774 = vadd.xlane.f32.xlu0 %v7773_v21  ;;  %v19828_v52 = vld [vmem:[#allocation83_spill] sm:$0xff] }
 0x58c   : > { %v7694_v21 = vmul.f32 %v19828_v52, %v17363_v49 }
 0x58e   : > { %v7794_v45 = vsel %vm6629_vm8, %v7694_v21, 0.0 }
 0x58f   : > { %7765 = vadd.xlane.f32.xlu1 %v7764_v3  ;;  %7768 = vadd.xlane.f32.xlu0 %v7767_v23  ;;  %v7797_v3 = vsel %vm6629_vm8, %v7695_v25, 0.0  ;;  %v19830_v23 = vld [vmem:[#allocation33_spill] sm:$0xff] }
 0x590   : > { %v7692_v48 = vmul.f32 %v19830_v23, %v17369_v46  ;;  %v11278_v25 = vld [vmem:[%s19195_s8 + $0xa0] sm:$0xff] }
 0x592   : > { %v7788_v40 = vsel %vm6629_vm8, %v7692_v48, 0.0 }
 0x5a0   : > { %8078 = vrot.lane.b32.xlu1 %v17284_v50, %s11421_s20 }
 0x5a4   : > { %8082 = vrot.lane.b32.xlu1 %v17291_v56, %s11421_s20 }
 0x5a5   : > { %8080 = vrot.lane.b32.xlu0 %v17298_v44, %s11421_s20 }
 0x5a9   : > { %8084 = vrot.lane.b32.xlu0 %v17305_v16, %s11421_s20 }
 0x5c8   : > { %7783 = vadd.xlane.f32.xlu1 %v7782_v15  ;;  %7786 = vadd.xlane.f32.xlu0 %v7785_v11  ;;  %v7373_v15 = vpop.f32.mrf.mxu0 }
 0x5c9   : > { %v7374_v29 = vadd.f32 %v16895_v7, %v7373_v15 }
 0x5ca   : > { %v9696_v11 = vpop.f32.mrf.mxu0 }
 0x5cb   : > { %v7385_v8 = vadd.f32 %v9696_v11, %v16895_v7  ;;  %v17421_v35 = vmax.f32 %v7374_v29, 0.0 }
 0x5cc   : > { %7777 = vadd.xlane.f32.xlu1 %v7776_v14  ;;  %7780 = vadd.xlane.f32.xlu0 %v7779_v19  ;;  %v7376_v14 = vpop.f32.mrf.mxu0  ;;  %v17415_v19 = vmax.f32 %v7382_v63, 0.0 }
 0x5cd   : > { %v17418_v42 = vmax.f32 %v7385_v8, 0.0  ;;  %v7377_v28 = vadd.f32 %v16895_v7, %v7376_v14  ;;  %19834 = vst [vmem:[#allocation61_spill] sm:$0xff] %v17421_v35  ;;  %v17467_v8 = vpop.permute.xlu0 %7998 }
 0x5ce   : > { %19832 = vst [vmem:[#allocation59_spill] sm:$0xff] %v17415_v19  ;;  %v7698_v39 = vmul.f32 %v19836_v58, %v17415_v19  ;;  %v9699_v15 = vpop.f32.mrf.mxu0 }
 0x5cf   : > { %19833 = vst [vmem:[#allocation23_spill] sm:$0xff] %v17418_v42  ;;  %v17423_v59 = vmax.f32 %v7377_v28, 0.0  ;;  %v7699_v52 = vmul.f32 %v19837_v30, %v17418_v42  ;;  %v7398_v14 = vadd.f32 %v9699_v15, %v16895_v7 }
 0x5d0   : > { %v7806_v21 = vsel %vm6629_vm8, %v7698_v39, 0.0  ;;  %v7389_v11 = vpop.f32.mrf.mxu0 }
 0x5d1   : > { %19835 = vst [vmem:[#allocation60_spill] sm:$0xff] %v17423_v59  ;;  %v7809_v62 = vsel %vm6629_vm8, %v7699_v52, 0.0  ;;  %v17471_v58 = vmax.f32 %v7398_v14, 0.0  ;;  %v7390_v39 = vadd.f32 %v16895_v7, %v7389_v11  ;;  %v11280_v14 = vld [vmem:[%s19195_s8 + $0xc0] sm:$0xff] }
 0x5d2   : > { %v9700_v63 = vpop.f32.mrf.mxu0 }
 0x5d3   : > { %v7401_v29 = vadd.f32 %v9700_v63, %v16895_v7  ;;  %19839 = vst [vmem:[#allocation27_spill] sm:$0xff] %v17471_v58 }
 0x5d4   : > { %v7392_v28 = vpop.f32.mrf.mxu0 }
 0x5d5   : > { %v17474_v30 = vmax.f32 %v7401_v29, 0.0  ;;  %v7393_v52 = vadd.f32 %v16895_v7, %v7392_v28  ;;  %v19844_v28 = vld [vmem:[#allocation12_spill] sm:$0xff] }
 0x5d7   : > { %19840 = vst [vmem:[#allocation63_spill] sm:$0xff] %v17474_v30 }
 0x5dd   : > { %8086 = vrot.lane.b32.xlu1 %v17336_v60, %s11421_s20 }
 0x5e1   : > { %8090 = vrot.lane.b32.xlu1 %v17343_v4, %s11421_s20 }
 0x5e2   : > { %8088 = vrot.lane.b32.xlu0 %v17350_v41, %s11421_s20 }
 0x5e6   : > { %8092 = vrot.lane.b32.xlu0 %v17357_v18, %s11421_s20 }
 0x605   : > { %7795 = vadd.xlane.f32.xlu1 %v7794_v45  ;;  %7798 = vadd.xlane.f32.xlu0 %v7797_v3  ;;  %v7696_v45 = vmul.f32 %v11278_v25, %v17421_v35  ;;  %v19838_v3 = vld [vmem:[#allocation74_spill] sm:$0xff]  ;;  %v17481_v25 = vmax.f32 %v7393_v52, 0.0 }
 0x606   : > { %v7697_v23 = vmul.f32 %v19838_v3, %v17423_v59  ;;  %v11279_v3 = vld [vmem:[%s19195_s8 + $0xd0] sm:$0xff]  ;;  %v9703_v59 = vpop.f32.mrf.mxu0 }
 0x607   : > { %v7800_v48 = vsel %vm6629_vm8, %v7696_v45, 0.0  ;;  %19842 = vst [vmem:[#allocation20_spill] sm:$0xff] %v17481_v25  ;;  %v17483_v45 = vpop.permute.xlu1 %8000 }
 0x608   : > { %v7803_v22 = vsel %vm6629_vm8, %v7697_v23, 0.0  ;;  %v7702_v23 = vmul.f32 %v11279_v3, %v17471_v58  ;;  %v7405_v35 = vpop.f32.mrf.mxu0 }
 0x609   : > { %7789 = vadd.xlane.f32.xlu1 %v7788_v40  ;;  %7792 = vadd.xlane.f32.xlu0 %v7791_v51  ;;  %v17449_v40 = vld [vmem:[%s19195_s8 + $0x1b8] sm:$0xff]  ;;  %v17456_v51 = vld [vmem:[%s19195_s8 + $0x1b0] sm:$0xff] }
 0x60a   : > { %v7818_v11 = vsel %vm6629_vm8, %v7702_v23, 0.0  ;;  %v9704_v49 = vpop.f32.mrf.mxu0 }
 0x60b   : > { %v17501_v52 = vpop.permute.xlu1 %8002  ;;  %v7417_v46 = vadd.f32 %v9704_v49, %v16895_v7  ;;  %v11281_v49 = vld [vmem:[%s19195_s8 + $0xf0] sm:$0xff] }
 0x60c   : > { %v7408_v55 = vpop.f32.mrf.mxu0 }
 0x61a   : > { %8094 = vrot.lane.b32.xlu1 %v17388_v53, %s11421_s20 }
 0x61e   : > { %8098 = vrot.lane.b32.xlu1 %v17395_v2, %s11421_s20 }
 0x61f   : > { %8096 = vrot.lane.b32.xlu0 %v17402_v27, %s11421_s20 }
 0x623   : > { %8100 = vrot.lane.b32.xlu0 %v17409_v12, %s11421_s20 }
 0x642   : > { %7807 = vadd.xlane.f32.xlu1 %v7806_v21  ;;  %7810 = vadd.xlane.f32.xlu0 %v7809_v62  ;;  %v17477_v21 = vpop.permute.xlu0 %8004  ;;  %v17479_v62 = vmax.f32 %v7390_v39, 0.0  ;;  %v7701_v39 = vmul.f32 %v19844_v28, %v17481_v25  ;;  %v17529_v28 = vld [vmem:[%s19195_s8 + $0x1d8] sm:$0xff]  ;;  %v17547_v25 = vld [vmem:[%s19195_s8 + $0x1e0] sm:$0xff] }
 0x644   : > { %19841 = vst [vmem:[#allocation64_spill] sm:$0xff] %v17479_v62  ;;  %v7700_v29 = vmul.f32 %v11280_v14, %v17479_v62  ;;  %v7815_v23 = vsel %vm6629_vm8, %v7701_v39, 0.0 }
 0x646   : > { %7801 = vadd.xlane.f32.xlu1 %v7800_v48  ;;  %7804 = vadd.xlane.f32.xlu0 %v7803_v22  ;;  %v19843_v48 = vld [vmem:[#allocation110_spill] sm:$0xff]  ;;  %v17491_v15 = vpop.permute.xlu0 %8008 }
 0x647   : > { %v7703_v22 = vmul.f32 %v19843_v48, %v17474_v30  ;;  %v7812_v48 = vsel %vm6629_vm8, %v7700_v29, 0.0 }
 0x649   : > { %v7821_v63 = vsel %vm6629_vm8, %v7703_v22, 0.0  ;;  %v17507_v22 = vpop.permute.xlu1 %8006 }
 0x64a   : > { %v17503_v3 = vpop.permute.xlu0 %8012 }
 0x64b   : > { %19845 = vst [vmem:[#allocation16_spill] sm:$0xff] %v17503_v3 }
 0x64d   : > { %v17511_v14 = vpop.permute.xlu1 %8010 }
 0x64e   : > { %v17509_v30 = vpop.permute.xlu0 %8016 }
 0x64f   : > { %19846 = vst [vmem:[#allocation50_spill] sm:$0xff] %v17509_v30 }
 0x652   : > { %v17513_v58 = vpop.permute.xlu0 %8020 }
 0x653   : > { %19847 = vst [vmem:[#allocation123_spill] sm:$0xff] %v17513_v58 }
 0x656   : > { %v17522_v29 = vpop.permute.xlu0 %8024 }
 0x657   : > { %8102 = vrot.lane.b32.xlu1 %v17442_v1, %s11421_s20  ;;  %19849 = vst [vmem:[#allocation25_spill] sm:$0xff] %v17522_v29 }
 0x65b   : > { %8106 = vrot.lane.b32.xlu1 %v17449_v40, %s11421_s20 }
 0x65c   : > { %8104 = vrot.lane.b32.xlu0 %v17456_v51, %s11421_s20 }
 0x660   : > { %8108 = vrot.lane.b32.xlu0 %v17463_v38, %s11421_s20 }
 0x67f   : > { %7819 = vadd.xlane.f32.xlu1 %v7818_v11  ;;  %7822 = vadd.xlane.f32.xlu0 %v7821_v63  ;;  %v17515_v11 = vpop.permute.xlu1 %8014  ;;  %v17520_v63 = vld [vmem:[%s19195_s8 + $0x1c8] sm:$0xff] }
 0x680   : > { %19848 = vst [vmem:[#allocation26_spill] sm:$0xff] %v17515_v11  ;;  %v17657_v11 = vld [vmem:[%s19194_s7] ss:$0 sm:$0xff] }
 0x683   : > { %7813 = vadd.xlane.f32.xlu1 %v7812_v48  ;;  %7816 = vadd.xlane.f32.xlu0 %v7815_v23  ;;  %v17531_v39 = vpop.permute.xlu1 %8018  ;;  %v17538_v48 = vld [vmem:[%s19195_s8 + $0x1d0] sm:$0xff]  ;;  %v17542_v23 = vpop.permute.xlu0 %8028 }
 0x684   : > { %19850 = vst [vmem:[#allocation22_spill] sm:$0xff] %v17531_v39  ;;  %19851 = vst [vmem:[#allocation51_spill] sm:$0xff] %v17542_v23  ;;  %v7414_v23 = vadd.f32 %v9703_v59, %v16895_v7 }
 0x687   : > { %v17551_v42 = vpop.permute.xlu1 %8022  ;;  %v17553_v62 = vpop.permute.xlu0 %8032 }
 0x688   : > { %19852 = vst [vmem:[#allocation53_spill] sm:$0xff] %v17551_v42  ;;  %19853 = vst [vmem:[#allocation57_spill] sm:$0xff] %v17553_v62  ;;  %v17569_v62 = vmax.f32 %v7414_v23, 0.0  ;;  %v19865_v23 = vld [vmem:[#allocation95_spill] sm:$0xff] }
 0x68a   : > { %19860 = vst [vmem:[#allocation34_spill] sm:$0xff] %v17569_v62 }
 0x68b   : > { %v17555_v19 = vpop.permute.xlu1 %8026  ;;  %v17557_v26 = vpop.permute.xlu0 %8036 }
 0x68c   : > { %19854 = vst [vmem:[#allocation54_spill] sm:$0xff] %v17555_v19  ;;  %19855 = vst [vmem:[#allocation24_spill] sm:$0xff] %v17557_v26  ;;  %v7406_v19 = vadd.f32 %v16895_v7, %v7405_v35  ;;  %v17572_v26 = vmax.f32 %v7417_v46, 0.0 }
 0x68e   : > { %19861 = vst [vmem:[#allocation65_spill] sm:$0xff] %v17572_v26 }
 0x68f   : > { %v17559_v9 = vpop.permute.xlu1 %8030  ;;  %v17561_v33 = vpop.permute.xlu0 %8040 }
 0x690   : > { %19856 = vst [vmem:[#allocation29_spill] sm:$0xff] %v17559_v9  ;;  %19857 = vst [vmem:[#allocation31_spill] sm:$0xff] %v17561_v33  ;;  %v7409_v9 = vadd.f32 %v16895_v7, %v7408_v55  ;;  %v17577_v33 = vmax.f32 %v7406_v19, 0.0  ;;  %v11282_v55 = vld [vmem:[%s19195_s8 + $0xe0] sm:$0xff]  ;;  %v11283_v19 = vld [vmem:[%s19195_s8 + $0xe8] sm:$0xff] }
 0x692   : > { %19863 = vst [vmem:[#allocation67_spill] sm:$0xff] %v17577_v33  ;;  %v17579_v59 = vmax.f32 %v7409_v9, 0.0  ;;  %v7704_v9 = vmul.f32 %v11282_v55, %v17577_v33  ;;  %v9707_v55 = vpop.f32.mrf.mxu0 }
 0x693   : > { %v17565_v29 = vpop.permute.xlu1 %8034  ;;  %v17567_v42 = vpop.permute.xlu0 %8044 }
 0x694   : > { %8110 = vrot.lane.b32.xlu1 %v17520_v63, %s11421_s20  ;;  %19858 = vst [vmem:[#allocation35_spill] sm:$0xff] %v17565_v29  ;;  %19859 = vst [vmem:[#allocation30_spill] sm:$0xff] %v17567_v42  ;;  %v7706_v42 = vmul.f32 %v11281_v49, %v17569_v62  ;;  %v7707_v29 = vmul.f32 %v19865_v23, %v17572_v26  ;;  %v7705_v49 = vmul.f32 %v11283_v19, %v17579_v59 }
 0x695   : > { %19864 = vst [vmem:[#allocation37_spill] sm:$0xff] %v17579_v59 }
 0x696   : > { %v7830_v46 = vsel %vm6629_vm8, %v7706_v42, 0.0  ;;  %v7833_v7 = vsel %vm6629_vm8, %v7707_v29, 0.0  ;;  %v7824_v42 = vsel %vm6629_vm8, %v7704_v9, 0.0  ;;  %v7827_v29 = vsel %vm6629_vm8, %v7705_v49, 0.0  ;;  %v17620_v49 = vld [vmem:[%s19195_s8 + $0x1e8] sm:$0xff] }
 0x697   : > { %v17575_v0 = vpop.permute.xlu1 %8038  ;;  %v17587_v35 = vpop.permute.xlu0 %8048  ;;  %19875 = vst [vmem:[#allocation45_spill] sm:$0xff] %v17620_v49 }
 0x698   : > { %8114 = vrot.lane.b32.xlu1 %v17529_v28, %s11421_s20  ;;  %19862 = vst [vmem:[#allocation32_spill] sm:$0xff] %v17575_v0  ;;  %19866 = vst [vmem:[#allocation68_spill] sm:$0xff] %v17587_v35  ;;  %v7421_v35 = vpop.f32.mrf.mxu0 }
 0x699   : > { %8112 = vrot.lane.b32.xlu0 %v17538_v48, %s11421_s20  ;;  %v7422_v3 = vadd.f32 %v17657_v11, %v7421_v35 }
 0x69b   : > { %v17599_v62 = vpop.permute.xlu1 %8042  ;;  %v17601_v23 = vpop.permute.xlu0 %8052 }
 0x69c   : > { %19867 = vst [vmem:[#allocation72_spill] sm:$0xff] %v17599_v62  ;;  %19868 = vst [vmem:[#allocation71_spill] sm:$0xff] %v17601_v23 }
 0x69d   : > { %8116 = vrot.lane.b32.xlu0 %v17547_v25, %s11421_s20 }
 0x69f   : > { %v17605_v26 = vpop.permute.xlu1 %8046  ;;  %v17607_v33 = vpop.permute.xlu0 %8056 }
 0x6a0   : > { %19869 = vst [vmem:[#allocation36_spill] sm:$0xff] %v17605_v26  ;;  %19870 = vst [vmem:[#allocation73_spill] sm:$0xff] %v17607_v33 }
 0x6a3   : > { %v17609_v0 = vpop.permute.xlu1 %8050  ;;  %v17611_v19 = vpop.xlane.xlu0 %7747 }
 0x6a4   : > { %19871 = vst [vmem:[#allocation76_spill] sm:$0xff] %v17609_v0  ;;  %19872 = vst [vmem:[#allocation43_spill] sm:$0xff] %v17611_v19  ;;  %v17631_v19 = vld [vmem:[%s19195_s8 + $0x1f8] sm:$0xff] }
 0x6a5   : > { %19878 = vst [vmem:[#allocation106_spill] sm:$0xff] %v17631_v19 }
 0x6a7   : > { %v17615_v59 = vpop.xlane.xlu0 %7741 }
 0x6a8   : > { %19874 = vst [vmem:[#allocation77_spill] sm:$0xff] %v17615_v59 }
 0x6ab   : > { %v17626_v33 = vpop.xlane.xlu0 %7750 }
 0x6ac   : > { %19877 = vst [vmem:[#allocation46_spill] sm:$0xff] %v17626_v33 }
 0x6af   : > { %v17644_v33 = vpop.permute.xlu0 %8060 }
 0x6b0   : > { %19880 = vst [vmem:[#allocation80_spill] sm:$0xff] %v17644_v33 }
 0x6b3   : > { %v17648_v39 = vpop.permute.xlu0 %8064 }
 0x6b4   : > { %19882 = vst [vmem:[#allocation56_spill] sm:$0xff] %v17648_v39 }
 0x6b7   : > { %v17652_v6 = vpop.permute.xlu0 %8068 }
 0x6b8   : > { %19884 = vst [vmem:[#allocation84_spill] sm:$0xff] %v17652_v6 }
 0x6bb   : > { %v17662_v30 = vpop.xlane.xlu0 %7762 }
 0x6bc   : > { %7831 = vadd.xlane.f32.xlu1 %v7830_v46  ;;  %7834 = vadd.xlane.f32.xlu0 %v7833_v7  ;;  %v9708_v46 = vpop.f32.mrf.mxu0  ;;  %v17613_v7 = vpop.permute.xlu1 %8054  ;;  %19886 = vst [vmem:[#allocation48_spill] sm:$0xff] %v17662_v30 }
 0x6bd   : > { %19873 = vst [vmem:[#allocation40_spill] sm:$0xff] %v17613_v7  ;;  %v17638_v7 = vld [vmem:[%s19195_s8 + $0x1f0] sm:$0xff] }
 0x6be   : > { %v7424_v9 = vpop.f32.mrf.mxu0 }
 0x6c0   : > { %7825 = vadd.xlane.f32.xlu1 %v7824_v42  ;;  %7828 = vadd.xlane.f32.xlu0 %v7827_v29  ;;  %v9711_v42 = vpop.f32.mrf.mxu0  ;;  %v17624_v29 = vpop.permute.xlu1 %8058 }
 0x6c1   : > { %19876 = vst [vmem:[#allocation47_spill] sm:$0xff] %v17624_v29  ;;  %v7446_v30 = vadd.f32 %v17657_v11, %v9711_v42 }
 0x6c2   : > { %v7437_v59 = vpop.f32.mrf.mxu0 }
 0x6c4   : > { %v9712_v29 = vpop.f32.mrf.mxu0  ;;  %v17642_v0 = vpop.permute.xlu1 %8062 }
 0x6c5   : > { %19879 = vst [vmem:[#allocation108_spill] sm:$0xff] %v17642_v0  ;;  %v7433_v0 = vadd.f32 %v17657_v11, %v9708_v46 }
 0x6c6   : > { %v7440_v23 = vpop.f32.mrf.mxu0 }
 0x6c7   : > { %v17665_v39 = vmax.f32 %v7433_v0, 0.0 }
 0x6c8   : > { %v17646_v26 = vpop.xlane.xlu1 %7744  ;;  %v9715_v62 = vpop.f32.mrf.mxu0 }
 0x6c9   : > { %19881 = vst [vmem:[#allocation109_spill] sm:$0xff] %v17646_v26  ;;  %v7430_v26 = vadd.f32 %v17657_v11, %v9707_v55  ;;  %19887 = vst [vmem:[#allocation52_spill] sm:$0xff] %v17665_v39  ;;  %v7711_v0 = vmul.f32 %v17176_v31, %v17665_v39  ;;  %v11285_v31 = vld [vmem:[%s19195_s8 + $0x108] sm:$0xff] }
 0x6ca   : > { %v7453_v10 = vpop.f32.mrf.mxu0 }
 0x6cb   : > { %v17671_v36 = vmax.f32 %v7430_v26, 0.0 }
 0x6cc   : > { %v17650_v58 = vpop.permute.xlu1 %8066  ;;  %v9716_v43 = vpop.f32.mrf.mxu0 }
 0x6cd   : > { %19883 = vst [vmem:[#allocation81_spill] sm:$0xff] %v17650_v58  ;;  %v7425_v58 = vadd.f32 %v17657_v11, %v7424_v9  ;;  %19889 = vst [vmem:[#allocation85_spill] sm:$0xff] %v17671_v36  ;;  %v17682_v9 = vmax.f32 %v7422_v3, 0.0 }
 0x6ce   : > { %v7456_v13 = vpop.f32.mrf.mxu0 }
 0x6cf   : > { %v17673_v46 = vmax.f32 %v7425_v58, 0.0  ;;  %19891 = vst [vmem:[#allocation88_spill] sm:$0xff] %v17682_v9  ;;  %v7845_v58 = vsel %vm6629_vm8, %v7711_v0, 0.0  ;;  %v7708_v0 = vmul.f32 %v17154_v34, %v17682_v9  ;;  %v7457_v34 = vadd.f32 %v17657_v11, %v7456_v13 }
 0x6d0   : > { %v17660_v33 = vpop.xlane.xlu1 %7759  ;;  %v9719_v6 = vpop.f32.mrf.mxu0 }
 0x6d1   : > { %8118 = vrot.lane.b32.xlu1 %v17620_v49, %s11421_s20  ;;  %19885 = vst [vmem:[#allocation49_spill] sm:$0xff] %v17660_v33  ;;  %v7449_v33 = vadd.f32 %v17657_v11, %v9712_v29  ;;  %v7710_v29 = vmul.f32 %v17181_v57, %v17671_v36  ;;  %v7709_v3 = vmul.f32 %v11285_v31, %v17673_v46 }
 0x6d2   : > { %v17680_v55 = vpop.f32.mrf.mxu0  ;;  %v7465_v57 = vadd.f32 %v17657_v11, %v9716_v43  ;;  %v7836_v43 = vsel %vm6629_vm8, %v7708_v0, 0.0  ;;  %v17732_v0 = vmax.f32 %v7457_v34, 0.0  ;;  %v7478_v34 = vadd.f32 %v17657_v11, %v9719_v6 }
 0x6d3   : > { %v17686_v35 = vmax.f32 %v7449_v33, 0.0  ;;  %v7438_v33 = vadd.f32 %v17657_v11, %v7437_v59  ;;  %v7842_v39 = vsel %vm6629_vm8, %v7710_v29, 0.0  ;;  %v7839_v36 = vsel %vm6629_vm8, %v7709_v3, 0.0 }
 0x6d4   : > { %v17668_v49 = vpop.xlane.xlu1 %7753 }
 0x6d5   : > { %8122 = vrot.lane.b32.xlu1 %v17631_v19, %s11421_s20  ;;  %19888 = vst [vmem:[#allocation13_spill] sm:$0xff] %v17668_v49  ;;  %v17676_v19 = vpop.xlane.xlu0 %7756  ;;  %v7441_v49 = vadd.f32 %v17657_v11, %v7440_v23  ;;  %v17699_v23 = vmax.f32 %v7446_v30, 0.0  ;;  %v17713_v59 = vmax.f32 %v7438_v33, 0.0  ;;  %v7454_v33 = vadd.f32 %v17657_v11, %v7453_v10 }
 0x6d6   : > { %8120 = vrot.lane.b32.xlu0 %v17638_v7, %s11421_s20  ;;  %19890 = vst [vmem:[#allocation10_spill] sm:$0xff] %v17676_v19  ;;  %v9720_v19 = vpop.f32.mrf.mxu0  ;;  %s11426_s20 = smov [#allocation6]  }
 0x6d7   : > { %v17743_v10 = vmax.f32 %v7454_v33, 0.0  ;;  %v7470_v33 = vadd.f32 %v17657_v11, %v17680_v55  ;;  %s11354_s28 = sshll.u32 %s11426_s20, 4  ;;  %s11355_s28 = int_to_ptr.vmem [resolvable:$false] %s11354_s28 }
 0x6d8   : > { %v17688_v26 = vpop.permute.xlu1 %8070  ;;  %v7472_v30 = vpop.f32.mrf.mxu0  ;;  %s11356_s17 = scalar_lea.vmem %s11355_s28, 32 }
 0x6d9   : > { %19892 = vst [vmem:[#allocation89_spill] sm:$0xff] %v17688_v26  ;;  %v17697_v42 = vpop.permute.xlu0 %8072  ;;  %v17702_v26 = vmax.f32 %v7441_v49, 0.0  ;;  %v7462_v49 = vadd.f32 %v17657_v11, %v9715_v62 }
 0x6da   : > { %19893 = vst [vmem:[#allocation9_spill] sm:$0xff] %v17697_v42  ;;  %v17718_v42 = vmax.f32 %v7465_v57, 0.0  ;;  %v9723_v29 = vpop.f32.mrf.mxu0  ;;  %v7712_v57 = vmul.f32 %v17196_v47, %v17713_v59  ;;  %v7473_v47 = vadd.f32 %v17657_v11, %v7472_v30  ;;  %v17759_v30 = vmax.f32 %v7478_v34, 0.0 }
 0x6db   : > { %v17729_v13 = vmax.f32 %v7462_v49, 0.0  ;;  %v7494_v55 = vadd.f32 %v17657_v11, %v9723_v29  ;;  %v19900_v29 = vld [vmem:[#allocation112_spill] sm:$0xff] }
 0x6dc   : > { %v17711_v31 = vpop.permute.xlu1 %8074  ;;  %v7719_v49 = vmul.f32 %v17291_v56, %v17718_v42 }
 0x6dd   : > { %v17720_v3 = vpop.permute.xlu0 %8076  ;;  %v7718_v56 = vmul.f32 %v17298_v44, %v17729_v13  ;;  %v7716_v44 = vmul.f32 %v17251_v32, %v17743_v10  ;;  %v7722_v32 = vmul.f32 %v17350_v41, %v17759_v30 }
 0x6de   : > { %19894 = vst [vmem:[#allocation90_spill] sm:$0xff] %v17720_v3  ;;  %v7485_v3 = vpop.f32.mrf.mxu0 }
 0x6e0   : > { %v17727_v62 = vpop.xlane.xlu1 %7771 }
 0x6e1   : > { %19895 = vst [vmem:[#allocation17_spill] sm:$0xff] %v17727_v62 }
 0x6e4   : > { %v17750_v62 = vpop.xlane.xlu1 %7765 }
 0x6e5   : > { %19898 = vst [vmem:[#allocation94_spill] sm:$0xff] %v17750_v62 }
 0x6e8   : > { %v17771_v34 = vpop.permute.xlu1 %8078 }
 0x6ec   : > { %v17790_v62 = vpop.permute.xlu1 %8082 }
 0x6f5   : > { %7846 = vadd.xlane.f32.xlu0 %v7845_v58  ;;  %v7715_v58 = vmul.f32 %v17237_v20, %v17686_v35 }
 0x6f7   : > { %v7857_v20 = vsel %vm6629_vm8, %v7715_v58, 0.0  ;;  %v7481_v58 = vadd.f32 %v17657_v11, %v9720_v19  ;;  %v7848_v19 = vsel %vm6629_vm8, %v7712_v57, 0.0  ;;  %v17763_v57 = vmax.f32 %v7473_v47, 0.0 }
 0x6f9   : > { %7843 = vadd.xlane.f32.xlu1 %v7842_v39  ;;  %7840 = vadd.xlane.f32.xlu0 %v7839_v36  ;;  %v7714_v36 = vmul.f32 %v17244_v5, %v17699_v23  ;;  %v7713_v39 = vmul.f32 %v17230_v54, %v17702_v26  ;;  %v17737_v5 = vpop.xlane.xlu0 %7774 }
 0x6fa   : > { %19896 = vst [vmem:[#allocation14_spill] sm:$0xff] %v17737_v5  ;;  %v9724_v5 = vpop.f32.mrf.mxu0 }
 0x6fb   : > { %v7854_v54 = vsel %vm6629_vm8, %v7714_v36, 0.0  ;;  %v7869_v36 = vsel %vm6629_vm8, %v7719_v49, 0.0 }
 0x6fd   : > { %7837 = vadd.xlane.f32.xlu1 %v7836_v43  ;;  %7858 = vadd.xlane.f32.xlu0 %v7857_v20  ;;  %v7851_v43 = vsel %vm6629_vm8, %v7713_v39, 0.0  ;;  %v17748_v20 = vmax.f32 %v7481_v58, 0.0  ;;  %v7717_v39 = vmul.f32 %v17284_v50, %v17732_v0  ;;  %v17757_v6 = vpop.xlane.xlu0 %7768  ;;  %v7488_v58 = vpop.f32.mrf.mxu0 }
 0x6fe   : > { %19899 = vst [vmem:[#allocation93_spill] sm:$0xff] %v17757_v6 }
 0x6ff   : > { %19897 = vst [vmem:[#allocation91_spill] sm:$0xff] %v17748_v20  ;;  %v7723_v50 = vmul.f32 %v17343_v4, %v17748_v20  ;;  %v9727_v49 = vpop.f32.mrf.mxu0  ;;  %v7721_v4 = vmul.f32 %v17336_v60, %v17763_v57 }
 0x701   : > { %7855 = vadd.xlane.f32.xlu1 %v7854_v54  ;;  %7852 = vadd.xlane.f32.xlu0 %v7851_v43  ;;  %v7866_v54 = vsel %vm6629_vm8, %v7718_v56, 0.0  ;;  %v7863_v43 = vsel %vm6629_vm8, %v7717_v39, 0.0  ;;  %v17776_v47 = vpop.permute.xlu0 %8080  ;;  %v7881_v56 = vsel %vm6629_vm8, %v7723_v50, 0.0  ;;  %v7501_v39 = vpop.f32.mrf.mxu0  ;;  %v7878_v50 = vsel %vm6629_vm8, %v7722_v32, 0.0 }
 0x702   : > { %v7875_v41 = vsel %vm6629_vm8, %v7721_v4, 0.0  ;;  %v7489_v32 = vadd.f32 %v17657_v11, %v7488_v58  ;;  %v17806_v4 = vpop.xlane.xlu1 %7783 }
 0x703   : > { %19903 = vst [vmem:[#allocation100_spill] sm:$0xff] %v17806_v4 }
 0x705   : > { %7849 = vadd.xlane.f32.xlu1 %v7848_v19  ;;  %7870 = vadd.xlane.f32.xlu0 %v7869_v36  ;;  %v17773_v19 = vmax.f32 %v7470_v33, 0.0  ;;  %v7860_v36 = vsel %vm6629_vm8, %v7716_v44, 0.0  ;;  %v7486_v33 = vadd.f32 %v17657_v11, %v7485_v3  ;;  %v7497_v44 = vadd.f32 %v17657_v11, %v9724_v5  ;;  %v19902_v3 = vld [vmem:[#allocation82_spill] sm:$0xff] }
 0x707   : > { %v7720_v60 = vmul.f32 %v17305_v16, %v17773_v19 }
 0x709   : > { %7867 = vadd.xlane.f32.xlu1 %v7866_v54  ;;  %7864 = vadd.xlane.f32.xlu0 %v7863_v43  ;;  %v17784_v54 = vmax.f32 %v7494_v55, 0.0  ;;  %v19901_v43 = vld [vmem:[#allocation28_spill] sm:$0xff]  ;;  %v9728_v55 = vpop.f32.mrf.mxu0  ;;  %v7872_v16 = vsel %vm6629_vm8, %v7720_v60, 0.0 }
 0x70a   : > { %v8188_v6 = vmul.f32 %v19901_v43, %v19900_v29  ;;  %v17800_v43 = vmax.f32 %v7486_v33, 0.0  ;;  %v17803_v29 = vmax.f32 %v7497_v44, 0.0  ;;  %v17814_v33 = vmax.f32 %v7489_v32, 0.0 }
 0x70c   : > { %v8252_v5 = vsel %vm6629_vm8, %v8188_v6, 0.0  ;;  %v7724_v58 = vmul.f32 %v17357_v18, %v17800_v43  ;;  %v7727_v60 = vmul.f32 %v17395_v2, %v17803_v29  ;;  %v7725_v18 = vmul.f32 %v17388_v53, %v17814_v33 }
 0x70d   : > { %7861 = vadd.xlane.f32.xlu1 %v7860_v36  ;;  %7882 = vadd.xlane.f32.xlu0 %v7881_v56  ;;  %v17796_v36 = vpop.permute.xlu0 %8084  ;;  %v8190_v56 = vmul.f32 %v17483_v45, %v19902_v3  ;;  %v8192_v2 = vmul.f32 %v17477_v21, %v17211_v17  ;;  %v8193_v21 = vmul.f32 %v17507_v22, %v17213_v61 }
 0x70e   : > { %v7893_v4 = vsel %vm6629_vm8, %v7727_v60, 0.0  ;;  %v7887_v53 = vsel %vm6629_vm8, %v7725_v18, 0.0 }
 0x70f   : > { %v8258_v45 = vsel %vm6629_vm8, %v8190_v56, 0.0  ;;  %v7510_v56 = vadd.f32 %v17657_v11, %v9727_v49 }
 0x711   : > { %7879 = vadd.xlane.f32.xlu1 %v7878_v50  ;;  %7876 = vadd.xlane.f32.xlu0 %v7875_v41  ;;  %v7726_v50 = vmul.f32 %v17402_v27, %v17784_v54  ;;  %v7504_v41 = vpop.f32.mrf.mxu0  ;;  %v17811_v20 = vpop.xlane.xlu0 %7786 }
 0x712   : > { %19904 = vst [vmem:[#allocation98_spill] sm:$0xff] %v17811_v20  ;;  %v17821_v27 = vpop.xlane.xlu1 %7777 }
 0x713   : > { %v9731_v6 = vpop.f32.mrf.mxu0  ;;  %v7890_v44 = vsel %vm6629_vm8, %v7726_v50, 0.0  ;;  %19905 = vst [vmem:[#allocation102_spill] sm:$0xff] %v17821_v27  ;;  %v7884_v50 = vsel %vm6629_vm8, %v7724_v58, 0.0  ;;  %v7513_v58 = vadd.f32 %v17657_v11, %v9728_v55  ;;  %v7505_v55 = vadd.f32 %v17657_v11, %v7504_v41 }
 0x714   : > { %v7526_v22 = vadd.f32 %v17657_v11, %v9731_v6  ;;  %v8194_v6 = vmul.f32 %v17491_v15, %v17205_v37  ;;  %v8195_v15 = vmul.f32 %v17511_v14, %v17208_v24 }
 0x715   : > { %7873 = vadd.xlane.f32.xlu1 %v7872_v16  ;;  %8253 = vadd.xlane.f32.xlu0 %v8252_v5  ;;  %v19906_v5 = vld [vmem:[#allocation96_spill] sm:$0xff]  ;;  %v7517_v32 = vpop.f32.mrf.mxu0  ;;  %v17826_v20 = vpop.xlane.xlu0 %7780 }
 0x716   : > { %v8189_v16 = vmul.f32 %v17467_v8, %v19906_v5  ;;  %19907 = vst [vmem:[#allocation101_spill] sm:$0xff] %v17826_v20  ;;  %v7502_v20 = vadd.f32 %v17657_v11, %v7501_v39  ;;  %v17841_v27 = vpop.permute.xlu1 %8086  ;;  %v17852_v39 = vmax.f32 %v7513_v58, 0.0 }
 0x717   : > { %v9732_v60 = vpop.f32.mrf.mxu0 }
 0x718   : > { %v8255_v49 = vsel %vm6629_vm8, %v8189_v16, 0.0 }
 0x719   : > { %7891 = vadd.xlane.f32.xlu1 %v7890_v44  ;;  %8259 = vadd.xlane.f32.xlu0 %v8258_v45  ;;  %v19908_v45 = vld [vmem:[#allocation97_spill] sm:$0xff]  ;;  %v17837_v44 = vmax.f32 %v7510_v56, 0.0  ;;  %v17850_v56 = vmax.f32 %v7502_v20, 0.0 }
 0x71a   : > { %v8191_v8 = vmul.f32 %v17501_v52, %v19908_v45  ;;  %v8264_v52 = vsel %vm6629_vm8, %v8192_v2, 0.0  ;;  %v8267_v2 = vsel %vm6629_vm8, %v8193_v21, 0.0  ;;  %v17874_v21 = vmax.f32 %v7526_v22, 0.0 }
 0x71b   : > { %v7730_v18 = vmul.f32 %v17456_v51, %v17837_v44  ;;  %v7728_v41 = vmul.f32 %v17409_v12, %v17850_v56  ;;  %v7731_v51 = vmul.f32 %v17449_v40, %v17852_v39 }
 0x71c   : > { %v8261_v16 = vsel %vm6629_vm8, %v8191_v8, 0.0 }
 0x71d   : > { %7885 = vadd.xlane.f32.xlu1 %v7884_v50  ;;  %7894 = vadd.xlane.f32.xlu0 %v7893_v4  ;;  %v17844_v4 = vpop.permute.xlu0 %8088  ;;  %v7520_v50 = vpop.f32.mrf.mxu0  ;;  %v7902_v58 = vsel %vm6629_vm8, %v7730_v18, 0.0  ;;  %v7896_v12 = vsel %vm6629_vm8, %v7728_v41, 0.0  ;;  %v7905_v40 = vsel %vm6629_vm8, %v7731_v51, 0.0 }
 0x71f   : > { %v9735_v20 = vpop.f32.mrf.mxu0 }
 0x720   : > { %v7542_v41 = vadd.f32 %v17657_v11, %v9735_v20  ;;  %v8273_v20 = vsel %vm6629_vm8, %v8195_v15, 0.0 }
 0x721   : > { %8256 = vadd.xlane.f32.xlu1 %v8255_v49  ;;  %7888 = vadd.xlane.f32.xlu0 %v7887_v53  ;;  %v17857_v49 = vpop.permute.xlu1 %8090  ;;  %v17861_v53 = vmax.f32 %v7505_v55, 0.0  ;;  %v17863_v8 = vpop.permute.xlu0 %8092  ;;  %v7529_v55 = vadd.f32 %v17657_v11, %v9732_v60  ;;  %v8270_v60 = vsel %vm6629_vm8, %v8194_v6, 0.0 }
 0x722   : > { %v7533_v18 = vpop.f32.mrf.mxu0 }
 0x725   : > { %8265 = vadd.xlane.f32.xlu1 %v8264_v52  ;;  %8262 = vadd.xlane.f32.xlu0 %v8261_v16  ;;  %v17870_v52 = vpop.xlane.xlu1 %7795  ;;  %v7518_v16 = vadd.f32 %v17657_v11, %v7517_v32  ;;  %v17878_v61 = vpop.xlane.xlu0 %7798  ;;  %v7521_v32 = vadd.f32 %v17657_v11, %v7520_v50  ;;  %v7534_v50 = vadd.f32 %v17657_v11, %v7533_v18 }
 0x726   : > { %19909 = vst [vmem:[#allocation105_spill] sm:$0xff] %v17870_v52  ;;  %19910 = vst [vmem:[#allocation104_spill] sm:$0xff] %v17878_v61  ;;  %v9736_v61 = vpop.f32.mrf.mxu0 }
 0x727   : > { %v17886_v22 = vmax.f32 %v7518_v16, 0.0  ;;  %v17900_v16 = vmax.f32 %v7521_v32, 0.0  ;;  %v7545_v6 = vadd.f32 %v17657_v11, %v9736_v61  ;;  %v17914_v18 = vmax.f32 %v7534_v50, 0.0 }
 0x729   : > { %7903 = vadd.xlane.f32.xlu1 %v7902_v58  ;;  %8268 = vadd.xlane.f32.xlu0 %v8267_v2  ;;  %v7729_v2 = vmul.f32 %v17442_v1, %v17861_v53  ;;  %v17890_v58 = vmax.f32 %v7529_v55, 0.0  ;;  %v17893_v51 = vpop.xlane.xlu1 %7789  ;;  %v17898_v14 = vpop.xlane.xlu0 %7792  ;;  %v17905_v55 = vmax.f32 %v7542_v41, 0.0  ;;  %v17916_v61 = vmax.f32 %v7545_v6, 0.0 }
 0x72a   : > { %19911 = vst [vmem:[#allocation107_spill] sm:$0xff] %v17893_v51  ;;  %19912 = vst [vmem:[#allocation66_spill] sm:$0xff] %v17898_v14  ;;  %v19924_v14 = vld [vmem:[#allocation122_spill] sm:$0xff] }
 0x72b   : > { %v7899_v1 = vsel %vm6629_vm8, %v7729_v2, 0.0  ;;  %19913 = vst [vmem:[#allocation38_spill] sm:$0xff] %v17905_v55  ;;  %19914 = vst [vmem:[#allocation21_spill] sm:$0xff] %v17916_v61  ;;  %v19925_v51 = vld [vmem:[#allocation26_spill] sm:$0xff] }
 0x72c   : > { %v8197_v24 = vmul.f32 %v19925_v51, %v19924_v14 }
 0x72d   : > { %7897 = vadd.xlane.f32.xlu1 %v7896_v12  ;;  %7906 = vadd.xlane.f32.xlu0 %v7905_v40  ;;  %v7734_v12 = vmul.f32 %v17538_v48, %v17874_v21  ;;  %v7536_v40 = vpop.f32.mrf.mxu0  ;;  %v7732_v48 = vmul.f32 %v17463_v38, %v17886_v22  ;;  %v17912_v32 = vpop.permute.xlu1 %8094  ;;  %v7738_v38 = vmul.f32 %v17638_v7, %v17905_v55 }
 0x72e   : > { %v7537_v15 = vadd.f32 %v17657_v11, %v7536_v40  ;;  %v17919_v41 = vpop.permute.xlu0 %8096  ;;  %v7736_v40 = vmul.f32 %v17547_v25, %v17914_v18  ;;  %v8279_v51 = vsel %vm6629_vm8, %v8197_v24, 0.0  ;;  %v19937_v24 = vld [vmem:[#allocation51_spill] sm:$0xff] }
 0x72f   : > { %v7914_v2 = vsel %vm6629_vm8, %v7734_v12, 0.0  ;;  %v7926_v11 = vsel %vm6629_vm8, %v7738_v38, 0.0 }
 0x730   : > { %v17927_v50 = vmax.f32 %v7537_v15, 0.0 }
 0x731   : > { %8271 = vadd.xlane.f32.xlu1 %v8270_v60  ;;  %7900 = vadd.xlane.f32.xlu0 %v7899_v1  ;;  %v7735_v60 = vmul.f32 %v17529_v28, %v17890_v58  ;;  %v7908_v1 = vsel %vm6629_vm8, %v7732_v48, 0.0  ;;  %v7733_v28 = vmul.f32 %v17520_v63, %v17900_v16  ;;  %v17929_v6 = vpop.permute.xlu1 %8098  ;;  %v19917_v63 = vld [vmem:[#allocation19_spill] sm:$0xff] }
 0x732   : > { %19915 = vst [vmem:[#allocation69_spill] sm:$0xff] %v17927_v50  ;;  %v17937_v7 = vpop.permute.xlu0 %8100 }
 0x733   : > { %v7917_v12 = vsel %vm6629_vm8, %v7735_v60, 0.0  ;;  %v19918_v60 = vld [vmem:[#allocation16_spill] sm:$0xff] }
 0x734   : > { %v8196_v15 = vmul.f32 %v19918_v60, %v19917_v63  ;;  %v19930_v63 = vld [vmem:[#allocation22_spill] sm:$0xff] }
 0x735   : > { %7915 = vadd.xlane.f32.xlu1 %v7914_v2  ;;  %8274 = vadd.xlane.f32.xlu0 %v8273_v20  ;;  %v7911_v20 = vsel %vm6629_vm8, %v7733_v28, 0.0  ;;  %v19916_v2 = vld [vmem:[#allocation106_spill] sm:$0xff]  ;;  %v19920_v28 = vld [vmem:[#allocation45_spill] sm:$0xff] }
 0x736   : > { %v7739_v48 = vmul.f32 %v19916_v2, %v17916_v61  ;;  %v7737_v52 = vmul.f32 %v19920_v28, %v17927_v50  ;;  %v17947_v25 = vpop.xlane.xlu0 %7810  ;;  %v8276_v60 = vsel %vm6629_vm8, %v8196_v15, 0.0  ;;  %v19928_v28 = vld [vmem:[#allocation123_spill] sm:$0xff] }
 0x737   : > { %19921 = vst [vmem:[#allocation75_spill] sm:$0xff] %v17947_v25  ;;  %v19932_v15 = vld [vmem:[#allocation119_spill] sm:$0xff] }
 0x738   : > { %v7929_v38 = vsel %vm6629_vm8, %v7739_v48, 0.0  ;;  %v19927_v48 = vld [vmem:[#allocation92_spill] sm:$0xff] }
 0x739   : > { %7909 = vadd.xlane.f32.xlu1 %v7908_v1  ;;  %7918 = vadd.xlane.f32.xlu0 %v7917_v12  ;;  %v17941_v1 = vpop.xlane.xlu1 %7807  ;;  %v7920_v12 = vsel %vm6629_vm8, %v7736_v40, 0.0 }
 0x73a   : > { %19919 = vst [vmem:[#allocation70_spill] sm:$0xff] %v17941_v1  ;;  %v7923_v1 = vsel %vm6629_vm8, %v7737_v52, 0.0  ;;  %v17961_v37 = vpop.xlane.xlu0 %7804  ;;  %v19933_v52 = vld [vmem:[#allocation25_spill] sm:$0xff] }
 0x73b   : > { %19931 = vst [vmem:[#allocation42_spill] sm:$0xff] %v17961_v37 }
 0x73d   : > { %7927 = vadd.xlane.f32.xlu1 %v7926_v11  ;;  %7912 = vadd.xlane.f32.xlu0 %v7911_v20  ;;  %v19922_v11 = vld [vmem:[#allocation121_spill] sm:$0xff]  ;;  %v19923_v20 = vld [vmem:[#allocation50_spill] sm:$0xff]  ;;  %v17955_v40 = vpop.xlane.xlu1 %7801 }
 0x73e   : > { %v8198_v2 = vmul.f32 %v19923_v20, %v19922_v11  ;;  %19926 = vst [vmem:[#allocation62_spill] sm:$0xff] %v17955_v40  ;;  %v19935_v11 = vld [vmem:[#allocation53_spill] sm:$0xff]  ;;  %v17973_v37 = vpop.permute.xlu0 %8104 }
 0x740   : > { %v8282_v20 = vsel %vm6629_vm8, %v8198_v2, 0.0  ;;  %v19936_v2 = vld [vmem:[#allocation126_spill] sm:$0xff] }
 0x741   : > { %7921 = vadd.xlane.f32.xlu1 %v7920_v12  ;;  %7930 = vadd.xlane.f32.xlu0 %v7929_v38  ;;  %v8200_v12 = vmul.f32 %v19928_v28, %v19927_v48  ;;  %v19929_v38 = vld [vmem:[#allocation103_spill] sm:$0xff]  ;;  %v17969_v14 = vpop.permute.xlu1 %8102  ;;  %v19939_v48 = vld [vmem:[#allocation54_spill] sm:$0xff] }
 0x742   : > { %v8199_v25 = vmul.f32 %v19930_v63, %v19929_v38  ;;  %v17987_v45 = vpop.permute.xlu0 %8108 }
 0x743   : > { %v8288_v28 = vsel %vm6629_vm8, %v8200_v12, 0.0  ;;  %v19940_v12 = vld [vmem:[#allocation125_spill] sm:$0xff] }
 0x744   : > { %v8285_v63 = vsel %vm6629_vm8, %v8199_v25, 0.0  ;;  %v19941_v25 = vld [vmem:[#allocation57_spill] sm:$0xff] }
 0x745   : > { %8277 = vadd.xlane.f32.xlu1 %v8276_v60  ;;  %7924 = vadd.xlane.f32.xlu0 %v7923_v1  ;;  %v8202_v60 = vmul.f32 %v19933_v52, %v19932_v15  ;;  %v19934_v1 = vld [vmem:[#allocation124_spill] sm:$0xff]  ;;  %v17981_v15 = vpop.permute.xlu1 %8106 }
 0x746   : > { %v8201_v40 = vmul.f32 %v19935_v11, %v19934_v1  ;;  %v19943_v1 = vld [vmem:[#allocation29_spill] sm:$0xff] }
 0x747   : > { %v8294_v52 = vsel %vm6629_vm8, %v8202_v60, 0.0 }
 0x748   : > { %v8291_v11 = vsel %vm6629_vm8, %v8201_v40, 0.0  ;;  %v19945_v40 = vld [vmem:[#allocation61_spill] sm:$0xff] }
 0x749   : > { %8283 = vadd.xlane.f32.xlu1 %v8282_v20  ;;  %8280 = vadd.xlane.f32.xlu0 %v8279_v51  ;;  %v8204_v20 = vmul.f32 %v19937_v24, %v19936_v2  ;;  %v19938_v51 = vld [vmem:[#allocation117_spill] sm:$0xff]  ;;  %v17991_v60 = vpop.xlane.xlu1 %7819  ;;  %v19947_v2 = vld [vmem:[#allocation18_spill] sm:$0xff] }
 0x74a   : > { %v8203_v38 = vmul.f32 %v19939_v48, %v19938_v51  ;;  %19944 = vst [vmem:[#allocation11_spill] sm:$0xff] %v17991_v60  ;;  %v19948_v51 = vld [vmem:[#allocation35_spill] sm:$0xff] }
 0x74b   : > { %v8300_v24 = vsel %vm6629_vm8, %v8204_v20, 0.0  ;;  %v8207_v3 = vmul.f32 %v19948_v51, %v19947_v2  ;;  %v19950_v20 = vld [vmem:[#allocation59_spill] sm:$0xff] }
 0x74c   : > { %v8297_v48 = vsel %vm6629_vm8, %v8203_v38, 0.0  ;;  %v19951_v38 = vld [vmem:[#allocation31_spill] sm:$0xff] }
 0x74d   : > { %8289 = vadd.xlane.f32.xlu1 %v8288_v28  ;;  %8286 = vadd.xlane.f32.xlu0 %v8285_v63  ;;  %v8206_v28 = vmul.f32 %v19941_v25, %v19940_v12  ;;  %v19942_v63 = vld [vmem:[#allocation58_spill] sm:$0xff]  ;;  %v17997_v25 = vpop.xlane.xlu0 %7822  ;;  %v18005_v5 = vpop.xlane.xlu1 %7813  ;;  %v8309_v51 = vsel %vm6629_vm8, %v8207_v3, 0.0  ;;  %v19961_v3 = vld [vmem:[#allocation68_spill] sm:$0xff] }
 0x74e   : > { %v8205_v17 = vmul.f32 %v19943_v1, %v19942_v63  ;;  %19949 = vst [vmem:[#allocation79_spill] sm:$0xff] %v17997_v25  ;;  %v19953_v63 = vld [vmem:[#allocation32_spill] sm:$0xff]  ;;  %19954 = vst [vmem:[#allocation41_spill] sm:$0xff] %v18005_v5 }
 0x74f   : > { %v8306_v1 = vsel %vm6629_vm8, %v8206_v28, 0.0  ;;  %v19956_v28 = vld [vmem:[#allocation64_spill] sm:$0xff] }
 0x750   : > { %v8303_v12 = vsel %vm6629_vm8, %v8205_v17, 0.0  ;;  %v19957_v17 = vld [vmem:[#allocation30_spill] sm:$0xff] }
 0x751   : > { %8295 = vadd.xlane.f32.xlu1 %v8294_v52  ;;  %8292 = vadd.xlane.f32.xlu0 %v8291_v11  ;;  %v19946_v52 = vld [vmem:[#allocation24_spill] sm:$0xff]  ;;  %v18009_v25 = vpop.xlane.xlu0 %7816  ;;  %v18017_v5 = vpop.permute.xlu1 %8110 }
 0x752   : > { %v8208_v11 = vmul.f32 %v19946_v52, %v19945_v40  ;;  %19955 = vst [vmem:[#allocation44_spill] sm:$0xff] %v18009_v25  ;;  %v19959_v40 = vld [vmem:[#allocation72_spill] sm:$0xff] }
 0x754   : > { %v8312_v52 = vsel %vm6629_vm8, %v8208_v11, 0.0  ;;  %v19960_v11 = vld [vmem:[#allocation27_spill] sm:$0xff] }
 0x755   : > { %8301 = vadd.xlane.f32.xlu1 %v8300_v24  ;;  %8298 = vadd.xlane.f32.xlu0 %v8297_v48  ;;  %v8210_v24 = vmul.f32 %v19951_v38, %v19950_v20  ;;  %v19952_v48 = vld [vmem:[#allocation60_spill] sm:$0xff]  ;;  %v18031_v61 = vpop.permute.xlu1 %8114 }
 0x756   : > { %v8209_v60 = vmul.f32 %v19953_v63, %v19952_v48  ;;  %v19963_v20 = vld [vmem:[#allocation36_spill] sm:$0xff]  ;;  %v18023_v48 = vpop.permute.xlu0 %8112 }
 0x757   : > { %v8318_v38 = vsel %vm6629_vm8, %v8210_v24, 0.0  ;;  %v19964_v24 = vld [vmem:[#allocation67_spill] sm:$0xff] }
 0x758   : > { %v8315_v63 = vsel %vm6629_vm8, %v8209_v60, 0.0  ;;  %v19965_v60 = vld [vmem:[#allocation71_spill] sm:$0xff] }
 0x759   : > { %8307 = vadd.xlane.f32.xlu1 %v8306_v1  ;;  %8304 = vadd.xlane.f32.xlu0 %v8303_v12  ;;  %v8212_v1 = vmul.f32 %v19957_v17, %v19956_v28  ;;  %v19958_v12 = vld [vmem:[#allocation23_spill] sm:$0xff]  ;;  %v19967_v28 = vld [vmem:[#allocation76_spill] sm:$0xff] }
 0x75a   : > { %v8211_v2 = vmul.f32 %v19959_v40, %v19958_v12 }
 0x75b   : > { %v8324_v17 = vsel %vm6629_vm8, %v8212_v1, 0.0  ;;  %v19968_v1 = vld [vmem:[#allocation34_spill] sm:$0xff] }
 0x75c   : > { %v8321_v40 = vsel %vm6629_vm8, %v8211_v2, 0.0  ;;  %v19969_v2 = vld [vmem:[#allocation73_spill] sm:$0xff] }
 0x75d   : > { %8313 = vadd.xlane.f32.xlu1 %v8312_v52  ;;  %8310 = vadd.xlane.f32.xlu0 %v8309_v51  ;;  %v8214_v52 = vmul.f32 %v19961_v3, %v19960_v11  ;;  %v19962_v51 = vld [vmem:[#allocation20_spill] sm:$0xff]  ;;  %v18035_v11 = vpop.permute.xlu0 %8116 }
 0x75e   : > { %v8213_v25 = vmul.f32 %v19963_v20, %v19962_v51  ;;  %v19971_v51 = vld [vmem:[#allocation40_spill] sm:$0xff] }
 0x75f   : > { %v8330_v3 = vsel %vm6629_vm8, %v8214_v52, 0.0 }
 0x760   : > { %v8327_v20 = vsel %vm6629_vm8, %v8213_v25, 0.0  ;;  %v19974_v25 = vld [vmem:[#allocation65_spill] sm:$0xff] }
 0x761   : > { %8319 = vadd.xlane.f32.xlu1 %v8318_v38  ;;  %8316 = vadd.xlane.f32.xlu0 %v8315_v63  ;;  %v8216_v38 = vmul.f32 %v19965_v60, %v19964_v24  ;;  %v19966_v63 = vld [vmem:[#allocation63_spill] sm:$0xff]  ;;  %v18041_v60 = vpop.xlane.xlu1 %7831  ;;  %v18045_v52 = vpop.xlane.xlu0 %7834 }
 0x762   : > { %v8215_v12 = vmul.f32 %v19967_v28, %v19966_v63  ;;  %19972 = vst [vmem:[#allocation55_spill] sm:$0xff] %v18041_v60  ;;  %19973 = vst [vmem:[#allocation111_spill] sm:$0xff] %v18045_v52  ;;  %v19976_v63 = vld [vmem:[#allocation80_spill] sm:$0xff] }
 0x763   : > { %v8336_v28 = vsel %vm6629_vm8, %v8216_v38, 0.0  ;;  %v8220_v50 = vmul.f32 %v19976_v63, %v17682_v9 }
 0x764   : > { %v8333_v24 = vsel %vm6629_vm8, %v8215_v12, 0.0  ;;  %v19978_v12 = vld [vmem:[#allocation108_spill] sm:$0xff] }
 0x765   : > { %8325 = vadd.xlane.f32.xlu1 %v8324_v17  ;;  %8322 = vadd.xlane.f32.xlu0 %v8321_v40  ;;  %v8218_v17 = vmul.f32 %v19969_v2, %v19968_v1  ;;  %v19970_v40 = vld [vmem:[#allocation37_spill] sm:$0xff]  ;;  %v18053_v60 = vpop.xlane.xlu1 %7825  ;;  %v8221_v38 = vmul.f32 %v19978_v12, %v17673_v46  ;;  %v18059_v1 = vpop.xlane.xlu0 %7828 }
 0x766   : > { %v8217_v55 = vmul.f32 %v19971_v51, %v19970_v40  ;;  %19977 = vst [vmem:[#allocation114_spill] sm:$0xff] %v18053_v60  ;;  %19981 = vst [vmem:[#allocation116_spill] sm:$0xff] %v18059_v1 }
 0x767   : > { %v8342_v2 = vsel %vm6629_vm8, %v8218_v17, 0.0  ;;  %v19982_v17 = vld [vmem:[#allocation52_spill] sm:$0xff] }
 0x768   : > { %v8339_v51 = vsel %vm6629_vm8, %v8217_v55, 0.0  ;;  %v19983_v55 = vld [vmem:[#allocation81_spill] sm:$0xff] }
 0x769   : > { %8331 = vadd.xlane.f32.xlu1 %v8330_v3  ;;  %8328 = vadd.xlane.f32.xlu0 %v8327_v20  ;;  %v19975_v3 = vld [vmem:[#allocation47_spill] sm:$0xff]  ;;  %v18067_v9 = vpop.permute.xlu1 %8118  ;;  %v18071_v1 = vpop.permute.xlu0 %8120 }
 0x76a   : > { %v8219_v20 = vmul.f32 %v19975_v3, %v19974_v25  ;;  %v8348_v3 = vsel %vm6629_vm8, %v8220_v50, 0.0  ;;  %v19985_v50 = vld [vmem:[#allocation89_spill] sm:$0xff] }
 0x76c   : > { %v8345_v63 = vsel %vm6629_vm8, %v8219_v20, 0.0  ;;  %v8225_v20 = vmul.f32 %v19985_v50, %v17702_v26 }
 0x76d   : > { %8337 = vadd.xlane.f32.xlu1 %v8336_v28  ;;  %8334 = vadd.xlane.f32.xlu0 %v8333_v24  ;;  %v19979_v24 = vld [vmem:[#allocation85_spill] sm:$0xff]  ;;  %v19980_v28 = vld [vmem:[#allocation56_spill] sm:$0xff] }
 0x76e   : > { %v8222_v52 = vmul.f32 %v19980_v28, %v19979_v24  ;;  %v8351_v28 = vsel %vm6629_vm8, %v8221_v38, 0.0  ;;  %v18079_v24 = vpop.permute.xlu1 %8122  ;;  %v8227_v38 = vmul.f32 %v17711_v31, %v17686_v35 }
 0x770   : > { %v8354_v12 = vsel %vm6629_vm8, %v8222_v52, 0.0 }
 0x771   : > { %8343 = vadd.xlane.f32.xlu1 %v8342_v2  ;;  %8340 = vadd.xlane.f32.xlu0 %v8339_v51  ;;  %v8223_v2 = vmul.f32 %v19983_v55, %v19982_v17  ;;  %v19984_v51 = vld [vmem:[#allocation84_spill] sm:$0xff] }
 0x772   : > { %v8224_v60 = vmul.f32 %v19984_v51, %v17713_v59 }
 0x773   : > { %v8357_v51 = vsel %vm6629_vm8, %v8223_v2, 0.0 }
 0x774   : > { %v8360_v55 = vsel %vm6629_vm8, %v8224_v60, 0.0 }
 0x775   : > { %8349 = vadd.xlane.f32.xlu1 %v8348_v3  ;;  %8346 = vadd.xlane.f32.xlu0 %v8345_v63  ;;  %v19986_v3 = vld [vmem:[#allocation9_spill] sm:$0xff] }
 0x776   : > { %v8226_v63 = vmul.f32 %v19986_v3, %v17699_v23  ;;  %v8363_v3 = vsel %vm6629_vm8, %v8225_v20, 0.0 }
 0x778   : > { %v8366_v50 = vsel %vm6629_vm8, %v8226_v63, 0.0 }
 0x779   : > { %8355 = vadd.xlane.f32.xlu1 %v8354_v12  ;;  %8352 = vadd.xlane.f32.xlu0 %v8351_v28  ;;  %v19988_v12 = vld [vmem:[#allocation90_spill] sm:$0xff] }
 0x77a   : > { %v8228_v28 = vmul.f32 %v19988_v12, %v17743_v10  ;;  %v8369_v12 = vsel %vm6629_vm8, %v8227_v38, 0.0 }
 0x77c   : > { %v8372_v31 = vsel %vm6629_vm8, %v8228_v28, 0.0 }
 0x77d   : > { %8361 = vadd.xlane.f32.xlu1 %v8360_v55  ;;  %8358 = vadd.xlane.f32.xlu0 %v8357_v51  ;;  %v8229_v55 = vmul.f32 %v17771_v34, %v17732_v0  ;;  %v8230_v51 = vmul.f32 %v17776_v47, %v17729_v13 }
 0x77e   : > { %v18081_v52 = vpop.xlane.xlu0 %7846 }
 0x77f   : > { %19987 = vst [vmem:[#allocation118_spill] sm:$0xff] %v18081_v52  ;;  %v8378_v34 = vsel %vm6629_vm8, %v8230_v51, 0.0  ;;  %v8375_v47 = vsel %vm6629_vm8, %v8229_v55, 0.0 }
 0x781   : > { %8367 = vadd.xlane.f32.xlu1 %v8366_v50  ;;  %8364 = vadd.xlane.f32.xlu0 %v8363_v3  ;;  %v8231_v50 = vmul.f32 %v17790_v62, %v17718_v42  ;;  %v8232_v3 = vmul.f32 %v17796_v36, %v17773_v19 }
 0x782   : > { %v18089_v60 = vpop.xlane.xlu1 %7843  ;;  %v18091_v2 = vpop.xlane.xlu0 %7840 }
 0x783   : > { %19989 = vst [vmem:[#allocation120_spill] sm:$0xff] %v18089_v60  ;;  %19990 = vst [vmem:[#allocation83_spill] sm:$0xff] %v18091_v2  ;;  %v8384_v62 = vsel %vm6629_vm8, %v8232_v3, 0.0  ;;  %v8381_v36 = vsel %vm6629_vm8, %v8231_v50, 0.0 }
 0x785   : > { %8373 = vadd.xlane.f32.xlu1 %v8372_v31  ;;  %8370 = vadd.xlane.f32.xlu0 %v8369_v12  ;;  %v8233_v31 = vmul.f32 %v17841_v27, %v17763_v57  ;;  %v8234_v12 = vmul.f32 %v17844_v4, %v17759_v30 }
 0x786   : > { %v18099_v63 = vpop.xlane.xlu1 %7837  ;;  %v18101_v20 = vpop.xlane.xlu0 %7858 }
 0x787   : > { %19991 = vst [vmem:[#allocation39_spill] sm:$0xff] %v18099_v63  ;;  %19992 = vst [vmem:[#allocation33_spill] sm:$0xff] %v18101_v20  ;;  %v8236_v20 = vmul.f32 %v17863_v8, %v17800_v43  ;;  %v8390_v27 = vsel %vm6629_vm8, %v8234_v12, 0.0  ;;  %v8387_v4 = vsel %vm6629_vm8, %v8233_v31, 0.0 }
 0x789   : > { %8379 = vadd.xlane.f32.xlu1 %v8378_v34  ;;  %8376 = vadd.xlane.f32.xlu0 %v8375_v47  ;;  %v19997_v34 = vld [vmem:[#allocation91_spill] sm:$0xff] }
 0x78a   : > { %v18109_v28 = vpop.xlane.xlu1 %7855  ;;  %v18111_v38 = vpop.xlane.xlu0 %7852  ;;  %v8235_v47 = vmul.f32 %v17857_v49, %v19997_v34  ;;  %v8396_v49 = vsel %vm6629_vm8, %v8236_v20, 0.0 }
 0x78b   : > { %19993 = vst [vmem:[#allocation15_spill] sm:$0xff] %v18109_v28  ;;  %19994 = vst [vmem:[#allocation87_spill] sm:$0xff] %v18111_v38 }
 0x78c   : > { %v8393_v8 = vsel %vm6629_vm8, %v8235_v47, 0.0 }
 0x78d   : > { %8385 = vadd.xlane.f32.xlu1 %v8384_v62  ;;  %8382 = vadd.xlane.f32.xlu0 %v8381_v36  ;;  %v8237_v62 = vmul.f32 %v17912_v32, %v17814_v33  ;;  %v8238_v36 = vmul.f32 %v17919_v41, %v17784_v54 }
 0x78e   : > { %v18119_v51 = vpop.xlane.xlu1 %7849  ;;  %v18121_v55 = vpop.xlane.xlu0 %7870 }
 0x78f   : > { %19995 = vst [vmem:[#allocation78_spill] sm:$0xff] %v18119_v51  ;;  %19996 = vst [vmem:[#allocation74_spill] sm:$0xff] %v18121_v55  ;;  %v8402_v32 = vsel %vm6629_vm8, %v8238_v36, 0.0  ;;  %v8399_v41 = vsel %vm6629_vm8, %v8237_v62, 0.0 }
 0x791   : > { %8391 = vadd.xlane.f32.xlu1 %v8390_v27  ;;  %8388 = vadd.xlane.f32.xlu0 %v8387_v4  ;;  %v8239_v27 = vmul.f32 %v17929_v6, %v17803_v29  ;;  %v8240_v4 = vmul.f32 %v17937_v7, %v17850_v56 }
 0x792   : > { %v18129_v3 = vpop.xlane.xlu1 %7867  ;;  %v18131_v50 = vpop.xlane.xlu0 %7864 }
 0x793   : > { %19998 = vst [vmem:[#allocation110_spill] sm:$0xff] %v18129_v3  ;;  %19999 = vst [vmem:[#allocation12_spill] sm:$0xff] %v18131_v50  ;;  %v8408_v6 = vsel %vm6629_vm8, %v8240_v4, 0.0  ;;  %v8405_v7 = vsel %vm6629_vm8, %v8239_v27, 0.0 }
 0x795   : > { %8397 = vadd.xlane.f32.xlu1 %v8396_v49  ;;  %8394 = vadd.xlane.f32.xlu0 %v8393_v8  ;;  %v8241_v49 = vmul.f32 %v17969_v14, %v17861_v53  ;;  %v8242_v8 = vmul.f32 %v17973_v37, %v17837_v44 }
 0x796   : > { %v18139_v12 = vpop.xlane.xlu1 %7861  ;;  %v18141_v31 = vpop.xlane.xlu0 %7882 }
 0x797   : > { %20000 = vst [vmem:[#allocation95_spill] sm:$0xff] %v18139_v12  ;;  %20001 = vst [vmem:[#allocation28_spill] sm:$0xff] %v18141_v31  ;;  %v8414_v14 = vsel %vm6629_vm8, %v8242_v8, 0.0  ;;  %v8411_v37 = vsel %vm6629_vm8, %v8241_v49, 0.0 }
 0x799   : > { %8403 = vadd.xlane.f32.xlu1 %v8402_v32  ;;  %8400 = vadd.xlane.f32.xlu0 %v8399_v41  ;;  %v8243_v32 = vmul.f32 %v17981_v15, %v17852_v39  ;;  %v8244_v41 = vmul.f32 %v17987_v45, %v17886_v22 }
 0x79a   : > { %v18149_v20 = vpop.xlane.xlu1 %7879  ;;  %v18151_v47 = vpop.xlane.xlu0 %7876 }
 0x79b   : > { %20002 = vst [vmem:[#allocation106_spill] sm:$0xff] %v18149_v20  ;;  %20003 = vst [vmem:[#allocation16_spill] sm:$0xff] %v18151_v47  ;;  %v8420_v15 = vsel %vm6629_vm8, %v8244_v41, 0.0  ;;  %v8417_v45 = vsel %vm6629_vm8, %v8243_v32, 0.0 }
 0x79d   : > { %8409 = vadd.xlane.f32.xlu1 %v8408_v6  ;;  %8406 = vadd.xlane.f32.xlu0 %v8405_v7  ;;  %v8245_v6 = vmul.f32 %v18017_v5, %v17900_v16  ;;  %v8246_v7 = vmul.f32 %v18023_v48, %v17874_v21 }
 0x79e   : > { %v18159_v36 = vpop.xlane.xlu1 %7873  ;;  %v18161_v62 = vpop.xlane.xlu0 %8253 }
 0x79f   : > { %20004 = vst [vmem:[#allocation45_spill] sm:$0xff] %v18159_v36  ;;  %v8426_v5 = vsel %vm6629_vm8, %v8246_v7, 0.0  ;;  %v8423_v48 = vsel %vm6629_vm8, %v8245_v6, 0.0 }
 0x7a1   : > { %8415 = vadd.xlane.f32.xlu1 %v8414_v14  ;;  %8412 = vadd.xlane.f32.xlu0 %v8411_v37  ;;  %v8247_v14 = vmul.f32 %v18031_v61, %v17890_v58  ;;  %v8248_v37 = vmul.f32 %v18035_v11, %v17914_v18 }
 0x7a2   : > { %v18169_v4 = vpop.xlane.xlu1 %7891  ;;  %v18171_v27 = vpop.xlane.xlu0 %8259 }
 0x7a3   : > { %20005 = vst [vmem:[#allocation50_spill] sm:$0xff] %v18169_v4  ;;  %v8432_v61 = vsel %vm6629_vm8, %v8248_v37, 0.0  ;;  %v8429_v11 = vsel %vm6629_vm8, %v8247_v14, 0.0 }
 0x7a5   : > { %8421 = vadd.xlane.f32.xlu1 %v8420_v15  ;;  %8418 = vadd.xlane.f32.xlu0 %v8417_v45  ;;  %v20009_v15 = vld [vmem:[#allocation69_spill] sm:$0xff] }
 0x7a6   : > { %v18179_v8 = vpop.xlane.xlu1 %7885  ;;  %v18181_v49 = vpop.xlane.xlu0 %7894  ;;  %v8249_v45 = vmul.f32 %v18067_v9, %v20009_v15 }
 0x7a7   : > { %20006 = vst [vmem:[#allocation26_spill] sm:$0xff] %v18179_v8  ;;  %20007 = vst [vmem:[#allocation123_spill] sm:$0xff] %v18181_v49  ;;  %v20010_v49 = vld [vmem:[#allocation38_spill] sm:$0xff] }
 0x7a8   : > { %v8250_v4 = vmul.f32 %v18071_v1, %v20010_v49  ;;  %v8435_v9 = vsel %vm6629_vm8, %v8249_v45, 0.0 }
 0x7a9   : > { %8427 = vadd.xlane.f32.xlu1 %v8426_v5  ;;  %8424 = vadd.xlane.f32.xlu0 %v8423_v48  ;;  %v20011_v5 = vld [vmem:[#allocation21_spill] sm:$0xff] }
 0x7aa   : > { %v18189_v41 = vpop.xlane.xlu1 %8256  ;;  %v18191_v32 = vpop.xlane.xlu0 %7888  ;;  %v8251_v48 = vmul.f32 %v18079_v24, %v20011_v5 }
 0x7ab   : > { %20008 = vst [vmem:[#allocation22_spill] sm:$0xff] %v18191_v32  ;;  %v8438_v32 = vsel %vm6629_vm8, %v8250_v4, 0.0 }
 0x7ac   : > { %v8441_v14 = vsel %vm6629_vm8, %v8251_v48, 0.0  ;;  %v11286_v48 = vld [vmem:[%s19195_s8] sm:$0xff] }
 0x7ad   : > { %8433 = vadd.xlane.f32.xlu1 %v8432_v61  ;;  %8430 = vadd.xlane.f32.xlu0 %v8429_v11 }
 0x7ae   : > { %v18199_v7 = vpop.xlane.xlu1 %8265  ;;  %v18201_v6 = vpop.xlane.xlu0 %8262 }
 0x7b1   : > { %8439 = vadd.xlane.f32.xlu1 %v8438_v32  ;;  %8436 = vadd.xlane.f32.xlu0 %v8435_v9 }
 0x7b2   : > { %v18207_v1 = vpop.xlane.xlu1 %7903  ;;  %v18209_v37 = vpop.xlane.xlu0 %8268 }
 0x7b3   : > { %20012 = vst [vmem:[#allocation25_spill] sm:$0xff] %v18207_v1  ;;  %v11288_v1 = vld [vmem:[%s19195_s8 + $0x18] sm:$0xff] }
 0x7b5   : > { %8442 = vadd.xlane.f32.xlu0 %v8441_v14 }
 0x7b6   : > { %v18212_v61 = vpop.xlane.xlu1 %7897  ;;  %v18214_v11 = vpop.xlane.xlu0 %7906 }
 0x7b7   : > { %20013 = vst [vmem:[#allocation53_spill] sm:$0xff] %v18212_v61  ;;  %20014 = vst [vmem:[#allocation51_spill] sm:$0xff] %v18214_v11 }
 0x7ba   : > { %v18216_v8 = vpop.xlane.xlu1 %8271  ;;  %v18218_v24 = vpop.xlane.xlu0 %7900 }
 0x7bb   : > { %20015 = vst [vmem:[#allocation54_spill] sm:$0xff] %v18218_v24 }
 0x7be   : > { %v18220_v4 = vpop.xlane.xlu1 %7915  ;;  %v18222_v45 = vpop.xlane.xlu0 %8274 }
 0x7bf   : > { %20016 = vst [vmem:[#allocation57_spill] sm:$0xff] %v18220_v4  ;;  %v11287_v4 = vld [vmem:[%s19195_s8 + $0x10] sm:$0xff] }
 0x7c2   : > { %v18224_v32 = vpop.xlane.xlu1 %7909  ;;  %v18226_v9 = vpop.xlane.xlu0 %7918  ;;  %8444 = vrot.lane.b32.xlu1 %v11286_v48, %s11425_s18  ;;  %v11289_v48 = vld [vmem:[%s19195_s8 + $0x8] sm:$0xff] }
 0x7c3   : > { %20017 = vst [vmem:[#allocation29_spill] sm:$0xff] %v18224_v32  ;;  %20018 = vst [vmem:[#allocation24_spill] sm:$0xff] %v18226_v9 }
 0x7c6   : > { %v18232_v14 = vpop.xlane.xlu1 %7927  ;;  %v18234_v11 = vpop.xlane.xlu0 %7912  ;;  %8448 = vrot.lane.b32.xlu1 %v11287_v4, %s11425_s18  ;;  %v11290_v4 = vld [vmem:[%s19195_s8 + $0x28] sm:$0xff] }
 0x7c7   : > { %20019 = vst [vmem:[#allocation35_spill] sm:$0xff] %v18232_v14  ;;  %20020 = vst [vmem:[#allocation31_spill] sm:$0xff] %v18234_v11 }
 0x7ca   : > { %v18240_v32 = vpop.xlane.xlu1 %7921  ;;  %v18242_v9 = vpop.xlane.xlu0 %7930  ;;  %8450 = vrot.lane.b32.xlu1 %v11288_v1, %s11425_s18  ;;  %v11291_v1 = vld [vmem:[%s19195_s8 + $0x20] sm:$0xff] }
 0x7cb   : > { %20021 = vst [vmem:[#allocation32_spill] sm:$0xff] %v18240_v32  ;;  %20022 = vst [vmem:[#allocation30_spill] sm:$0xff] %v18242_v9  ;;  %8446 = vrot.lane.b32.xlu0 %v11289_v48, %s11425_s18  ;;  %v11292_v48 = vld [vmem:[%s19195_s8 + $0x38] sm:$0xff] }
 0x7ce   : > { %v18252_v14 = vpop.xlane.xlu1 %8277  ;;  %v18254_v11 = vpop.xlane.xlu0 %7924  ;;  %8454 = vrot.lane.b32.xlu1 %v11290_v4, %s11425_s18  ;;  %v11293_v4 = vld [vmem:[%s19195_s8 + $0x30] sm:$0xff] }
 0x7cf   : > { %20023 = vst [vmem:[#allocation72_spill] sm:$0xff] %v18252_v14  ;;  %20024 = vst [vmem:[#allocation68_spill] sm:$0xff] %v18254_v11  ;;  %8452 = vrot.lane.b32.xlu0 %v11291_v1, %s11425_s18  ;;  %v11294_v1 = vld [vmem:[%s19195_s8 + $0x48] sm:$0xff] }
 0x7d2   : > { %v18264_v9 = vpop.xlane.xlu1 %8283  ;;  %v18266_v32 = vpop.xlane.xlu0 %8280  ;;  %8458 = vrot.lane.b32.xlu1 %v11292_v48, %s11425_s18  ;;  %v11295_v48 = vld [vmem:[%s19195_s8 + $0x40] sm:$0xff] }
 0x7d3   : > { %20025 = vst [vmem:[#allocation36_spill] sm:$0xff] %v18264_v9  ;;  %20026 = vst [vmem:[#allocation71_spill] sm:$0xff] %v18266_v32  ;;  %8456 = vrot.lane.b32.xlu0 %v11293_v4, %s11425_s18  ;;  %v11296_v4 = vld [vmem:[%s19195_s8 + $0x58] sm:$0xff]  ;;  %v20103_v32 = vld [vmem:[#allocation109_spill] sm:$0xff] }
 0x7d6   : > { %v18276_v11 = vpop.xlane.xlu1 %8289  ;;  %v18278_v24 = vpop.xlane.xlu0 %8286  ;;  %8462 = vrot.lane.b32.xlu1 %v11294_v1, %s11425_s18  ;;  %v11297_v1 = vld [vmem:[%s19195_s8 + $0x50] sm:$0xff] }
 0x7d7   : > { %20027 = vst [vmem:[#allocation76_spill] sm:$0xff] %v18276_v11  ;;  %20028 = vst [vmem:[#allocation73_spill] sm:$0xff] %v18278_v24  ;;  %8460 = vrot.lane.b32.xlu0 %v11295_v48, %s11425_s18  ;;  %v11298_v48 = vld [vmem:[%s19195_s8 + $0x68] sm:$0xff] }
 0x7da   : > { %v18288_v61 = vpop.xlane.xlu1 %8295  ;;  %v18290_v31 = vpop.xlane.xlu0 %8292  ;;  %8466 = vrot.lane.b32.xlu1 %v11296_v4, %s11425_s18  ;;  %v11299_v4 = vld [vmem:[%s19195_s8 + $0x60] sm:$0xff] }
 0x7db   : > { %20029 = vst [vmem:[#allocation37_spill] sm:$0xff] %v18288_v61  ;;  %20030 = vst [vmem:[#allocation40_spill] sm:$0xff] %v18290_v31  ;;  %8464 = vrot.lane.b32.xlu0 %v11297_v1, %s11425_s18  ;;  %v11300_v1 = vld [vmem:[%s19195_s8 + $0x78] sm:$0xff] }
 0x7de   : > { %v18300_v20 = vpop.xlane.xlu1 %8301  ;;  %v18302_v47 = vpop.xlane.xlu0 %8298  ;;  %8470 = vrot.lane.b32.xlu1 %v11298_v48, %s11425_s18  ;;  %v11301_v48 = vld [vmem:[%s19195_s8 + $0x70] sm:$0xff] }
 0x7df   : > { %20031 = vst [vmem:[#allocation65_spill] sm:$0xff] %v18300_v20  ;;  %20032 = vst [vmem:[#allocation47_spill] sm:$0xff] %v18302_v47  ;;  %8468 = vrot.lane.b32.xlu0 %v11299_v4, %s11425_s18  ;;  %v11302_v4 = vld [vmem:[%s19195_s8 + $0x88] sm:$0xff]  ;;  %v20088_v20 = vld [vmem:[#allocation19_spill] sm:$0xff] }
 0x7e2   : > { %v18312_v36 = vpop.xlane.xlu1 %8307  ;;  %v18314_v55 = vpop.xlane.xlu0 %8304  ;;  %8474 = vrot.lane.b32.xlu1 %v11300_v1, %s11425_s18  ;;  %v11303_v1 = vld [vmem:[%s19195_s8 + $0x80] sm:$0xff] }
 0x7e3   : > { %20033 = vst [vmem:[#allocation80_spill] sm:$0xff] %v18312_v36  ;;  %20034 = vst [vmem:[#allocation108_spill] sm:$0xff] %v18314_v55  ;;  %8472 = vrot.lane.b32.xlu0 %v11301_v48, %s11425_s18  ;;  %v11304_v48 = vld [vmem:[%s19195_s8 + $0x98] sm:$0xff]  ;;  %v20082_v36 = vld [vmem:[#allocation82_spill] sm:$0xff] }
 0x7e6   : > { %v18324_v3 = vpop.xlane.xlu1 %8313  ;;  %v18326_v50 = vpop.xlane.xlu0 %8310  ;;  %8478 = vrot.lane.b32.xlu1 %v11302_v4, %s11425_s18  ;;  %v11305_v4 = vld [vmem:[%s19195_s8 + $0x90] sm:$0xff] }
 0x7e7   : > { %20035 = vst [vmem:[#allocation56_spill] sm:$0xff] %v18324_v3  ;;  %20036 = vst [vmem:[#allocation52_spill] sm:$0xff] %v18326_v50  ;;  %8476 = vrot.lane.b32.xlu0 %v11303_v1, %s11425_s18  ;;  %v11306_v1 = vld [vmem:[%s19195_s8 + $0xa8] sm:$0xff]  ;;  %v20081_v50 = vld [vmem:[#allocation96_spill] sm:$0xff] }
 0x7ea   : > { %v18336_v12 = vpop.xlane.xlu1 %8319  ;;  %v18338_v28 = vpop.xlane.xlu0 %8316  ;;  %8482 = vrot.lane.b32.xlu1 %v11304_v48, %s11425_s18  ;;  %v11307_v48 = vld [vmem:[%s19195_s8 + $0xa0] sm:$0xff] }
 0x7eb   : > { %20037 = vst [vmem:[#allocation81_spill] sm:$0xff] %v18336_v12  ;;  %20038 = vst [vmem:[#allocation84_spill] sm:$0xff] %v18338_v28  ;;  %8480 = vrot.lane.b32.xlu0 %v11305_v4, %s11425_s18  ;;  %v11308_v4 = vld [vmem:[%s19195_s8 + $0xb8] sm:$0xff] }
 0x7ee   : > { %v18348_v38 = vpop.xlane.xlu1 %8325  ;;  %v18350_v51 = vpop.xlane.xlu0 %8322  ;;  %8486 = vrot.lane.b32.xlu1 %v11306_v1, %s11425_s18  ;;  %v11309_v1 = vld [vmem:[%s19195_s8 + $0xb0] sm:$0xff] }
 0x7ef   : > { %20039 = vst [vmem:[#allocation89_spill] sm:$0xff] %v18348_v38  ;;  %20040 = vst [vmem:[#allocation9_spill] sm:$0xff] %v18350_v51  ;;  %8484 = vrot.lane.b32.xlu0 %v11307_v48, %s11425_s18  ;;  %v11310_v48 = vld [vmem:[%s19195_s8 + $0xc8] sm:$0xff] }
 0x7f2   : > { %v18360_v52 = vpop.xlane.xlu1 %8331  ;;  %v18362_v60 = vpop.xlane.xlu0 %8328  ;;  %8490 = vrot.lane.b32.xlu1 %v11308_v4, %s11425_s18  ;;  %v11311_v4 = vld [vmem:[%s19195_s8 + $0xc0] sm:$0xff] }
 0x7f3   : > { %20041 = vst [vmem:[#allocation90_spill] sm:$0xff] %v18360_v52  ;;  %20042 = vst [vmem:[#allocation91_spill] sm:$0xff] %v18362_v60  ;;  %8488 = vrot.lane.b32.xlu0 %v11309_v1, %s11425_s18  ;;  %v11312_v1 = vld [vmem:[%s19195_s8 + $0xd8] sm:$0xff] }
 0x7f6   : > { %v18372_v2 = vpop.xlane.xlu1 %8337  ;;  %v18374_v63 = vpop.xlane.xlu0 %8334  ;;  %8494 = vrot.lane.b32.xlu1 %v11310_v48, %s11425_s18  ;;  %v11313_v48 = vld [vmem:[%s19195_s8 + $0xd0] sm:$0xff] }
 0x7f7   : > { %20043 = vst [vmem:[#allocation69_spill] sm:$0xff] %v18372_v2  ;;  %20044 = vst [vmem:[#allocation38_spill] sm:$0xff] %v18374_v63  ;;  %8492 = vrot.lane.b32.xlu0 %v11311_v4, %s11425_s18  ;;  %v11314_v4 = vld [vmem:[%s19195_s8 + $0xe8] sm:$0xff] }
 0x7fa   : > { %v18384_v52 = vpop.xlane.xlu1 %8343  ;;  %v18386_v60 = vpop.xlane.xlu0 %8340  ;;  %8498 = vrot.lane.b32.xlu1 %v11312_v1, %s11425_s18  ;;  %v11315_v1 = vld [vmem:[%s19195_s8 + $0xe0] sm:$0xff] }
 0x7fb   : > { %20045 = vst [vmem:[#allocation21_spill] sm:$0xff] %v18384_v52  ;;  %20046 = vst [vmem:[#allocation127_spill] sm:$0xff] %v18386_v60  ;;  %8496 = vrot.lane.b32.xlu0 %v11313_v48, %s11425_s18  ;;  %v11316_v48 = vld [vmem:[%s19195_s8 + $0xf8] sm:$0xff] }
 0x7fe   : > { %v18396_v2 = vpop.xlane.xlu1 %8349  ;;  %v18398_v63 = vpop.xlane.xlu0 %8346  ;;  %8502 = vrot.lane.b32.xlu1 %v11314_v4, %s11425_s18  ;;  %v11317_v4 = vld [vmem:[%s19195_s8 + $0xf0] sm:$0xff] }
 0x7ff   : > { %20047 = vst [vmem:[#allocation128_spill] sm:$0xff] %v18396_v2  ;;  %20048 = vst [vmem:[#allocation129_spill] sm:$0xff] %v18398_v63  ;;  %8500 = vrot.lane.b32.xlu0 %v11315_v1, %s11425_s18 }
 0x802   : > { %v18408_v52 = vpop.xlane.xlu1 %8355  ;;  %v18410_v60 = vpop.xlane.xlu0 %8352  ;;  %8506 = vrot.lane.b32.xlu1 %v11316_v48, %s11425_s18 }
 0x803   : > { %20049 = vst [vmem:[#allocation130_spill] sm:$0xff] %v18408_v52  ;;  %20050 = vst [vmem:[#allocation131_spill] sm:$0xff] %v18410_v60  ;;  %8504 = vrot.lane.b32.xlu0 %v11317_v4, %s11425_s18 }
 0x806   : > { %v18420_v2 = vpop.xlane.xlu1 %8361  ;;  %v18422_v63 = vpop.xlane.xlu0 %8358 }
 0x807   : > { %20051 = vst [vmem:[#allocation132_spill] sm:$0xff] %v18420_v2  ;;  %20052 = vst [vmem:[#allocation133_spill] sm:$0xff] %v18422_v63 }
 0x80a   : > { %v18424_v1 = vpop.xlane.xlu1 %8367  ;;  %v18426_v52 = vpop.xlane.xlu0 %8364 }
 0x80b   : > { %20053 = vst [vmem:[#allocation134_spill] sm:$0xff] %v18424_v1  ;;  %20054 = vst [vmem:[#allocation135_spill] sm:$0xff] %v18426_v52 }
 0x80e   : > { %v18428_v60 = vpop.xlane.xlu1 %8373  ;;  %v18430_v38 = vpop.xlane.xlu0 %8370 }
 0x80f   : > { %20055 = vst [vmem:[#allocation136_spill] sm:$0xff] %v18428_v60  ;;  %20056 = vst [vmem:[#allocation137_spill] sm:$0xff] %v18430_v38 }
 0x812   : > { %v18432_v51 = vpop.xlane.xlu1 %8379  ;;  %v18434_v48 = vpop.xlane.xlu0 %8376 }
 0x813   : > { %20057 = vst [vmem:[#allocation138_spill] sm:$0xff] %v18432_v51  ;;  %20058 = vst [vmem:[#allocation139_spill] sm:$0xff] %v18434_v48 }
 0x816   : > { %v18436_v12 = vpop.xlane.xlu1 %8385  ;;  %v18438_v28 = vpop.xlane.xlu0 %8382 }
 0x817   : > { %20059 = vst [vmem:[#allocation140_spill] sm:$0xff] %v18436_v12  ;;  %20060 = vst [vmem:[#allocation141_spill] sm:$0xff] %v18438_v28 }
 0x81a   : > { %v18440_v4 = vpop.xlane.xlu1 %8391  ;;  %v18442_v2 = vpop.xlane.xlu0 %8388 }
 0x81b   : > { %20061 = vst [vmem:[#allocation142_spill] sm:$0xff] %v18440_v4  ;;  %20062 = vst [vmem:[#allocation143_spill] sm:$0xff] %v18442_v2 }
 0x81e   : > { %v18444_v63 = vpop.xlane.xlu1 %8397  ;;  %v18446_v1 = vpop.xlane.xlu0 %8394 }
 0x81f   : > { %20063 = vst [vmem:[#allocation144_spill] sm:$0xff] %v18444_v63  ;;  %20064 = vst [vmem:[#allocation145_spill] sm:$0xff] %v18446_v1 }
 0x822   : > { %v18448_v52 = vpop.xlane.xlu1 %8403  ;;  %v18450_v60 = vpop.xlane.xlu0 %8400 }
 0x823   : > { %20065 = vst [vmem:[#allocation146_spill] sm:$0xff] %v18448_v52  ;;  %20066 = vst [vmem:[#allocation147_spill] sm:$0xff] %v18450_v60 }
 0x826   : > { %v18452_v38 = vpop.xlane.xlu1 %8409  ;;  %v18454_v51 = vpop.xlane.xlu0 %8406 }
 0x827   : > { %20067 = vst [vmem:[#allocation148_spill] sm:$0xff] %v18452_v38  ;;  %20068 = vst [vmem:[#allocation149_spill] sm:$0xff] %v18454_v51 }
 0x82a   : > { %v18456_v48 = vpop.xlane.xlu1 %8415  ;;  %v18458_v12 = vpop.xlane.xlu0 %8412 }
 0x82b   : > { %20069 = vst [vmem:[#allocation150_spill] sm:$0xff] %v18456_v48  ;;  %20070 = vst [vmem:[#allocation151_spill] sm:$0xff] %v18458_v12  ;;  %v20080_v12 = vld [vmem:[#allocation112_spill] sm:$0xff] }
 0x82e   : > { %v18460_v28 = vpop.xlane.xlu1 %8421  ;;  %v18462_v4 = vpop.xlane.xlu0 %8418 }
 0x82f   : > { %20071 = vst [vmem:[#allocation152_spill] sm:$0xff] %v18460_v28  ;;  %20072 = vst [vmem:[#allocation153_spill] sm:$0xff] %v18462_v4 }
 0x832   : > { %v18464_v2 = vpop.xlane.xlu1 %8427  ;;  %v18466_v63 = vpop.xlane.xlu0 %8424 }
 0x833   : > { %20073 = vst [vmem:[#allocation154_spill] sm:$0xff] %v18464_v2  ;;  %20074 = vst [vmem:[#allocation155_spill] sm:$0xff] %v18466_v63 }
 0x836   : > { %v18468_v1 = vpop.xlane.xlu1 %8433  ;;  %v18470_v52 = vpop.xlane.xlu0 %8430 }
 0x837   : > { %20075 = vst [vmem:[#allocation156_spill] sm:$0xff] %v18468_v1  ;;  %20076 = vst [vmem:[#allocation157_spill] sm:$0xff] %v18470_v52 }
 0x83a   : > { %v18472_v60 = vpop.xlane.xlu1 %8439  ;;  %v18474_v38 = vpop.xlane.xlu0 %8436 }
 0x83b   : > { %20077 = vst [vmem:[#allocation158_spill] sm:$0xff] %v18472_v60  ;;  %20078 = vst [vmem:[#allocation159_spill] sm:$0xff] %v18474_v38 }
 0x83e   : > { %v8445_v51 = vpop.permute.xlu1 %8444  ;;  %v18476_v48 = vpop.xlane.xlu0 %8442 }
 0x83f   : > { %20079 = vst [vmem:[#allocation160_spill] sm:$0xff] %v18476_v48  ;;  %v8636_v3 = vmul.f32 %v8445_v51, %v20080_v12  ;;  %v11318_v48 = vld [vmem:[%s19195_s8 + $0x100] sm:$0xff] }
 0x841   : > { %v8700_v28 = vsel %vm6629_vm8, %v8636_v3, 0.0 }
 0x842   : > { %8701 = vadd.xlane.f32.xlu0 %v8700_v28  ;;  %v8449_v4 = vpop.permute.xlu1 %8448  ;;  %v8447_v2 = vpop.permute.xlu0 %8446  ;;  %v11319_v28 = vld [vmem:[%s19195_s8 + $0x108] sm:$0xff] }
 0x843   : > { %v8637_v63 = vmul.f32 %v8447_v2, %v20081_v50  ;;  %v8638_v1 = vmul.f32 %v8449_v4, %v20082_v36  ;;  %v11320_v2 = vld [vmem:[%s19195_s8 + $0x110] sm:$0xff] }
 0x844   : > { %v20084_v50 = vld [vmem:[#allocation86_spill] sm:$0xff] }
 0x845   : > { %v8703_v52 = vsel %vm6629_vm8, %v8637_v63, 0.0  ;;  %v8706_v60 = vsel %vm6629_vm8, %v8638_v1, 0.0  ;;  %v20085_v1 = vld [vmem:[#allocation115_spill] sm:$0xff] }
 0x846   : > { %8704 = vadd.xlane.f32.xlu1 %v8703_v52  ;;  %v8451_v52 = vpop.permute.xlu1 %8450  ;;  %v8453_v3 = vpop.permute.xlu0 %8452 }
 0x847   : > { %v8640_v12 = vmul.f32 %v8453_v3, %v20084_v50  ;;  %v20086_v3 = vld [vmem:[#allocation113_spill] sm:$0xff] }
 0x849   : > { %v8712_v4 = vsel %vm6629_vm8, %v8640_v12, 0.0 }
 0x84a   : > { %8707 = vadd.xlane.f32.xlu1 %v8706_v60  ;;  %v20083_v60 = vld [vmem:[#allocation97_spill] sm:$0xff]  ;;  %v8455_v36 = vpop.permute.xlu1 %8454 }
 0x84b   : > { %v8639_v63 = vmul.f32 %v8451_v52, %v20083_v60  ;;  %v11322_v52 = vld [vmem:[%s19195_s8 + $0x120] sm:$0xff]  ;;  %v11323_v60 = vld [vmem:[%s19195_s8 + $0x128] sm:$0xff] }
 0x84d   : > { %v8709_v51 = vsel %vm6629_vm8, %v8639_v63, 0.0  ;;  %v8457_v63 = vpop.permute.xlu0 %8456 }
 0x84e   : > { %v8642_v50 = vmul.f32 %v8457_v63, %v20086_v3  ;;  %v11324_v63 = vld [vmem:[%s19195_s8 + $0x130] sm:$0xff] }
 0x84f   : > { %v20089_v3 = vld [vmem:[#allocation122_spill] sm:$0xff] }
 0x850   : > { %v8718_v12 = vsel %vm6629_vm8, %v8642_v50, 0.0 }
 0x858   : > { %8508 = vrot.lane.b32.xlu0 %v11318_v48, %s11425_s18  ;;  %v8641_v48 = vmul.f32 %v8455_v36, %v20085_v1  ;;  %v8461_v1 = vpop.permute.xlu0 %8460 }
 0x859   : > { %v8644_v47 = vmul.f32 %v8461_v1, %v20088_v20  ;;  %v11325_v20 = vld [vmem:[%s19195_s8 + $0x138] sm:$0xff] }
 0x85b   : > { %8510 = vrot.lane.b32.xlu1 %v11319_v28, %s11425_s18  ;;  %v8715_v28 = vsel %vm6629_vm8, %v8641_v48, 0.0 }
 0x85f   : > { %8512 = vrot.lane.b32.xlu1 %v11320_v2, %s11425_s18  ;;  %v11321_v2 = vld [vmem:[%s19195_s8 + $0x118] sm:$0xff] }
 0x877   : > { %8710 = vadd.xlane.f32.xlu0 %v8709_v51  ;;  %v8459_v51 = vpop.permute.xlu1 %8458 }
 0x87b   : > { %v8463_v36 = vpop.permute.xlu1 %8462 }
 0x87c   : > { %v8645_v50 = vmul.f32 %v8463_v36, %v20089_v3  ;;  %v11326_v36 = vld [vmem:[%s19195_s8 + $0x140] sm:$0xff] }
 0x87f   : > { %v8467_v48 = vpop.permute.xlu1 %8466 }
 0x883   : > { %8713 = vadd.xlane.f32.xlu1 %v8712_v4  ;;  %v8465_v4 = vpop.permute.xlu0 %8464 }
 0x887   : > { %8716 = vadd.xlane.f32.xlu1 %v8715_v28  ;;  %v8471_v28 = vpop.permute.xlu1 %8470  ;;  %v8469_v38 = vpop.permute.xlu0 %8468 }
 0x88b   : > { %v8475_v55 = vpop.permute.xlu1 %8474  ;;  %v8473_v61 = vpop.permute.xlu0 %8472 }
 0x88d   : > { %8514 = vrot.lane.b32.xlu0 %v11321_v2, %s11425_s18  ;;  %v20087_v2 = vld [vmem:[#allocation99_spill] sm:$0xff] }
 0x88f   : > { %v8479_v31 = vpop.permute.xlu1 %8478 }
 0x898   : > { %8516 = vrot.lane.b32.xlu1 %v11322_v52, %s11425_s18  ;;  %v8643_v52 = vmul.f32 %v8459_v51, %v20087_v2  ;;  %v20090_v51 = vld [vmem:[#allocation121_spill] sm:$0xff]  ;;  %v8727_v2 = vsel %vm6629_vm8, %v8645_v50, 0.0  ;;  %v20092_v50 = vld [vmem:[#allocation92_spill] sm:$0xff] }
 0x899   : > { %v8646_v1 = vmul.f32 %v8465_v4, %v20090_v51  ;;  %v11327_v4 = vld [vmem:[%s19195_s8 + $0x148] sm:$0xff] }
 0x89b   : > { %v8730_v3 = vsel %vm6629_vm8, %v8646_v1, 0.0  ;;  %v20093_v1 = vld [vmem:[#allocation124_spill] sm:$0xff] }
 0x89c   : > { %8518 = vrot.lane.b32.xlu1 %v11323_v60, %s11425_s18  ;;  %v8721_v60 = vsel %vm6629_vm8, %v8643_v52, 0.0  ;;  %v8477_v52 = vpop.permute.xlu0 %8476 }
 0x8ac   : > { %8719 = vadd.xlane.f32.xlu0 %v8718_v12  ;;  %v8724_v12 = vsel %vm6629_vm8, %v8644_v47, 0.0  ;;  %v20091_v47 = vld [vmem:[#allocation103_spill] sm:$0xff] }
 0x8c0   : > { %8722 = vadd.xlane.f32.xlu1 %v8721_v60  ;;  %v8483_v60 = vpop.permute.xlu1 %8482 }
 0x8c2   : > { %8520 = vrot.lane.b32.xlu0 %v11324_v63, %s11425_s18  ;;  %v8647_v63 = vmul.f32 %v8467_v48, %v20091_v47  ;;  %v11328_v48 = vld [vmem:[%s19195_s8 + $0x150] sm:$0xff] }
 0x8c4   : > { %8725 = vadd.xlane.f32.xlu1 %v8724_v12  ;;  %v8481_v12 = vpop.permute.xlu0 %8480  ;;  %v8733_v51 = vsel %vm6629_vm8, %v8647_v63, 0.0  ;;  %v20094_v63 = vld [vmem:[#allocation119_spill] sm:$0xff] }
 0x8c6   : > { %8522 = vrot.lane.b32.xlu0 %v11325_v20, %s11425_s18  ;;  %v8648_v20 = vmul.f32 %v8469_v38, %v20092_v50  ;;  %v11329_v38 = vld [vmem:[%s19195_s8 + $0x158] sm:$0xff] }
 0x8c8   : > { %8728 = vadd.xlane.f32.xlu1 %v8727_v2  ;;  %v8487_v2 = vpop.permute.xlu1 %8486  ;;  %v8736_v47 = vsel %vm6629_vm8, %v8648_v20, 0.0  ;;  %v20095_v20 = vld [vmem:[#allocation117_spill] sm:$0xff] }
 0x8ca   : > { %8524 = vrot.lane.b32.xlu0 %v11326_v36, %s11425_s18  ;;  %v8649_v36 = vmul.f32 %v8471_v28, %v20093_v1  ;;  %v11330_v28 = vld [vmem:[%s19195_s8 + $0x160] sm:$0xff] }
 0x8cc   : > { %8731 = vadd.xlane.f32.xlu1 %v8730_v3  ;;  %v8485_v3 = vpop.permute.xlu0 %8484  ;;  %v18549_v11 = vpop.permute.xlu1 %8490  ;;  %v8739_v50 = vsel %vm6629_vm8, %v8649_v36, 0.0  ;;  %v20096_v36 = vld [vmem:[#allocation126_spill] sm:$0xff] }
 0x8ce   : > { %8526 = vrot.lane.b32.xlu0 %v11327_v4, %s11425_s18  ;;  %v8650_v4 = vmul.f32 %v8473_v61, %v20094_v63  ;;  %v11331_v61 = vld [vmem:[%s19195_s8 + $0x168] sm:$0xff] }
 0x8d0   : > { %8734 = vadd.xlane.f32.xlu1 %v8733_v51  ;;  %v8489_v51 = vpop.permute.xlu0 %8488  ;;  %v8742_v1 = vsel %vm6629_vm8, %v8650_v4, 0.0  ;;  %v20097_v4 = vld [vmem:[#allocation58_spill] sm:$0xff] }
 0x8d2   : > { %8528 = vrot.lane.b32.xlu0 %v11328_v48, %s11425_s18  ;;  %v8651_v48 = vmul.f32 %v8475_v55, %v20095_v20  ;;  %v11332_v55 = vld [vmem:[%s19195_s8 + $0x170] sm:$0xff]  ;;  %v8653_v20 = vmul.f32 %v8479_v31, %v20097_v4  ;;  %v11334_v31 = vld [vmem:[%s19195_s8 + $0x180] sm:$0xff] }
 0x8d4   : > { %8737 = vadd.xlane.f32.xlu1 %v8736_v47  ;;  %v18563_v47 = vpop.permute.xlu1 %8494  ;;  %v8745_v63 = vsel %vm6629_vm8, %v8651_v48, 0.0  ;;  %v20098_v48 = vld [vmem:[#allocation125_spill] sm:$0xff] }
 0x8d6   : > { %8530 = vrot.lane.b32.xlu0 %v11329_v38, %s11425_s18  ;;  %v8652_v38 = vmul.f32 %v8477_v52, %v20096_v36  ;;  %v11333_v52 = vld [vmem:[%s19195_s8 + $0x178] sm:$0xff]  ;;  %v8654_v36 = vmul.f32 %v8481_v12, %v20098_v48  ;;  %v11335_v12 = vld [vmem:[%s19195_s8 + $0x188] sm:$0xff] }
 0x8d8   : > { %8740 = vadd.xlane.f32.xlu1 %v8739_v50  ;;  %v8493_v50 = vpop.permute.xlu0 %8492  ;;  %v8754_v4 = vsel %vm6629_vm8, %v8654_v36, 0.0  ;;  %v11336_v36 = vld [vmem:[%s19195_s8 + $0x190] sm:$0xff] }
 0x8da   : > { %8532 = vrot.lane.b32.xlu0 %v11330_v28, %s11425_s18  ;;  %v18571_v28 = vpop.permute.xlu1 %8498 }
 0x8dc   : > { %8743 = vadd.xlane.f32.xlu1 %v8742_v1  ;;  %v8748_v1 = vsel %vm6629_vm8, %v8652_v38, 0.0  ;;  %v20099_v38 = vld [vmem:[#allocation18_spill] sm:$0xff] }
 0x8de   : > { %8534 = vrot.lane.b32.xlu0 %v11331_v61, %s11425_s18  ;;  %v18579_v61 = vpop.permute.xlu0 %8496  ;;  %v18587_v24 = vpop.permute.xlu1 %8502 }
 0x8e0   : > { %8746 = vadd.xlane.f32.xlu1 %v8745_v63  ;;  %v8751_v63 = vsel %vm6629_vm8, %v8653_v20, 0.0  ;;  %v20100_v20 = vld [vmem:[#allocation61_spill] sm:$0xff] }
 0x8e1   : > { %v8656_v48 = vmul.f32 %v8485_v3, %v20100_v20  ;;  %v11337_v3 = vld [vmem:[%s19195_s8 + $0x198] sm:$0xff] }
 0x8e2   : > { %8536 = vrot.lane.b32.xlu0 %v11332_v55, %s11425_s18  ;;  %v8655_v55 = vmul.f32 %v8483_v60, %v20099_v38  ;;  %v20101_v38 = vld [vmem:[#allocation60_spill] sm:$0xff] }
 0x8e3   : > { %v8760_v9 = vsel %vm6629_vm8, %v8656_v48, 0.0  ;;  %v20104_v48 = vld [vmem:[#allocation77_spill] sm:$0xff] }
 0x8e4   : > { %8749 = vadd.xlane.f32.xlu1 %v8748_v1  ;;  %v18595_v1 = vpop.permute.xlu0 %8500 }
 0x8e6   : > { %8538 = vrot.lane.b32.xlu0 %v11333_v52, %s11425_s18  ;;  %v18597_v52 = vpop.permute.xlu1 %8506 }
 0x8e8   : > { %8752 = vadd.xlane.f32.xlu1 %v8751_v63  ;;  %v8757_v63 = vsel %vm6629_vm8, %v8655_v55, 0.0  ;;  %v20102_v55 = vld [vmem:[#allocation59_spill] sm:$0xff] }
 0x8e9   : > { %v8658_v20 = vmul.f32 %v8489_v51, %v20102_v55  ;;  %v11338_v51 = vld [vmem:[%s19195_s8 + $0x1a0] sm:$0xff] }
 0x8ea   : > { %8540 = vrot.lane.b32.xlu0 %v11334_v31, %s11425_s18  ;;  %v18605_v31 = vpop.permute.xlu0 %8504  ;;  %v8705_v60 = vpop.xlane.xlu1 %8704 }
 0x8ec   : > { %8755 = vadd.xlane.f32.xlu1 %v8754_v4  ;;  %v8657_v4 = vmul.f32 %v8487_v2, %v20101_v38  ;;  %v8893_v38 = vsel %vm8892_vm15, %v20104_v48, %v18161_v62  ;;  %v8766_v62 = vsel %vm6629_vm8, %v8658_v20, 0.0  ;;  %v11339_v48 = vld [vmem:[%s19195_s8 + $0x1a8] sm:$0xff] }
 0x8ee   : > { %8542 = vrot.lane.b32.xlu0 %v11335_v12, %s11425_s18  ;;  %v8702_v12 = vpop.xlane.xlu0 %8701  ;;  %v8708_v2 = vpop.xlane.xlu1 %8707 }
 0x8f0   : > { %8758 = vadd.xlane.f32.xlu1 %v8757_v63  ;;  %v8763_v63 = vsel %vm6629_vm8, %v8657_v4, 0.0 }
 0x8f2   : > { %8544 = vrot.lane.b32.xlu0 %v11336_v36, %s11425_s18  ;;  %v8894_v36 = vsel %vm8892_vm15, %v20103_v32, %v18189_v41  ;;  %v20106_v41 = vld [vmem:[#allocation23_spill] sm:$0xff]  ;;  %v18638_v55 = vpop.permute.xlu0 %8508 }
 0x8f3   : > { %v8659_v32 = vmul.f32 %v18549_v11, %v20106_v41  ;;  %v20107_v11 = vld [vmem:[#allocation64_spill] sm:$0xff]  ;;  %v8511_v41 = vpop.permute.xlu1 %8510 }
 0x8f4   : > { %8761 = vadd.xlane.f32.xlu1 %v8760_v9  ;;  %v8959_v9 = vsel %vm8957_vm0, %v8894_v36, %v8705_v60  ;;  %v8958_v60 = vsel %vm8957_vm0, %v8893_v38, %v8702_v12  ;;  %v8660_v12 = vmul.f32 %v8493_v50, %v20107_v11  ;;  %v20109_v50 = vld [vmem:[#allocation20_spill] sm:$0xff] }
 0x8f5   : > { %v8769_v20 = vsel %vm6629_vm8, %v8659_v32, 0.0  ;;  %v8661_v32 = vmul.f32 %v18563_v47, %v20109_v50  ;;  %v11342_v47 = vld [vmem:[%s19195_s8 + $0x1c0] sm:$0xff] }
 0x8f6   : > { %8546 = vrot.lane.b32.xlu0 %v11337_v3, %s11425_s18  ;;  %v20105_v3 = vld [vmem:[#allocation43_spill] sm:$0xff] }
 0x8f7   : > { %v8895_v14 = vsel %vm8892_vm15, %v20105_v3, %v18171_v27  ;;  %v9024_v27 = vsel %vm9022_vm1, %v8959_v9, 0.0  ;;  %v18668_v11 = vpop.permute.xlu1 %8512 }
 0x8f8   : > { %8764 = vadd.xlane.f32.xlu1 %v8763_v63  ;;  %v8960_v4 = vsel %vm8957_vm0, %v8895_v14, %v8708_v2  ;;  %v9023_v63 = vsel %vm9022_vm1, %v8958_v60, 0.0  ;;  %v20108_v2 = vld [vmem:[#allocation46_spill] sm:$0xff] }
 0x8f9   : > { %v9026_v36 = vsel %vm9022_vm1, %v8960_v4, 0.0  ;;  %v9025_v14 = vadd.f32 %v9024_v27, %v9023_v63  ;;  %v8896_v9 = vsel %vm8892_vm15, %v20108_v2, %v18201_v6  ;;  %v11340_v4 = vld [vmem:[%s19195_s8 + $0x1b0] sm:$0xff]  ;;  %v8772_v6 = vsel %vm6629_vm8, %v8660_v12, 0.0  ;;  %v11341_v27 = vld [vmem:[%s19195_s8 + $0x1b8] sm:$0xff]  ;;  %v20112_v2 = vld [vmem:[#allocation13_spill] sm:$0xff] }
 0x8fa   : > { %8548 = vrot.lane.b32.xlu0 %v11338_v51, %s11425_s18  ;;  %v20110_v63 = vld [vmem:[#allocation27_spill] sm:$0xff] }
 0x8fb   : > { %v9027_v3 = vadd.f32 %v9026_v36, %v9025_v14  ;;  %v8662_v36 = vmul.f32 %v18579_v61, %v20110_v63  ;;  %v20111_v12 = vld [vmem:[#allocation63_spill] sm:$0xff]  ;;  %v8897_v61 = vsel %vm8892_vm15, %v20112_v2, %v18199_v7  ;;  %v20114_v7 = vld [vmem:[#allocation10_spill] sm:$0xff] }
 0x8fc   : > { %8767 = vadd.xlane.f32.xlu1 %v8766_v62  ;;  %v8663_v14 = vmul.f32 %v18571_v28, %v20111_v12  ;;  %v11347_v2 = vld [vmem:[%s19195_s8 + $0x1e8] sm:$0xff] }
 0x8fe   : > { %8550 = vrot.lane.b32.xlu0 %v11339_v48, %s11425_s18  ;;  %v8775_v48 = vsel %vm6629_vm8, %v8661_v32, 0.0  ;;  %v8781_v50 = vsel %vm6629_vm8, %v8663_v14, 0.0  ;;  %v8898_v32 = vsel %vm8892_vm15, %v20114_v7, %v18209_v37  ;;  %v11345_v37 = vld [vmem:[%s19195_s8 + $0x1d8] sm:$0xff] }
 0x900   : > { %v8711_v38 = vpop.xlane.xlu0 %8710  ;;  %8770 = vadd.xlane.f32.xlu1 %v8769_v20  ;;  %v8778_v20 = vsel %vm6629_vm8, %v8662_v36, 0.0  ;;  %v11344_v36 = vld [vmem:[%s19195_s8 + $0x1d0] sm:$0xff] }
 0x901   : > { %v8961_v51 = vsel %vm8957_vm0, %v8896_v9, %v8711_v38 }
 0x902   : > { %v9028_v60 = vsel %vm9022_vm1, %v8961_v51, 0.0  ;;  %8552 = vrot.lane.b32.xlu0 %v11340_v4, %s11425_s18  ;;  %v11343_v51 = vld [vmem:[%s19195_s8 + $0x1c8] sm:$0xff] }
 0x903   : > { %v9029_v62 = vadd.f32 %v9028_v60, %v9027_v3  ;;  %v20113_v60 = vld [vmem:[#allocation67_spill] sm:$0xff] }
 0x904   : > { %8773 = vadd.xlane.f32.xlu1 %v8772_v6  ;;  %v8664_v28 = vmul.f32 %v18595_v1, %v20113_v60  ;;  %v8665_v1 = vmul.f32 %v18587_v24, %v19970_v40  ;;  %v11346_v40 = vld [vmem:[%s19195_s8 + $0x1e0] sm:$0xff]  ;;  %v8667_v24 = vmul.f32 %v18597_v52, %v19974_v25  ;;  %v8669_v25 = vmul.f32 %v8511_v41, %v17673_v46 }
 0x906   : > { %8554 = vrot.lane.b32.xlu0 %v11341_v27, %s11425_s18  ;;  %v8787_v14 = vsel %vm6629_vm8, %v8665_v1, 0.0 }
 0x908   : > { %8776 = vadd.xlane.f32.xlu1 %v8775_v48  ;;  %v8784_v48 = vsel %vm6629_vm8, %v8664_v28, 0.0  ;;  %v8799_v28 = vsel %vm6629_vm8, %v8669_v25, 0.0 }
 0x90a   : > { %8556 = vrot.lane.b32.xlu0 %v11342_v47, %s11425_s18  ;;  %v20115_v47 = vld [vmem:[#allocation34_spill] sm:$0xff] }
 0x90b   : > { %v8666_v12 = vmul.f32 %v18605_v31, %v20115_v47  ;;  %v20116_v31 = vld [vmem:[#allocation88_spill] sm:$0xff] }
 0x90c   : > { %8779 = vadd.xlane.f32.xlu1 %v8778_v20  ;;  %v8714_v9 = vpop.xlane.xlu1 %8713 }
 0x90d   : > { %v8962_v38 = vsel %vm8957_vm0, %v8897_v61, %v8714_v9  ;;  %v8790_v20 = vsel %vm6629_vm8, %v8666_v12, 0.0  ;;  %v8668_v61 = vmul.f32 %v18638_v55, %v20116_v31  ;;  %v8793_v9 = vsel %vm6629_vm8, %v8667_v24, 0.0  ;;  %v11349_v55 = vld [vmem:[%s19195_s8 + $0x1f8] sm:$0xff]  ;;  %v20118_v12 = vld [vmem:[#allocation85_spill] sm:$0xff] }
 0x90e   : > { %v9030_v3 = vsel %vm9022_vm1, %v8962_v38, 0.0  ;;  %8558 = vrot.lane.b32.xlu0 %v11343_v51, %s11425_s18  ;;  %v11348_v38 = vld [vmem:[%s19195_s8 + $0x1f0] sm:$0xff]  ;;  %v20119_v31 = vld [vmem:[#allocation48_spill] sm:$0xff] }
 0x90f   : > { %v9031_v4 = vadd.f32 %v9030_v3, %v9029_v62  ;;  %v8796_v52 = vsel %vm6629_vm8, %v8668_v61, 0.0  ;;  %v8515_v3 = vpop.permute.xlu0 %8514 }
 0x910   : > { %8782 = vadd.xlane.f32.xlu1 %v8781_v50  ;;  %v8717_v6 = vpop.xlane.xlu1 %8716  ;;  %v8671_v60 = vmul.f32 %v8515_v3, %v19982_v17 }
 0x911   : > { %v8963_v27 = vsel %vm8957_vm0, %v8898_v32, %v8717_v6  ;;  %v20117_v6 = vld [vmem:[#allocation49_spill] sm:$0xff] }
 0x912   : > { %v9032_v63 = vsel %vm9022_vm1, %v8963_v27, 0.0  ;;  %8560 = vrot.lane.b32.xlu0 %v11344_v36, %s11425_s18  ;;  %v8805_v46 = vsel %vm6629_vm8, %v8671_v60, 0.0  ;;  %v8899_v17 = vsel %vm8892_vm15, %v20117_v6, %v18216_v8 }
 0x913   : > { %v9033_v62 = vadd.f32 %v9032_v63, %v9031_v4 }
 0x914   : > { %8785 = vadd.xlane.f32.xlu1 %v8784_v48  ;;  %v8517_v51 = vpop.permute.xlu1 %8516 }
 0x915   : > { %v8672_v4 = vmul.f32 %v8517_v51, %v17713_v59 }
 0x916   : > { %8562 = vrot.lane.b32.xlu0 %v11345_v37, %s11425_s18 }
 0x917   : > { %v8808_v7 = vsel %vm6629_vm8, %v8672_v4, 0.0 }
 0x918   : > { %8788 = vadd.xlane.f32.xlu1 %v8787_v14  ;;  %v8519_v41 = vpop.permute.xlu1 %8518  ;;  %v8670_v14 = vmul.f32 %v18668_v11, %v20118_v12  ;;  %v8900_v11 = vsel %vm8892_vm15, %v20119_v31, %v18222_v45 }
 0x919   : > { %v8673_v50 = vmul.f32 %v8519_v41, %v17702_v26 }
 0x91a   : > { %8564 = vrot.lane.b32.xlu0 %v11346_v40, %s11425_s18 }
 0x91b   : > { %v8811_v32 = vsel %vm6629_vm8, %v8673_v50, 0.0 }
 0x91c   : > { %8791 = vadd.xlane.f32.xlu1 %v8790_v20 }
 0x91e   : > { %8566 = vrot.lane.b32.xlu0 %v11347_v2, %s11425_s18 }
 0x920   : > { %8794 = vadd.xlane.f32.xlu1 %v8793_v9 }
 0x922   : > { %8568 = vrot.lane.b32.xlu0 %v11348_v38, %s11425_s18 }
 0x924   : > { %8797 = vadd.xlane.f32.xlu1 %v8796_v52 }
 0x926   : > { %8570 = vrot.lane.b32.xlu0 %v11349_v55, %s11425_s18  ;;  %s350_s18 = sand.u32 1, %s11402_s14  }
 0x927   : > { %s351_s11 = scalar_lea.vmem [#allocation6], %s350_s18  ;;  %s9161_s30 = scalar_lea.sflag [#allocation7], %s350_s18 }
 0x928   : > { %8800 = vadd.xlane.f32.xlu1 %v8799_v28  ;;  %s9173_s12 = sshll.u32 %s351_s11, 4  ;;  %s9174_s12 = int_to_ptr.vmem [resolvable:$true] %s9173_s12 }
 0x929   : > { %s11350_s21 = scalar_lea.vmem %s9174_s12, 16  ;;  %p11357_p0 = scmp.lt.s32.totalorder %s9174_s12, %s11355_s28 }
 0x92a   : > { %p11351_p11 = scmp.ne.s32.totalorder %s9174_s12, %s11350_s21  ;;  %p11358_p1 = scmp.lt.s32.totalorder %s11356_s17, %s11350_s21 }
 0x92c   : > { %8806 = vadd.xlane.f32.xlu1 %v8805_v46  ;;  %p11352_p12 = pnand %p11351_p11, %p11520_p5  ;;  %p11359_p2 = por %p11358_p1, %p11357_p0 }
 0x92e   : > { %p11353_p13 = pneg %p11352_p12 }
 0x930   : > { %8809 = vadd.xlane.f32.xlu1 %v8808_v7  ;;  %p11360_p3 = pnand %p11359_p2, %p11353_p13 }
 0x934   : > { %8812 = vadd.xlane.f32.xlu1 %v8811_v32 }
 0x935   : > { %v8720_v27 = vpop.xlane.xlu0 %8719 }
 0x936   : > { %v8964_v63 = vsel %vm8957_vm0, %v8899_v17, %v8720_v27 }
 0x937   : > { %v9034_v59 = vsel %vm9022_vm1, %v8964_v63, 0.0 }
 0x938   : > { %v9035_v36 = vadd.f32 %v9034_v59, %v9033_v62  ;;  %v8802_v62 = vsel %vm6629_vm8, %v8670_v14, 0.0 }
 0x939   : > { %v8521_v1 = vpop.permute.xlu0 %8520 }
 0x93a   : > { %v8674_v48 = vmul.f32 %v8521_v1, %v17699_v23 }
 0x93c   : > { %v8814_v26 = vsel %vm6629_vm8, %v8674_v48, 0.0 }
 0x93d   : > { %v8523_v37 = vpop.permute.xlu0 %8522  ;;  %8815 = vadd.xlane.f32.xlu1 %v8814_v26 }
 0x93e   : > { %v8675_v47 = vmul.f32 %v8523_v37, %v17686_v35 }
 0x940   : > { %v8817_v8 = vsel %vm6629_vm8, %v8675_v47, 0.0 }
 0x941   : > { %v8525_v40 = vpop.permute.xlu0 %8524  ;;  %8818 = vadd.xlane.f32.xlu1 %v8817_v8 }
 0x942   : > { %v8676_v24 = vmul.f32 %v8525_v40, %v17743_v10 }
 0x944   : > { %v8820_v20 = vsel %vm6629_vm8, %v8676_v24, 0.0 }
 0x945   : > { %v8527_v23 = vpop.permute.xlu0 %8526  ;;  %8803 = vadd.xlane.f32.xlu0 %v8802_v62  ;;  %8821 = vadd.xlane.f32.xlu1 %v8820_v20 }
 0x946   : > { %v8677_v2 = vmul.f32 %v8527_v23, %v17732_v0 }
 0x948   : > { %v8823_v35 = vsel %vm6629_vm8, %v8677_v2, 0.0 }
 0x949   : > { %v8529_v61 = vpop.permute.xlu0 %8528  ;;  %8824 = vadd.xlane.f32.xlu1 %v8823_v35  ;;  %v8723_v9 = vpop.xlane.xlu1 %8722 }
 0x94a   : > { %v8678_v10 = vmul.f32 %v8529_v61, %v17729_v13  ;;  %v8965_v38 = vsel %vm8957_vm0, %v8900_v11, %v8723_v9 }
 0x94b   : > { %v9036_v25 = vsel %vm9022_vm1, %v8965_v38, 0.0 }
 0x94c   : > { %v18761_v52 = vadd.f32 %v9036_v25, %v9035_v36  ;;  %v8826_v3 = vsel %vm6629_vm8, %v8678_v10, 0.0 }
 0x94d   : > { %v8531_v0 = vpop.permute.xlu0 %8530  ;;  %8827 = vadd.xlane.f32.xlu0 %v8826_v3  ;;  %v18764_v51 = vpop.xlane.xlu1 %8725 }
 0x94e   : > { %v8679_v55 = vmul.f32 %v8531_v0, %v17718_v42 }
 0x950   : > { %v8829_v45 = vsel %vm6629_vm8, %v8679_v55, 0.0 }
 0x951   : > { %v8533_v60 = vpop.permute.xlu0 %8532  ;;  %8830 = vadd.xlane.f32.xlu1 %v8829_v45  ;;  %v18768_v28 = vpop.xlane.xlu1 %8728 }
 0x952   : > { %v8680_v13 = vmul.f32 %v8533_v60, %v17773_v19 }
 0x954   : > { %v8832_v4 = vsel %vm6629_vm8, %v8680_v13, 0.0 }
 0x955   : > { %v8535_v46 = vpop.permute.xlu0 %8534  ;;  %8833 = vadd.xlane.f32.xlu0 %v8832_v4  ;;  %v18772_v41 = vpop.xlane.xlu1 %8731 }
 0x956   : > { %v8681_v50 = vmul.f32 %v8535_v46, %v17763_v57 }
 0x958   : > { %v8835_v7 = vsel %vm6629_vm8, %v8681_v50, 0.0 }
 0x959   : > { %v8537_v32 = vpop.permute.xlu0 %8536  ;;  %8836 = vadd.xlane.f32.xlu1 %v8835_v7  ;;  %v18776_v42 = vpop.xlane.xlu1 %8734 }
 0x95a   : > { %v8682_v6 = vmul.f32 %v8537_v32, %v17759_v30 }
 0x95c   : > { %v8838_v17 = vsel %vm6629_vm8, %v8682_v6, 0.0 }
 0x95d   : > { %v8539_v27 = vpop.permute.xlu0 %8538  ;;  %8839 = vadd.xlane.f32.xlu0 %v8838_v17  ;;  %v18780_v19 = vpop.xlane.xlu1 %8737 }
 0x95e   : > { %v8683_v63 = vmul.f32 %v8539_v27, %v19997_v34 }
 0x960   : > { %v8841_v59 = vsel %vm6629_vm8, %v8683_v63, 0.0 }
 0x961   : > { %v8541_v36 = vpop.permute.xlu0 %8540  ;;  %8842 = vadd.xlane.f32.xlu1 %v8841_v59  ;;  %v18784_v57 = vpop.xlane.xlu1 %8740 }
 0x962   : > { %v8684_v1 = vmul.f32 %v8541_v36, %v17800_v43 }
 0x964   : > { %v8844_v48 = vsel %vm6629_vm8, %v8684_v1, 0.0 }
 0x965   : > { %v8543_v26 = vpop.permute.xlu0 %8542  ;;  %8845 = vadd.xlane.f32.xlu0 %v8844_v48  ;;  %v18788_v30 = vpop.xlane.xlu1 %8743 }
 0x966   : > { %v8685_v37 = vmul.f32 %v8543_v26, %v17814_v33 }
 0x968   : > { %v8847_v47 = vsel %vm6629_vm8, %v8685_v37, 0.0 }
 0x969   : > { %v8545_v12 = vpop.permute.xlu0 %8544  ;;  %8848 = vadd.xlane.f32.xlu1 %v8847_v47  ;;  %v18792_v34 = vpop.xlane.xlu1 %8746 }
 0x96a   : > { %v8686_v14 = vmul.f32 %v8545_v12, %v17784_v54  ;;  %v20120_v12 = vld [vmem:[#allocation72_spill] sm:$0xff] }
 0x96c   : > { %v8850_v8 = vsel %vm6629_vm8, %v8686_v14, 0.0  ;;  %v20121_v14 = vld [vmem:[#allocation94_spill] sm:$0xff] }
 0x96d   : > { %v8547_v40 = vpop.permute.xlu0 %8546  ;;  %8851 = vadd.xlane.f32.xlu0 %v8850_v8  ;;  %v18796_v43 = vpop.xlane.xlu1 %8749 }
 0x96e   : > { %v8687_v24 = vmul.f32 %v8547_v40, %v17803_v29 }
 0x970   : > { %v8853_v62 = vsel %vm6629_vm8, %v8687_v24, 0.0  ;;  %v20122_v24 = vld [vmem:[#allocation71_spill] sm:$0xff] }
 0x971   : > { %v8549_v20 = vpop.permute.xlu0 %8548  ;;  %8854 = vadd.xlane.f32.xlu1 %v8853_v62  ;;  %v18800_v33 = vpop.xlane.xlu1 %8752 }
 0x972   : > { %v8688_v23 = vmul.f32 %v8549_v20, %v17850_v56 }
 0x974   : > { %v8856_v2 = vsel %vm6629_vm8, %v8688_v23, 0.0  ;;  %v20124_v23 = vld [vmem:[#allocation36_spill] sm:$0xff] }
 0x975   : > { %v8551_v35 = vpop.permute.xlu0 %8550  ;;  %8857 = vadd.xlane.f32.xlu0 %v8856_v2  ;;  %v18804_v54 = vpop.xlane.xlu1 %8755  ;;  %v20125_v2 = vld [vmem:[#allocation17_spill] sm:$0xff] }
 0x976   : > { %v8689_v31 = vmul.f32 %v8551_v35, %v17861_v53 }
 0x978   : > { %v8859_v11 = vsel %vm6629_vm8, %v8689_v31, 0.0 }
 0x979   : > { %v8553_v61 = vpop.permute.xlu0 %8552  ;;  %8860 = vadd.xlane.f32.xlu1 %v8859_v11  ;;  %v18808_v29 = vpop.xlane.xlu1 %8758 }
 0x97a   : > { %v8690_v9 = vmul.f32 %v8553_v61, %v17837_v44  ;;  %v20127_v61 = vld [vmem:[#allocation14_spill] sm:$0xff] }
 0x97c   : > { %v8862_v10 = vsel %vm6629_vm8, %v8690_v9, 0.0 }
 0x97d   : > { %v8555_v38 = vpop.permute.xlu0 %8554  ;;  %8863 = vadd.xlane.f32.xlu0 %v8862_v10  ;;  %v18812_v56 = vpop.xlane.xlu1 %8761 }
 0x97e   : > { %v8691_v25 = vmul.f32 %v8555_v38, %v17852_v39 }
 0x980   : > { %v8865_v3 = vsel %vm6629_vm8, %v8691_v25, 0.0  ;;  %v20128_v25 = vld [vmem:[#allocation76_spill] sm:$0xff] }
 0x981   : > { %v8557_v0 = vpop.permute.xlu0 %8556  ;;  %8866 = vadd.xlane.f32.xlu1 %v8865_v3  ;;  %v18816_v53 = vpop.xlane.xlu1 %8764  ;;  %v20129_v3 = vld [vmem:[#allocation102_spill] sm:$0xff] }
 0x982   : > { %v8692_v55 = vmul.f32 %v8557_v0, %v17886_v22  ;;  %v8905_v0 = vsel %vm8892_vm15, %v20129_v3, %v20128_v25 }
 0x984   : > { %v8868_v45 = vsel %vm6629_vm8, %v8692_v55, 0.0 }
 0x985   : > { %v8559_v60 = vpop.permute.xlu0 %8558  ;;  %8869 = vadd.xlane.f32.xlu0 %v8868_v45  ;;  %v18821_v13 = vpop.xlane.xlu1 %8767 }
 0x986   : > { %v8693_v44 = vmul.f32 %v8559_v60, %v17900_v16  ;;  %v20130_v60 = vld [vmem:[#allocation40_spill] sm:$0xff] }
 0x988   : > { %v8871_v4 = vsel %vm6629_vm8, %v8693_v44, 0.0  ;;  %v20131_v44 = vld [vmem:[#allocation101_spill] sm:$0xff] }
 0x989   : > { %v8561_v46 = vpop.permute.xlu0 %8560  ;;  %8872 = vadd.xlane.f32.xlu1 %v8871_v4  ;;  %v18825_v50 = vpop.xlane.xlu1 %8770  ;;  %v8906_v4 = vsel %vm8892_vm15, %v20131_v44, %v20130_v60  ;;  %v20148_v44 = vld [vmem:[#allocation81_spill] sm:$0xff] }
 0x98a   : > { %v8694_v39 = vmul.f32 %v8561_v46, %v17874_v21 }
 0x98c   : > { %v8874_v7 = vsel %vm6629_vm8, %v8694_v39, 0.0 }
 0x98d   : > { %v8563_v32 = vpop.permute.xlu0 %8562  ;;  %8875 = vadd.xlane.f32.xlu0 %v8874_v7  ;;  %v18830_v16 = vpop.xlane.xlu1 %8773  ;;  %v20132_v7 = vld [vmem:[#allocation37_spill] sm:$0xff] }
 0x98e   : > { %v8695_v22 = vmul.f32 %v8563_v32, %v17890_v58  ;;  %v20133_v32 = vld [vmem:[#allocation100_spill] sm:$0xff] }
 0x990   : > { %v8877_v6 = vsel %vm6629_vm8, %v8695_v22, 0.0  ;;  %v8907_v22 = vsel %vm8892_vm15, %v20133_v32, %v20132_v7  ;;  %v20150_v32 = vld [vmem:[#allocation9_spill] sm:$0xff] }
 0x991   : > { %v8565_v17 = vpop.permute.xlu0 %8564  ;;  %8878 = vadd.xlane.f32.xlu1 %v8877_v6  ;;  %v18835_v36 = vpop.xlane.xlu1 %8776 }
 0x992   : > { %v8696_v27 = vmul.f32 %v8565_v17, %v17914_v18 }
 0x994   : > { %v8880_v63 = vsel %vm6629_vm8, %v8696_v27, 0.0  ;;  %v20134_v27 = vld [vmem:[#allocation47_spill] sm:$0xff] }
 0x995   : > { %v8567_v59 = vpop.permute.xlu0 %8566  ;;  %8881 = vadd.xlane.f32.xlu0 %v8880_v63  ;;  %v18840_v47 = vpop.xlane.xlu1 %8779  ;;  %v20135_v63 = vld [vmem:[#allocation98_spill] sm:$0xff] }
 0x996   : > { %v8697_v21 = vmul.f32 %v8567_v59, %v20009_v15  ;;  %v8901_v15 = vsel %vm8892_vm15, %v20121_v14, %v20120_v12  ;;  %v8908_v59 = vsel %vm8892_vm15, %v20135_v63, %v20134_v27  ;;  %v20138_v14 = vld [vmem:[#allocation108_spill] sm:$0xff]  ;;  %v20152_v27 = vld [vmem:[#allocation89_spill] sm:$0xff] }
 0x997   : > { %v8966_v40 = vsel %vm8957_vm0, %v8901_v15, %v18764_v51  ;;  %v20126_v51 = vld [vmem:[#allocation73_spill] sm:$0xff]  ;;  %v20139_v15 = vld [vmem:[#allocation66_spill] sm:$0xff] }
 0x998   : > { %v8883_v1 = vsel %vm6629_vm8, %v8697_v21, 0.0  ;;  %v9038_v35 = vsel %vm9022_vm1, %v8966_v40, 0.0  ;;  %v8904_v9 = vsel %vm8892_vm15, %v20127_v61, %v20126_v51  ;;  %v20153_v63 = vld [vmem:[#allocation41_spill] sm:$0xff] }
 0x999   : > { %v8569_v48 = vpop.permute.xlu0 %8568  ;;  %8884 = vadd.xlane.f32.xlu1 %v8883_v1  ;;  %v18858_v31 = vpop.xlane.xlu1 %8782  ;;  %v9039_v38 = vadd.f32 %v9038_v35, %v18761_v52  ;;  %v20143_v35 = vld [vmem:[#allocation104_spill] sm:$0xff] }
 0x99a   : > { %v8698_v58 = vmul.f32 %v8569_v48, %v20010_v49  ;;  %v20123_v49 = vld [vmem:[#allocation93_spill] sm:$0xff] }
 0x99b   : > { %v8902_v62 = vsel %vm8892_vm15, %v20123_v49, %v20122_v24  ;;  %v20136_v48 = vld [vmem:[#allocation65_spill] sm:$0xff]  ;;  %v20140_v49 = vld [vmem:[#allocation80_spill] sm:$0xff] }
 0x99c   : > { %v8886_v26 = vsel %vm6629_vm8, %v8698_v58, 0.0  ;;  %v8967_v20 = vsel %vm8957_vm0, %v8902_v62, %v18768_v28  ;;  %v8969_v28 = vsel %vm8957_vm0, %v8904_v9, %v18776_v42  ;;  %v8971_v42 = vsel %vm8957_vm0, %v8906_v4, %v18784_v57  ;;  %v20137_v58 = vld [vmem:[#allocation107_spill] sm:$0xff]  ;;  %v20141_v62 = vld [vmem:[#allocation105_spill] sm:$0xff]  ;;  %v20149_v4 = vld [vmem:[#allocation70_spill] sm:$0xff] }
 0x99d   : > { %v8571_v37 = vpop.permute.xlu0 %8570  ;;  %8887 = vadd.xlane.f32.xlu0 %v8886_v26  ;;  %v9040_v10 = vsel %vm9022_vm1, %v8967_v20, 0.0  ;;  %v9044_v46 = vsel %vm9022_vm1, %v8969_v28, 0.0  ;;  %v18879_v52 = vpop.xlane.xlu1 %8785  ;;  %v9048_v21 = vsel %vm9022_vm1, %v8971_v42, 0.0  ;;  %v8973_v57 = vsel %vm8957_vm0, %v8908_v59, %v18792_v34 }
 0x99e   : > { %v8699_v18 = vmul.f32 %v8571_v37, %v20011_v5  ;;  %v8903_v5 = vsel %vm8892_vm15, %v20125_v2, %v20124_v23  ;;  %v9041_v45 = vadd.f32 %v9040_v10, %v9039_v38  ;;  %v8909_v26 = vsel %vm8892_vm15, %v20137_v58, %v20136_v48  ;;  %v20144_v10 = vld [vmem:[#allocation56_spill] sm:$0xff]  ;;  %v20145_v38 = vld [vmem:[#allocation62_spill] sm:$0xff] }
 0x99f   : > { %v8968_v11 = vsel %vm8957_vm0, %v8903_v5, %v18772_v41  ;;  %v8970_v41 = vsel %vm8957_vm0, %v8905_v0, %v18780_v19  ;;  %v8972_v19 = vsel %vm8957_vm0, %v8907_v22, %v18788_v30  ;;  %v8974_v30 = vsel %vm8957_vm0, %v8909_v26, %v18796_v43  ;;  %v20142_v5 = vld [vmem:[#allocation52_spill] sm:$0xff]  ;;  %v20151_v22 = vld [vmem:[#allocation75_spill] sm:$0xff] }
 0x9a0   : > { %v8889_v8 = vsel %vm6629_vm8, %v8699_v18, 0.0  ;;  %v9042_v55 = vsel %vm9022_vm1, %v8968_v11, 0.0  ;;  %v9046_v6 = vsel %vm9022_vm1, %v8970_v41, 0.0  ;;  %v9050_v37 = vsel %vm9022_vm1, %v8972_v19, 0.0  ;;  %v20146_v0 = vld [vmem:[#allocation84_spill] sm:$0xff] }
 0x9a1   : > { %8890 = vadd.xlane.f32.xlu1 %v8889_v8  ;;  %v9043_v39 = vadd.f32 %v9042_v55, %v9041_v45  ;;  %v8789_v18 = vpop.xlane.xlu1 %8788  ;;  %v8910_v8 = vsel %vm8892_vm15, %v20139_v15, %v20138_v14  ;;  %v9052_v40 = vsel %vm9022_vm1, %v8973_v57, 0.0  ;;  %v8911_v20 = vsel %vm8892_vm15, %v20141_v62, %v20140_v49  ;;  %v20147_v55 = vld [vmem:[#allocation42_spill] sm:$0xff]  ;;  %v20154_v57 = vld [vmem:[#allocation91_spill] sm:$0xff]  ;;  %v20155_v48 = vld [vmem:[#allocation44_spill] sm:$0xff] }
 0x9a2   : > { %v8975_v34 = vsel %vm8957_vm0, %v8910_v8, %v18800_v33  ;;  %v9054_v23 = vsel %vm9022_vm1, %v8974_v30, 0.0  ;;  %v8976_v43 = vsel %vm8957_vm0, %v8911_v20, %v18804_v54  ;;  %v8912_v11 = vsel %vm8892_vm15, %v20143_v35, %v20142_v5  ;;  %v20156_v30 = vld [vmem:[#allocation90_spill] sm:$0xff]  ;;  %v20157_v14 = vld [vmem:[#allocation11_spill] sm:$0xff] }
 0x9a3   : > { %v9045_v17 = vadd.f32 %v9044_v46, %v9043_v39  ;;  %v9056_v51 = vsel %vm9022_vm1, %v8975_v34, 0.0  ;;  %v8977_v33 = vsel %vm8957_vm0, %v8912_v11, %v18808_v29  ;;  %v8913_v28 = vsel %vm8892_vm15, %v20145_v38, %v20144_v10  ;;  %v20159_v34 = vld [vmem:[#allocation79_spill] sm:$0xff] }
 0x9a4   : > { %v9058_v25 = vsel %vm9022_vm1, %v8976_v43, 0.0  ;;  %v8978_v54 = vsel %vm8957_vm0, %v8913_v28, %v18812_v56  ;;  %v8914_v45 = vsel %vm8892_vm15, %v20147_v55, %v20146_v0  ;;  %v9060_v41 = vsel %vm9022_vm1, %v8977_v33, 0.0  ;;  %v20164_v28 = vld [vmem:[#allocation21_spill] sm:$0xff] }
 0x9a5   : > { %v9047_v1 = vadd.f32 %v9046_v6, %v9045_v17  ;;  %v8792_v61 = vpop.xlane.xlu1 %8791  ;;  %v8979_v29 = vsel %vm8957_vm0, %v8914_v45, %v18816_v53  ;;  %v8915_v46 = vsel %vm8892_vm15, %v20149_v4, %v20148_v44  ;;  %v9062_v39 = vsel %vm9022_vm1, %v8978_v54, 0.0  ;;  %v20166_v45 = vld [vmem:[#allocation129_spill] sm:$0xff] }
 0x9a6   : > { %v8980_v56 = vsel %vm8957_vm0, %v8915_v46, %v18821_v13  ;;  %v8916_v6 = vsel %vm8892_vm15, %v20151_v22, %v20150_v32  ;;  %v9064_v17 = vsel %vm9022_vm1, %v8979_v29, 0.0  ;;  %v8917_v59 = vsel %vm8892_vm15, %v20153_v63, %v20152_v27  ;;  %v20169_v46 = vld [vmem:[#allocation39_spill] sm:$0xff]  ;;  %v20173_v63 = vld [vmem:[#allocation120_spill] sm:$0xff] }
 0x9a7   : > { %v9049_v12 = vadd.f32 %v9048_v21, %v9047_v1  ;;  %v8981_v53 = vsel %vm8957_vm0, %v8916_v6, %v18825_v50  ;;  %v9066_v21 = vsel %vm9022_vm1, %v8980_v56, 0.0  ;;  %v8982_v13 = vsel %vm8957_vm0, %v8917_v59, %v18830_v16  ;;  %v20171_v22 = vld [vmem:[#allocation83_spill] sm:$0xff] }
 0x9a8   : > { %v8918_v58 = vsel %vm8892_vm15, %v20155_v48, %v20154_v57  ;;  %v9068_v26 = vsel %vm9022_vm1, %v8981_v53, 0.0  ;;  %v8919_v15 = vsel %vm8892_vm15, %v20157_v14, %v20156_v30  ;;  %v9070_v8 = vsel %vm9022_vm1, %v8982_v13, 0.0 }
 0x9a9   : > { %v9051_v24 = vadd.f32 %v9050_v37, %v9049_v12  ;;  %v8795_v42 = vpop.xlane.xlu1 %8794  ;;  %v8983_v50 = vsel %vm8957_vm0, %v8918_v58, %v18835_v36  ;;  %v8984_v16 = vsel %vm8957_vm0, %v8919_v15, %v18840_v47 }
 0x9aa   : > { %v9072_v62 = vsel %vm9022_vm1, %v8983_v50, 0.0  ;;  %v9074_v5 = vsel %vm9022_vm1, %v8984_v16, 0.0  ;;  %v20175_v50 = vld [vmem:[#allocation118_spill] sm:$0xff] }
 0x9ab   : > { %v9053_v2 = vadd.f32 %v9052_v40, %v9051_v24  ;;  %v20158_v24 = vld [vmem:[#allocation38_spill] sm:$0xff] }
 0x9ac   : > { %v8920_v49 = vsel %vm8892_vm15, %v20159_v34, %v20158_v24  ;;  %v20177_v16 = vld [vmem:[#allocation78_spill] sm:$0xff] }
 0x9ad   : > { %v9055_v9 = vadd.f32 %v9054_v23, %v9053_v2  ;;  %v8798_v37 = vpop.xlane.xlu1 %8797  ;;  %v8985_v36 = vsel %vm8957_vm0, %v8920_v49, %v18858_v31  ;;  %v20160_v23 = vld [vmem:[#allocation69_spill] sm:$0xff]  ;;  %v20161_v2 = vld [vmem:[#allocation114_spill] sm:$0xff] }
 0x9ae   : > { %v8921_v43 = vsel %vm8892_vm15, %v20161_v2, %v20160_v23  ;;  %v9076_v10 = vsel %vm9022_vm1, %v8985_v36, 0.0  ;;  %v20178_v36 = vld [vmem:[#allocation135_spill] sm:$0xff] }
 0x9af   : > { %v9057_v3 = vadd.f32 %v9056_v51, %v9055_v9  ;;  %v8986_v47 = vsel %vm8957_vm0, %v8921_v43, %v18879_v52  ;;  %v20162_v51 = vld [vmem:[#allocation127_spill] sm:$0xff]  ;;  %v20163_v9 = vld [vmem:[#allocation116_spill] sm:$0xff] }
 0x9b0   : > { %v8922_v33 = vsel %vm8892_vm15, %v20163_v9, %v20162_v51  ;;  %v9078_v54 = vsel %vm9022_vm1, %v8986_v47, 0.0  ;;  %v20167_v52 = vld [vmem:[#allocation111_spill] sm:$0xff]  ;;  %v20180_v47 = vld [vmem:[#allocation134_spill] sm:$0xff] }
 0x9b1   : > { %v9059_v60 = vadd.f32 %v9058_v25, %v9057_v3  ;;  %v8801_v35 = vpop.xlane.xlu1 %8800  ;;  %v8987_v31 = vsel %vm8957_vm0, %v8922_v33, %v8789_v18  ;;  %v20165_v25 = vld [vmem:[#allocation55_spill] sm:$0xff]  ;;  %v20168_v18 = vld [vmem:[#allocation128_spill] sm:$0xff] }
 0x9b2   : > { %v8923_v3 = vsel %vm8892_vm15, %v20165_v25, %v20164_v28  ;;  %v20179_v23 = vld [vmem:[#allocation87_spill] sm:$0xff]  ;;  %v20183_v28 = vld [vmem:[#allocation33_spill] sm:$0xff] }
 0x9b3   : > { %v9061_v7 = vadd.f32 %v9060_v41, %v9059_v60  ;;  %v8988_v55 = vsel %vm8957_vm0, %v8923_v3, %v8792_v61  ;;  %v8924_v41 = vsel %vm8892_vm15, %v20167_v52, %v20166_v45  ;;  %v9080_v60 = vsel %vm9022_vm1, %v8987_v31, 0.0  ;;  %v20170_v61 = vld [vmem:[#allocation131_spill] sm:$0xff]  ;;  %v20182_v31 = vld [vmem:[#allocation137_spill] sm:$0xff]  ;;  %v20184_v45 = vld [vmem:[#allocation136_spill] sm:$0xff] }
 0x9b4   : > { %v8989_v4 = vsel %vm8957_vm0, %v8924_v41, %v8795_v42  ;;  %v8926_v6 = vsel %vm8892_vm15, %v20171_v22, %v20170_v61  ;;  %v20172_v42 = vld [vmem:[#allocation130_spill] sm:$0xff]  ;;  %v8930_v2 = vsel %vm8892_vm15, %v20179_v23, %v20178_v36  ;;  %v20181_v51 = vld [vmem:[#allocation15_spill] sm:$0xff]  ;;  %v8932_v25 = vsel %vm8892_vm15, %v20183_v28, %v20182_v31 }
 0x9b5   : > { %v9063_v19 = vadd.f32 %v9062_v39, %v9061_v7  ;;  %v8807_v29 = vpop.xlane.xlu1 %8806  ;;  %v8925_v39 = vsel %vm8892_vm15, %v20169_v46, %v20168_v18  ;;  %v9082_v7 = vsel %vm9022_vm1, %v8988_v55, 0.0  ;;  %v8991_v27 = vsel %vm8957_vm0, %v8926_v6, %v8801_v35  ;;  %v20185_v52 = vld [vmem:[#allocation95_spill] sm:$0xff]  ;;  %v20187_v46 = vld [vmem:[#allocation12_spill] sm:$0xff]  ;;  %v20188_v22 = vld [vmem:[#allocation138_spill] sm:$0xff] }
 0x9b6   : > { %v8990_v32 = vsel %vm8957_vm0, %v8925_v39, %v8798_v37  ;;  %v8927_v59 = vsel %vm8892_vm15, %v20173_v63, %v20172_v42  ;;  %v9088_v48 = vsel %vm9022_vm1, %v8991_v27, 0.0  ;;  %v8931_v9 = vsel %vm8892_vm15, %v20181_v51, %v20180_v47  ;;  %v20186_v18 = vld [vmem:[#allocation139_spill] sm:$0xff]  ;;  %v20189_v6 = vld [vmem:[#allocation110_spill] sm:$0xff]  ;;  %v20190_v63 = vld [vmem:[#allocation141_spill] sm:$0xff] }
 0x9b7   : > { %v9065_v1 = vadd.f32 %v9064_v17, %v9063_v19  ;;  %v9084_v17 = vsel %vm9022_vm1, %v8989_v4, 0.0  ;;  %v8933_v41 = vsel %vm8892_vm15, %v20185_v52, %v20184_v45  ;;  %v8934_v39 = vsel %vm8892_vm15, %v20187_v46, %v20186_v18 }
 0x9b9   : > { %v9067_v12 = vadd.f32 %v9066_v21, %v9065_v1  ;;  %v9086_v21 = vsel %vm9022_vm1, %v8990_v32, 0.0  ;;  %v8810_v1 = vpop.xlane.xlu1 %8809 }
 0x9bb   : > { %v9069_v40 = vadd.f32 %v9068_v26, %v9067_v12  ;;  %v20174_v12 = vld [vmem:[#allocation133_spill] sm:$0xff] }
 0x9bc   : > { %v8928_v30 = vsel %vm8892_vm15, %v20175_v50, %v20174_v12 }
 0x9bd   : > { %v9071_v20 = vadd.f32 %v9070_v8, %v9069_v40  ;;  %v8813_v14 = vpop.xlane.xlu1 %8812  ;;  %v8993_v15 = vsel %vm8957_vm0, %v8928_v30, %v8807_v29  ;;  %v20176_v40 = vld [vmem:[#allocation132_spill] sm:$0xff] }
 0x9be   : > { %v8929_v24 = vsel %vm8892_vm15, %v20177_v16, %v20176_v40  ;;  %v9092_v34 = vsel %vm9022_vm1, %v8993_v15, 0.0  ;;  %v20194_v15 = vld [vmem:[#allocation143_spill] sm:$0xff] }
 0x9bf   : > { %v9073_v11 = vadd.f32 %v9072_v62, %v9071_v20  ;;  %v8994_v62 = vsel %vm8957_vm0, %v8929_v24, %v8810_v1 }
 0x9c0   : > { %v9094_v43 = vsel %vm9022_vm1, %v8994_v62, 0.0  ;;  %v20196_v62 = vld [vmem:[#allocation142_spill] sm:$0xff] }
 0x9c1   : > { %v9075_v38 = vadd.f32 %v9074_v5, %v9073_v11  ;;  %v8995_v5 = vsel %vm8957_vm0, %v8930_v2, %v8813_v14 }
 0x9c2   : > { %v9096_v33 = vsel %vm9022_vm1, %v8995_v5, 0.0  ;;  %v20199_v5 = vld [vmem:[#allocation28_spill] sm:$0xff] }
 0x9c3   : > { %v9077_v0 = vadd.f32 %v9076_v10, %v9075_v38 }
 0x9c5   : > { %v9079_v44 = vadd.f32 %v9078_v54, %v9077_v0 }
 0x9c6   : > { %v8816_v49 = vpop.xlane.xlu1 %8815 }
 0x9c7   : > { %v9081_v56 = vadd.f32 %v9080_v60, %v9079_v44  ;;  %v8996_v10 = vsel %vm8957_vm0, %v8931_v9, %v8816_v49 }
 0x9c8   : > { %v9098_v3 = vsel %vm9022_vm1, %v8996_v10, 0.0  ;;  %v20201_v10 = vld [vmem:[#allocation26_spill] sm:$0xff] }
 0x9c9   : > { %v9083_v53 = vadd.f32 %v9082_v7, %v9081_v56 }
 0x9ca   : > { %v8819_v11 = vpop.xlane.xlu1 %8818 }
 0x9cb   : > { %v9085_v13 = vadd.f32 %v9084_v17, %v9083_v53  ;;  %v8997_v0 = vsel %vm8957_vm0, %v8932_v25, %v8819_v11  ;;  %v8935_v17 = vsel %vm8892_vm15, %v20189_v6, %v20188_v22 }
 0x9cc   : > { %v9100_v60 = vsel %vm9022_vm1, %v8997_v0, 0.0 }
 0x9cd   : > { %v9087_v58 = vadd.f32 %v9086_v21, %v9085_v13 }
 0x9ce   : > { %v8804_v19 = vpop.xlane.xlu0 %8803  ;;  %v8822_v54 = vpop.xlane.xlu1 %8821 }
 0x9cf   : > { %v8992_v57 = vsel %vm8957_vm0, %v8927_v59, %v8804_v19  ;;  %v9089_v37 = vadd.f32 %v9088_v48, %v9087_v58  ;;  %v8998_v44 = vsel %vm8957_vm0, %v8933_v41, %v8822_v54  ;;  %v20191_v59 = vld [vmem:[#allocation74_spill] sm:$0xff]  ;;  %v20192_v58 = vld [vmem:[#allocation140_spill] sm:$0xff] }
 0x9d0   : > { %v9090_v26 = vsel %vm9022_vm1, %v8992_v57, 0.0  ;;  %v9102_v7 = vsel %vm9022_vm1, %v8998_v44, 0.0  ;;  %v8936_v21 = vsel %vm8892_vm15, %v20191_v59, %v20190_v63  ;;  %v20203_v54 = vld [vmem:[#allocation22_spill] sm:$0xff] }
 0x9d1   : > { %v9091_v8 = vadd.f32 %v9090_v26, %v9089_v37  ;;  %v20193_v26 = vld [vmem:[#allocation45_spill] sm:$0xff] }
 0x9d2   : > { %v8825_v4 = vpop.xlane.xlu1 %8824  ;;  %v8937_v37 = vsel %vm8892_vm15, %v20193_v26, %v20192_v58 }
 0x9d3   : > { %v9093_v20 = vadd.f32 %v9092_v34, %v9091_v8  ;;  %v8999_v32 = vsel %vm8957_vm0, %v8934_v39, %v8825_v4  ;;  %v20195_v8 = vld [vmem:[#allocation16_spill] sm:$0xff] }
 0x9d4   : > { %v9104_v19 = vsel %vm9022_vm1, %v8999_v32, 0.0  ;;  %v8938_v40 = vsel %vm8892_vm15, %v20195_v8, %v20194_v15 }
 0x9d5   : > { %v9095_v35 = vadd.f32 %v9094_v43, %v9093_v20  ;;  %v20197_v20 = vld [vmem:[#allocation106_spill] sm:$0xff]  ;;  %v20198_v43 = vld [vmem:[#allocation145_spill] sm:$0xff] }
 0x9d6   : > { %v8828_v61 = vpop.xlane.xlu0 %8827  ;;  %v8939_v36 = vsel %vm8892_vm15, %v20197_v20, %v20196_v62 }
 0x9d7   : > { %v9097_v38 = vadd.f32 %v9096_v33, %v9095_v35  ;;  %v9000_v27 = vsel %vm8957_vm0, %v8935_v17, %v8828_v61  ;;  %v8940_v35 = vsel %vm8892_vm15, %v20199_v5, %v20198_v43  ;;  %v20200_v33 = vld [vmem:[#allocation144_spill] sm:$0xff] }
 0x9d8   : > { %v9106_v1 = vsel %vm9022_vm1, %v9000_v27, 0.0 }
 0x9d9   : > { %v9099_v55 = vadd.f32 %v9098_v3, %v9097_v38  ;;  %v8941_v38 = vsel %vm8892_vm15, %v20201_v10, %v20200_v33  ;;  %v20202_v3 = vld [vmem:[#allocation147_spill] sm:$0xff] }
 0x9da   : > { %v8831_v42 = vpop.xlane.xlu1 %8830  ;;  %v8942_v0 = vsel %vm8892_vm15, %v20203_v54, %v20202_v3  ;;  %v20221_v3 = vld [vmem:[#allocation57_spill] sm:$0xff] }
 0x9db   : > { %v9101_v29 = vadd.f32 %v9100_v60, %v9099_v55  ;;  %v9001_v57 = vsel %vm8957_vm0, %v8936_v21, %v8831_v42  ;;  %v20204_v60 = vld [vmem:[#allocation146_spill] sm:$0xff] }
 0x9dc   : > { %v9108_v12 = vsel %vm9022_vm1, %v9001_v57, 0.0 }
 0x9dd   : > { %v9103_v56 = vadd.f32 %v9102_v7, %v9101_v29  ;;  %v20205_v29 = vld [vmem:[#allocation50_spill] sm:$0xff]  ;;  %v20206_v7 = vld [vmem:[#allocation149_spill] sm:$0xff] }
 0x9de   : > { %v8834_v48 = vpop.xlane.xlu0 %8833  ;;  %v8943_v44 = vsel %vm8892_vm15, %v20205_v29, %v20204_v60  ;;  %v20223_v60 = vld [vmem:[#allocation24_spill] sm:$0xff] }
 0x9df   : > { %v9105_v53 = vadd.f32 %v9104_v19, %v9103_v56  ;;  %v9002_v30 = vsel %vm8957_vm0, %v8937_v37, %v8834_v48  ;;  %v20207_v56 = vld [vmem:[#allocation123_spill] sm:$0xff]  ;;  %v20208_v19 = vld [vmem:[#allocation148_spill] sm:$0xff] }
 0x9e0   : > { %v9110_v16 = vsel %vm9022_vm1, %v9002_v30, 0.0  ;;  %v8944_v32 = vsel %vm8892_vm15, %v20207_v56, %v20206_v7  ;;  %v20225_v7 = vld [vmem:[#allocation32_spill] sm:$0xff] }
 0x9e1   : > { %v9107_v13 = vadd.f32 %v9106_v1, %v9105_v53  ;;  %v20209_v53 = vld [vmem:[#allocation53_spill] sm:$0xff]  ;;  %v20210_v1 = vld [vmem:[#allocation151_spill] sm:$0xff] }
 0x9e2   : > { %v8837_v14 = vpop.xlane.xlu1 %8836  ;;  %v8945_v27 = vsel %vm8892_vm15, %v20209_v53, %v20208_v19 }
 0x9e3   : > { %v9109_v50 = vadd.f32 %v9108_v12, %v9107_v13  ;;  %v9003_v49 = vsel %vm8957_vm0, %v8938_v40, %v8837_v14  ;;  %v20211_v13 = vld [vmem:[#allocation54_spill] sm:$0xff] }
 0x9e4   : > { %v9112_v11 = vsel %vm9022_vm1, %v9003_v49, 0.0  ;;  %v8946_v57 = vsel %vm8892_vm15, %v20211_v13, %v20210_v1  ;;  %v20212_v12 = vld [vmem:[#allocation150_spill] sm:$0xff]  ;;  %v20229_v13 = vld [vmem:[#allocation35_spill] sm:$0xff] }
 0x9e5   : > { %v9111_v34 = vadd.f32 %v9110_v16, %v9109_v50  ;;  %v20213_v50 = vld [vmem:[#allocation25_spill] sm:$0xff]  ;;  %v20228_v1 = vld [vmem:[#allocation158_spill] sm:$0xff] }
 0x9e6   : > { %v8840_v24 = vpop.xlane.xlu0 %8839  ;;  %v8947_v30 = vsel %vm8892_vm15, %v20213_v50, %v20212_v12  ;;  %v20214_v16 = vld [vmem:[#allocation153_spill] sm:$0xff] }
 0x9e7   : > { %v9004_v2 = vsel %vm8957_vm0, %v8939_v36, %v8840_v24  ;;  %v9113_v51 = vadd.f32 %v9112_v11, %v9111_v34  ;;  %v20215_v24 = vld [vmem:[#allocation51_spill] sm:$0xff] }
 0x9e8   : > { %v9114_v31 = vsel %vm9022_vm1, %v9004_v2, 0.0  ;;  %v8948_v34 = vsel %vm8892_vm15, %v20215_v24, %v20214_v16  ;;  %v20217_v2 = vld [vmem:[#allocation29_spill] sm:$0xff] }
 0x9e9   : > { %v9115_v52 = vadd.f32 %v9114_v31, %v9113_v51  ;;  %v20218_v51 = vld [vmem:[#allocation155_spill] sm:$0xff] }
 0x9ea   : > { %v8843_v23 = vpop.xlane.xlu1 %8842 }
 0x9eb   : > { %v9005_v9 = vsel %vm8957_vm0, %v8940_v35, %v8843_v23  ;;  %v20216_v23 = vld [vmem:[#allocation152_spill] sm:$0xff] }
 0x9ec   : > { %v9116_v55 = vsel %vm9022_vm1, %v9005_v9, 0.0  ;;  %v8949_v43 = vsel %vm8892_vm15, %v20217_v2, %v20216_v23  ;;  %v20219_v9 = vld [vmem:[#allocation31_spill] sm:$0xff]  ;;  %v9156_v2 = vld [vmem:[%s19196_s9] sm:$0x1] }
 0x9ed   : > { %v9117_v46 = vadd.f32 %v9116_v55, %v9115_v52  ;;  %v8950_v33 = vsel %vm8892_vm15, %v20219_v9, %v20218_v51 }
 0x9ee   : > { %v8846_v47 = vpop.xlane.xlu0 %8845 }
 0x9ef   : > { %v9006_v25 = vsel %vm8957_vm0, %v8941_v38, %v8846_v47 }
 0x9f0   : > { %v9118_v4 = vsel %vm9022_vm1, %v9006_v25, 0.0  ;;  %v20220_v25 = vld [vmem:[#allocation154_spill] sm:$0xff] }
 0x9f1   : > { %v9119_v6 = vadd.f32 %v9118_v4, %v9117_v46  ;;  %v8951_v54 = vsel %vm8892_vm15, %v20221_v3, %v20220_v25 }
 0x9f2   : > { %v8849_v28 = vpop.xlane.xlu1 %8848 }
 0x9f3   : > { %v9007_v41 = vsel %vm8957_vm0, %v8942_v0, %v8849_v28 }
 0x9f4   : > { %v9120_v61 = vsel %vm9022_vm1, %v9007_v41, 0.0  ;;  %v20222_v41 = vld [vmem:[#allocation157_spill] sm:$0xff] }
 0x9f5   : > { %v9121_v59 = vadd.f32 %v9120_v61, %v9119_v6  ;;  %v8952_v29 = vsel %vm8892_vm15, %v20223_v60, %v20222_v41  ;;  %v20226_v6 = vld [vmem:[#allocation159_spill] sm:$0xff] }
 0x9f6   : > { %v8852_v45 = vpop.xlane.xlu0 %8851 }
 0x9f7   : > { %v9008_v39 = vsel %vm8957_vm0, %v8943_v44, %v8852_v45 }
 0x9f8   : > { %v9122_v42 = vsel %vm9022_vm1, %v9008_v39, 0.0  ;;  %v20224_v39 = vld [vmem:[#allocation156_spill] sm:$0xff] }
 0x9f9   : > { %v9123_v26 = vadd.f32 %v9122_v42, %v9121_v59  ;;  %v8953_v56 = vsel %vm8892_vm15, %v20225_v7, %v20224_v39 }
 0x9fa   : > { %v8855_v18 = vpop.xlane.xlu1 %8854 }
 0x9fb   : > { %v9009_v17 = vsel %vm8957_vm0, %v8944_v32, %v8855_v18 }
 0x9fc   : > { %v9124_v48 = vsel %vm9022_vm1, %v9009_v17, 0.0  ;;  %v20227_v17 = vld [vmem:[#allocation68_spill] sm:$0xff] }
 0x9fd   : > { %v9125_v8 = vadd.f32 %v9124_v48, %v9123_v26  ;;  %v8954_v19 = vsel %vm8892_vm15, %v20227_v17, %v20226_v6 }
 0x9fe   : > { %v8858_v22 = vpop.xlane.xlu0 %8857 }
 0x9ff   : > { %v9010_v21 = vsel %vm8957_vm0, %v8945_v27, %v8858_v22 }
 0xa00   : > { %v9126_v14 = vsel %vm9022_vm1, %v9010_v21, 0.0 }
 0xa01   : > { %v9127_v20 = vadd.f32 %v9126_v14, %v9125_v8  ;;  %v20231_v14 = vld [vmem:[#allocation30_spill] sm:$0xff] }
 0xa02   : > { %v8861_v63 = vpop.xlane.xlu1 %8860 }
 0xa03   : > { %v9011_v37 = vsel %vm8957_vm0, %v8946_v57, %v8861_v63  ;;  %v8955_v57 = vsel %vm8892_vm15, %v20229_v13, %v20228_v1 }
 0xa04   : > { %v9128_v49 = vsel %vm9022_vm1, %v9011_v37, 0.0 }
 0xa05   : > { %v9129_v11 = vadd.f32 %v9128_v49, %v9127_v20 }
 0xa06   : > { %v8864_v58 = vpop.xlane.xlu0 %8863 }
 0xa07   : > { %v9012_v40 = vsel %vm8957_vm0, %v8947_v30, %v8864_v58  ;;  %v20230_v30 = vld [vmem:[#allocation160_spill] sm:$0xff] }
 0xa08   : > { %v9130_v5 = vsel %vm9022_vm1, %v9012_v40, 0.0 }
 0xa09   : > { %v9131_v31 = vadd.f32 %v9130_v5, %v9129_v11 }
 0xa0a   : > { %v8867_v15 = vpop.xlane.xlu1 %8866 }
 0xa0b   : > { %v9013_v36 = vsel %vm8957_vm0, %v8948_v34, %v8867_v15  ;;  %v8956_v15 = vsel %vm8892_vm15, %v20231_v14, %v20230_v30 }
 0xa0c   : > { %v9132_v10 = vsel %vm9022_vm1, %v9013_v36, 0.0 }
 0xa0d   : > { %v9133_v45 = vadd.f32 %v9132_v10, %v9131_v31 }
 0xa0e   : > { %v8870_v62 = vpop.xlane.xlu0 %8869 }
 0xa0f   : > { %v9014_v47 = vsel %vm8957_vm0, %v8949_v43, %v8870_v62 }
 0xa10   : > { %v9134_v0 = vsel %vm9022_vm1, %v9014_v47, 0.0 }
 0xa11   : > { %v9135_v18 = vadd.f32 %v9134_v0, %v9133_v45 }
 0xa12   : > { %v8873_v35 = vpop.xlane.xlu1 %8872 }
 0xa13   : > { %v9015_v28 = vsel %vm8957_vm0, %v8950_v33, %v8873_v35 }
 0xa14   : > { %v9136_v44 = vsel %vm9022_vm1, %v9015_v28, 0.0 }
 0xa15   : > { %v9137_v61 = vadd.f32 %v9136_v44, %v9135_v18 }
 0xa16   : > { %v8876_v38 = vpop.xlane.xlu0 %8875 }
 0xa17   : > { %v9016_v52 = vsel %vm8957_vm0, %v8951_v54, %v8876_v38 }
 0xa18   : > { %v9138_v32 = vsel %vm9022_vm1, %v9016_v52, 0.0 }
 0xa19   : > { %v9139_v42 = vadd.f32 %v9138_v32, %v9137_v61 }
 0xa1a   : > { %v8879_v55 = vpop.xlane.xlu1 %8878 }
 0xa1b   : > { %v9017_v46 = vsel %vm8957_vm0, %v8952_v29, %v8879_v55 }
 0xa1c   : > { %v9140_v53 = vsel %vm9022_vm1, %v9017_v46, 0.0 }
 0xa1d   : > { %v9141_v21 = vadd.f32 %v9140_v53, %v9139_v42 }
 0xa1e   : > { %v8882_v4 = vpop.xlane.xlu0 %8881 }
 0xa1f   : > { %v9018_v22 = vsel %vm8957_vm0, %v8953_v56, %v8882_v4 }
 0xa20   : > { %v9142_v59 = vsel %vm9022_vm1, %v9018_v22, 0.0 }
 0xa21   : > { %v9143_v26 = vadd.f32 %v9142_v59, %v9141_v21 }
 0xa22   : > { %v8885_v27 = vpop.xlane.xlu1 %8884 }
 0xa23   : > { %v9019_v63 = vsel %vm8957_vm0, %v8954_v19, %v8885_v27 }
 0xa24   : > { %v9144_v48 = vsel %vm9022_vm1, %v9019_v63, 0.0 }
 0xa25   : > { %v9145_v50 = vadd.f32 %v9144_v48, %v9143_v26 }
 0xa26   : > { %v8888_v58 = vpop.xlane.xlu0 %8887 }
 0xa27   : > { %v9020_v37 = vsel %vm8957_vm0, %v8955_v57, %v8888_v58 }
 0xa28   : > { %v9146_v12 = vsel %vm9022_vm1, %v9020_v37, 0.0 }
 0xa29   : > { %v9147_v40 = vadd.f32 %v9146_v12, %v9145_v50 }
 0xa2a   : > { %v8891_v8 = vpop.xlane.xlu1 %8890 }
 0xa2b   : > { %v9021_v16 = vsel %vm8957_vm0, %v8956_v15, %v8891_v8 }
 0xa2c   : > { %v9148_v24 = vsel %vm9022_vm1, %v9021_v16, 0.0 }
 0xa2d   : > { %v9149_v34 = vadd.f32 %v9148_v24, %v9147_v40 }
 0xa2f   : > { %v9150_v49 = vrot.slane %v9149_v34, 4 }
 0xa31   : > { %v9151_v62 = vadd.f32 %v9150_v49, %v9149_v34 }
 0xa33   : > { %v9152_v20 = vrot.slane %v9151_v62, 2 }
 0xa35   : > { %v9153_v36 = vadd.f32 %v9152_v20, %v9151_v62 }
 0xa37   : > { %v9154_v23 = vrot.slane %v9153_v36, 1 }
 0xa39   : > { %v9155_v43 = vadd.f32 %v9154_v23, %v9153_v36 }
 0xa3b   : > { %v9157_v5 = vadd.f32 %v9156_v2, %v9155_v43 }
 0xa3d   : > { %9159 = vst.msk [vmem:[%s351_s11] sm:$0x1] %vm9158_vm2, %v9157_v5 }
 0xa3e   : > { %11363 = shalt.err (!%p11360_p3)
}
 0xa3f   : > { %s11364_s0 = scalar_lea.hbm %s9171_s27, 16  ;;  %s11368_s11 = scalar_lea.hbm %s19197_s10, 32 }
 0xa40   : > { %p11365_p4 = scmp.ne.s32.totalorder %s9171_s27, %s11364_s0  ;;  %p11369_p9 = scmp.lt.s32.totalorder %s9171_s27, %s19197_s10 }
 0xa41   : > { %p11370_p10 = scmp.lt.s32.totalorder %s11368_s11, %s11364_s0 }
 0xa42   : > { %p11366_p7 = pnand %p11365_p4, %p11520_p5 }
 0xa43   : > { %p11371_p11 = por %p11370_p10, %p11369_p9 }
 0xa44   : > { %p11367_p8 = pneg %p11366_p7 }
 0xa46   : > { %p11372_p12 = pnand %p11371_p11, %p11367_p8 }
 0xa48   : > { %11375 = shalt.err (!%p11372_p12)
}
 0xa49   : > { %9770 = dma.vmem_to_hbm [thread:$0]  (%p11520_p5), %s9174_s12, 16, %s9171_s27, %s9161_s30  }
 0xa4a PF: > { %p9776_p13 = scmp.ge.s32.totalorder %s11410_s16, 2  ;;  %s9185_s21 = sand.u32 1, %s11398_s13  }
 0xa4b   : > { %s9186_s20 = scalar_lea.sflag [#allocation7], %s9185_s21 }
 0xa4c   : > { %p9773_p0 = pnand %p9776_p13, %p11524_p6 }
 0xa4e   : > { %p9774_p1 = pneg %p9773_p0 }
 0xa50   : > { %11393 = dma.done.wait (%p9774_p1), %s9186_s20, 16  }
 0xa51   : > { %11395 = vsyncadd (%p9774_p1), %s9186_s20, 4294967280  ;;  %p20_p2 = scmp.ge.s32.totalorder %s11507_s19, 4   ;;  %s20232_s13 = smov %s11402_s14 }
 0xa52   : > { %s20233_s14 = smov %s11406_s15  ;;  %s20234_s15 = smov %s11518_s22 }
 0xa53   : > { %s20235_s16 = smov %s11507_s19  ;;  %22 = sbr.rel (!%p20_p2) target bundleno = 5 (0x5), region = 95 }
 0xa58   :  { %9190 = vsyncpa [#allocation7], 1 }
 0xa59   :  { %9192 = vsyncpa [#allocation7 + $0x1], 1 }

</bundles_post_ra>
